<compile_context>
chip_gen: v7x
topology: tpu7x:2x2x1
jax: 0.10.0
libtpu: 0.0.40
codegen_flags: <defaults>
</compile_context>

<pallas_src>
import functools

import jax
import jax.numpy as jnp
from jax import lax
from jax.experimental import pallas as pl
from jax.experimental.pallas import tpu as pltpu


# ----------------------------------------------------------------------------
# Fused kernel: conv1 + relu + conv2 + relu + bilinear x2 + conv3
# p1_ref : (1, H, W, 75)   conv1 im2col patches (built in the wrapper), bf16
# w1_ref : (75, 64)        conv1 weight, (kh,kw,ci) flattened, bf16
# b1_ref : (1, 64)         conv1 bias, f32
# w2_ref : (576, 64)       conv2 weight, bf16
# b2_ref : (1, 64)
# w3_ref : (576, 3)        conv3 weight, bf16
# b3_ref : (1, 3)
# o_ref  : (1, 2, 2*H*W, 3)  output, split by output-column parity, f32
# ----------------------------------------------------------------------------
def _upscaler_kernel(p1_ref, w1_ref, b1_ref, w2_ref, b2_ref, w3_ref, b3_ref,
                     o_ref):
    _, H, W, K1 = p1_ref.shape
    C = w1_ref.shape[1]                       # hidden channels (64)
    HO = 2 * H                                # upsampled height
    cdt = w1_ref.dtype                        # matmul compute dtype (bf16)
    f32 = jnp.float32

    def mm(patches, w_ref):                   # (M, K) @ (K, Cout) on the MXU
        return lax.dot_general(
            patches, w_ref[...],
            dimension_numbers=(((1,), (0,)), ((), ())),
            preferred_element_type=f32)

    # --- conv1 (5x5, pad 2): patches were im2col'ed in the wrapper (K1 = 75).
    a1 = mm(p1_ref[0].reshape(H * W, K1), w1_ref)
    a1 = jnp.maximum(a1 + b1_ref[...], 0.0).astype(cdt).reshape(H, W, C)

    # --- conv2 (3x3, pad 1): zero-pad in registers, im2col via lane concat,
    #     single (H*W, 576) x (576, 64) matmul.
    zc = jnp.zeros((H, 1, C), cdt)
    zr = jnp.zeros((1, W + 2, C), cdt)
    a1p = jnp.concatenate([zc, a1, zc], axis=1)
    a1p = jnp.concatenate([zr, a1p, zr], axis=0)            # (H+2, W+2, C)
    p2 = jnp.concatenate(
        [a1p[kh:kh + H, kw:kw + W, :] for kh in range(3) for kw in range(3)],
        axis=-1).reshape(H * W, 9 * C)
    a2 = mm(p2, w2_ref)
    a2 = jnp.maximum(a2 + b2_ref[...], 0.0).reshape(H, W, C)   # f32

    # --- x2 bilinear upsample (align_corners=False) as 0.75/0.25 shifted adds.
    # Rows: even output rows blend with the row above, odd with the row below;
    # edges replicate (matches PyTorch's clamped source index).
    up = jnp.concatenate([a2[:1], a2[:-1]], axis=0)
    dn = jnp.concatenate([a2[1:], a2[-1:]], axis=0)
    r = jnp.stack([0.75 * a2 + 0.25 * up,                    # rows 0,2,4,...
                   0.75 * a2 + 0.25 * dn], axis=1)           # rows 1,3,5,...
    r = r.reshape(HO, W, C)          # interleave rows (major-dim merge only)
    # Columns: keep the two parities separate -- they are interleaved for free
    # through the output layout instead of an in-kernel lane shuffle.
    lf = jnp.concatenate([r[:, :1], r[:, :-1]], axis=1)
    rt = jnp.concatenate([r[:, 1:], r[:, -1:]], axis=1)
    u_even = (0.75 * r + 0.25 * lf).astype(cdt)              # up cols 0,2,4,...
    u_odd = (0.75 * r + 0.25 * rt).astype(cdt)               # up cols 1,3,5,...

    # --- conv3 (3x3, pad 1) on the upsampled grid, two column-parity phases.
    # E[k] / O[k] hold the even / odd zero-padded upsampled columns.
    zc2 = jnp.zeros((HO, 1, C), cdt)
    zr2 = jnp.zeros((1, W + 1, C), cdt)
    E = jnp.concatenate([zc2, u_odd], axis=1)     # padded cols 0,2,...,2W
    O = jnp.concatenate([u_even, zc2], axis=1)    # padded cols 1,3,...,2W+1
    E = jnp.concatenate([zr2, E, zr2], axis=0)    # (HO+2, W+1, C)
    O = jnp.concatenate([zr2, O, zr2], axis=0)

    def conv3_phase(col_taps):
        taps = [src[dh:dh + HO, c0:c0 + W, :]
                for dh in range(3) for (src, c0) in col_taps]
        p3 = jnp.concatenate(taps, axis=-1).reshape(HO * W, 9 * C)
        return mm(p3, w3_ref) + b3_ref[...]       # (HO*W, 3) f32

    # even output col 2w reads padded cols (2w, 2w+1, 2w+2) = E[w], O[w], E[w+1]
    y_even = conv3_phase([(E, 0), (O, 0), (E, 1)])
    # odd output col 2w+1 reads padded cols (2w+1, 2w+2, 2w+3) = O[w], E[w+1], O[w+1]
    y_odd = conv3_phase([(O, 0), (E, 1), (O, 1)])

    o_ref[0] = jnp.stack([y_even, y_odd], axis=0).astype(o_ref.dtype)


# ----------------------------------------------------------------------------
# Wrapper: NCHW in / NCHW out, matching the PyTorch module.
# ----------------------------------------------------------------------------
@functools.partial(jax.jit, static_argnames=("compute_dtype",))
def image_upscaler_cnn_forward(x_nchw, params, *, compute_dtype=jnp.bfloat16):
    N, Cin, H, W = x_nchw.shape
    KH1 = params["w1"].shape[0]                   # 5
    C = params["w1"].shape[3]                     # 64
    pad1 = KH1 // 2
    K1 = KH1 * KH1 * Cin                          # 75

    # conv1 im2col in the wrapper: folds KH*KW*Cin into a dense lane axis so
    # the kernel never sees a 3-wide channel dim; everything downstream is
    # fused inside the single pallas_call.
    x = jnp.transpose(x_nchw, (0, 2, 3, 1))       # NHWC
    xp = jnp.pad(x, ((0, 0), (pad1, pad1), (pad1, pad1), (0, 0)))
    p1 = jnp.concatenate(
        [xp[:, kh:kh + H, kw:kw + W, :]
         for kh in range(KH1) for kw in range(KH1)],
        axis=-1).astype(compute_dtype)            # (N, H, W, 75)

    w1 = params["w1"].reshape(K1, C).astype(compute_dtype)
    w2 = params["w2"].reshape(9 * C, C).astype(compute_dtype)
    w3 = params["w3"].reshape(9 * C, 3).astype(compute_dtype)
    b1 = params["b1"].reshape(1, C).astype(jnp.float32)
    b2 = params["b2"].reshape(1, C).astype(jnp.float32)
    b3 = params["b3"].reshape(1, 3).astype(jnp.float32)

    HO, M3 = 2 * H, 2 * H * W
    out = pl.pallas_call(
        _upscaler_kernel,
        out_shape=jax.ShapeDtypeStruct((N, 2, M3, 3), jnp.float32),
        grid=(N,),
        in_specs=[
            pl.BlockSpec((1, H, W, K1), lambda n: (n, 0, 0, 0)),
            pl.BlockSpec((K1, C), lambda n: (0, 0)),
            pl.BlockSpec((1, C), lambda n: (0, 0)),
            pl.BlockSpec((9 * C, C), lambda n: (0, 0)),
            pl.BlockSpec((1, C), lambda n: (0, 0)),
            pl.BlockSpec((9 * C, 3), lambda n: (0, 0)),
            pl.BlockSpec((1, 3), lambda n: (0, 0)),
        ],
        out_specs=pl.BlockSpec((1, 2, M3, 3), lambda n: (n, 0, 0, 0)),
        compiler_params=pltpu.CompilerParams(
            dimension_semantics=("parallel",)),
    )(p1, w1, b1, w2, b2, w3, b3)

    # (N, parity, 2H*W, 3) -> NCHW (N, 3, 2H, 2W). The parity axis interleaves
    # the upsampled columns; this only touches the tiny 3-channel output.
    out = out.reshape(N, 2, HO, W, 3)
    out = jnp.transpose(out, (0, 4, 2, 3, 1)).reshape(N, 3, HO, 2 * W)
    return out


# ----------------------------------------------------------------------------
# Params + pure-JAX f32 reference (mirrors PyTorch semantics) for validation.
# ----------------------------------------------------------------------------
def init_params(key):
    k1, k2, k3, k4, k5, k6 = jax.random.split(key, 6)
    s = 0.05
    return {
        "w1": jax.random.normal(k1, (5, 5, 3, 64), jnp.float32) * s,
        "b1": jax.random.normal(k2, (64,), jnp.float32) * s,
        "w2": jax.random.normal(k3, (3, 3, 64, 64), jnp.float32) * s,
        "b2": jax.random.normal(k4, (64,), jnp.float32) * s,
        "w3": jax.random.normal(k5, (3, 3, 64, 3), jnp.float32) * s,
        "b3": jax.random.normal(k6, (3,), jnp.float32) * s,
    }


def _bilinear_matrix(in_size, out_size):
    """PyTorch Upsample(bilinear, align_corners=False) interpolation matrix."""
    scale = in_size / out_size
    dst = jnp.arange(out_size, dtype=jnp.float32)
    src = jnp.maximum((dst + 0.5) * scale - 0.5, 0.0)
    i0 = jnp.minimum(jnp.floor(src).astype(jnp.int32), in_size - 1)
    i1 = jnp.minimum(i0 + 1, in_size - 1)
    lam = src - i0.astype(jnp.float32)
    rows = jnp.arange(out_size)
    U = jnp.zeros((out_size, in_size), jnp.float32)
    U = U.at[rows, i0].add(1.0 - lam)
    U = U.at[rows, i1].add(lam)
    return U


def _reference_forward(x_nchw, params):
    def conv(x, w_hwio, b, relu):
        w_oihw = jnp.transpose(w_hwio, (3, 2, 0, 1))
        pad = w_hwio.shape[0] // 2
        y = lax.conv_general_dilated(
            x, w_oihw, window_strides=(1, 1),
            padding=((pad, pad), (pad, pad)),
            dimension_numbers=("NCHW", "OIHW", "NCHW"))
        y = y + b[None, :, None, None]
        return jnp.maximum(y, 0.0) if relu else y

    x = conv(x_nchw, params["w1"], params["b1"], True)
    x = conv(x, params["w2"], params["b2"], True)
    N, C, H, W = x.shape
    uh = _bilinear_matrix(H, 2 * H)
    uw = _bilinear_matrix(W, 2 * W)
    x = jnp.einsum("ph,nchw,qw->ncpq", uh, x, uw)
    return conv(x, params["w3"], params["b3"], False)


if __name__ == "__main__":
    key = jax.random.PRNGKey(0)
    x = jax.random.normal(key, (2, 3, 16, 16), jnp.float32)   # NCHW, like PyTorch
    params = init_params(jax.random.PRNGKey(42))

    out = jax.block_until_ready(image_upscaler_cnn_forward(x, params))
    assert out.shape == (2, 3, 32, 32), out.shape

    ref = jax.block_until_ready(_reference_forward(x, params))
    # Tolerance is sized for bf16 matmul operands (f32 accumulation): observed
    # error is ~1e-2 of this bound, while genuine tap/phase/layout bugs land
    # far above it.
    max_err = float(jnp.max(jnp.abs(out - ref)))
    assert jnp.allclose(out, ref, atol=2.5e-2, rtol=2.5e-2), max_err

    print("KERNEL_OK")
</pallas_src>

<mosaic_0001>
module attributes {stable_mosaic.version = 11 : i64} {
  func.func @_upscaler_kernel(%arg0: i32, %arg1: memref<1x16x16x75xbf16, #tpu.memory_space<vmem>>, %arg2: memref<75x64xbf16, #tpu.memory_space<vmem>>, %arg3: memref<1x64xf32, #tpu.memory_space<vmem>>, %arg4: memref<576x64xbf16, #tpu.memory_space<vmem>>, %arg5: memref<1x64xf32, #tpu.memory_space<vmem>>, %arg6: memref<576x3xbf16, #tpu.memory_space<vmem>>, %arg7: memref<1x3xf32, #tpu.memory_space<vmem>>, %arg8: memref<1x2x512x3xf32, #tpu.memory_space<vmem>>) attributes {dimension_semantics = [#tpu.dimension_semantics<parallel>], iteration_bounds = array<i64: 2>, scalar_prefetch = 0 : i64, scratch_operands = 0 : i64, tpu.core_type = #tpu.core_type<tc>, window_params = [{transform_indices = @transform_0, window_bounds = array<i64: 1, 16, 16, 75>}, {pipeline_mode = #tpu.pipeline_mode<synchronous>, transform_indices = @transform_1, window_bounds = array<i64: 75, 64>}, {pipeline_mode = #tpu.pipeline_mode<synchronous>, transform_indices = @transform_2, window_bounds = array<i64: 1, 64>}, {pipeline_mode = #tpu.pipeline_mode<synchronous>, transform_indices = @transform_3, window_bounds = array<i64: 576, 64>}, {pipeline_mode = #tpu.pipeline_mode<synchronous>, transform_indices = @transform_4, window_bounds = array<i64: 1, 64>}, {pipeline_mode = #tpu.pipeline_mode<synchronous>, transform_indices = @transform_5, window_bounds = array<i64: 576, 3>}, {pipeline_mode = #tpu.pipeline_mode<synchronous>, transform_indices = @transform_6, window_bounds = array<i64: 1, 3>}, {transform_indices = @transform_7, window_bounds = array<i64: 1, 2, 512, 3>}]} {
    %c0 = arith.constant 0 : index
    %c0_0 = arith.constant 0 : index
    %c0_1 = arith.constant 0 : index
    %c0_2 = arith.constant 0 : index
    %0 = vector.load %arg1[%c0, %c0_0, %c0_1, %c0_2] : memref<1x16x16x75xbf16, #tpu.memory_space<vmem>>, vector<1x16x16x75xbf16>
    %1 = vector.shape_cast %0 : vector<1x16x16x75xbf16> to vector<16x16x75xbf16>
    %2 = vector.shape_cast %1 : vector<16x16x75xbf16> to vector<256x75xbf16>
    %c0_3 = arith.constant 0 : index
    %c0_4 = arith.constant 0 : index
    %3 = vector.load %arg2[%c0_3, %c0_4] : memref<75x64xbf16, #tpu.memory_space<vmem>>, vector<75x64xbf16>
    %cst = arith.constant dense<0.000000e+00> : vector<256x64xf32>
    %4 = tpu.matmul %2, %3, %cst {dimension_numbers = #tpu.dot_dimension_numbers<[1], [0], [0], [1], [0, 0, 1, 1], [], []>} : vector<256x75xbf16>, vector<75x64xbf16>, vector<256x64xf32> -> vector<256x64xf32>
    %c0_5 = arith.constant 0 : index
    %c0_6 = arith.constant 0 : index
    %5 = vector.load %arg3[%c0_5, %c0_6] : memref<1x64xf32, #tpu.memory_space<vmem>>, vector<1x64xf32>
    %6 = vector.broadcast %5 : vector<1x64xf32> to vector<256x64xf32>
    %7 = arith.addf %4, %6 : vector<256x64xf32>
    %cst_7 = arith.constant 0.000000e+00 : f32
    %8 = vector.broadcast %cst_7 : f32 to vector<256x64xf32>
    %9 = arith.maximumf %7, %8 : vector<256x64xf32>
    %10 = arith.truncf %9 : vector<256x64xf32> to vector<256x64xbf16>
    %11 = vector.shape_cast %10 : vector<256x64xbf16> to vector<16x16x64xbf16>
    %cst_8 = arith.constant 0.000000e+00 : bf16
    %12 = vector.broadcast %cst_8 : bf16 to vector<16x1x64xbf16>
    %cst_9 = arith.constant 0.000000e+00 : bf16
    %13 = vector.broadcast %cst_9 : bf16 to vector<1x18x64xbf16>
    %14 = tpu.concatenate %12, %11, %12 in 1 : vector<16x1x64xbf16>, vector<16x16x64xbf16>, vector<16x1x64xbf16> -> vector<16x18x64xbf16>
    %15 = tpu.concatenate %13, %14, %13 in 0 : vector<1x18x64xbf16>, vector<16x18x64xbf16>, vector<1x18x64xbf16> -> vector<18x18x64xbf16>
    %16 = vector.extract_strided_slice %15 {offsets = [0, 0, 0], sizes = [16, 16, 64], strides = [1, 1, 1]} : vector<18x18x64xbf16> to vector<16x16x64xbf16>
    %17 = vector.extract_strided_slice %15 {offsets = [0, 1, 0], sizes = [16, 16, 64], strides = [1, 1, 1]} : vector<18x18x64xbf16> to vector<16x16x64xbf16>
    %18 = vector.extract_strided_slice %15 {offsets = [0, 2, 0], sizes = [16, 16, 64], strides = [1, 1, 1]} : vector<18x18x64xbf16> to vector<16x16x64xbf16>
    %19 = vector.extract_strided_slice %15 {offsets = [1, 0, 0], sizes = [16, 16, 64], strides = [1, 1, 1]} : vector<18x18x64xbf16> to vector<16x16x64xbf16>
    %20 = vector.extract_strided_slice %15 {offsets = [1, 1, 0], sizes = [16, 16, 64], strides = [1, 1, 1]} : vector<18x18x64xbf16> to vector<16x16x64xbf16>
    %21 = vector.extract_strided_slice %15 {offsets = [1, 2, 0], sizes = [16, 16, 64], strides = [1, 1, 1]} : vector<18x18x64xbf16> to vector<16x16x64xbf16>
    %22 = vector.extract_strided_slice %15 {offsets = [2, 0, 0], sizes = [16, 16, 64], strides = [1, 1, 1]} : vector<18x18x64xbf16> to vector<16x16x64xbf16>
    %23 = vector.extract_strided_slice %15 {offsets = [2, 1, 0], sizes = [16, 16, 64], strides = [1, 1, 1]} : vector<18x18x64xbf16> to vector<16x16x64xbf16>
    %24 = vector.extract_strided_slice %15 {offsets = [2, 2, 0], sizes = [16, 16, 64], strides = [1, 1, 1]} : vector<18x18x64xbf16> to vector<16x16x64xbf16>
    %25 = tpu.concatenate %16, %17, %18, %19, %20, %21, %22, %23, %24 in 2 : vector<16x16x64xbf16>, vector<16x16x64xbf16>, vector<16x16x64xbf16>, vector<16x16x64xbf16>, vector<16x16x64xbf16>, vector<16x16x64xbf16>, vector<16x16x64xbf16>, vector<16x16x64xbf16>, vector<16x16x64xbf16> -> vector<16x16x576xbf16>
    %26 = vector.shape_cast %25 : vector<16x16x576xbf16> to vector<256x576xbf16>
    %c0_10 = arith.constant 0 : index
    %c0_11 = arith.constant 0 : index
    %27 = vector.load %arg4[%c0_10, %c0_11] : memref<576x64xbf16, #tpu.memory_space<vmem>>, vector<576x64xbf16>
    %cst_12 = arith.constant dense<0.000000e+00> : vector<256x64xf32>
    %28 = tpu.matmul %26, %27, %cst_12 {dimension_numbers = #tpu.dot_dimension_numbers<[1], [0], [0], [1], [0, 0, 1, 1], [], []>} : vector<256x576xbf16>, vector<576x64xbf16>, vector<256x64xf32> -> vector<256x64xf32>
    %c0_13 = arith.constant 0 : index
    %c0_14 = arith.constant 0 : index
    %29 = vector.load %arg5[%c0_13, %c0_14] : memref<1x64xf32, #tpu.memory_space<vmem>>, vector<1x64xf32>
    %30 = vector.broadcast %29 : vector<1x64xf32> to vector<256x64xf32>
    %31 = arith.addf %28, %30 : vector<256x64xf32>
    %cst_15 = arith.constant 0.000000e+00 : f32
    %32 = vector.broadcast %cst_15 : f32 to vector<256x64xf32>
    %33 = arith.maximumf %31, %32 : vector<256x64xf32>
    %34 = vector.shape_cast %33 : vector<256x64xf32> to vector<16x16x64xf32>
    %35 = vector.extract_strided_slice %34 {offsets = [0, 0, 0], sizes = [1, 16, 64], strides = [1, 1, 1]} : vector<16x16x64xf32> to vector<1x16x64xf32>
    %36 = vector.extract_strided_slice %34 {offsets = [0, 0, 0], sizes = [15, 16, 64], strides = [1, 1, 1]} : vector<16x16x64xf32> to vector<15x16x64xf32>
    %37 = tpu.concatenate %35, %36 in 0 : vector<1x16x64xf32>, vector<15x16x64xf32> -> vector<16x16x64xf32>
    %38 = vector.extract_strided_slice %34 {offsets = [1, 0, 0], sizes = [15, 16, 64], strides = [1, 1, 1]} : vector<16x16x64xf32> to vector<15x16x64xf32>
    %39 = vector.extract_strided_slice %34 {offsets = [15, 0, 0], sizes = [1, 16, 64], strides = [1, 1, 1]} : vector<16x16x64xf32> to vector<1x16x64xf32>
    %40 = tpu.concatenate %38, %39 in 0 : vector<15x16x64xf32>, vector<1x16x64xf32> -> vector<16x16x64xf32>
    %cst_16 = arith.constant 7.500000e-01 : f32
    %41 = vector.broadcast %cst_16 : f32 to vector<16x16x64xf32>
    %42 = arith.mulf %41, %34 : vector<16x16x64xf32>
    %cst_17 = arith.constant 2.500000e-01 : f32
    %43 = vector.broadcast %cst_17 : f32 to vector<16x16x64xf32>
    %44 = arith.mulf %43, %37 : vector<16x16x64xf32>
    %45 = arith.addf %42, %44 : vector<16x16x64xf32>
    %cst_18 = arith.constant 7.500000e-01 : f32
    %46 = vector.broadcast %cst_18 : f32 to vector<16x16x64xf32>
    %47 = arith.mulf %46, %34 : vector<16x16x64xf32>
    %cst_19 = arith.constant 2.500000e-01 : f32
    %48 = vector.broadcast %cst_19 : f32 to vector<16x16x64xf32>
    %49 = arith.mulf %48, %40 : vector<16x16x64xf32>
    %50 = arith.addf %47, %49 : vector<16x16x64xf32>
    %51 = vector.shape_cast %45 : vector<16x16x64xf32> to vector<16x1x16x64xf32>
    %52 = vector.shape_cast %50 : vector<16x16x64xf32> to vector<16x1x16x64xf32>
    %53 = tpu.concatenate %51, %52 in 1 : vector<16x1x16x64xf32>, vector<16x1x16x64xf32> -> vector<16x2x16x64xf32>
    %54 = vector.shape_cast %53 : vector<16x2x16x64xf32> to vector<32x16x64xf32>
    %55 = vector.extract_strided_slice %54 {offsets = [0, 0, 0], sizes = [32, 1, 64], strides = [1, 1, 1]} : vector<32x16x64xf32> to vector<32x1x64xf32>
    %56 = vector.extract_strided_slice %54 {offsets = [0, 0, 0], sizes = [32, 15, 64], strides = [1, 1, 1]} : vector<32x16x64xf32> to vector<32x15x64xf32>
    %57 = tpu.concatenate %55, %56 in 1 : vector<32x1x64xf32>, vector<32x15x64xf32> -> vector<32x16x64xf32>
    %58 = vector.extract_strided_slice %54 {offsets = [0, 1, 0], sizes = [32, 15, 64], strides = [1, 1, 1]} : vector<32x16x64xf32> to vector<32x15x64xf32>
    %59 = vector.extract_strided_slice %54 {offsets = [0, 15, 0], sizes = [32, 1, 64], strides = [1, 1, 1]} : vector<32x16x64xf32> to vector<32x1x64xf32>
    %60 = tpu.concatenate %58, %59 in 1 : vector<32x15x64xf32>, vector<32x1x64xf32> -> vector<32x16x64xf32>
    %cst_20 = arith.constant 7.500000e-01 : f32
    %61 = vector.broadcast %cst_20 : f32 to vector<32x16x64xf32>
    %62 = arith.mulf %61, %54 : vector<32x16x64xf32>
    %cst_21 = arith.constant 2.500000e-01 : f32
    %63 = vector.broadcast %cst_21 : f32 to vector<32x16x64xf32>
    %64 = arith.mulf %63, %57 : vector<32x16x64xf32>
    %65 = arith.addf %62, %64 : vector<32x16x64xf32>
    %66 = arith.truncf %65 : vector<32x16x64xf32> to vector<32x16x64xbf16>
    %cst_22 = arith.constant 7.500000e-01 : f32
    %67 = vector.broadcast %cst_22 : f32 to vector<32x16x64xf32>
    %68 = arith.mulf %67, %54 : vector<32x16x64xf32>
    %cst_23 = arith.constant 2.500000e-01 : f32
    %69 = vector.broadcast %cst_23 : f32 to vector<32x16x64xf32>
    %70 = arith.mulf %69, %60 : vector<32x16x64xf32>
    %71 = arith.addf %68, %70 : vector<32x16x64xf32>
    %72 = arith.truncf %71 : vector<32x16x64xf32> to vector<32x16x64xbf16>
    %cst_24 = arith.constant 0.000000e+00 : bf16
    %73 = vector.broadcast %cst_24 : bf16 to vector<32x1x64xbf16>
    %cst_25 = arith.constant 0.000000e+00 : bf16
    %74 = vector.broadcast %cst_25 : bf16 to vector<1x17x64xbf16>
    %75 = tpu.concatenate %73, %72 in 1 : vector<32x1x64xbf16>, vector<32x16x64xbf16> -> vector<32x17x64xbf16>
    %76 = tpu.concatenate %66, %73 in 1 : vector<32x16x64xbf16>, vector<32x1x64xbf16> -> vector<32x17x64xbf16>
    %77 = tpu.concatenate %74, %75, %74 in 0 : vector<1x17x64xbf16>, vector<32x17x64xbf16>, vector<1x17x64xbf16> -> vector<34x17x64xbf16>
    %78 = tpu.concatenate %74, %76, %74 in 0 : vector<1x17x64xbf16>, vector<32x17x64xbf16>, vector<1x17x64xbf16> -> vector<34x17x64xbf16>
    %79 = vector.extract_strided_slice %77 {offsets = [0, 0, 0], sizes = [32, 16, 64], strides = [1, 1, 1]} : vector<34x17x64xbf16> to vector<32x16x64xbf16>
    %80 = vector.extract_strided_slice %78 {offsets = [0, 0, 0], sizes = [32, 16, 64], strides = [1, 1, 1]} : vector<34x17x64xbf16> to vector<32x16x64xbf16>
    %81 = vector.extract_strided_slice %77 {offsets = [0, 1, 0], sizes = [32, 16, 64], strides = [1, 1, 1]} : vector<34x17x64xbf16> to vector<32x16x64xbf16>
    %82 = vector.extract_strided_slice %77 {offsets = [1, 0, 0], sizes = [32, 16, 64], strides = [1, 1, 1]} : vector<34x17x64xbf16> to vector<32x16x64xbf16>
    %83 = vector.extract_strided_slice %78 {offsets = [1, 0, 0], sizes = [32, 16, 64], strides = [1, 1, 1]} : vector<34x17x64xbf16> to vector<32x16x64xbf16>
    %84 = vector.extract_strided_slice %77 {offsets = [1, 1, 0], sizes = [32, 16, 64], strides = [1, 1, 1]} : vector<34x17x64xbf16> to vector<32x16x64xbf16>
    %85 = vector.extract_strided_slice %77 {offsets = [2, 0, 0], sizes = [32, 16, 64], strides = [1, 1, 1]} : vector<34x17x64xbf16> to vector<32x16x64xbf16>
    %86 = vector.extract_strided_slice %78 {offsets = [2, 0, 0], sizes = [32, 16, 64], strides = [1, 1, 1]} : vector<34x17x64xbf16> to vector<32x16x64xbf16>
    %87 = vector.extract_strided_slice %77 {offsets = [2, 1, 0], sizes = [32, 16, 64], strides = [1, 1, 1]} : vector<34x17x64xbf16> to vector<32x16x64xbf16>
    %88 = tpu.concatenate %79, %80, %81, %82, %83, %84, %85, %86, %87 in 2 : vector<32x16x64xbf16>, vector<32x16x64xbf16>, vector<32x16x64xbf16>, vector<32x16x64xbf16>, vector<32x16x64xbf16>, vector<32x16x64xbf16>, vector<32x16x64xbf16>, vector<32x16x64xbf16>, vector<32x16x64xbf16> -> vector<32x16x576xbf16>
    %89 = vector.shape_cast %88 : vector<32x16x576xbf16> to vector<512x576xbf16>
    %c0_26 = arith.constant 0 : index
    %c0_27 = arith.constant 0 : index
    %90 = vector.load %arg6[%c0_26, %c0_27] : memref<576x3xbf16, #tpu.memory_space<vmem>>, vector<576x3xbf16>
    %cst_28 = arith.constant dense<0.000000e+00> : vector<512x3xf32>
    %91 = tpu.matmul %89, %90, %cst_28 {dimension_numbers = #tpu.dot_dimension_numbers<[1], [0], [0], [1], [0, 0, 1, 1], [], []>} : vector<512x576xbf16>, vector<576x3xbf16>, vector<512x3xf32> -> vector<512x3xf32>
    %c0_29 = arith.constant 0 : index
    %c0_30 = arith.constant 0 : index
    %92 = vector.load %arg7[%c0_29, %c0_30] : memref<1x3xf32, #tpu.memory_space<vmem>>, vector<1x3xf32>
    %93 = vector.broadcast %92 : vector<1x3xf32> to vector<512x3xf32>
    %94 = arith.addf %91, %93 : vector<512x3xf32>
    %95 = vector.extract_strided_slice %78 {offsets = [0, 0, 0], sizes = [32, 16, 64], strides = [1, 1, 1]} : vector<34x17x64xbf16> to vector<32x16x64xbf16>
    %96 = vector.extract_strided_slice %77 {offsets = [0, 1, 0], sizes = [32, 16, 64], strides = [1, 1, 1]} : vector<34x17x64xbf16> to vector<32x16x64xbf16>
    %97 = vector.extract_strided_slice %78 {offsets = [0, 1, 0], sizes = [32, 16, 64], strides = [1, 1, 1]} : vector<34x17x64xbf16> to vector<32x16x64xbf16>
    %98 = vector.extract_strided_slice %78 {offsets = [1, 0, 0], sizes = [32, 16, 64], strides = [1, 1, 1]} : vector<34x17x64xbf16> to vector<32x16x64xbf16>
    %99 = vector.extract_strided_slice %77 {offsets = [1, 1, 0], sizes = [32, 16, 64], strides = [1, 1, 1]} : vector<34x17x64xbf16> to vector<32x16x64xbf16>
    %100 = vector.extract_strided_slice %78 {offsets = [1, 1, 0], sizes = [32, 16, 64], strides = [1, 1, 1]} : vector<34x17x64xbf16> to vector<32x16x64xbf16>
    %101 = vector.extract_strided_slice %78 {offsets = [2, 0, 0], sizes = [32, 16, 64], strides = [1, 1, 1]} : vector<34x17x64xbf16> to vector<32x16x64xbf16>
    %102 = vector.extract_strided_slice %77 {offsets = [2, 1, 0], sizes = [32, 16, 64], strides = [1, 1, 1]} : vector<34x17x64xbf16> to vector<32x16x64xbf16>
    %103 = vector.extract_strided_slice %78 {offsets = [2, 1, 0], sizes = [32, 16, 64], strides = [1, 1, 1]} : vector<34x17x64xbf16> to vector<32x16x64xbf16>
    %104 = tpu.concatenate %95, %96, %97, %98, %99, %100, %101, %102, %103 in 2 : vector<32x16x64xbf16>, vector<32x16x64xbf16>, vector<32x16x64xbf16>, vector<32x16x64xbf16>, vector<32x16x64xbf16>, vector<32x16x64xbf16>, vector<32x16x64xbf16>, vector<32x16x64xbf16>, vector<32x16x64xbf16> -> vector<32x16x576xbf16>
    %105 = vector.shape_cast %104 : vector<32x16x576xbf16> to vector<512x576xbf16>
    %c0_31 = arith.constant 0 : index
    %c0_32 = arith.constant 0 : index
    %106 = vector.load %arg6[%c0_31, %c0_32] : memref<576x3xbf16, #tpu.memory_space<vmem>>, vector<576x3xbf16>
    %cst_33 = arith.constant dense<0.000000e+00> : vector<512x3xf32>
    %107 = tpu.matmul %105, %106, %cst_33 {dimension_numbers = #tpu.dot_dimension_numbers<[1], [0], [0], [1], [0, 0, 1, 1], [], []>} : vector<512x576xbf16>, vector<576x3xbf16>, vector<512x3xf32> -> vector<512x3xf32>
    %c0_34 = arith.constant 0 : index
    %c0_35 = arith.constant 0 : index
    %108 = vector.load %arg7[%c0_34, %c0_35] : memref<1x3xf32, #tpu.memory_space<vmem>>, vector<1x3xf32>
    %109 = vector.broadcast %108 : vector<1x3xf32> to vector<512x3xf32>
    %110 = arith.addf %107, %109 : vector<512x3xf32>
    %111 = vector.shape_cast %94 : vector<512x3xf32> to vector<1x512x3xf32>
    %112 = vector.shape_cast %110 : vector<512x3xf32> to vector<1x512x3xf32>
    %113 = tpu.concatenate %111, %112 in 0 : vector<1x512x3xf32>, vector<1x512x3xf32> -> vector<2x512x3xf32>
    %c0_36 = arith.constant 0 : index
    %c0_37 = arith.constant 0 : index
    %c0_38 = arith.constant 0 : index
    %c0_39 = arith.constant 0 : index
    %114 = vector.load %arg8[%c0_36, %c0_37, %c0_38, %c0_39] : memref<1x2x512x3xf32, #tpu.memory_space<vmem>>, vector<1x2x512x3xf32>
    %115 = vector.shape_cast %114 : vector<1x2x512x3xf32> to vector<2x512x3xf32>
    %116 = vector.shape_cast %113 : vector<2x512x3xf32> to vector<1x2x512x3xf32>
    tpu.vector_store %arg8[%c0_36, %c0_37, %c0_38, %c0_39], %116 {strides = array<i32>} : memref<1x2x512x3xf32, #tpu.memory_space<vmem>>, vector<1x2x512x3xf32>,
    return
  }
  func.func @transform_0(%arg0: i32) -> (i32, i32, i32, i32) {
    %c0_i32 = arith.constant 0 : i32
    %c0_i32_0 = arith.constant 0 : i32
    %c0_i32_1 = arith.constant 0 : i32
    %c0_i32_2 = arith.constant 0 : i32
    return %arg0, %c0_i32, %c0_i32_0, %c0_i32_1 : i32, i32, i32, i32
  }
  func.func @transform_1(%arg0: i32) -> (i32, i32) {
    %c0_i32 = arith.constant 0 : i32
    %c0_i32_0 = arith.constant 0 : i32
    %c0_i32_1 = arith.constant 0 : i32
    return %c0_i32, %c0_i32_0 : i32, i32
  }
  func.func @transform_2(%arg0: i32) -> (i32, i32) {
    %c0_i32 = arith.constant 0 : i32
    %c0_i32_0 = arith.constant 0 : i32
    %c0_i32_1 = arith.constant 0 : i32
    return %c0_i32, %c0_i32_0 : i32, i32
  }
  func.func @transform_3(%arg0: i32) -> (i32, i32) {
    %c0_i32 = arith.constant 0 : i32
    %c0_i32_0 = arith.constant 0 : i32
    %c0_i32_1 = arith.constant 0 : i32
    return %c0_i32, %c0_i32_0 : i32, i32
  }
  func.func @transform_4(%arg0: i32) -> (i32, i32) {
    %c0_i32 = arith.constant 0 : i32
    %c0_i32_0 = arith.constant 0 : i32
    %c0_i32_1 = arith.constant 0 : i32
    return %c0_i32, %c0_i32_0 : i32, i32
  }
  func.func @transform_5(%arg0: i32) -> (i32, i32) {
    %c0_i32 = arith.constant 0 : i32
    %c0_i32_0 = arith.constant 0 : i32
    %c0_i32_1 = arith.constant 0 : i32
    return %c0_i32, %c0_i32_0 : i32, i32
  }
  func.func @transform_6(%arg0: i32) -> (i32, i32) {
    %c0_i32 = arith.constant 0 : i32
    %c0_i32_0 = arith.constant 0 : i32
    %c0_i32_1 = arith.constant 0 : i32
    return %c0_i32, %c0_i32_0 : i32, i32
  }
  func.func @transform_7(%arg0: i32) -> (i32, i32, i32, i32) {
    %c0_i32 = arith.constant 0 : i32
    %c0_i32_0 = arith.constant 0 : i32
    %c0_i32_1 = arith.constant 0 : i32
    %c0_i32_2 = arith.constant 0 : i32
    return %arg0, %c0_i32, %c0_i32_0, %c0_i32_1 : i32, i32, i32, i32
  }
}

</mosaic_0001>

<bundles_post_ra>
// kernel: image_upscaler_cnn_forward.1
= control target key start
LH: loop header
LB: loop body
LE: loop exit
PB: predicated region body
PF: predicated region fallthrough
CT: control target
= control target key end

     0   :  { %s8684_s24 = smov 0   ;;  %s14002_s0 = inlined_call_operand.vmem [shape: bf16[2,16,16,75], index: 0, kind: input, shape index: {}]   ;;  %s14003_s1 = inlined_call_operand.vmem [shape: bf16[75,64], index: 1, kind: input, shape index: {}]   ;;  %s14004_s2 = inlined_call_operand.vmem [shape: f32[1,64], index: 2, kind: input, shape index: {}]   ;;  %s14005_s3 = inlined_call_operand.vmem [shape: bf16[576,64], index: 3, kind: input, shape index: {}]   ;;  %s14006_s4 = inlined_call_operand.vmem [shape: f32[1,64], index: 4, kind: input, shape index: {}]   ;;  %s14007_s5 = inlined_call_operand.vmem [shape: bf16[576,3], index: 5, kind: input, shape index: {}]   ;;  %s14008_s6 = inlined_call_operand.vmem [shape: f32[1,3], index: 6, kind: input, shape index: {}]   ;;  %s14009_s7 = inlined_call_operand.vmem [shape: f32[2,2,512,3], index: 7, kind: output, shape index: {}]  }
   0x1 LB: > { %s7355_s25 = sadd.s32 4294967295, %s8639_s24   ;;  %p7359_p0 = scmp.ge.s32.totalorder %s8639_s24, 1  ;;  %s8639_s24 = sphi %s8684_s24, %s17_s24  }
   0x2   : > { %p237_p1 = scmp.lt.s32.totalorder %s8639_s24, 3 }
   0x4   : > { %p238_p2 = pnand %p7359_p0, %p237_p1 }
   0x6   : > { %241 = sbr.rel (%p238_p2) target bundleno = 1886 (0x75e), region = 48 }
   0xd   : > { %v8530_v0 = vld [vmem:[%s14003_s1] sm:$0xff]   ;;  %v8531_v1 = vld [vmem:[%s14003_s1 + $0x8] sm:$0xff]   ;;  %vm487_vm0 = vcmask 1044480   ;;  %vm488_vm1 = vcmask 1045504   ;;  %v8532_v2 = vld [vmem:[%s14003_s1 + $0x10] sm:$0xff]   ;;  %v8641_v3 = vmov 65535  }
   0xe   : > { %7909 = vmatprep.subr.bf16.mxu0 %v8530_v0  ;;  %v489_v4 = vsel %vm487_vm0, 4294967295, %v8641_v3  ;;  %p269_p3 = scmp.lt.s32.totalorder %s7355_s25, 1  ;;  %v8533_v5 = vld [vmem:[%s14003_s1 + $0x18] sm:$0xff]   ;;  %v8534_v6 = vld [vmem:[%s14003_s1 + $0x20] sm:$0x3f]   ;;  %vm438_vm2 = vcmask 613376  }
   0xf   : > { %7910 = vmatpush3.bf16.msra.mxu0 %v8530_v0  ;;  %v490_v7 = vsel %vm488_vm1, %v489_v4, 0  ;;  %v8551_v25 = vld [vmem:[%s14005_s3 + $0x40] sm:$0xff]   ;;  %v8553_v27 = vld [vmem:[%s14005_s3 + $0x48] sm:$0xff]   ;;  %v8555_v29 = vld [vmem:[%s14005_s3 + $0x50] sm:$0xff]   ;;  %vm847_vm3 = vcmask 1040384   ;;  %v14385_v0 = vmov 0 }
  0x10   : > { %7911 = vmatprep.subr.bf16.mxu0 %v8531_v1  ;;  %s15314_s25 = smov (!%p269_p3, %s7355_s25), 1  ;;  %v492_v9 = vand.u32 %v8534_v6, %v490_v7  ;;  %v8552_v26 = vld [vmem:[%s14005_s3] sm:$0xff]   ;;  %7593 = vmatprep.subr.bf16.mxu1 %v8551_v25  ;;  %v8554_v28 = vld [vmem:[%s14005_s3 + $0x8] sm:$0xff]   ;;  %v8556_v30 = vld [vmem:[%s14005_s3 + $0x10] sm:$0xff]   ;;  %vm848_vm4 = vsmask.f32 256 }
  0x11   : > { %s7570_s13 = sshll.u32 %s15314_s25, 7  ;;  %7594 = vmatpush3.bf16.msra.mxu1 %v8552_v26  ;;  %v8557_v31 = vld [vmem:[%s14005_s3 + $0x58] sm:$0xff]   ;;  %v8559_v33 = vld [vmem:[%s14005_s3 + $0x60] sm:$0xff]   ;;  %v8561_v35 = vld [vmem:[%s14005_s3 + $0x68] sm:$0xff]   ;;  %vm882_vm6 = vsmask.f32 7424 }
  0x12   : > { %s8713_s16 = scalar_lea.vmem %s14002_s0, %s7570_s13  ;;  %7595 = vmatprep.subr.bf16.mxu1 %v8553_v27  ;;  %v8558_v32 = vld [vmem:[%s14005_s3 + $0x18] sm:$0xff]   ;;  %v8560_v34 = vld [vmem:[%s14005_s3 + $0x20] sm:$0xff]   ;;  %v8562_v37 = vld [vmem:[%s14005_s3 + $0x28] sm:$0xff]   ;;  %s8643_s11 = smov 64   ;;  %vm1134_vm7 = vcmask 1046528   ;;  %vm1265_vm8 = vcmask 523264  }
  0x13   : > { %7912 = vmatpush3.bf16.msra.mxu0 %v8531_v1  ;;  %v8535_v8 = vld [vmem:[%s8713_s16] sm:$0xff]   ;;  %v8536_v10 = vld [vmem:[%s8713_s16 + $0x8] sm:$0xff]   ;;  %v8537_v11 = vld [vmem:[%s8713_s16 + $0x10] sm:$0xff]   ;;  %s7571_s23 = sshll.u32 %s15314_s25, 10  ;;  %vm7171_vm10 = vcmask 23552  }
  0x14   : > { %7913 = vmatprep.subr.bf16.mxu0 %v8532_v2  ;;  %7919 = vmatprep.mubr.msk.bf16.mxu0 %vm438_vm2, %v8535_v8  ;;  %v8538_v12 = vld [vmem:[%s8713_s16 + $0x18] sm:$0xff]   ;;  %v8539_v13 = vld [vmem:[%s8713_s16 + $0x20] sm:$0xff]   ;;  %v8540_v14 = vld [vmem:[%s8713_s16 + $0x28] sm:$0xff]   ;;  %s13237_s28 = scalar_lea.vmem %s14009_s7, %s7571_s23 }
  0x15   : > { %v8541_v15 = vld [vmem:[%s8713_s16 + $0x30] sm:$0xff]   ;;  %v8542_v16 = vld [vmem:[%s8713_s16 + $0x38] sm:$0xff]   ;;  %v8543_v17 = vld [vmem:[%s8713_s16 + $0x40] sm:$0xff]   ;;  %7596 = vmatpush3.bf16.msra.mxu1 %v8554_v28 }
  0x16   : > { %v8544_v18 = vld [vmem:[%s8713_s16 + $0x48] sm:$0xff]   ;;  %v8545_v19 = vld [vmem:[%s8713_s16 + $0x50] sm:$0xff]   ;;  %v8546_v20 = vld [vmem:[%s8713_s16 + $0x58] sm:$0xff]   ;;  %7597 = vmatprep.subr.bf16.mxu1 %v8555_v29 }
  0x17   : > { %7914 = vmatpush3.bf16.msra.mxu0 %v8532_v2  ;;  %v8547_v21 = vld [vmem:[%s8713_s16 + $0x60] sm:$0xff]   ;;  %v8548_v22 = vld [vmem:[%s8713_s16 + $0x68] sm:$0xff]   ;;  %v8549_v23 = vld [vmem:[%s8713_s16 + $0x70] sm:$0xff]  }
  0x18   : > { %7915 = vmatprep.subr.bf16.mxu0 %v8533_v5  ;;  %v8550_v24 = vld [vmem:[%s8713_s16 + $0x78] sm:$0xff]   ;;  %v8783_v36 = vld [vmem:[%s14004_s2] ss:$0 sm:$0xff]  ;;  %v8563_v39 = vld [vmem:[%s14005_s3 + $0x70] sm:$0xff]  }
  0x19   : > { %7598 = vmatpush3.bf16.msra.mxu1 %v8556_v30  ;;  %v8564_v46 = vld [vmem:[%s14005_s3 + $0x30] sm:$0xff]   ;;  %v8565_v48 = vld [vmem:[%s14005_s3 + $0x78] sm:$0xff]   ;;  %v8807_v57 = vld [vmem:[%s14005_s3 + $0x100] sm:$0xff]  }
  0x1a   : > { %7599 = vmatprep.subr.bf16.mxu1 %v8557_v31  ;;  %v8566_v54 = vld [vmem:[%s14005_s3 + $0x38] sm:$0xff]   ;;  %vm8812_vm5 = vmand %vm847_vm3, %vm848_vm4 }
  0x1b   : > { %7916 = vmatpush3.bf16.msra.mxu0 %v8533_v5  ;;  %v14386_v0 = vsel %vm8812_vm5, 4294967295, %v14385_v0  ;;  %vm9336_vm9 = vmneg %vm1265_vm8 }
  0x1c   : > { %7917 = vmatprep.subr.bf16.mxu0 %v492_v9  ;;  %14387 = vst [vmem:[#allocation2_spill] sm:$0xff] %v14386_v0 }
  0x1d   : > { %7600 = vmatpush3.bf16.msra.mxu1 %v8558_v32 }
  0x1e   : > { %7601 = vmatprep.subr.bf16.mxu1 %v8559_v33 }
  0x1f   : > { %7918 = vmatpush3.bf16.msra.mxu0 %v492_v9 }
  0x21   : > { %7602 = vmatpush3.bf16.msra.mxu1 %v8560_v34 }
  0x22   : > { %7920 = vmatmul.mubr.msk.bf16.vlgmr.msra.gmra.mrb[0].mxu0 %vm438_vm2, %v8536_v10  ;;  %7603 = vmatprep.subr.bf16.mxu1 %v8561_v35 }
  0x23   : > { %7923 = vmatprep.mubr.msk.bf16.mxu0 %vm438_vm2, %v8537_v11 }
  0x25   : > { %7604 = vmatpush3.bf16.msra.mxu1 %v8562_v37 }
  0x26   : > { %7605 = vmatprep.subr.bf16.mxu1 %v8563_v39 }
  0x29   : > { %7606 = vmatpush3.bf16.msra.mxu1 %v8564_v46 }
  0x2a   : > { %7924 = vmatmul.mubr.msk.bf16.gmra.mrb[4].mxu0 %vm438_vm2, %v8538_v12  ;;  %7607 = vmatprep.subr.bf16.mxu1 %v8565_v48  ;;  %v14010_v12 = vmov 0  }
  0x2b   : > { %7927 = vmatprep.mubr.msk.bf16.mxu0 %vm438_vm2, %v8539_v13  ;;  %v8820_v13 = vrot.slane %v14010_v12, 1 }
  0x2d   : > { %7608 = vmatpush3.bf16.msra.mxu1 %v8566_v54  ;;  %14388 = vst [vmem:[#allocation3_spill] sm:$0xff] %v8820_v13 }
  0x2e   : > { %7951 = vmatprep.subr.bf16.mxu1 %v8807_v57 }
  0x32   : > { %7928 = vmatmul.mubr.msk.bf16.gmra.mrb[8].mxu0 %vm438_vm2, %v8540_v14 }
  0x33   : > { %7931 = vmatprep.mubr.msk.bf16.mxu0 %vm438_vm2, %v8541_v15 }
  0x3a   : > { %7932 = vmatmul.mubr.msk.bf16.gmra.mrb[12].mxu0 %vm438_vm2, %v8542_v16 }
  0x3b   : > { %7935 = vmatprep.mubr.msk.bf16.mxu0 %vm438_vm2, %v8543_v17 }
  0x42   : > { %7936 = vmatmul.mubr.msk.bf16.gmra.mrb[16].mxu0 %vm438_vm2, %v8544_v18 }
  0x43   : > { %7939 = vmatprep.mubr.msk.bf16.mxu0 %vm438_vm2, %v8545_v19 }
  0x4a   : > { %7940 = vmatmul.mubr.msk.bf16.gmra.mrb[20].mxu0 %vm438_vm2, %v8546_v20 }
  0x4b   : > { %7943 = vmatprep.mubr.msk.bf16.mxu0 %vm438_vm2, %v8547_v21 }
  0x52   : > { %7944 = vmatmul.mubr.msk.bf16.gmra.mrb[24].mxu0 %vm438_vm2, %v8548_v22 }
  0x53   : > { %7947 = vmatprep.mubr.msk.bf16.mxu0 %vm438_vm2, %v8549_v23 }
  0x5a   : > { %7948 = vmatmul.mubr.msk.bf16.gmra.mrb[28].mxu0 %vm438_vm2, %v8550_v24 }
  0xf5   : > { %v7921_v38 = vpop.f32.mrb[0].mxu0 }
  0xf6   : > { %v537_v40 = vadd.f32 %v7921_v38, %v8783_v36  ;;  %v528_v41 = vpop.f32.mrb[1].mxu0 }
  0xf7   : > { %v529_v42 = vadd.f32 %v8783_v36, %v528_v41  ;;  %v7922_v43 = vpop.f32.mrb[2].mxu0 }
  0xf8   : > { %v540_v44 = vadd.f32 %v7922_v43, %v8783_v36  ;;  %v531_v45 = vpop.f32.mrb[3].mxu0  ;;  %v657_v49 = vmax.f32 %v537_v40, 0.0 }
  0xf9   : > { %v532_v47 = vadd.f32 %v8783_v36, %v531_v45  ;;  %v655_v51 = vmax.f32 %v529_v42, 0.0 }
  0xfa   : > { %v658_v50 = vmax.f32 %v540_v44, 0.0 }
  0xfb   : > { %v656_v52 = vmax.f32 %v532_v47, 0.0 }
  0xfc   : > { %v688_v53 = vpack.c.bf16 %v658_v50, %v657_v49 }
  0xfd   : > { %v687_v55 = vpack.c.bf16 %v656_v52, %v655_v51  ;;  %v7925_v56 = vpop.f32.mrb[4].mxu0 }
  0xfe   : > { %v711_v58 = vshrl.u32 %v688_v53, 16  ;;  %v553_v59 = vadd.f32 %v7925_v56, %v8783_v36  ;;  %v544_v60 = vpop.f32.mrb[5].mxu0  ;;  %v714_v2 = vshll.u32 %v688_v53, 16 }
  0xff   : > { %v704_v61 = vshrl.u32 %v687_v55, 16  ;;  %v545_v62 = vadd.f32 %v8783_v36, %v544_v60  ;;  %v7926_v63 = vpop.f32.mrb[6].mxu0  ;;  %v707_v7 = vshll.u32 %v687_v55, 16 }
 0x100   : > { %v713_v1 = vrot.slane %v711_v58, 7  ;;  %v661_v3 = vmax.f32 %v553_v59, 0.0  ;;  %v556_v4 = vadd.f32 %v7926_v63, %v8783_v36  ;;  %v547_v5 = vpop.f32.mrb[7].mxu0 }
 0x101   : > { %v706_v6 = vrot.slane %v704_v61, 7  ;;  %v659_v8 = vmax.f32 %v545_v62, 0.0  ;;  %v548_v9 = vadd.f32 %v8783_v36, %v547_v5 }
 0x102   : > { %v662_v10 = vmax.f32 %v556_v4, 0.0  ;;  %v716_v11 = vor.u32 %v714_v2, %v713_v1  ;;  %v8824_v14 = vsel %vm8812_vm5, %v713_v1, 0 }
 0x103   : > { %v660_v15 = vmax.f32 %v548_v9, 0.0  ;;  %v709_v16 = vor.u32 %v707_v7, %v706_v6  ;;  %v8828_v17 = vsel %vm8812_vm5, %v706_v6, 0  ;;  %v911_v21 = vshll.u32 %v8824_v14, 16 }
 0x104   : > { %v690_v18 = vpack.c.bf16 %v662_v10, %v661_v3  ;;  %v8832_v19 = vsel %vm8812_vm5, 0, %v716_v11  ;;  %v899_v20 = vshll.u32 %v8828_v17, 16 }
 0x105   : > { %v689_v22 = vpack.c.bf16 %v660_v15, %v659_v8  ;;  %1185 = vrot.lane.b32.xlu1 %v8832_v19, %s8643_s11  ;;  %v7929_v23 = vpop.f32.mrb[8].mxu0  ;;  %v8840_v24 = vsel %vm8812_vm5, 0, %v709_v16  ;;  %v904_v25 = vshrl.u32 %v8832_v19, 16  ;;  %v906_v26 = vshll.u32 %v8832_v19, 16 }
 0x106   : > { %v725_v27 = vshrl.u32 %v690_v18, 16  ;;  %v728_v28 = vshll.u32 %v690_v18, 16  ;;  %v569_v29 = vadd.f32 %v7929_v23, %v8783_v36  ;;  %v560_v30 = vpop.f32.mrb[9].mxu0  ;;  %1183 = vrot.lane.b32.xlu0 %v8840_v24, %s8643_s11  ;;  %v892_v31 = vshrl.u32 %v8840_v24, 16 }
 0x107   : > { %v718_v32 = vshrl.u32 %v689_v22, 16  ;;  %v721_v33 = vshll.u32 %v689_v22, 16  ;;  %v561_v34 = vadd.f32 %v8783_v36, %v560_v30  ;;  %v7930_v35 = vpop.f32.mrb[10].mxu0  ;;  %v894_v37 = vshll.u32 %v8840_v24, 16 }
 0x108   : > { %v727_v38 = vrot.slane %v725_v27, 7  ;;  %v665_v39 = vmax.f32 %v569_v29, 0.0  ;;  %v572_v40 = vadd.f32 %v7930_v35, %v8783_v36  ;;  %v563_v41 = vpop.f32.mrb[11].mxu0  ;;  %v901_v42 = vrot.slane %v899_v20, 1 }
 0x109   : > { %v720_v43 = vrot.slane %v718_v32, 7  ;;  %v663_v44 = vmax.f32 %v561_v34, 0.0  ;;  %v564_v45 = vadd.f32 %v8783_v36, %v563_v41  ;;  %v896_v46 = vrot.slane %v894_v37, 1 }
 0x10a   : > { %v666_v47 = vmax.f32 %v572_v40, 0.0  ;;  %1071 = vrot.lane.b32.xlu0 %v8820_v13, %s8643_s11  ;;  %v908_v48 = vrot.slane %v906_v26, 1  ;;  %v913_v49 = vrot.slane %v911_v21, 1  ;;  %v730_v50 = vor.u32 %v728_v28, %v727_v38 }
 0x10b   : > { %v664_v51 = vmax.f32 %v564_v45, 0.0  ;;  %v897_v52 = vor.u32 %v896_v46, %v892_v31  ;;  %v723_v53 = vor.u32 %v721_v33, %v720_v43  ;;  %v8856_v54 = vsel %vm8812_vm5, %v720_v43, 0 }
 0x10c   : > { %v692_v55 = vpack.c.bf16 %v666_v47, %v665_v39  ;;  %v909_v56 = vor.u32 %v908_v48, %v904_v25  ;;  %v8860_v58 = vsel %vm8812_vm5, 0, %v730_v50  ;;  %v923_v59 = vshll.u32 %v8856_v54, 16 }
 0x10d   : > { %v691_v60 = vpack.c.bf16 %v664_v51, %v663_v44  ;;  %v7933_v61 = vpop.f32.mrb[12].mxu0  ;;  %v8864_v62 = vsel %vm882_vm6, %v897_v52, %v901_v42  ;;  %v8868_v63 = vsel %vm8812_vm5, 0, %v723_v53  ;;  %v8872_v1 = vsel %vm8812_vm5, %v727_v38, 0 }
 0x10e   : > { %v739_v2 = vshrl.u32 %v692_v55, 16  ;;  %v742_v3 = vshll.u32 %v692_v55, 16  ;;  %v585_v4 = vadd.f32 %v7933_v61, %v8783_v36  ;;  %1073 = vrot.lane.b32.xlu1 %v8864_v62, %s8643_s11  ;;  %v576_v5 = vpop.f32.mrb[13].mxu0  ;;  %1187 = vrot.lane.b32.xlu0 %v8868_v63, %s8643_s11  ;;  %v8880_v6 = vsel %vm882_vm6, %v909_v56, %v913_v49 }
 0x10f   : > { %v732_v7 = vshrl.u32 %v691_v60, 16  ;;  %v735_v8 = vshll.u32 %v691_v60, 16  ;;  %v577_v9 = vadd.f32 %v8783_v36, %v576_v5  ;;  %v7934_v10 = vpop.f32.mrb[14].mxu0  ;;  %v916_v11 = vshrl.u32 %v8868_v63, 16 }
 0x110   : > { %v741_v15 = vrot.slane %v739_v2, 7  ;;  %v669_v16 = vmax.f32 %v585_v4, 0.0  ;;  %v588_v18 = vadd.f32 %v7934_v10, %v8783_v36  ;;  %v579_v20 = vpop.f32.mrb[15].mxu0  ;;  %v918_v21 = vshll.u32 %v8868_v63, 16 }
 0x111   : > { %v734_v22 = vrot.slane %v732_v7, 7  ;;  %v667_v23 = vmax.f32 %v577_v9, 0.0  ;;  %v580_v25 = vadd.f32 %v8783_v36, %v579_v20  ;;  %v925_v26 = vrot.slane %v923_v59, 1 }
 0x112   : > { %v670_v27 = vmax.f32 %v588_v18, 0.0  ;;  %1075 = vrot.lane.b32.xlu1 %v8880_v6, %s8643_s11  ;;  %1189 = vrot.lane.b32.xlu0 %v8860_v58, %s8643_s11  ;;  %v920_v28 = vrot.slane %v918_v21, 1  ;;  %v928_v29 = vshrl.u32 %v8860_v58, 16  ;;  %v930_v30 = vshll.u32 %v8860_v58, 16 }
 0x113   : > { %v668_v31 = vmax.f32 %v580_v25, 0.0  ;;  %v737_v32 = vor.u32 %v735_v8, %v734_v22  ;;  %v935_v33 = vshll.u32 %v8872_v1, 16  ;;  %v744_v34 = vor.u32 %v742_v3, %v741_v15 }
 0x114   : > { %v694_v35 = vpack.c.bf16 %v670_v27, %v669_v16  ;;  %v921_v37 = vor.u32 %v920_v28, %v916_v11  ;;  %v932_v38 = vrot.slane %v930_v30, 1  ;;  %v8896_v39 = vsel %vm8812_vm5, %v734_v22, 0  ;;  %v8569_v27 = vld [vmem:[%s14005_s3 + $0x80] sm:$0xff]  }
 0x115   : > { %v693_v40 = vpack.c.bf16 %v668_v31, %v667_v23  ;;  %v7937_v41 = vpop.f32.mrb[16].mxu0  ;;  %v8900_v42 = vsel %vm8812_vm5, 0, %v737_v32  ;;  %v937_v43 = vrot.slane %v935_v33, 1  ;;  %v8904_v44 = vsel %vm8812_vm5, 0, %v744_v34 }
 0x116   : > { %v753_v45 = vshrl.u32 %v694_v35, 16  ;;  %v756_v46 = vshll.u32 %v694_v35, 16  ;;  %v601_v47 = vadd.f32 %v7937_v41, %v8783_v36  ;;  %v8908_v48 = vsel %vm882_vm6, %v921_v37, %v925_v26  ;;  %v592_v49 = vpop.f32.mrb[17].mxu0  ;;  %1191 = vrot.lane.b32.xlu0 %v8900_v42, %s8643_s11 }
 0x117   : > { %v746_v50 = vshrl.u32 %v693_v40, 16  ;;  %v749_v51 = vshll.u32 %v693_v40, 16  ;;  %1077 = vrot.lane.b32.xlu1 %v8908_v48, %s8643_s11  ;;  %v593_v52 = vadd.f32 %v8783_v36, %v592_v49  ;;  %v7938_v53 = vpop.f32.mrb[18].mxu0  ;;  %v933_v55 = vor.u32 %v932_v38, %v928_v29 }
 0x118   : > { %v8915_v56 = vrot.slane %v753_v45, 7  ;;  %v673_v59 = vmax.f32 %v601_v47, 0.0  ;;  %v604_v60 = vadd.f32 %v7938_v53, %v8783_v36  ;;  %v595_v61 = vpop.f32.mrb[19].mxu0  ;;  %v940_v2 = vshrl.u32 %v8900_v42, 16 }
 0x119   : > { %v748_v3 = vrot.slane %v746_v50, 7  ;;  %v671_v4 = vmax.f32 %v593_v52, 0.0  ;;  %v596_v5 = vadd.f32 %v8783_v36, %v595_v61  ;;  %v8921_v7 = vsel %vm882_vm6, %v933_v55, %v937_v43  ;;  %v8571_v61 = vld [vmem:[%s14005_s3 + $0xc8] sm:$0xff]  }
 0x11a   : > { %v674_v8 = vmax.f32 %v604_v60, 0.0  ;;  %1193 = vrot.lane.b32.xlu0 %v8904_v44, %s8643_s11  ;;  %v942_v9 = vshll.u32 %v8900_v42, 16  ;;  %v947_v10 = vshll.u32 %v8896_v39, 16  ;;  %v8929_v11 = vsel %vm8812_vm5, %v741_v15, 0  ;;  %v8568_v15 = vld [vmem:[%s14005_s3 + $0xc0] sm:$0xff]  }
 0x11b   : > { %v672_v16 = vmax.f32 %v596_v5, 0.0  ;;  %1079 = vrot.lane.b32.xlu1 %v8921_v7, %s8643_s11  ;;  %v751_v18 = vor.u32 %v749_v51, %v748_v3  ;;  %v952_v20 = vshrl.u32 %v8904_v44, 16  ;;  %v954_v21 = vshll.u32 %v8904_v44, 16  ;;  %7705 = vmatprep.subr.bf16.mxu0 %v8568_v15 }
 0x11c   : > { %v8935_v22 = vpack.c.bf16 %v674_v8, %v673_v59  ;;  %v944_v23 = vrot.slane %v942_v9, 1  ;;  %v949_v25 = vrot.slane %v947_v10, 1  ;;  %v959_v26 = vshll.u32 %v8929_v11, 16  ;;  %7706 = vmatpush3.bf16.msra.mxu0 %v8569_v27 }
 0x11d   : > { %v695_v28 = vpack.c.bf16 %v672_v16, %v671_v4  ;;  %v7941_v29 = vpop.f32.mrb[20].mxu0  ;;  %v8946_v30 = vsel %vm8812_vm5, 0, %v751_v18  ;;  %v956_v31 = vrot.slane %v954_v21, 1  ;;  %v758_v32 = vor.u32 %v756_v46, %v8915_v56  ;;  %7707 = vmatprep.subr.bf16.mxu0 %v8571_v61 }
 0x11e   : > { %v767_v33 = vshrl.u32 %v8935_v22, 16  ;;  %v770_v34 = vshll.u32 %v8935_v22, 16  ;;  %v617_v35 = vadd.f32 %v7941_v29, %v8783_v36  ;;  %v945_v37 = vor.u32 %v944_v23, %v940_v2  ;;  %v608_v38 = vpop.f32.mrb[21].mxu0  ;;  %1195 = vrot.lane.b32.xlu0 %v8946_v30, %s8643_s11  ;;  %v8572_v2 = vld [vmem:[%s14005_s3 + $0x88] sm:$0xff]  }
 0x11f   : > { %v760_v40 = vshrl.u32 %v695_v28, 16  ;;  %v763_v41 = vshll.u32 %v695_v28, 16  ;;  %v609_v43 = vadd.f32 %v8783_v36, %v608_v38  ;;  %v7942_v45 = vpop.f32.mrb[22].mxu0  ;;  %v957_v47 = vor.u32 %v956_v31, %v952_v20  ;;  %v8573_v31 = vld [vmem:[%s14005_s3 + $0xd0] sm:$0xff]  }
 0x120   : > { %v8955_v46 = vrot.slane %v767_v33, 7  ;;  %v677_v49 = vmax.f32 %v617_v35, 0.0  ;;  %v8958_v50 = vsel %vm882_vm6, %v945_v37, %v949_v25  ;;  %v620_v51 = vadd.f32 %v7942_v45, %v8783_v36  ;;  %v611_v52 = vpop.f32.mrb[23].mxu0  ;;  %7708 = vmatpush3.bf16.msra.mxu0 %v8572_v2 }
 0x121   : > { %v762_v53 = vrot.slane %v760_v40, 7  ;;  %1081 = vrot.lane.b32.xlu1 %v8958_v50, %s8643_s11  ;;  %v675_v55 = vmax.f32 %v609_v43, 0.0  ;;  %v612_v59 = vadd.f32 %v8783_v36, %v611_v52  ;;  %v961_v60 = vrot.slane %v959_v26, 1  ;;  %7709 = vmatprep.subr.bf16.mxu0 %v8573_v31 }
 0x122   : > { %v678_v4 = vmax.f32 %v620_v51, 0.0  ;;  %v8972_v5 = vsel %vm8812_vm5, 0, %v758_v32  ;;  %v8976_v8 = vsel %vm8812_vm5, %v748_v3, 0  ;;  %v964_v9 = vshrl.u32 %v8946_v30, 16 }
 0x123   : > { %v676_v10 = vmax.f32 %v612_v59, 0.0  ;;  %v8980_v16 = vsel %vm882_vm6, %v957_v47, %v961_v60  ;;  %1197 = vrot.lane.b32.xlu0 %v8972_v5, %s8643_s11  ;;  %v966_v18 = vshll.u32 %v8946_v30, 16  ;;  %v971_v20 = vshll.u32 %v8976_v8, 16 }
 0x124   : > { %v8986_v21 = vpack.c.bf16 %v678_v4, %v677_v49  ;;  %v765_v23 = vor.u32 %v763_v41, %v762_v53  ;;  %v8991_v3 = vsel %vm8812_vm5, %v8915_v56, 0  ;;  %v976_v25 = vshrl.u32 %v8972_v5, 16  ;;  %v8574_v56 = vld [vmem:[%s14005_s3 + $0x90] sm:$0xff]  }
 0x125   : > { %v697_v26 = vpack.c.bf16 %v676_v10, %v675_v55  ;;  %1083 = vrot.lane.b32.xlu1 %v8980_v16, %s8643_s11  ;;  %v7945_v15 = vpop.f32.mrb[24].mxu0  ;;  %v968_v27 = vrot.slane %v966_v18, 1  ;;  %v973_v28 = vrot.slane %v971_v20, 1  ;;  %v978_v29 = vshll.u32 %v8972_v5, 16  ;;  %7710 = vmatpush3.bf16.msra.mxu0 %v8574_v56 }
 0x126   : > { %v781_v32 = vshrl.u32 %v8986_v21, 16  ;;  %v784_v33 = vshll.u32 %v8986_v21, 16  ;;  %v633_v35 = vadd.f32 %v7945_v15, %v8783_v36  ;;  %v624_v37 = vpop.f32.mrb[25].mxu0  ;;  %v9008_v38 = vsel %vm8812_vm5, 0, %v765_v23 }
 0x127   : > { %v774_v40 = vshrl.u32 %v697_v26, 16  ;;  %v777_v41 = vshll.u32 %v697_v26, 16  ;;  %v969_v43 = vor.u32 %v968_v27, %v964_v9  ;;  %v625_v45 = vadd.f32 %v8783_v36, %v624_v37  ;;  %1199 = vrot.lane.b32.xlu0 %v9008_v38, %s8643_s11  ;;  %v7946_v47 = vpop.f32.mrb[26].mxu0 }
 0x128   : > { %v9013_v49 = vrot.slane %v781_v32, 7  ;;  %v681_v51 = vmax.f32 %v633_v35, 0.0  ;;  %v636_v52 = vadd.f32 %v7946_v47, %v8783_v36  ;;  %v627_v55 = vpop.f32.mrb[27].mxu0  ;;  %v980_v59 = vrot.slane %v978_v29, 1 }
 0x129   : > { %v776_v60 = vrot.slane %v774_v40, 7  ;;  %v9017_v61 = vsel %vm882_vm6, %v969_v43, %v973_v28  ;;  %v679_v2 = vmax.f32 %v625_v45, 0.0  ;;  %v628_v4 = vadd.f32 %v8783_v36, %v627_v55  ;;  %v8575_v28 = vld [vmem:[%s14005_s3 + $0xd8] sm:$0xff]  }
 0x12a   : > { %1085 = vrot.lane.b32.xlu1 %v9017_v61, %s8643_s11  ;;  %v682_v9 = vmax.f32 %v636_v52, 0.0  ;;  %v981_v10 = vor.u32 %v980_v59, %v976_v25  ;;  %v983_v18 = vshll.u32 %v8991_v3, 16  ;;  %v772_v20 = vor.u32 %v770_v34, %v8955_v46  ;;  %v8576_v25 = vld [vmem:[%s14005_s3 + $0x98] sm:$0xff]   ;;  %7711 = vmatprep.subr.bf16.mxu0 %v8575_v28 }
 0x12b   : > { %v680_v23 = vmax.f32 %v628_v4, 0.0  ;;  %v9028_v26 = vsel %vm8812_vm5, %v762_v53, 0  ;;  %v988_v15 = vshrl.u32 %v9008_v38, 16  ;;  %v990_v27 = vshll.u32 %v9008_v38, 16  ;;  %7712 = vmatpush3.bf16.msra.mxu0 %v8576_v25  ;;  %v8578_v4 = vld [vmem:[%s14005_s3 + $0xa0] sm:$0xff]  }
 0x12c   : > { %v9038_v29 = vpack.c.bf16 %v682_v9, %v681_v51  ;;  %v985_v22 = vrot.slane %v983_v18, 1  ;;  %v9042_v34 = vsel %vm8812_vm5, 0, %v772_v20  ;;  %v995_v53 = vshll.u32 %v9028_v26, 16 }
 0x12d   : > { %v699_v31 = vpack.c.bf16 %v680_v23, %v679_v2  ;;  %1201 = vrot.lane.b32.xlu0 %v9042_v34, %s8643_s11  ;;  %v7949_v56 = vpop.f32.mrb[28].mxu0  ;;  %v992_v32 = vrot.slane %v990_v27, 1  ;;  %v779_v35 = vor.u32 %v777_v41, %v776_v60  ;;  %v9050_v37 = vsel %vm8812_vm5, %v8955_v46, 0  ;;  %v8577_v2 = vld [vmem:[%s14005_s3 + $0xe0] sm:$0xff]  }
 0x12e   : > { %v795_v40 = vshrl.u32 %v9038_v29, 16  ;;  %v798_v43 = vshll.u32 %v9038_v29, 16  ;;  %v9055_v45 = vsel %vm882_vm6, %v981_v10, %v985_v22  ;;  %v649_v47 = vadd.f32 %v7949_v56, %v8783_v36  ;;  %v640_v51 = vpop.f32.mrb[29].mxu0  ;;  %7713 = vmatprep.subr.bf16.mxu0 %v8577_v2  ;;  %v8584_v29 = vld [vmem:[%s14005_s3 + $0xb8] sm:$0xff]  }
 0x12f   : > { %v788_v52 = vshrl.u32 %v699_v31, 16  ;;  %v791_v55 = vshll.u32 %v699_v31, 16  ;;  %1087 = vrot.lane.b32.xlu1 %v9055_v45, %s8643_s11  ;;  %v993_v41 = vor.u32 %v992_v32, %v988_v15  ;;  %v997_v46 = vrot.slane %v995_v53, 1  ;;  %v7950_v59 = vpop.f32.mrb[30].mxu0  ;;  %7714 = vmatpush3.bf16.msra.mxu0 %v8578_v4 }
 0x130   : > { %v9066_v9 = vrot.slane %v795_v40, 7  ;;  %v685_v10 = vmax.f32 %v649_v47, 0.0  ;;  %v641_v18 = vadd.f32 %v8783_v36, %v640_v51  ;;  %v9071_v20 = vsel %vm8812_vm5, 0, %v779_v35  ;;  %v643_v23 = vpop.f32.mrb[31].mxu0  ;;  %v8579_v47 = vld [vmem:[%s14005_s3 + $0xe8] sm:$0xff]  }
 0x131   : > { %v790_v15 = vrot.slane %v788_v52, 7  ;;  %v9074_v27 = vsel %vm882_vm6, %v993_v41, %v997_v46  ;;  %1203 = vrot.lane.b32.xlu0 %v9071_v20, %s8643_s11  ;;  %v652_v28 = vadd.f32 %v7950_v59, %v8783_v36  ;;  %v644_v25 = vadd.f32 %v8783_v36, %v643_v23  ;;  %v8580_v51 = vld [vmem:[%s14005_s3 + $0xa8] sm:$0xff]   ;;  %7715 = vmatprep.subr.bf16.mxu0 %v8579_v47 }
 0x132   : > { %v683_v22 = vmax.f32 %v641_v18, 0.0  ;;  %v1000_v53 = vshrl.u32 %v9042_v34, 16  ;;  %v1002_v31 = vshll.u32 %v9042_v34, 16  ;;  %v1007_v56 = vshll.u32 %v9050_v37, 16 }
 0x133   : > { %1089 = vrot.lane.b32.xlu1 %v9074_v27, %s8643_s11  ;;  %v686_v32 = vmax.f32 %v652_v28, 0.0  ;;  %v684_v35 = vmax.f32 %v644_v25, 0.0  ;;  %v786_v40 = vor.u32 %v784_v33, %v9013_v49  ;;  %v9090_v36 = vsel %vm8812_vm5, %v776_v60, 0  ;;  %7716 = vmatpush3.bf16.msra.mxu0 %v8580_v51 }
 0x134   : > { %v1004_v52 = vrot.slane %v1002_v31, 1  ;;  %v1009_v41 = vrot.slane %v1007_v56, 1  ;;  %v1012_v46 = vshrl.u32 %v9071_v20, 16  ;;  %v1014_v59 = vshll.u32 %v9071_v20, 16  ;;  %v8581_v56 = vld [vmem:[%s14005_s3 + $0xf0] sm:$0xff]  }
 0x135   : > { %v702_v21 = vpack.c.bf16 %v686_v32, %v685_v10  ;;  %v701_v33 = vpack.c.bf16 %v684_v35, %v683_v22  ;;  %v9102_v60 = vsel %vm8812_vm5, 0, %v786_v40  ;;  %v1019_v2 = vshll.u32 %v9090_v36, 16  ;;  %7717 = vmatprep.subr.bf16.mxu0 %v8581_v56 }
 0x136   : > { %v1005_v4 = vor.u32 %v1004_v52, %v1000_v53  ;;  %1205 = vrot.lane.b32.xlu0 %v9102_v60, %s8643_s11  ;;  %v1016_v18 = vrot.slane %v1014_v59, 1  ;;  %v793_v23 = vor.u32 %v791_v55, %v790_v15  ;;  %v9110_v28 = vsel %vm8812_vm5, %v9013_v49, 0  ;;  %v8582_v53 = vld [vmem:[%s14005_s3 + $0xb0] sm:$0xff]  }
 0x137   : > { %v809_v10 = vshrl.u32 %v702_v21, 16  ;;  %v812_v25 = vshll.u32 %v702_v21, 16  ;;  %v802_v22 = vshrl.u32 %v701_v33, 16  ;;  %v805_v31 = vshll.u32 %v701_v33, 16  ;;  %7718 = vmatpush3.bf16.msra.mxu0 %v8582_v53 }
 0x138   : > { %v9119_v55 = vsel %vm882_vm6, %v1005_v4, %v1009_v41  ;;  %v1017_v32 = vor.u32 %v1016_v18, %v1012_v46  ;;  %v1021_v35 = vrot.slane %v1019_v2, 1  ;;  %v9123_v49 = vsel %vm8812_vm5, 0, %v793_v23  ;;  %v8583_v23 = vld [vmem:[%s14005_s3 + $0xf8] sm:$0xff]  }
 0x139   : > { %v9125_v40 = vrot.slane %v809_v10, 7  ;;  %v804_v47 = vrot.slane %v802_v22, 7  ;;  %1091 = vrot.lane.b32.xlu1 %v9119_v55, %s8643_s11  ;;  %v1024_v51 = vshrl.u32 %v9102_v60, 16  ;;  %v1026_v52 = vshll.u32 %v9102_v60, 16  ;;  %7719 = vmatprep.subr.bf16.mxu0 %v8583_v23 }
 0x13a   : > { %v9132_v41 = vsel %vm882_vm6, %v1017_v32, %v1021_v35  ;;  %1207 = vrot.lane.b32.xlu0 %v9123_v49, %s8643_s11  ;;  %v1031_v46 = vshll.u32 %v9110_v28, 16  ;;  %v800_v59 = vor.u32 %v798_v43, %v9066_v9  ;;  %v9142_v21 = vsel %vm8812_vm5, %v790_v15, 0 }
 0x13b   : > { %v1028_v33 = vrot.slane %v1026_v52, 1  ;;  %v1036_v2 = vshrl.u32 %v9123_v49, 16  ;;  %v1038_v4 = vshll.u32 %v9123_v49, 16  ;;  %v1043_v18 = vshll.u32 %v9142_v21, 16  ;;  %7720 = vmatpush3.bf16.msra.mxu0 %v8584_v29 }
 0x13c   : > { %v1033_v43 = vrot.slane %v1031_v46, 1  ;;  %v9155_v15 = vsel %vm8812_vm5, 0, %v800_v59  ;;  %v807_v10 = vor.u32 %v805_v31, %v804_v47  ;;  %v9160_v22 = vsel %vm8812_vm5, %v9066_v9, 0  ;;  %4895 = vmatprep.subr.bf16.mxu0 %v14010_v12 }
 0x13d   : > { %1093 = vrot.lane.b32.xlu1 %v9132_v41, %s8643_s11  ;;  %v1029_v56 = vor.u32 %v1028_v33, %v1024_v51  ;;  %v1040_v53 = vrot.slane %v1038_v4, 1  ;;  %v1045_v32 = vrot.slane %v1043_v18, 1  ;;  %v1048_v31 = vshrl.u32 %v9155_v15, 16 }
 0x13e   : > { %1209 = vrot.lane.b32.xlu0 %v9155_v15, %s8643_s11  ;;  %v9168_v35 = vsel %vm8812_vm5, 0, %v807_v10  ;;  %v1050_v52 = vshll.u32 %v9155_v15, 16  ;;  %v1055_v9 = vshll.u32 %v9160_v22, 16  ;;  %v814_v59 = vor.u32 %v812_v25, %v9125_v40 }
 0x13f   : > { %v9174_v46 = vsel %vm882_vm6, %v1029_v56, %v1033_v43  ;;  %v1041_v51 = vor.u32 %v1040_v53, %v1036_v2  ;;  %v9179_v33 = vsel %vm8812_vm5, %v804_v47, 0  ;;  %v1062_v18 = vshll.u32 %v9168_v35, 16 }
 0x140   : > { %v1052_v4 = vrot.slane %v1050_v52, 1  ;;  %v1057_v23 = vrot.slane %v1055_v9, 1  ;;  %v1060_v29 = vshrl.u32 %v9168_v35, 16  ;;  %v1067_v2 = vshll.u32 %v9179_v33, 16 }
 0x141   : > { %1095 = vrot.lane.b32.xlu1 %v9174_v46, %s8643_s11  ;;  %v9187_v43 = vsel %vm882_vm6, %v1041_v51, %v1045_v32  ;;  %v1064_v47 = vrot.slane %v1062_v18, 1  ;;  %v9194_v10 = vsel %vm8812_vm5, 0, %v814_v59  ;;  %v1137_v56 = vrot.slane %v8840_v24, 1 }
 0x142   : > { %1211 = vrot.lane.b32.xlu0 %v9168_v35, %s8643_s11  ;;  %v1053_v25 = vor.u32 %v1052_v4, %v1048_v31  ;;  %v1069_v31 = vrot.slane %v1067_v2, 1  ;;  %v1138_v52 = vrot.slane %v8828_v17, 1  ;;  %v1143_v51 = vrot.slane %v8868_v63, 1 }
 0x143   : > { %v1065_v32 = vor.u32 %v1064_v47, %v1060_v29  ;;  %v1144_v59 = vrot.slane %v8856_v54, 1  ;;  %v1140_v18 = vrot.slane %v8832_v19, 1  ;;  %v1150_v29 = vrot.slane %v8896_v39, 1 }
 0x144   : > { %v9200_v53 = vsel %vm882_vm6, %v1053_v25, %v1057_v23  ;;  %v9208_v9 = vsel %vm1134_vm7, %v1137_v56, %v1138_v52  ;;  %v1149_v23 = vrot.slane %v8900_v42, 1  ;;  %v1141_v54 = vrot.slane %v8824_v14, 1 }
 0x145   : > { %1097 = vrot.lane.b32.xlu1 %v9187_v43, %s8643_s11  ;;  %v9213_v4 = vsel %vm882_vm6, %v1065_v32, %v1069_v31  ;;  %v9221_v17 = vsel %vm1134_vm7, %v1143_v51, %v1144_v59  ;;  %v1146_v47 = vrot.slane %v8860_v58, 1  ;;  %v1147_v2 = vrot.slane %v8872_v1, 1 }
 0x146   : > { %1213 = vrot.lane.b32.xlu0 %v9194_v10, %s8643_s11  ;;  %14389 = vst [vmem:[#allocation4_spill] sm:$0xff] %v9213_v4  ;;  %v9229_v25 = vsel %vm1134_vm7, %v1140_v18, %v1141_v54  ;;  %v9236_v56 = vsel %vm1134_vm7, %v1149_v23, %v1150_v29  ;;  %v1155_v39 = vrot.slane %v8946_v30, 1  ;;  %v1156_v14 = vrot.slane %v8976_v8, 1 }
 0x147   : > { %v9243_v32 = vsel %vm1134_vm7, %v1146_v47, %v1147_v2  ;;  %v1152_v31 = vrot.slane %v8904_v44, 1  ;;  %v1153_v1 = vrot.slane %v8929_v11, 1  ;;  %v1161_v51 = vrot.slane %v9008_v38, 1 }
 0x148   : > { %v9250_v52 = vsel %vm1134_vm7, %v1155_v39, %v1156_v14  ;;  %v1162_v8 = vrot.slane %v9028_v26, 1  ;;  %v1218_v59 = vshll.u32 %v9194_v10, 16  ;;  %v1158_v11 = vrot.slane %v8972_v5, 1 }
 0x149   : > { %1099 = vrot.lane.b32.xlu1 %v9200_v53, %s8643_s11  ;;  %v9258_v18 = vsel %vm1134_vm7, %v1152_v31, %v1153_v1  ;;  %v1159_v23 = vrot.slane %v8991_v3, 1  ;;  %v881_v29 = vsel %vm8812_vm5, %v9125_v40, 0  ;;  %v1167_v54 = vrot.slane %v9071_v20, 1 }
 0x14a   : > { %1231 = vrot.lane.b32.xlu0 %v9208_v9, %s8643_s11  ;;  %v9268_v26 = vsel %vm1134_vm7, %v1161_v51, %v1162_v8  ;;  %v1168_v47 = vrot.slane %v9090_v36, 1  ;;  %v1173_v2 = vrot.slane %v9123_v49, 1  ;;  %v1174_v3 = vrot.slane %v9142_v21, 1 }
 0x14b   : > { %v1216_v39 = vshrl.u32 %v9194_v10, 16  ;;  %v1220_v40 = vrot.slane %v1218_v59, 1  ;;  %v1223_v14 = vshll.u32 %v881_v29, 16  ;;  %v9278_v31 = vsel %vm1134_vm7, %v1158_v11, %v1159_v23 }
 0x14c   : > { %v1164_v1 = vrot.slane %v9042_v34, 1  ;;  %v1165_v51 = vrot.slane %v9050_v37, 1  ;;  %v9285_v36 = vsel %vm1134_vm7, %v1167_v54, %v1168_v47  ;;  %v9290_v21 = vsel %vm1134_vm7, %v1173_v2, %v1174_v3 }
 0x14d   : > { %1101 = vrot.lane.b32.xlu1 %v9213_v4, %s8643_s11  ;;  %v1221_v8 = vor.u32 %v1220_v40, %v1216_v39  ;;  %v1225_v59 = vrot.slane %v1223_v14, 1  ;;  %v1170_v23 = vrot.slane %v9102_v60, 1  ;;  %v1171_v37 = vrot.slane %v9110_v28, 1 }
 0x14e   : > { %1235 = vrot.lane.b32.xlu0 %v9221_v17, %s8643_s11  ;;  %v9293_v11 = vsel %vm1134_vm7, %v1164_v1, %v1165_v51  ;;  %v1176_v54 = vrot.slane %v9155_v15, 1  ;;  %v1177_v47 = vrot.slane %v9160_v22, 1  ;;  %v1228_v3 = vrot.slane %v9194_v10, 1 }
 0x14f   : > { %v9304_v2 = vsel %vm882_vm6, %v1221_v8, %v1225_v59  ;;  %v1229_v39 = vrot.slane %v881_v29, 1  ;;  %v9308_v40 = vsel %vm1134_vm7, %v1170_v23, %v1171_v37  ;;  %v1179_v22 = vrot.slane %v9168_v35, 1  ;;  %v8570_v23 = vld [vmem:[%s14005_s3 + $0x108] sm:$0xff]  }
 0x150   : > { %14390 = vst [vmem:[#allocation5_spill] sm:$0xff] %v9304_v2  ;;  %v9313_v28 = vsel %vm1134_vm7, %v1176_v54, %v1177_v47  ;;  %v1180_v14 = vrot.slane %v9179_v33, 1  ;;  %v14392_v59 = vmov 0  ;;  %v8585_v47 = vld [vmem:[%s14005_s3 + $0x110] sm:$0xff]  }
 0x151   : > { %1233 = vrot.lane.b32.xlu1 %v9229_v25, %s8643_s11  ;;  %v9320_v1 = vsel %vm1134_vm7, %v1228_v3, %v1229_v39  ;;  %v14393_v59 = vsel %vm9336_vm9, 4294967295, %v14392_v59 }
 0x152   : > { %1239 = vrot.lane.b32.xlu0 %v9236_v56, %s8643_s11  ;;  %14391 = vst [vmem:[#allocation6_spill] sm:$0xff] %v9320_v1  ;;  %v9325_v29 = vsel %vm1134_vm7, %v1179_v22, %v1180_v14  ;;  %14394 = vst [vmem:[#allocation7_spill] sm:$0xff] %v14393_v59 }
 0x155   : > { %1237 = vrot.lane.b32.xlu1 %v9243_v32, %s8643_s11 }
 0x156   : > { %1243 = vrot.lane.b32.xlu0 %v9250_v52, %s8643_s11 }
 0x159   : > { %1241 = vrot.lane.b32.xlu1 %v9258_v18, %s8643_s11 }
 0x15a   : > { %1247 = vrot.lane.b32.xlu0 %v9268_v26, %s8643_s11 }
 0x15d   : > { %1245 = vrot.lane.b32.xlu1 %v9278_v31, %s8643_s11 }
 0x15e   : > { %1251 = vrot.lane.b32.xlu0 %v9285_v36, %s8643_s11 }
 0x161   : > { %1249 = vrot.lane.b32.xlu1 %v9293_v11, %s8643_s11 }
 0x162   : > { %1255 = vrot.lane.b32.xlu0 %v9290_v21, %s8643_s11 }
 0x165   : > { %1253 = vrot.lane.b32.xlu1 %v9308_v40, %s8643_s11 }
 0x166   : > { %1263 = vrot.lane.b32.xlu0 %v9304_v2, %s8643_s11 }
 0x169   : > { %1257 = vrot.lane.b32.xlu1 %v9313_v28, %s8643_s11 }
 0x16a   : > { %1261 = vrot.lane.b32.xlu0 %v9320_v1, %s8643_s11 }
 0x16d   : > { %1259 = vrot.lane.b32.xlu1 %v9325_v29, %s8643_s11 }
 0x16e   : > { %3569 = vrot.lane.b32.xlu0 %v14010_v12, %s8643_s11 }
 0x177   : > { %v1186_v8 = vpop.permute.xlu1 %1185 }
 0x178   : > { %v1184_v33 = vpop.permute.xlu0 %1183  ;;  %v1320_v54 = vsel %vm1265_vm8, %v9208_v9, %v1186_v8  ;;  %v8586_v9 = vld [vmem:[%s14005_s3 + $0x118] sm:$0xff]  }
 0x179   : > { %v1316_v51 = vsel %vm1265_vm8, %v8820_v13, %v1184_v33 }
 0x17a   : > { %1805 = vmatprep.mubr.bf16.mxu1 %v1316_v51 }
 0x17c   : > { %v9343_v37 = vpop.permute.xlu0 %1071 }
 0x17d   : > { %14395 = vst [vmem:[#allocation8_spill] sm:$0xff] %v9343_v37  ;;  %7440 = vmatmul.mubr.msk.bf16.vlgmr.msra.gmra.mrb[0].mxu1 %vm9336_vm9, %v9343_v37 }
 0x17e   : > { %7952 = vmatpush3.bf16.msra.mxu1 %v8807_v57  ;;  %1813 = vmatprep.mubr.bf16.mxu1 %v1320_v54 }
 0x17f   : > { %7953 = vmatprep.subr.bf16.mxu1 %v8570_v23 }
 0x180   : > { %v1074_v3 = vpop.permute.xlu1 %1073  ;;  %v1188_v39 = vpop.permute.xlu0 %1187 }
 0x181   : > { %v1270_v33 = vsel %vm1265_vm8, %v8840_v24, %v1074_v3  ;;  %v1324_v51 = vsel %vm1265_vm8, %v9229_v25, %v1188_v39 }
 0x182   : > { %7954 = vmatpush3.bf16.msra.mxu1 %v8570_v23 }
 0x183   : > { %7955 = vmatprep.subr.bf16.mxu1 %v8585_v47 }
 0x184   : > { %v1076_v22 = vpop.permute.xlu1 %1075  ;;  %v1190_v14 = vpop.permute.xlu0 %1189 }
 0x185   : > { %1814 = vmatmul.mubr.bf16.gmra.mrb[4].mxu1 %v1270_v33  ;;  %v1273_v57 = vsel %vm1265_vm8, %v8832_v19, %v1076_v22  ;;  %v1328_v3 = vsel %vm1265_vm8, %v9221_v17, %v1190_v14 }
 0x186   : > { %1966 = vmatprep.mubr.bf16.mxu0 %v1273_v57  ;;  %1821 = vmatprep.mubr.bf16.mxu1 %v1324_v51 }
 0x187   : > { %7956 = vmatpush3.bf16.msra.mxu1 %v8585_v47 }
 0x188   : > { %v1192_v8 = vpop.permute.xlu0 %1191  ;;  %7957 = vmatprep.subr.bf16.mxu1 %v8586_v9 }
 0x189   : > { %v1078_v23 = vpop.permute.xlu1 %1077  ;;  %v1332_v47 = vsel %vm1265_vm8, %v9243_v32, %v1192_v8 }
 0x18a   : > { %v1276_v19 = vsel %vm1265_vm8, %v8868_v63, %v1078_v23 }
 0x18b   : > { %7958 = vmatpush3.bf16.msra.mxu1 %v8586_v9 }
 0x18c   : > { %v1194_v54 = vpop.permute.xlu0 %1193 }
 0x18d   : > { %v1080_v24 = vpop.permute.xlu1 %1079  ;;  %1822 = vmatmul.mubr.bf16.gmra.mrb[8].mxu1 %v1273_v57  ;;  %v1336_v14 = vsel %vm1265_vm8, %v9236_v56, %v1194_v54 }
 0x18e   : > { %1829 = vmatprep.mubr.bf16.mxu1 %v1328_v3  ;;  %v1279_v57 = vsel %vm1265_vm8, %v8860_v58, %v1080_v24 }
 0x190   : > { %v1196_v33 = vpop.permute.xlu0 %1195 }
 0x191   : > { %v1340_v8 = vsel %vm1265_vm8, %v9258_v18, %v1196_v33 }
 0x193   : > { %v1082_v12 = vpop.permute.xlu1 %1081 }
 0x194   : > { %v1282_v23 = vsel %vm1265_vm8, %v8900_v42, %v1082_v12 }
 0x195   : > { %v1198_v39 = vpop.permute.xlu0 %1197  ;;  %1830 = vmatmul.mubr.bf16.gmra.mrb[12].mxu1 %v1276_v19 }
 0x196   : > { %1837 = vmatprep.mubr.bf16.mxu1 %v1332_v47  ;;  %v1344_v54 = vsel %vm1265_vm8, %v9250_v52, %v1198_v39 }
 0x197   : > { %v1084_v22 = vpop.permute.xlu1 %1083 }
 0x198   : > { %v1285_v24 = vsel %vm1265_vm8, %v8904_v44, %v1084_v22 }
 0x199   : > { %v1200_v9 = vpop.permute.xlu0 %1199 }
 0x19a   : > { %v1348_v33 = vsel %vm1265_vm8, %v9278_v31, %v1200_v9 }
 0x19c   : > { %v1086_v51 = vpop.permute.xlu1 %1085 }
 0x19d   : > { %1838 = vmatmul.mubr.bf16.gmra.mrb[16].mxu1 %v1279_v57  ;;  %v1288_v37 = vsel %vm1265_vm8, %v8946_v30, %v1086_v51 }
 0x19e   : > { %1845 = vmatprep.mubr.bf16.mxu1 %v1336_v14 }
 0x19f   : > { %v1202_v3 = vpop.permute.xlu0 %1201 }
 0x1a0   : > { %v1352_v4 = vsel %vm1265_vm8, %v9268_v26, %v1202_v3 }
 0x1a1   : > { %v1088_v0 = vpop.permute.xlu1 %1087 }
 0x1a2   : > { %v1291_v39 = vsel %vm1265_vm8, %v8972_v5, %v1088_v0 }
 0x1a3   : > { %v1204_v63 = vpop.permute.xlu0 %1203 }
 0x1a4   : > { %v1356_v0 = vsel %vm1265_vm8, %v9293_v11, %v1204_v63 }
 0x1a5   : > { %v1090_v13 = vpop.permute.xlu1 %1089  ;;  %1846 = vmatmul.mubr.bf16.gmra.mrb[20].mxu1 %v1282_v23 }
 0x1a6   : > { %1853 = vmatprep.mubr.bf16.mxu1 %v1340_v8  ;;  %v1294_v51 = vsel %vm1265_vm8, %v9008_v38, %v1090_v13 }
 0x1a8   : > { %v1206_v47 = vpop.permute.xlu0 %1205 }
 0x1a9   : > { %v1360_v13 = vsel %vm1265_vm8, %v9285_v36, %v1206_v47 }
 0x1ab   : > { %v1092_v2 = vpop.permute.xlu1 %1091 }
 0x1ac   : > { %v1208_v58 = vpop.permute.xlu0 %1207  ;;  %v1297_v5 = vsel %vm1265_vm8, %v9042_v34, %v1092_v2 }
 0x1ad   : > { %1854 = vmatmul.mubr.bf16.gmra.mrb[24].mxu1 %v1285_v24  ;;  %v1364_v34 = vsel %vm1265_vm8, %v9308_v40, %v1208_v58 }
 0x1ae   : > { %1861 = vmatprep.mubr.bf16.mxu1 %v1344_v54 }
 0x1af   : > { %v1094_v14 = vpop.permute.xlu1 %1093 }
 0x1b0   : > { %v1210_v59 = vpop.permute.xlu0 %1209  ;;  %v1300_v38 = vsel %vm1265_vm8, %v9071_v20, %v1094_v14 }
 0x1b1   : > { %v1368_v20 = vsel %vm1265_vm8, %v9290_v21, %v1210_v59 }
 0x1b3   : > { %v1096_v12 = vpop.permute.xlu1 %1095 }
 0x1b4   : > { %v1212_v42 = vpop.permute.xlu0 %1211  ;;  %v1303_v2 = vsel %vm1265_vm8, %v9102_v60, %v1096_v12 }
 0x1b5   : > { %1862 = vmatmul.mubr.bf16.gmra.mrb[28].mxu1 %v1288_v37  ;;  %v1372_v60 = vsel %vm1265_vm8, %v9313_v28, %v1212_v42 }
 0x1b6   : > { %1869 = vmatprep.mubr.bf16.mxu1 %v1348_v33 }
 0x1b7   : > { %v1098_v8 = vpop.permute.xlu1 %1097 }
 0x1b8   : > { %v1214_v1 = vpop.permute.xlu0 %1213  ;;  %v1306_v3 = vsel %vm1265_vm8, %v9123_v49, %v1098_v8 }
 0x1b9   : > { %v1376_v49 = vsel %vm1265_vm8, %v9325_v29, %v1214_v1 }
 0x1bb   : > { %v1100_v44 = vpop.permute.xlu1 %1099 }
 0x1bc   : > { %v1232_v22 = vpop.permute.xlu0 %1231  ;;  %v1309_v59 = vsel %vm1265_vm8, %v9155_v15, %v1100_v44 }
 0x1bd   : > { %v1380_v54 = vsel %vm1265_vm8, %v8864_v62, %v1232_v22  ;;  %1870 = vmatmul.mubr.bf16.gmra.mrb[32].mxu1 %v1291_v39 }
 0x1be   : > { %1967 = vmatmul.mubr.bf16.vlgmr.msra.gmra.mrb[32].mxu0 %v1380_v54  ;;  %1877 = vmatprep.mubr.bf16.mxu1 %v1352_v4 }
 0x1bf   : > { %v1102_v30 = vpop.permute.xlu1 %1101  ;;  %1974 = vmatprep.mubr.bf16.mxu0 %v1276_v19 }
 0x1c0   : > { %v1236_v62 = vpop.permute.xlu0 %1235 }
 0x1c1   : > { %v1388_v4 = vsel %vm1265_vm8, %v8908_v48, %v1236_v62 }
 0x1c3   : > { %v1234_v9 = vpop.permute.xlu1 %1233 }
 0x1c4   : > { %v1384_v33 = vsel %vm1265_vm8, %v8880_v6, %v1234_v9  ;;  %v1240_v48 = vpop.permute.xlu0 %1239 }
 0x1c5   : > { %1878 = vmatmul.mubr.bf16.gmra.mrb[36].mxu1 %v1294_v51 }
 0x1c6   : > { %1975 = vmatmul.mubr.bf16.gmra.mrb[36].mxu0 %v1384_v33  ;;  %1885 = vmatprep.mubr.bf16.mxu1 %v1356_v0 }
 0x1c7   : > { %1982 = vmatprep.mubr.bf16.mxu0 %v1279_v57  ;;  %v1238_v6 = vpop.permute.xlu1 %1237  ;;  %v1396_v57 = vsel %vm1265_vm8, %v8958_v50, %v1240_v48 }
 0x1c8   : > { %v1392_v19 = vsel %vm1265_vm8, %v8921_v7, %v1238_v6  ;;  %v1244_v50 = vpop.permute.xlu0 %1243 }
 0x1cb   : > { %v1242_v7 = vpop.permute.xlu1 %1241 }
 0x1cc   : > { %v1400_v63 = vsel %vm1265_vm8, %v8980_v16, %v1242_v7 }
 0x1cd   : > { %1886 = vmatmul.mubr.bf16.gmra.mrb[40].mxu1 %v1297_v5 }
 0x1ce   : > { %1983 = vmatmul.mubr.bf16.gmra.mrb[40].mxu0 %v1388_v4  ;;  %1893 = vmatprep.mubr.bf16.mxu1 %v1360_v13 }
 0x1cf   : > { %1990 = vmatprep.mubr.bf16.mxu0 %v1282_v23  ;;  %v1246_v16 = vpop.permute.xlu1 %1245  ;;  %v1312_v23 = vsel %vm1265_vm8, %v9168_v35, %v1102_v30 }
 0x1d0   : > { %v1408_v47 = vsel %vm1265_vm8, %v9055_v45, %v1246_v16 }
 0x1d3   : > { %v1250_v35 = vpop.permute.xlu1 %1249 }
 0x1d4   : > { %v1416_v45 = vsel %vm1265_vm8, %v9119_v55, %v1250_v35 }
 0x1d5   : > { %1894 = vmatmul.mubr.bf16.gmra.mrb[44].mxu1 %v1300_v38 }
 0x1d6   : > { %1991 = vmatmul.mubr.bf16.gmra.mrb[44].mxu0 %v1392_v19  ;;  %1901 = vmatprep.mubr.bf16.mxu1 %v1364_v34 }
 0x1d7   : > { %1998 = vmatprep.mubr.bf16.mxu0 %v1285_v24  ;;  %v1254_v55 = vpop.permute.xlu1 %1253 }
 0x1dd   : > { %1902 = vmatmul.mubr.bf16.gmra.mrb[48].mxu1 %v1303_v2 }
 0x1de   : > { %1999 = vmatmul.mubr.bf16.gmra.mrb[48].mxu0 %v1396_v57  ;;  %1909 = vmatprep.mubr.bf16.mxu1 %v1368_v20 }
 0x1df   : > { %2006 = vmatprep.mubr.bf16.mxu0 %v1288_v37  ;;  %v1404_v37 = vsel %vm1265_vm8, %v9017_v61, %v1244_v50  ;;  %v1248_v61 = vpop.permute.xlu0 %1247 }
 0x1e0   : > { %v1412_v15 = vsel %vm1265_vm8, %v9074_v27, %v1248_v61 }
 0x1e3   : > { %v1252_v27 = vpop.permute.xlu0 %1251 }
 0x1e5   : > { %1910 = vmatmul.mubr.bf16.gmra.mrb[52].mxu1 %v1306_v3 }
 0x1e6   : > { %2007 = vmatmul.mubr.bf16.gmra.mrb[52].mxu0 %v1400_v63  ;;  %1917 = vmatprep.mubr.bf16.mxu1 %v1372_v60  ;;  %v14402_v63 = vmov 0  }
 0x1e7   : > { %2014 = vmatprep.mubr.bf16.mxu0 %v1291_v39 }
 0x1ed   : > { %1918 = vmatmul.mubr.bf16.gmra.mrb[56].mxu1 %v1309_v59 }
 0x1ee   : > { %2015 = vmatmul.mubr.bf16.gmra.mrb[56].mxu0 %v1404_v37  ;;  %1925 = vmatprep.mubr.bf16.mxu1 %v1376_v49 }
 0x1ef   : > { %2022 = vmatprep.mubr.bf16.mxu0 %v1294_v51 }
 0x1f5   : > { %1926 = vmatmul.mubr.bf16.gmra.mrb[60].mxu1 %v1312_v23 }
 0x1f6   : > { %2023 = vmatmul.mubr.bf16.gmra.mrb[60].mxu0 %v1408_v47  ;;  %7959 = vmatprep.mubr.msk.bf16.mxu1 %vm1265_vm8, %v9229_v25  ;;  %v1424_v25 = vsel %vm1265_vm8, %v9174_v46, %v1254_v55  ;;  %v1258_v46 = vpop.permute.xlu1 %1257  ;;  %v8589_v47 = vld [vmem:[%s14007_s5 + $0x108] sm:$0xff]  }
 0x1f7   : > { %2030 = vmatprep.mubr.bf16.mxu0 %v1297_v5 }
 0x1fd   : > { %7960 = vmatmul.mubr.msk.bf16.vlgmr.msra.gmra.mrb[64].mxu1 %vm1265_vm8, %v9221_v17  ;;  %v1420_v17 = vsel %vm1265_vm8, %v9132_v41, %v1252_v27  ;;  %v1256_v41 = vpop.permute.xlu0 %1255 }
 0x1fe   : > { %2031 = vmatmul.mubr.bf16.gmra.mrb[64].mxu0 %v1412_v15  ;;  %7963 = vmatprep.mubr.msk.bf16.mxu1 %vm1265_vm8, %v9243_v32  ;;  %v8590_v15 = vld [vmem:[%s14007_s5 + $0x8] sm:$0xff]  }
 0x1ff   : > { %2038 = vmatprep.mubr.bf16.mxu0 %v1300_v38 }
 0x201   : > { %v1264_v32 = vpop.permute.xlu0 %1263 }
 0x205   : > { %7964 = vmatmul.mubr.msk.bf16.gmra.mrb[68].mxu1 %vm1265_vm8, %v9236_v56  ;;  %v1428_v56 = vsel %vm1265_vm8, %v9187_v43, %v1256_v41  ;;  %v1443_v43 = vsel %vm1265_vm8, %v9194_v10, %v1264_v32  ;;  %v1262_v10 = vpop.permute.xlu0 %1261 }
 0x206   : > { %2039 = vmatmul.mubr.bf16.gmra.mrb[68].mxu0 %v1416_v45  ;;  %7967 = vmatprep.mubr.msk.bf16.mxu1 %vm1265_vm8, %v9258_v18  ;;  %v1260_v18 = vpop.permute.xlu1 %1259 }
 0x207   : > { %2046 = vmatprep.mubr.bf16.mxu0 %v1303_v2  ;;  %v8587_v2 = vld [vmem:[%s14007_s5] sm:$0xff]  }
 0x208   : > { %4896 = vmatpush1.bf16.msra.mxu0 %v8587_v2 }
 0x209   : > { %4897 = vmatprep.subr.bf16.mxu0 %v14402_v63 }
 0x20c   : > { %4898 = vmatpush1.bf16.msra.mxu0 %v8590_v15 }
 0x20d   : > { %7968 = vmatmul.mubr.msk.bf16.gmra.mrb[72].mxu1 %vm1265_vm8, %v9250_v52  ;;  %v1432_v52 = vsel %vm1265_vm8, %v9200_v53, %v1258_v46  ;;  %v14397_v53 = vld [vmem:[#allocation6_spill] sm:$0xff]  ;;  %4899 = vmatprep.subr.bf16.mxu0 %v14402_v63 }
 0x20e   : > { %2047 = vmatmul.mubr.bf16.gmra.mrb[72].mxu0 %v1420_v17  ;;  %7971 = vmatprep.mubr.msk.bf16.mxu1 %vm1265_vm8, %v9278_v31 }
 0x20f   : > { %2054 = vmatprep.mubr.bf16.mxu0 %v1306_v3 }
 0x215   : > { %7972 = vmatmul.mubr.msk.bf16.gmra.mrb[76].mxu1 %vm1265_vm8, %v9268_v26  ;;  %v14396_v26 = vld [vmem:[#allocation4_spill] sm:$0xff] }
 0x216   : > { %2055 = vmatmul.mubr.bf16.gmra.mrb[76].mxu0 %v1424_v25  ;;  %7975 = vmatprep.mubr.msk.bf16.mxu1 %vm1265_vm8, %v9293_v11  ;;  %v1436_v31 = vsel %vm1265_vm8, %v14396_v26, %v1260_v18  ;;  %v14400_v11 = vld [vmem:[#allocation5_spill] sm:$0xff]  ;;  %v9536_v26 = vld [vmem:[%s14006_s4] ss:$0 sm:$0xff] }
 0x217   : > { %2062 = vmatprep.mubr.bf16.mxu0 %v1309_v59 }
 0x21d   : > { %7976 = vmatmul.mubr.msk.bf16.gmra.mrb[80].mxu1 %vm1265_vm8, %v9285_v36  ;;  %v14398_v36 = vld [vmem:[#allocation8_spill] sm:$0xff] }
 0x21e   : > { %2063 = vmatmul.mubr.bf16.gmra.mrb[80].mxu0 %v1428_v56  ;;  %7979 = vmatprep.mubr.msk.bf16.mxu1 %vm1265_vm8, %v9308_v40  ;;  %v1440_v40 = vsel %vm1265_vm8, %v14400_v11, %v1262_v10 }
 0x21f   : > { %2070 = vmatprep.mubr.bf16.mxu0 %v1312_v23  ;;  %v8588_v23 = vld [vmem:[%s14007_s5 + $0x100] sm:$0xff]  }
 0x220   : > { %7991 = vmatprep.subr.bf16.mxu1 %v8588_v23 }
 0x221   : > { %7992 = vmatpush3.bf16.msra.mxu1 %v8588_v23 }
 0x222   : > { %7993 = vmatprep.subr.bf16.mxu1 %v8589_v47 }
 0x225   : > { %7980 = vmatmul.mubr.msk.bf16.gmra.mrb[84].mxu1 %vm1265_vm8, %v9290_v21 }
 0x226   : > { %2071 = vmatmul.mubr.bf16.gmra.mrb[84].mxu0 %v1432_v52  ;;  %7983 = vmatprep.mubr.msk.bf16.mxu1 %vm1265_vm8, %v9313_v28  ;;  %v14401_v28 = vld [vmem:[#allocation3_spill] sm:$0xff] }
 0x227   : > { %2078 = vmatprep.mubr.bf16.mxu0 %v1443_v43  ;;  %7994 = vmatpush3.bf16.msra.mxu1 %v8589_v47  ;;  %v8591_v43 = vld [vmem:[%s14007_s5 + $0x110] sm:$0xff]  }
 0x228   : > { %7995 = vmatprep.subr.bf16.mxu1 %v8591_v43  ;;  %v8593_v47 = vld [vmem:[%s14007_s5 + $0x10] sm:$0xff]  }
 0x229   : > { %4900 = vmatpush1.bf16.msra.mxu0 %v8593_v47 }
 0x22a   : > { %4901 = vmatprep.subr.bf16.mxu0 %v14402_v63 }
 0x22b   : > { %7996 = vmatpush3.bf16.msra.mxu1 %v8591_v43 }
 0x22d   : > { %7984 = vmatmul.mubr.msk.bf16.gmra.mrb[88].mxu1 %vm1265_vm8, %v9325_v29 }
 0x22e   : > { %2079 = vmatmul.mubr.bf16.gmra.mrb[88].mxu0 %v1436_v31  ;;  %7987 = vmatprep.mubr.msk.bf16.mxu1 %vm1265_vm8, %v14397_v53 }
 0x22f   : > { %7442 = vmatprep.mubr.msk.bf16.mxu0 %vm9336_vm9, %v14398_v36 }
 0x235   : > { %7988 = vmatmul.mubr.msk.bf16.gmra.mrb[92].mxu1 %vm1265_vm8, %v14401_v28 }
 0x236   : > { %2087 = vmatmul.mubr.bf16.gmra.mrb[92].mxu0 %v1440_v40 }
 0x250   : > { %v7609_v1 = vpop.f32.mrb[0].mxu1 }
 0x251   : > { %v7610_v58 = vpop.f32.mrb[1].mxu1 }
 0x252   : > { %v9484_v24 = vadd.f32 %v7610_v58, %v7609_v1  ;;  %v7612_v29 = vpop.f32.mrb[2].mxu1 }
 0x253   : > { %v7613_v14 = vpop.f32.mrb[3].mxu1 }
 0x254   : > { %v9486_v12 = vadd.f32 %v7613_v14, %v7612_v29  ;;  %v1808_v14 = vadd.f32 %v9484_v24, %v9536_v26 }
 0x258   : > { %v7615_v42 = vpop.f32.mrb[4].mxu1 }
 0x259   : > { %v7616_v8 = vpop.f32.mrb[5].mxu1 }
 0x25a   : > { %v9488_v44 = vadd.f32 %v7616_v8, %v7615_v42  ;;  %v7618_v22 = vpop.f32.mrb[6].mxu1 }
 0x25b   : > { %v7619_v39 = vpop.f32.mrb[7].mxu1 }
 0x25c   : > { %v9490_v54 = vadd.f32 %v7619_v39, %v7618_v22  ;;  %v8592_v22 = vld [vmem:[%s14007_s5 + $0x118] sm:$0xff]  }
 0x25d   : > { %7997 = vmatprep.subr.bf16.mxu1 %v8592_v22 }
 0x25e   : > { %7998 = vmatpush3.bf16.msra.mxu1 %v8592_v22 }
 0x25f   : > { %6304 = vmatprep.subr.bf16.mxu1 %v14402_v63 }
 0x260   : > { %v7621_v30 = vpop.f32.mrb[8].mxu1 }
 0x261   : > { %v7622_v9 = vpop.f32.mrb[9].mxu1 }
 0x262   : > { %v9492_v51 = vadd.f32 %v7622_v9, %v7621_v30  ;;  %v7624_v33 = vpop.f32.mrb[10].mxu1  ;;  %v1811_v9 = vadd.f32 %v9486_v12, %v9536_v26 }
 0x263   : > { %v7625_v0 = vpop.f32.mrb[11].mxu1 }
 0x264   : > { %v9494_v62 = vadd.f32 %v7625_v0, %v7624_v33 }
 0x268   : > { %v7627_v5 = vpop.f32.mrb[12].mxu1 }
 0x269   : > { %v7628_v4 = vpop.f32.mrb[13].mxu1 }
 0x26a   : > { %v9496_v13 = vadd.f32 %v7628_v4, %v7627_v5  ;;  %v7630_v6 = vpop.f32.mrb[14].mxu1 }
 0x26b   : > { %v7631_v38 = vpop.f32.mrb[15].mxu1 }
 0x26c   : > { %v9498_v19 = vadd.f32 %v7631_v38, %v7630_v6 }
 0x270   : > { %v7633_v34 = vpop.f32.mrb[16].mxu1 }
 0x271   : > { %v7634_v48 = vpop.f32.mrb[17].mxu1 }
 0x272   : > { %v9503_v57 = vadd.f32 %v7634_v48, %v7633_v34  ;;  %v7636_v20 = vpop.f32.mrb[18].mxu1 }
 0x273   : > { %v7637_v7 = vpop.f32.mrb[19].mxu1 }
 0x274   : > { %v9505_v3 = vadd.f32 %v7637_v7, %v7636_v20  ;;  %v1816_v20 = vadd.f32 %v9488_v44, %v9536_v26 }
 0x278   : > { %v7639_v60 = vpop.f32.mrb[20].mxu1 }
 0x279   : > { %v7640_v50 = vpop.f32.mrb[21].mxu1 }
 0x27a   : > { %v9508_v59 = vadd.f32 %v7640_v50, %v7639_v60  ;;  %v7642_v37 = vpop.f32.mrb[22].mxu1 }
 0x27b   : > { %v7643_v49 = vpop.f32.mrb[23].mxu1 }
 0x27c   : > { %v9510_v16 = vadd.f32 %v7643_v49, %v7642_v37  ;;  %v1819_v37 = vadd.f32 %v9490_v54, %v9536_v26  ;;  %v1824_v54 = vadd.f32 %v9492_v51, %v9536_v26 }
 0x280   : > { %v7645_v61 = vpop.f32.mrb[24].mxu1 }
 0x281   : > { %v7646_v35 = vpop.f32.mrb[25].mxu1 }
 0x282   : > { %v9521_v45 = vadd.f32 %v7646_v35, %v7645_v61  ;;  %v7648_v27 = vpop.f32.mrb[26].mxu1 }
 0x283   : > { %v7649_v17 = vpop.f32.mrb[27].mxu1 }
 0x284   : > { %v9524_v55 = vadd.f32 %v7649_v17, %v7648_v27 }
 0x288   : > { %v7651_v25 = vpop.f32.mrb[28].mxu1 }
 0x289   : > { %v7652_v41 = vpop.f32.mrb[29].mxu1 }
 0x28a   : > { %v9526_v56 = vadd.f32 %v7652_v41, %v7651_v25  ;;  %v7654_v46 = vpop.f32.mrb[30].mxu1 }
 0x28b   : > { %v7655_v32 = vpop.f32.mrb[31].mxu1 }
 0x28c   : > { %v9528_v52 = vadd.f32 %v7655_v32, %v7654_v46 }
 0x290   : > { %v7657_v18 = vpop.f32.mrb[32].mxu1 }
 0x291   : > { %v7721_v31 = vpop.f32.mrb[32].mxu0  ;;  %v7658_v53 = vpop.f32.mrb[33].mxu1 }
 0x292   : > { %v7722_v10 = vpop.f32.mrb[33].mxu0  ;;  %v9538_v11 = vadd.f32 %v7658_v53, %v7657_v18  ;;  %v7660_v40 = vpop.f32.mrb[34].mxu1 }
 0x293   : > { %v7723_v1 = vadd.f32 %v7722_v10, %v7721_v31  ;;  %v7724_v58 = vpop.f32.mrb[34].mxu0  ;;  %v7661_v29 = vpop.f32.mrb[35].mxu1  ;;  %v1827_v31 = vadd.f32 %v9494_v62, %v9536_v26 }
 0x294   : > { %v7725_v42 = vpop.f32.mrb[35].mxu0  ;;  %v9542_v8 = vadd.f32 %v7661_v29, %v7660_v40 }
 0x295   : > { %v7726_v39 = vadd.f32 %v7725_v42, %v7724_v58  ;;  %v9547_v30 = vadd.f32 %v7723_v1, %v1808_v14 }
 0x297   : > { %v9551_v33 = vadd.f32 %v7726_v39, %v1811_v9  ;;  %v1832_v39 = vadd.f32 %v9496_v13, %v9536_v26 }
 0x298   : > { %v7663_v0 = vpop.f32.mrb[36].mxu1 }
 0x299   : > { %v7727_v24 = vpop.f32.mrb[36].mxu0  ;;  %v7664_v5 = vpop.f32.mrb[37].mxu1 }
 0x29a   : > { %v7728_v4 = vpop.f32.mrb[37].mxu0  ;;  %v9554_v6 = vadd.f32 %v7664_v5, %v7663_v0  ;;  %v7666_v38 = vpop.f32.mrb[38].mxu1  ;;  %v1835_v5 = vadd.f32 %v9498_v19, %v9536_v26 }
 0x29b   : > { %v7729_v34 = vadd.f32 %v7728_v4, %v7727_v24  ;;  %v7730_v48 = vpop.f32.mrb[38].mxu0  ;;  %v7667_v2 = vpop.f32.mrb[39].mxu1 }
 0x29c   : > { %v7731_v12 = vpop.f32.mrb[39].mxu0  ;;  %v9558_v7 = vadd.f32 %v7667_v2, %v7666_v38 }
 0x29d   : > { %v7732_v60 = vadd.f32 %v7731_v12, %v7730_v48  ;;  %v9560_v50 = vadd.f32 %v7729_v34, %v1816_v20 }
 0x29f   : > { %v9564_v49 = vadd.f32 %v7732_v60, %v1819_v37 }
 0x2a0   : > { %v7669_v23 = vpop.f32.mrb[40].mxu1 }
 0x2a1   : > { %v7733_v61 = vpop.f32.mrb[40].mxu0  ;;  %v7670_v15 = vpop.f32.mrb[41].mxu1 }
 0x2a2   : > { %v7734_v35 = vpop.f32.mrb[41].mxu0  ;;  %v9569_v44 = vadd.f32 %v7670_v15, %v7669_v23  ;;  %v7672_v27 = vpop.f32.mrb[42].mxu1  ;;  %v1840_v23 = vadd.f32 %v9503_v57, %v9536_v26  ;;  %v8594_v57 = vld [vmem:[%s14007_s5 + $0x18] sm:$0xff]  }
 0x2a3   : > { %v7735_v17 = vadd.f32 %v7734_v35, %v7733_v61  ;;  %v7736_v25 = vpop.f32.mrb[42].mxu0  ;;  %v7673_v41 = vpop.f32.mrb[43].mxu1  ;;  %v1843_v35 = vadd.f32 %v9505_v3, %v9536_v26  ;;  %4902 = vmatpush1.bf16.msra.mxu0 %v8594_v57 }
 0x2a4   : > { %v7737_v46 = vpop.f32.mrb[43].mxu0  ;;  %v9574_v32 = vadd.f32 %v7673_v41, %v7672_v27  ;;  %4903 = vmatprep.subr.bf16.mxu0 %v14402_v63 }
 0x2a5   : > { %v7738_v43 = vadd.f32 %v7737_v46, %v7736_v25  ;;  %v9576_v18 = vadd.f32 %v7735_v17, %v1824_v54 }
 0x2a7   : > { %v9580_v53 = vadd.f32 %v7738_v43, %v1827_v31 }
 0x2a8   : > { %v7675_v10 = vpop.f32.mrb[44].mxu1 }
 0x2a9   : > { %v7739_v40 = vpop.f32.mrb[44].mxu0  ;;  %v7676_v1 = vpop.f32.mrb[45].mxu1 }
 0x2aa   : > { %v7740_v58 = vpop.f32.mrb[45].mxu0  ;;  %v9582_v29 = vadd.f32 %v7676_v1, %v7675_v10  ;;  %v7678_v51 = vpop.f32.mrb[46].mxu1  ;;  %v1848_v1 = vadd.f32 %v9508_v59, %v9536_v26 }
 0x2ab   : > { %v7741_v14 = vadd.f32 %v7740_v58, %v7739_v40  ;;  %v7742_v42 = vpop.f32.mrb[46].mxu0  ;;  %v7679_v22 = vpop.f32.mrb[47].mxu1 }
 0x2ac   : > { %v7743_v9 = vpop.f32.mrb[47].mxu0  ;;  %v9586_v0 = vadd.f32 %v7679_v22, %v7678_v51 }
 0x2ad   : > { %v7744_v24 = vadd.f32 %v7743_v9, %v7742_v42  ;;  %v9588_v62 = vadd.f32 %v7741_v14, %v1832_v39  ;;  %v1851_v42 = vadd.f32 %v9510_v16, %v9536_v26 }
 0x2af   : > { %v9592_v4 = vadd.f32 %v7744_v24, %v1835_v5 }
 0x2b0   : > { %v7681_v38 = vpop.f32.mrb[48].mxu1 }
 0x2b1   : > { %v7745_v34 = vpop.f32.mrb[48].mxu0  ;;  %v7682_v48 = vpop.f32.mrb[49].mxu1 }
 0x2b2   : > { %v7746_v2 = vpop.f32.mrb[49].mxu0  ;;  %v9594_v20 = vadd.f32 %v7682_v48, %v7681_v38  ;;  %v7684_v12 = vpop.f32.mrb[50].mxu1 }
 0x2b3   : > { %v7747_v60 = vadd.f32 %v7746_v2, %v7745_v34  ;;  %v7748_v13 = vpop.f32.mrb[50].mxu0  ;;  %v7685_v37 = vpop.f32.mrb[51].mxu1 }
 0x2b4   : > { %v7749_v47 = vpop.f32.mrb[51].mxu0  ;;  %v9598_v61 = vadd.f32 %v7685_v37, %v7684_v12  ;;  %v1856_v12 = vadd.f32 %v9521_v45, %v9536_v26 }
 0x2b5   : > { %v7750_v15 = vadd.f32 %v7749_v47, %v7748_v13  ;;  %v9600_v19 = vadd.f32 %v7747_v60, %v1840_v23  ;;  %v1859_v23 = vadd.f32 %v9524_v55, %v9536_v26 }
 0x2b7   : > { %v9604_v27 = vadd.f32 %v7750_v15, %v1843_v35 }
 0x2b8   : > { %v7687_v17 = vpop.f32.mrb[52].mxu1 }
 0x2b9   : > { %v7751_v25 = vpop.f32.mrb[52].mxu0  ;;  %v7688_v41 = vpop.f32.mrb[53].mxu1 }
 0x2ba   : > { %v7752_v54 = vpop.f32.mrb[53].mxu0  ;;  %v9606_v46 = vadd.f32 %v7688_v41, %v7687_v17  ;;  %v7690_v43 = vpop.f32.mrb[54].mxu1 }
 0x2bb   : > { %v7753_v31 = vadd.f32 %v7752_v54, %v7751_v25  ;;  %v7754_v10 = vpop.f32.mrb[54].mxu0  ;;  %v7691_v40 = vpop.f32.mrb[55].mxu1 }
 0x2bc   : > { %v7755_v3 = vpop.f32.mrb[55].mxu0  ;;  %v9613_v58 = vadd.f32 %v7691_v40, %v7690_v43 }
 0x2bd   : > { %v7756_v51 = vadd.f32 %v7755_v3, %v7754_v10  ;;  %v9615_v14 = vadd.f32 %v7753_v31, %v1848_v1  ;;  %v1864_v31 = vadd.f32 %v9526_v56, %v9536_v26  ;;  %v1867_v3 = vadd.f32 %v9528_v52, %v9536_v26 }
 0x2be   : > { %v1875_v56 = vadd.f32 %v9542_v8, %v9536_v26  ;;  %v9663_v8 = vadd.f32 %v9569_v44, %v9536_v26  ;;  %v9678_v44 = vadd.f32 %v9582_v29, %v9536_v26 }
 0x2bf   : > { %v9620_v22 = vadd.f32 %v7756_v51, %v1851_v42 }
 0x2c0   : > { %v7693_v39 = vpop.f32.mrb[56].mxu1  ;;  %14403 = vst [vmem:[#allocation4_spill] sm:$0xff] %v9663_v8  ;;  %14405 = vst [vmem:[#allocation5_spill] sm:$0xff] %v9678_v44 }
 0x2c1   : > { %v7757_v9 = vpop.f32.mrb[56].mxu0  ;;  %v7694_v24 = vpop.f32.mrb[57].mxu1 }
 0x2c2   : > { %v7758_v5 = vpop.f32.mrb[57].mxu0  ;;  %v9622_v38 = vadd.f32 %v7694_v24, %v7693_v39  ;;  %v7696_v59 = vpop.f32.mrb[58].mxu1 }
 0x2c3   : > { %v7759_v34 = vadd.f32 %v7758_v5, %v7757_v9  ;;  %v7760_v48 = vpop.f32.mrb[58].mxu0  ;;  %v7697_v2 = vpop.f32.mrb[59].mxu1  ;;  %v1872_v5 = vadd.f32 %v9538_v11, %v9536_v26 }
 0x2c4   : > { %v7761_v60 = vpop.f32.mrb[59].mxu0  ;;  %v9626_v13 = vadd.f32 %v7697_v2, %v7696_v59  ;;  %v9653_v59 = vadd.f32 %v9554_v6, %v9536_v26  ;;  %v9658_v2 = vadd.f32 %v9558_v7, %v9536_v26  ;;  %v9667_v6 = vadd.f32 %v9574_v32, %v9536_v26 }
 0x2c5   : > { %v7762_v16 = vadd.f32 %v7761_v60, %v7760_v48  ;;  %v9628_v37 = vadd.f32 %v7759_v34, %v1856_v12  ;;  %v9682_v32 = vadd.f32 %v9586_v0, %v9536_v26  ;;  %v9701_v0 = vadd.f32 %v9594_v20, %v9536_v26 }
 0x2c6   : > { %14404 = vst [vmem:[#allocation6_spill] sm:$0xff] %v9667_v6  ;;  %v9716_v20 = vadd.f32 %v9613_v58, %v9536_v26 }
 0x2c7   : > { %v9632_v47 = vadd.f32 %v7762_v16, %v1859_v23  ;;  %14406 = vst [vmem:[#allocation9_spill] sm:$0xff] %v9682_v32  ;;  %14407 = vst [vmem:[#allocation10_spill] sm:$0xff] %v9701_v0 }
 0x2c8   : > { %v7699_v15 = vpop.f32.mrb[60].mxu1  ;;  %14410 = vst [vmem:[#allocation13_spill] sm:$0xff] %v9716_v20 }
 0x2c9   : > { %v7763_v35 = vpop.f32.mrb[60].mxu0  ;;  %v7700_v17 = vpop.f32.mrb[61].mxu1 }
 0x2ca   : > { %v7764_v25 = vpop.f32.mrb[61].mxu0  ;;  %v9634_v41 = vadd.f32 %v7700_v17, %v7699_v15  ;;  %v7702_v54 = vpop.f32.mrb[62].mxu1 }
 0x2cb   : > { %v7765_v43 = vadd.f32 %v7764_v25, %v7763_v35  ;;  %v7766_v45 = vpop.f32.mrb[62].mxu0  ;;  %v7703_v57 = vpop.f32.mrb[63].mxu1 }
 0x2cc   : > { %v7767_v10 = vpop.f32.mrb[63].mxu0  ;;  %v9638_v40 = vadd.f32 %v7703_v57, %v7702_v54 }
 0x2cd   : > { %v7768_v1 = vadd.f32 %v7767_v10, %v7766_v45  ;;  %v9640_v55 = vadd.f32 %v7765_v43, %v1864_v31  ;;  %v8595_v31 = vld [vmem:[%s14007_s5 + $0x20] sm:$0xff]  }
 0x2ce   : > { %4904 = vmatpush1.bf16.msra.mxu0 %v8595_v31 }
 0x2cf   : > { %v9644_v51 = vadd.f32 %v7768_v1, %v1867_v3  ;;  %4905 = vmatprep.subr.bf16.mxu0 %v14402_v63 }
 0x2d0   : > { %v7961_v42 = vpop.f32.mrb[64].mxu1 }
 0x2d1   : > { %v7769_v39 = vpop.f32.mrb[64].mxu0  ;;  %v2138_v9 = vadd.f32 %v7961_v42, %v9560_v50  ;;  %v2129_v24 = vpop.f32.mrb[65].mxu1 }
 0x2d2   : > { %v7770_v34 = vpop.f32.mrb[65].mxu0  ;;  %v2130_v52 = vadd.f32 %v2129_v24, %v9547_v30  ;;  %v7962_v48 = vpop.f32.mrb[66].mxu1 }
 0x2d3   : > { %v7771_v50 = vadd.f32 %v7770_v34, %v7769_v39  ;;  %v7772_v12 = vpop.f32.mrb[66].mxu0  ;;  %v2258_v60 = vmax.f32 %v2138_v9, 0.0  ;;  %v2141_v11 = vadd.f32 %v7962_v48, %v9564_v49  ;;  %v2132_v16 = vpop.f32.mrb[67].mxu1  ;;  %v9708_v34 = vadd.f32 %v9598_v61, %v9536_v26 }
 0x2d4   : > { %v7773_v30 = vpop.f32.mrb[67].mxu0  ;;  %v2256_v23 = vmax.f32 %v2130_v52, 0.0  ;;  %v2133_v15 = vadd.f32 %v2132_v16, %v9551_v33  ;;  %v9712_v52 = vadd.f32 %v9606_v46, %v9536_v26  ;;  %v9720_v48 = vadd.f32 %v9622_v38, %v9536_v26 }
 0x2d5   : > { %v7774_v7 = vadd.f32 %v7773_v30, %v7772_v12  ;;  %v9670_v35 = vmul.f32 0.75, %v2258_v60  ;;  %v9672_v17 = vmul.f32 0.25, %v2258_v60  ;;  %v2259_v25 = vmax.f32 %v2141_v11, 0.0  ;;  %14408 = vst [vmem:[#allocation11_spill] sm:$0xff] %v9708_v34 }
 0x2d6   : > { %v2288_v49 = vmul.f32 0.75, %v2256_v23  ;;  %v2320_v54 = vmul.f32 0.25, %v2256_v23  ;;  %v2257_v43 = vmax.f32 %v2133_v15, 0.0  ;;  %v9674_v45 = vadd.f32 %v7771_v50, %v1872_v5  ;;  %14409 = vst [vmem:[#allocation12_spill] sm:$0xff] %v9712_v52  ;;  %14411 = vst [vmem:[#allocation14_spill] sm:$0xff] %v9720_v48 }
 0x2d7   : > { %v9684_v33 = vmul.f32 0.75, %v2259_v25  ;;  %v9686_v57 = vadd.f32 %v7774_v7, %v1875_v56  ;;  %v9697_v29 = vmul.f32 0.25, %v2259_v25  ;;  %v9725_v61 = vadd.f32 %v9626_v13, %v9536_v26 }
 0x2d8   : > { %v9692_v10 = vadd.f32 %v2320_v54, %v9670_v35  ;;  %v9695_v1 = vadd.f32 %v9672_v17, %v2288_v49  ;;  %v2289_v3 = vmul.f32 0.75, %v2257_v43  ;;  %v7965_v42 = vpop.f32.mrb[68].mxu1  ;;  %v9703_v39 = vadd.f32 %v2320_v54, %v2288_v49 }
 0x2d9   : > { %v2321_v9 = vmul.f32 0.25, %v2257_v43  ;;  %v7775_v24 = vpop.f32.mrb[68].mxu0  ;;  %v2154_v5 = vadd.f32 %v7965_v42, %v9588_v62  ;;  %v2145_v56 = vpop.f32.mrb[69].mxu1  ;;  %14412 = vst [vmem:[#allocation15_spill] sm:$0xff] %v9725_v61  ;;  %v9729_v46 = vadd.f32 %v9634_v41, %v9536_v26  ;;  %v9744_v41 = vadd.f32 %v9638_v40, %v9536_v26 }
 0x2da   : > { %v7776_v50 = vpop.f32.mrb[69].mxu0  ;;  %v7966_v62 = vpop.f32.mrb[70].mxu1  ;;  %v9737_v11 = vadd.f32 %v9697_v29, %v2289_v3  ;;  %v2146_v13 = vadd.f32 %v2145_v56, %v9576_v18  ;;  %v14428_v52 = vrot.slane %v9703_v39, 7 }
 0x2db   : > { %14413 = vst [vmem:[#allocation16_spill] sm:$0xff] %v9729_v46  ;;  %v9731_v12 = vadd.f32 %v2321_v9, %v2289_v3  ;;  %v9734_v58 = vadd.f32 %v2321_v9, %v9684_v33  ;;  %v7778_v60 = vpop.f32.mrb[70].mxu0  ;;  %v2148_v38 = vpop.f32.mrb[71].mxu1  ;;  %v9739_v16 = vadd.f32 %v7776_v50, %v7775_v24  ;;  %v2262_v23 = vmax.f32 %v2154_v5, 0.0  ;;  %14414 = vst [vmem:[#allocation17_spill] sm:$0xff] %v9744_v41 }
 0x2dc   : > { %v7779_v30 = vpop.f32.mrb[71].mxu0  ;;  %v14025_v43 = vrot.slane %v9737_v11, 1  ;;  %v2260_v40 = vmax.f32 %v2146_v13, 0.0  ;;  %v2157_v5 = vadd.f32 %v7966_v62, %v9592_v4  ;;  %v14415_v4 = vrot.slane %v9703_v39, 7 }
 0x2dd   : > { %v14023_v7 = vrot.slane %v9731_v12, 1  ;;  %v14024_v25 = vrot.slane %v9734_v58, 1  ;;  %v2482_v54 = vrot.slane %v9731_v12, 7  ;;  %v9752_v31 = vadd.f32 %v7779_v30, %v7778_v60 }
 0x2de   : > { %v9755_v3 = vmul.f32 0.75, %v2262_v23  ;;  %v9757_v26 = vmul.f32 0.25, %v2262_v23  ;;  %v2835_v50 = vsel %vm1134_vm7, %v14025_v43, %v9737_v11  ;;  %v2292_v60 = vmul.f32 0.75, %v2260_v40 }
 0x2df   : > { %v2834_v9 = vsel %vm1134_vm7, %v14023_v7, %v9731_v12  ;;  %v2836_v24 = vsel %vm1134_vm7, %v14024_v25, %v9734_v58  ;;  %v2324_v30 = vmul.f32 0.25, %v2260_v40  ;;  %v2149_v23 = vadd.f32 %v2148_v38, %v9580_v53 }
 0x2e0   : > { %v7969_v56 = vpop.f32.mrb[72].mxu1  ;;  %v2263_v42 = vmax.f32 %v2157_v5, 0.0  ;;  %v9779_v62 = vsel %vm847_vm3, %v14415_v4, %v2482_v54  ;;  %v9782_v43 = vadd.f32 %v9672_v17, %v2292_v60  ;;  %v9791_v38 = vadd.f32 %v9757_v26, %v2292_v60 }
 0x2e1   : > { %v7781_v13 = vpop.f32.mrb[72].mxu0  ;;  %v2161_v18 = vpop.f32.mrb[73].mxu1  ;;  %v2170_v49 = vadd.f32 %v7969_v56, %v9615_v14  ;;  %v9785_v40 = vadd.f32 %v2324_v30, %v9755_v3  ;;  %v9788_v53 = vadd.f32 %v2324_v30, %v9670_v35  ;;  %v2261_v54 = vmax.f32 %v2149_v23, 0.0 }
 0x2e2   : > { %v7782_v7 = vpop.f32.mrb[73].mxu0  ;;  %v2162_v25 = vadd.f32 %v2161_v18, %v9600_v19  ;;  %v7970_v15 = vpop.f32.mrb[74].mxu1  ;;  %14417 = vst [vmem:[#allocation19_spill] sm:$0xff] %v9791_v38  ;;  %v9799_v21 = vmul.f32 0.75, %v2263_v42  ;;  %v9801_v35 = vmul.f32 0.25, %v2263_v42  ;;  %v9803_v60 = vmul.f32 0.25, %v2834_v9 }
 0x2e3   : > { %14416 = vst [vmem:[#allocation18_spill] sm:$0xff] %v9785_v40  ;;  %v7784_v14 = vpop.f32.mrb[74].mxu0  ;;  %v2164_v19 = vpop.f32.mrb[75].mxu1  ;;  %v9795_v56 = vadd.f32 %v7782_v7, %v7781_v13  ;;  %v9805_v30 = vmul.f32 0.25, %v2835_v50  ;;  %v9807_v28 = vmul.f32 0.25, %v2836_v24  ;;  %v2293_v23 = vmul.f32 0.75, %v2261_v54 }
 0x2e4   : > { %v7785_v17 = vpop.f32.mrb[75].mxu0  ;;  %v2325_v7 = vmul.f32 0.25, %v2261_v54  ;;  %v2266_v5 = vmax.f32 %v2170_v49, 0.0  ;;  %v2264_v36 = vmax.f32 %v2162_v25, 0.0  ;;  %v2173_v61 = vadd.f32 %v7970_v15, %v9620_v22 }
 0x2e5   : > { %14418 = vst [vmem:[#allocation20_spill] sm:$0xff] %v9795_v56  ;;  %v9810_v13 = vadd.f32 %v7785_v17, %v7784_v14  ;;  %v9815_v42 = vadd.f32 %v2164_v19, %v9604_v27  ;;  %v9820_v24 = vadd.f32 %v9697_v29, %v2293_v23  ;;  %v9829_v49 = vadd.f32 %v9801_v35, %v2293_v23 }
 0x2e6   : > { %v9823_v50 = vadd.f32 %v2325_v7, %v9799_v21  ;;  %v9826_v14 = vadd.f32 %v2325_v7, %v9684_v33  ;;  %v9831_v22 = vmul.f32 0.75, %v2266_v5  ;;  %v9833_v27 = vmul.f32 0.25, %v2266_v5 }
 0x2e7   : > { %14419 = vst [vmem:[#allocation21_spill] sm:$0xff] %v9810_v13  ;;  %14421 = vst [vmem:[#allocation23_spill] sm:$0xff] %v9829_v49  ;;  %v2296_v15 = vmul.f32 0.75, %v2264_v36  ;;  %v2328_v19 = vmul.f32 0.25, %v2264_v36  ;;  %v14027_v5 = vrot.slane %v9820_v24, 1  ;;  %v14426_v48 = vrot.slane %v9829_v49, 1 }
 0x2e8   : > { %v9817_v9 = vpop.f32.mrb[76].mxu1  ;;  %14420 = vst [vmem:[#allocation22_spill] sm:$0xff] %v9823_v50  ;;  %v14026_v46 = vrot.slane %v9826_v14, 1  ;;  %v2267_v13 = vmax.f32 %v2173_v61, 0.0  ;;  %v9905_v6 = vmul.f32 0.75, %v9731_v12  ;;  %v2931_v40 = vmul.f32 0.25, %v9779_v62 }
 0x2e9   : > { %v7787_v25 = vpop.f32.mrb[76].mxu0  ;;  %v2177_v54 = vpop.f32.mrb[77].mxu1  ;;  %v9848_v4 = vadd.f32 %v9757_v26, %v2296_v15  ;;  %v9851_v18 = vadd.f32 %v2328_v19, %v9831_v22  ;;  %v9854_v33 = vadd.f32 %v2328_v19, %v9755_v3  ;;  %v9857_v23 = vadd.f32 %v9833_v27, %v2296_v15  ;;  %v9929_v62 = vld [vmem:[%s14007_s5 + $0x28] sm:$0xff]  }
 0x2ea   : > { %v7788_v17 = vpop.f32.mrb[77].mxu0  ;;  %v9835_v29 = vpop.f32.mrb[78].mxu1  ;;  %v2837_v36 = vsel %vm1134_vm7, %v14026_v46, %v9826_v14  ;;  %v2838_v26 = vsel %vm1134_vm7, %v14027_v5, %v9820_v24  ;;  %v2839_v20 = vsel %vm1134_vm7, %v14426_v48, %v9829_v49  ;;  %v14427_v3 = vrot.slane %v9823_v50, 1  ;;  %14435 = vst [vmem:[#allocation34_spill] sm:$0xff] %v9929_v62  ;;  %4906 = vmatpush1.bf16.msra.mxu0 %v9929_v62 }
 0x2eb   : > { %v7790_v7 = vpop.f32.mrb[78].mxu0  ;;  %v9841_v41 = vpop.f32.mrb[79].mxu1  ;;  %14422 = vst [vmem:[#allocation24_spill] sm:$0xff] %v9848_v4  ;;  %14423 = vst [vmem:[#allocation25_spill] sm:$0xff] %v9851_v18  ;;  %v2641_v5 = vsel %vm847_vm3, %v9703_v39, %v14428_v52  ;;  %v9885_v32 = vmul.f32 0.25, %v2837_v36  ;;  %v9889_v19 = vmul.f32 0.25, %v2838_v26  ;;  %4907 = vmatprep.subr.bf16.mxu0 %v14402_v63 }
 0x2ec   : > { %v7791_v34 = vpop.f32.mrb[79].mxu0  ;;  %14424 = vst [vmem:[#allocation26_spill] sm:$0xff] %v9854_v33  ;;  %14425 = vst [vmem:[#allocation27_spill] sm:$0xff] %v9857_v23  ;;  %v2840_v15 = vsel %vm1134_vm7, %v14427_v3, %v9823_v50  ;;  %v9891_v0 = vmul.f32 0.25, %v2839_v20  ;;  %v2265_v48 = vmax.f32 %v9815_v42, 0.0  ;;  %v9902_v36 = vmul.f32 0.75, %v9703_v39 }
 0x2ed   : > { %14429 = vst [vmem:[#allocation28_spill] sm:$0xff] %v9885_v32  ;;  %14430 = vst [vmem:[#allocation29_spill] sm:$0xff] %v9889_v19  ;;  %v9893_v46 = vmul.f32 0.25, %v2840_v15  ;;  %v2930_v15 = vmul.f32 0.25, %v2641_v5  ;;  %v9914_v50 = vadd.f32 %v7791_v34, %v7790_v7  ;;  %v9922_v19 = vmul.f32 0.25, %v2267_v13 }
 0x2ee   : > { %14431 = vst [vmem:[#allocation30_spill] sm:$0xff] %v9891_v0  ;;  %v9920_v0 = vmul.f32 0.75, %v2267_v13  ;;  %v2297_v49 = vmul.f32 0.75, %v2265_v48  ;;  %v2329_v56 = vmul.f32 0.25, %v2265_v48  ;;  %v2178_v7 = vadd.f32 %v2177_v54, %v9628_v37 }
 0x2ef   : > { %14432 = vst [vmem:[#allocation31_spill] sm:$0xff] %v9893_v46  ;;  %v9912_v46 = vadd.f32 %v7788_v17, %v7787_v25  ;;  %14434 = vst [vmem:[#allocation33_spill] sm:$0xff] %v9914_v50  ;;  %v2994_v34 = vadd.f32 %v2930_v15, %v9902_v36  ;;  %v2995_v25 = vadd.f32 %v2931_v40, %v9905_v6  ;;  %v14441_v37 = vrot.slane %v9737_v11, 7 }
 0x2f0   : > { %v9887_v3 = vpop.f32.mrb[80].mxu1  ;;  %v2186_v17 = vadd.f32 %v9817_v9, %v9640_v55  ;;  %v9937_v13 = vadd.f32 %v9801_v35, %v2297_v49  ;;  %v9940_v5 = vadd.f32 %v2329_v56, %v9920_v0  ;;  %v9943_v48 = vadd.f32 %v2329_v56, %v9799_v21 }
 0x2f1   : > { %v9896_v38 = vpop.f32.mrb[80].mxu0  ;;  %v9898_v52 = vpop.f32.mrb[81].mxu1  ;;  %14433 = vst [vmem:[#allocation32_spill] sm:$0xff] %v9912_v46  ;;  %v9946_v50 = vadd.f32 %v9922_v19, %v2297_v49  ;;  %v9949_v40 = vpack.c.bf16 %v2995_v25, %v2994_v34  ;;  %v2268_v55 = vmax.f32 %v2178_v7, 0.0  ;;  %v14442_v35 = vrot.slane %v9695_v1, 7 }
 0x2f2   : > { %v9907_v26 = vpop.f32.mrb[81].mxu0  ;;  %v9909_v20 = vpop.f32.mrb[82].mxu1  ;;  %14436 = vst [vmem:[#allocation35_spill] sm:$0xff] %v9937_v13  ;;  %14437 = vst [vmem:[#allocation36_spill] sm:$0xff] %v9940_v5  ;;  %v2270_v15 = vmax.f32 %v2186_v17, 0.0  ;;  %v14450_v62 = vrot.slane %v9940_v5, 1  ;;  %v2181_v46 = vadd.f32 %v9841_v41, %v9632_v47 }
 0x2f3   : > { %v9916_v61 = vpop.f32.mrb[82].mxu0  ;;  %v9918_v42 = vpop.f32.mrb[83].mxu1  ;;  %14438 = vst [vmem:[#allocation37_spill] sm:$0xff] %v9943_v48  ;;  %14439 = vst [vmem:[#allocation38_spill] sm:$0xff] %v9946_v50  ;;  %v2486_v9 = vsel %vm847_vm3, %v14442_v35, %v14441_v37  ;;  %3571 = vrot.lane.b32.xlu0 %v9949_v40, %s8643_s11  ;;  %v2300_v54 = vmul.f32 0.75, %v2268_v55  ;;  %v2332_v33 = vmul.f32 0.25, %v2268_v55 }
 0x2f4   : > { %v9924_v8 = vpop.f32.mrb[83].mxu0  ;;  %14440 = vst [vmem:[#allocation39_spill] sm:$0xff] %v9949_v40  ;;  %v9973_v49 = vmul.f32 0.75, %v2270_v15  ;;  %v9975_v21 = vmul.f32 0.25, %v2270_v15  ;;  %v14447_v15 = vrot.slane %v9943_v48, 1  ;;  %v14449_v37 = vrot.slane %v9946_v50, 1 }
 0x2f5   : > { %v2844_v18 = vsel %vm1134_vm7, %v14450_v62, %v9940_v5  ;;  %v10008_v4 = vadd.f32 %v9833_v27, %v2300_v54  ;;  %v14455_v62 = vrot.slane %v9695_v1, 7  ;;  %v2933_v27 = vmul.f32 0.25, %v2486_v9 }
 0x2f6   : > { %v2841_v55 = vsel %vm1134_vm7, %v14447_v15, %v9943_v48  ;;  %v2843_v40 = vsel %vm1134_vm7, %v14449_v37, %v9946_v50  ;;  %v10011_v15 = vadd.f32 %v2332_v33, %v9973_v49  ;;  %v10017_v48 = vadd.f32 %v9975_v21, %v2300_v54 }
 0x2f7   : > { %14452 = vst [vmem:[#allocation45_spill] sm:$0xff] %v10008_v4  ;;  %v2642_v32 = vsel %vm847_vm3, %v9695_v1, %v14455_v62  ;;  %v10026_v44 = vmul.f32 0.25, %v2841_v55  ;;  %v10035_v54 = vmul.f32 0.25, %v2844_v18  ;;  %v10039_v37 = vmul.f32 0.75, %v9695_v1 }
 0x2f8   : > { %v9961_v34 = vpop.f32.mrb[84].mxu1  ;;  %14453 = vst [vmem:[#allocation46_spill] sm:$0xff] %v10011_v15  ;;  %14454 = vst [vmem:[#allocation47_spill] sm:$0xff] %v10017_v48  ;;  %v2932_v9 = vmul.f32 0.25, %v2642_v32  ;;  %v14463_v5 = vrot.slane %v9703_v39, 1 }
 0x2f9   : > { %14443 = vst [vmem:[#allocation40_spill] sm:$0xff] %v9961_v34  ;;  %v9969_v35 = vpop.f32.mrb[84].mxu0  ;;  %v9971_v56 = vpop.f32.mrb[85].mxu1  ;;  %14456 = vst [vmem:[#allocation48_spill] sm:$0xff] %v10026_v44 }
 0x2fa   : > { %14444 = vst [vmem:[#allocation41_spill] sm:$0xff] %v9971_v56  ;;  %v9977_v25 = vpop.f32.mrb[85].mxu0  ;;  %v9979_v17 = vpop.f32.mrb[86].mxu1  ;;  %14459 = vst [vmem:[#allocation51_spill] sm:$0xff] %v10035_v54  ;;  %v14462_v54 = vrot.slane %v9731_v12, 1  ;;  %v2996_v12 = vadd.f32 %v2932_v9, %v10039_v37  ;;  %v2871_v9 = vmul.f32 0.75, %v9734_v58 }
 0x2fb   : > { %14445 = vst [vmem:[#allocation42_spill] sm:$0xff] %v9979_v17  ;;  %v9985_v34 = vpop.f32.mrb[86].mxu0  ;;  %v9987_v56 = vpop.f32.mrb[87].mxu1  ;;  %v14448_v17 = vrot.slane %v9937_v13, 1 }
 0x2fc   : > { %14446 = vst [vmem:[#allocation43_spill] sm:$0xff] %v9987_v56  ;;  %v10005_v23 = vpop.f32.mrb[87].mxu0  ;;  %v2676_v32 = vsel %vm1134_vm7, %v14463_v5, %v14462_v54 }
 0x2fd   : > { %v2842_v7 = vsel %vm1134_vm7, %v14448_v17, %v9937_v13  ;;  %14451 = vst [vmem:[#allocation44_spill] sm:$0xff] %v10005_v23  ;;  %v10014_v17 = vadd.f32 %v2332_v33, %v9831_v22  ;;  %v10031_v22 = vmul.f32 0.75, %v9737_v11  ;;  %v10033_v33 = vmul.f32 0.25, %v2843_v40 }
 0x2fe   : > { %v10028_v23 = vmul.f32 0.25, %v2842_v7  ;;  %v2189_v7 = vadd.f32 %v9835_v29, %v9644_v51  ;;  %v3090_v5 = vmul.f32 0.25, %v2676_v32  ;;  %v14470_v13 = vrot.slane %v9692_v10, 1 }
 0x2ff   : > { %14458 = vst [vmem:[#allocation50_spill] sm:$0xff] %v10033_v33  ;;  %v2997_v55 = vadd.f32 %v2933_v27, %v10031_v22  ;;  %v14464_v27 = vrot.slane %v9734_v58, 7  ;;  %v14465_v33 = vrot.slane %v9692_v10, 7 }
 0x300   : > { %14457 = vst [vmem:[#allocation49_spill] sm:$0xff] %v10028_v23  ;;  %v10041_v62 = vpop.f32.mrb[88].mxu1  ;;  %v2271_v39 = vmax.f32 %v2189_v7, 0.0  ;;  %v2269_v23 = vmax.f32 %v2181_v46, 0.0 }
 0x301   : > { %14460 = vst [vmem:[#allocation52_spill] sm:$0xff] %v10041_v62  ;;  %v10048_v40 = vpop.f32.mrb[88].mxu0  ;;  %v10050_v18 = vpop.f32.mrb[89].mxu1  ;;  %v2489_v51 = vsel %vm847_vm3, %v14465_v33, %v14464_v27  ;;  %v14466_v47 = vmov %v14465_v33  ;;  %v3155_v27 = vadd.f32 %v9803_v60, %v9905_v6  ;;  %v10087_v46 = vpack.c.bf16 %v2997_v55, %v2996_v12 }
 0x302   : > { %14461 = vst [vmem:[#allocation53_spill] sm:$0xff] %v10050_v18  ;;  %v2643_v41 = vsel %vm847_vm3, %v9692_v10, %v14466_v47  ;;  %v10067_v29 = vpop.f32.mrb[89].mxu0  ;;  %v10069_v56 = vpop.f32.mrb[90].mxu1  ;;  %v14469_v47 = vrot.slane %v9734_v58, 1  ;;  %v10089_v32 = vmul.f32 0.75, %v2271_v39  ;;  %v2301_v33 = vmul.f32 0.75, %v2269_v23 }
 0x303   : > { %14467 = vst [vmem:[#allocation54_spill] sm:$0xff] %v10069_v56  ;;  %v10072_v54 = vpop.f32.mrb[90].mxu0  ;;  %v10074_v50 = vpop.f32.mrb[91].mxu1  ;;  %14471 = vst [vmem:[#allocation56_spill] sm:$0xff] %v10087_v46  ;;  %v2333_v44 = vmul.f32 0.25, %v2269_v23  ;;  %v3154_v6 = vadd.f32 %v3090_v5, %v9902_v36  ;;  %v2934_v60 = vmul.f32 0.25, %v2643_v41  ;;  %3573 = vrot.lane.b32.xlu0 %v10087_v46, %s8643_s11 }
 0x304   : > { %14468 = vst [vmem:[#allocation55_spill] sm:$0xff] %v10074_v50  ;;  %v2682_v56 = vsel %vm1134_vm7, %v14470_v13, %v14469_v47  ;;  %v10085_v7 = vpop.f32.mrb[91].mxu0  ;;  %v10091_v50 = vmul.f32 0.25, %v2271_v39  ;;  %v2935_v18 = vmul.f32 0.25, %v2489_v51  ;;  %v10098_v58 = vadd.f32 %v9922_v19, %v2301_v33 }
 0x305   : > { %v2870_v55 = vmul.f32 0.75, %v9692_v10  ;;  %v10105_v12 = vadd.f32 %v2333_v44, %v10089_v32  ;;  %v10108_v23 = vadd.f32 %v2333_v44, %v9920_v0  ;;  %v3218_v36 = vpack.c.bf16 %v3155_v27, %v3154_v6 }
 0x306   : > { %v10101_v13 = vadd.f32 %v10091_v50, %v2301_v33  ;;  %v2999_v51 = vadd.f32 %v2935_v18, %v2871_v9  ;;  %v3094_v0 = vmul.f32 0.25, %v2682_v56  ;;  %v3159_v18 = vadd.f32 %v9807_v28, %v2871_v9  ;;  %v10150_v56 = vld [vmem:[%s14007_s5 + $0x30] sm:$0xff]  }
 0x307   : > { %14472 = vst [vmem:[#allocation57_spill] sm:$0xff] %v10105_v12  ;;  %v2998_v44 = vadd.f32 %v2934_v60, %v2870_v55  ;;  %v3251_v33 = vshrl.u32 %v3218_v36, 16  ;;  %v14473_v5 = vrot.slane %v10098_v58, 1  ;;  %v3254_v15 = vshll.u32 %v3218_v36, 16  ;;  %4908 = vmatpush1.bf16.msra.mxu0 %v10150_v56 }
 0x308   : > { %v10110_v41 = vpop.f32.mrb[92].mxu1  ;;  %v3158_v60 = vadd.f32 %v3094_v0, %v2870_v55  ;;  %v10154_v9 = vadd.f32 %v9907_v26, %v9896_v38  ;;  %v10158_v28 = vadd.f32 %v9924_v8, %v9916_v61  ;;  %v14476_v36 = vrot.slane %v10101_v13, 1  ;;  %4909 = vmatprep.subr.bf16.mxu0 %v14402_v63 }
 0x309   : > { %v10116_v47 = vpop.f32.mrb[92].mxu0  ;;  %v10118_v10 = vpop.f32.mrb[93].mxu1  ;;  %v2846_v19 = vsel %vm1134_vm7, %v14473_v5, %v10098_v58  ;;  %v10143_v39 = vrot.slane %v3251_v33, 7  ;;  %v10145_v4 = vpack.c.bf16 %v2999_v51, %v2998_v44  ;;  %v2041_v5 = vadd.f32 %v9739_v16, %v9653_v59 }
 0x30a   : > { %v10122_v27 = vpop.f32.mrb[93].mxu0  ;;  %v10124_v6 = vpop.f32.mrb[94].mxu1  ;;  %v2847_v51 = vsel %vm1134_vm7, %v14476_v36, %v10101_v13  ;;  %v14477_v38 = vrot.slane %v9737_v11, 1  ;;  %v14478_v26 = vrot.slane %v9695_v1, 1  ;;  %v2194_v61 = vadd.f32 %v9898_v52, %v9674_v45 }
 0x30b   : > { %v10129_v46 = vpop.f32.mrb[94].mxu0  ;;  %v10131_v48 = vpop.f32.mrb[95].mxu1  ;;  %14474 = vst [vmem:[#allocation58_spill] sm:$0xff] %v10143_v39  ;;  %14475 = vst [vmem:[#allocation59_spill] sm:$0xff] %v10145_v4  ;;  %v3256_v33 = vor.u32 %v3254_v15, %v10143_v39  ;;  %3575 = vrot.lane.b32.xlu0 %v10145_v4, %s8643_s11  ;;  %v10176_v59 = vpack.c.bf16 %v3159_v18, %v3158_v60  ;;  %v2202_v16 = vadd.f32 %v9887_v3, %v2041_v5 }
 0x30c   : > { %v10137_v62 = vpop.f32.mrb[95].mxu0  ;;  %v2679_v8 = vsel %vm1134_vm7, %v14478_v26, %v14477_v38  ;;  %v14479_v44 = vrot.slane %v9826_v14, 7  ;;  %v14480_v15 = vrot.slane %v9788_v53, 7  ;;  %v3157_v45 = vadd.f32 %v9805_v30, %v10031_v22 }
 0x30d   : > { %v3092_v55 = vmul.f32 0.25, %v2679_v8  ;;  %v10187_v1 = vsel %vm8812_vm5, 0, %v3256_v33  ;;  %v2272_v52 = vmax.f32 %v2194_v61, 0.0  ;;  %v14484_v60 = vrot.slane %v10108_v23, 1 }
 0x30e   : > { %v2492_v0 = vsel %vm847_vm3, %v14480_v15, %v14479_v44  ;;  %14482 = vst [vmem:[#allocation2_spill] sm:$0xff] %v10187_v1  ;;  %v14483_v18 = vmov %v14480_v15  ;;  %v14485_v36 = vrot.slane %v10105_v12, 1  ;;  %v10204_v38 = vmul.f32 0.25, %v2846_v19  ;;  %4037 = vrot.lane.b32.xlu1 %v10187_v1, %s8643_s11 }
 0x30f   : > { %v2644_v3 = vsel %vm847_vm3, %v9788_v53, %v14483_v18  ;;  %v2845_v5 = vsel %vm1134_vm7, %v14484_v60, %v10108_v23  ;;  %v2274_v30 = vmax.f32 %v2202_v16, 0.0  ;;  %v10208_v22 = vmul.f32 0.25, %v2847_v51 }
 0x310   : > { %v2848_v33 = vsel %vm1134_vm7, %v14485_v36, %v10105_v12  ;;  %v3156_v26 = vadd.f32 %v3092_v55, %v10039_v37  ;;  %v2304_v8 = vmul.f32 0.75, %v2272_v52  ;;  %v2336_v61 = vmul.f32 0.25, %v2272_v52 }
 0x311   : > { %v3636_v44 = vshll.u32 %v10187_v1, 16  ;;  %v10212_v15 = vmul.f32 0.75, %v2274_v30  ;;  %v10214_v18 = vmul.f32 0.25, %v2274_v30  ;;  %v2936_v60 = vmul.f32 0.25, %v2644_v3 }
 0x312   : > { %v3219_v36 = vpack.c.bf16 %v3157_v45, %v3156_v26  ;;  %v10217_v19 = vadd.f32 %v9975_v21, %v2304_v8  ;;  %v10220_v4 = vadd.f32 %v2336_v61, %v9973_v49  ;;  %v10223_v51 = vmul.f32 0.75, %v9788_v53 }
 0x313   : > { %v10226_v37 = vadd.f32 %v2336_v61, %v10212_v15  ;;  %v10229_v16 = vadd.f32 %v10214_v18, %v2304_v8  ;;  %v2937_v55 = vmul.f32 0.25, %v2492_v0  ;;  %v2044_v52 = vadd.f32 %v9752_v31, %v9658_v2 }
 0x314   : > { %14486 = vst [vmem:[#allocation60_spill] sm:$0xff] %v10217_v19  ;;  %14487 = vst [vmem:[#allocation61_spill] sm:$0xff] %v10220_v4  ;;  %v10233_v45 = vmul.f32 0.25, %v2845_v5  ;;  %v10235_v21 = vmul.f32 0.25, %v2848_v33  ;;  %v3258_v3 = vshrl.u32 %v3219_v36, 16  ;;  %v10238_v30 = vrot.slane %v3636_v44, 1 }
 0x315   : > { %14488 = vst [vmem:[#allocation62_spill] sm:$0xff] %v10226_v37  ;;  %14489 = vst [vmem:[#allocation63_spill] sm:$0xff] %v10229_v16  ;;  %v3268_v26 = vshll.u32 %v10176_v59, 16  ;;  %v10242_v61 = vmul.f32 0.75, %v9826_v14  ;;  %v3000_v8 = vadd.f32 %v2936_v60, %v10223_v51  ;;  %v3261_v39 = vshll.u32 %v3219_v36, 16 }
 0x316   : > { %14490 = vst [vmem:[#allocation64_spill] sm:$0xff] %v10235_v21  ;;  %14491 = vst [vmem:[#allocation65_spill] sm:$0xff] %v10238_v30  ;;  %v3260_v0 = vrot.slane %v3258_v3, 7  ;;  %v2205_v49 = vadd.f32 %v9909_v20, %v2044_v52  ;;  %v2197_v60 = vadd.f32 %v9918_v42, %v9686_v57  ;;  %v3265_v36 = vshrl.u32 %v10176_v59, 16  ;;  %v10266_v20 = vld [vmem:[%s14007_s5 + $0x38] sm:$0xff]  }
 0x317   : > { %v3001_v44 = vadd.f32 %v2937_v55, %v10242_v61  ;;  %v14493_v5 = vrot.slane %v9820_v24, 7  ;;  %v14494_v33 = vrot.slane %v9782_v43, 7  ;;  %4910 = vmatpush1.bf16.msra.mxu0 %v10266_v20  ;;  %v14496_v1 = vrot.slane %v9820_v24, 1 }
 0x318   : > { %v3263_v30 = vor.u32 %v3261_v39, %v3260_v0  ;;  %v2275_v31 = vmax.f32 %v2205_v49, 0.0  ;;  %v2273_v39 = vmax.f32 %v2197_v60, 0.0  ;;  %v3267_v59 = vrot.slane %v3265_v36, 7  ;;  %4911 = vmatprep.subr.bf16.mxu0 %v14402_v63 }
 0x319   : > { %v10256_v2 = vpack.c.bf16 %v3001_v44, %v3000_v8  ;;  %v2495_v55 = vsel %vm847_vm3, %v14494_v33, %v14493_v5  ;;  %v3653_v44 = vshll.u32 %v3260_v0, 16  ;;  %v14497_v49 = vrot.slane %v9782_v43, 1 }
 0x31a   : > { %v10270_v57 = vsel %vm8812_vm5, 0, %v3263_v30  ;;  %v10279_v8 = vmul.f32 0.75, %v2275_v31  ;;  %v10281_v5 = vmul.f32 0.25, %v2275_v31  ;;  %v2305_v30 = vmul.f32 0.75, %v2273_v39 }
 0x31b   : > { %14492 = vst [vmem:[#allocation66_spill] sm:$0xff] %v10256_v2  ;;  %14495 = vst [vmem:[#allocation67_spill] sm:$0xff] %v10270_v57  ;;  %v3648_v52 = vshll.u32 %v10270_v57, 16  ;;  %4039 = vrot.lane.b32.xlu1 %v10270_v57, %s8643_s11  ;;  %3577 = vrot.lane.b32.xlu0 %v10256_v2, %s8643_s11  ;;  %v2337_v33 = vmul.f32 0.25, %v2273_v39  ;;  %v3270_v42 = vor.u32 %v3268_v26, %v3267_v59  ;;  %v3646_v60 = vshrl.u32 %v10270_v57, 16 }
 0x31c   : > { %v3665_v3 = vshll.u32 %v3267_v59, 16  ;;  %v2688_v2 = vsel %vm1134_vm7, %v14497_v49, %v14496_v1  ;;  %v10292_v31 = vadd.f32 %v10091_v50, %v2305_v30  ;;  %v10301_v39 = vadd.f32 %v10281_v5, %v2305_v30 }
 0x31d   : > { %v3650_v36 = vrot.slane %v3648_v52, 1  ;;  %v10295_v0 = vadd.f32 %v2337_v33, %v10279_v8  ;;  %v10298_v26 = vadd.f32 %v2337_v33, %v10089_v32  ;;  %v10304_v59 = vmul.f32 0.75, %v10217_v19 }
 0x31e   : > { %14498 = vst [vmem:[#allocation68_spill] sm:$0xff] %v10292_v31  ;;  %14501 = vst [vmem:[#allocation71_spill] sm:$0xff] %v10301_v39  ;;  %v10308_v1 = vsel %vm8812_vm5, 0, %v3270_v42  ;;  %v14504_v50 = vrot.slane %v9782_v43, 7  ;;  %v10315_v57 = vmul.f32 0.75, %v10229_v16  ;;  %v10318_v32 = vmul.f32 0.75, %v10226_v37 }
 0x31f   : > { %14499 = vst [vmem:[#allocation69_spill] sm:$0xff] %v10295_v0  ;;  %14500 = vst [vmem:[#allocation70_spill] sm:$0xff] %v10298_v26  ;;  %v3651_v52 = vor.u32 %v3650_v36, %v3646_v60  ;;  %v3655_v30 = vrot.slane %v3653_v44, 1  ;;  %4041 = vrot.lane.b32.xlu1 %v10308_v1, %s8643_s11  ;;  %v2874_v33 = vmul.f32 0.75, %v9782_v43  ;;  %v14080_v36 = vrot.slane %v10301_v39, 1 }
 0x320   : > { %14502 = vst [vmem:[#allocation72_spill] sm:$0xff] %v10304_v59  ;;  %14503 = vst [vmem:[#allocation73_spill] sm:$0xff] %v10308_v1  ;;  %v2645_v49 = vsel %vm847_vm3, %v9782_v43, %v14504_v50  ;;  %v10327_v50 = vmul.f32 0.75, %v9820_v24  ;;  %v3667_v44 = vrot.slane %v3665_v3, 1  ;;  %v14508_v24 = vrot.slane %v10298_v26, 1 }
 0x321   : > { %14505 = vst [vmem:[#allocation74_spill] sm:$0xff] %v10315_v57  ;;  %14506 = vst [vmem:[#allocation75_spill] sm:$0xff] %v10318_v32  ;;  %v10331_v59 = vsel %vm882_vm6, %v3651_v52, %v3655_v30  ;;  %v2938_v32 = vmul.f32 0.25, %v2645_v49  ;;  %v14509_v3 = vrot.slane %v10292_v31, 1  ;;  %v10352_v49 = vmul.f32 0.75, %v10292_v31 }
 0x322   : > { %14507 = vst [vmem:[#allocation76_spill] sm:$0xff] %v10331_v59  ;;  %7999 = vmatprep.mubr.msk.bf16.mxu1 %vm1265_vm8, %v10331_v59  ;;  %v10343_v57 = vsel %vm1134_vm7, %v14508_v24, %v10298_v26  ;;  %v10355_v30 = vmul.f32 0.75, %v10301_v39  ;;  %v10361_v42 = vsel %vm1134_vm7, %v14080_v36, %v10301_v39  ;;  %v3658_v24 = vshrl.u32 %v10308_v1, 16  ;;  %v14522_v26 = vld [vmem:[#allocation23_spill] sm:$0xff] }
 0x323   : > { %v10349_v52 = vsel %vm1134_vm7, %v14509_v3, %v10292_v31  ;;  %14510 = vst [vmem:[#allocation77_spill] sm:$0xff] %v10352_v49  ;;  %v3660_v16 = vshll.u32 %v10308_v1, 16  ;;  %v2939_v43 = vmul.f32 0.25, %v2495_v55  ;;  %v10368_v3 = vld [vmem:[%s14007_s5 + $0x40] sm:$0xff]   ;;  %v3002_v60 = vadd.f32 %v2938_v32, %v2874_v33  ;;  %v14512_v49 = vld [vmem:[#allocation44_spill] sm:$0xff]  ;;  %v14513_v1 = vld [vmem:[#allocation5_spill] sm:$0xff] }
 0x324   : > { %14511 = vst [vmem:[#allocation78_spill] sm:$0xff] %v10355_v30  ;;  %v3098_v59 = vmul.f32 0.25, %v2688_v2  ;;  %v10372_v30 = vadd.f32 %v9977_v25, %v9969_v35  ;;  %v10376_v36 = vadd.f32 %v14512_v49, %v9985_v34  ;;  %v14514_v55 = vld [vmem:[#allocation32_spill] sm:$0xff]  ;;  %v14515_v37 = vrot.slane %v9826_v14, 1  ;;  %4912 = vmatpush1.bf16.msra.mxu0 %v10368_v3 }
 0x325   : > { %v3662_v39 = vrot.slane %v3660_v16, 1  ;;  %v3003_v19 = vadd.f32 %v2939_v43, %v10327_v50  ;;  %v2057_v31 = vadd.f32 %v14514_v55, %v14513_v1  ;;  %v14516_v4 = vrot.slane %v9788_v53, 1  ;;  %v14517_v34 = vld [vmem:[#allocation28_spill] sm:$0xff]  ;;  %4913 = vmatprep.subr.bf16.mxu0 %v14402_v63 }
 0x326   : > { %v10387_v25 = vadd.f32 %v3098_v59, %v2874_v33  ;;  %v3161_v32 = vadd.f32 %v14517_v34, %v10242_v61  ;;  %v14518_v16 = vld [vmem:[#allocation4_spill] sm:$0xff] }
 0x327   : > { %v2685_v2 = vsel %vm1134_vm7, %v14516_v4, %v14515_v37  ;;  %v14519_v49 = vld [vmem:[#allocation20_spill] sm:$0xff]  ;;  %v3663_v1 = vor.u32 %v3662_v39, %v3658_v24  ;;  %v10394_v55 = vpack.c.bf16 %v3003_v19, %v3002_v60  ;;  %v14523_v4 = vrot.slane %v14522_v26, 7  ;;  %v14524_v37 = vld [vmem:[#allocation19_spill] sm:$0xff] }
 0x328   : > { %v3096_v35 = vmul.f32 0.25, %v2685_v2  ;;  %v2049_v43 = vadd.f32 %v14519_v49, %v14518_v16  ;;  %v14521_v14 = vld [vmem:[#allocation40_spill] sm:$0xff]  ;;  %v14525_v21 = vrot.slane %v14524_v37, 7  ;;  %v14526_v2 = vld [vmem:[#allocation41_spill] sm:$0xff]  ;;  %v14528_v19 = vrot.slane %v14522_v26, 1 }
 0x329   : > { %14520 = vst [vmem:[#allocation44_spill] sm:$0xff] %v10394_v55  ;;  %v2218_v53 = vadd.f32 %v14521_v14, %v2057_v31  ;;  %v14529_v39 = vrot.slane %v14524_v37, 1  ;;  %v14530_v60 = vrot.slane %v10295_v0, 1  ;;  %3579 = vrot.lane.b32.xlu0 %v10394_v55, %s8643_s11 }
 0x32a   : > { %v2498_v59 = vsel %vm847_vm3, %v14525_v21, %v14523_v4  ;;  %v3160_v33 = vadd.f32 %v3096_v35, %v10223_v51  ;;  %v2210_v61 = vadd.f32 %v14526_v2, %v2049_v43  ;;  %v14527_v34 = vmov %v14525_v21 }
 0x32b   : > { %v2646_v16 = vsel %vm847_vm3, %v14524_v37, %v14527_v34  ;;  %v2691_v31 = vsel %vm1134_vm7, %v14529_v39, %v14528_v19  ;;  %v2852_v21 = vsel %vm1134_vm7, %v14530_v60, %v10295_v0  ;;  %v10418_v51 = vsel %vm882_vm6, %v3663_v1, %v3667_v44 }
 0x32c   : > { %14531 = vst [vmem:[#allocation5_spill] sm:$0xff] %v10418_v51  ;;  %v2278_v24 = vmax.f32 %v2218_v53, 0.0  ;;  %v2876_v35 = vmul.f32 0.75, %v14524_v37  ;;  %8000 = vmatmul.mubr.msk.bf16.vlgmr.msra.gmra.mrb[96].mxu1 %vm1265_vm8, %v10418_v51  ;;  %v3221_v49 = vpack.c.bf16 %v3161_v32, %v3160_v33  ;;  %v2276_v43 = vmax.f32 %v2210_v61, 0.0  ;;  %v8623_v53 = vld [vmem:[%s14007_s5] sm:$0xff]   ;;  %v14532_v61 = vld [vmem:[#allocation9_spill] sm:$0xff] }
 0x32d   : > { %v2940_v14 = vmul.f32 0.25, %v2646_v16  ;;  %v2941_v4 = vmul.f32 0.25, %v2498_v59  ;;  %v2877_v44 = vmul.f32 0.75, %v14522_v26  ;;  %v3100_v1 = vmul.f32 0.25, %v2691_v31  ;;  %6305 = vmatpush1.bf16.msra.mxu1 %v8623_v53  ;;  %v14533_v16 = vld [vmem:[#allocation33_spill] sm:$0xff] }
 0x32e   : > { %v10425_v2 = vmul.f32 0.75, %v2278_v24  ;;  %v10427_v34 = vmul.f32 0.25, %v2278_v24  ;;  %v3272_v37 = vshrl.u32 %v3221_v49, 16  ;;  %v3275_v19 = vshll.u32 %v3221_v49, 16  ;;  %6306 = vmatprep.subr.bf16.mxu1 %v14402_v63 }
 0x32f   : > { %v2308_v39 = vmul.f32 0.75, %v2276_v43  ;;  %v2340_v60 = vmul.f32 0.25, %v2276_v43  ;;  %v3004_v32 = vadd.f32 %v2940_v14, %v2876_v35  ;;  %v3005_v59 = vadd.f32 %v2941_v4, %v2877_v44  ;;  %v14539_v14 = vld [vmem:[#allocation42_spill] sm:$0xff] }
 0x330   : > { %v3164_v33 = vadd.f32 %v3100_v1, %v2876_v35  ;;  %v2060_v24 = vadd.f32 %v14533_v16, %v14532_v61  ;;  %v3274_v55 = vrot.slane %v3272_v37, 7  ;;  %v14540_v4 = vld [vmem:[#allocation6_spill] sm:$0xff]  ;;  %v14541_v1 = vld [vmem:[#allocation21_spill] sm:$0xff]  ;;  %v10457_v37 = vmul.f32 0.75, %v10295_v0 }
 0x331   : > { %v10437_v26 = vadd.f32 %v10214_v18, %v2308_v39  ;;  %v10440_v31 = vadd.f32 %v2340_v60, %v10425_v2  ;;  %v10443_v53 = vadd.f32 %v2340_v60, %v10212_v15  ;;  %v10446_v49 = vadd.f32 %v10427_v34, %v2308_v39  ;;  %v8624_v18 = vld [vmem:[%s14007_s5 + $0x8] sm:$0xff]   ;;  %v14544_v39 = vld [vmem:[#allocation29_spill] sm:$0xff] }
 0x332   : > { %v10448_v43 = vpack.c.bf16 %v3005_v59, %v3004_v32  ;;  %v2221_v35 = vadd.f32 %v14539_v14, %v2060_v24  ;;  %v2052_v61 = vadd.f32 %v14541_v1, %v14540_v4  ;;  %6307 = vmatpush1.bf16.msra.mxu1 %v8624_v18  ;;  %14542 = vst [vmem:[#allocation23_spill] sm:$0xff] %v10457_v37  ;;  %v10460_v15 = vmul.f32 0.25, %v10343_v57  ;;  %v14548_v14 = vld [vmem:[#allocation30_spill] sm:$0xff]  ;;  %v10479_v57 = vld [vmem:[%s14007_s5 + $0x48] sm:$0xff]  }
 0x333   : > { %14534 = vst [vmem:[#allocation32_spill] sm:$0xff] %v10437_v26  ;;  %14535 = vst [vmem:[#allocation28_spill] sm:$0xff] %v10440_v31  ;;  %v3163_v60 = vadd.f32 %v14544_v39, %v10327_v50  ;;  %v3277_v32 = vor.u32 %v3275_v19, %v3274_v55  ;;  %6308 = vmatprep.subr.bf16.mxu1 %v14402_v63  ;;  %v10466_v59 = vmul.f32 0.25, %v10349_v52  ;;  %v10469_v16 = vmul.f32 0.25, %v10361_v42  ;;  %v14551_v18 = vld [vmem:[#allocation22_spill] sm:$0xff] }
 0x334   : > { %14536 = vst [vmem:[#allocation4_spill] sm:$0xff] %v10443_v53  ;;  %14537 = vst [vmem:[#allocation20_spill] sm:$0xff] %v10446_v49  ;;  %v10471_v24 = vmul.f32 0.25, %v2852_v21  ;;  %v3165_v4 = vadd.f32 %v14548_v14, %v2877_v44  ;;  %3581 = vrot.lane.b32.xlu0 %v10448_v43, %s8643_s11  ;;  %4914 = vmatpush1.bf16.msra.mxu0 %v10479_v57  ;;  %v2279_v39 = vmax.f32 %v2221_v35, 0.0  ;;  %v3677_v52 = vshll.u32 %v3274_v55, 16  ;;  %v8625_v21 = vld [vmem:[%s14007_s5 + $0x10] sm:$0xff]  }
 0x335   : > { %14538 = vst [vmem:[#allocation40_spill] sm:$0xff] %v10448_v43  ;;  %14543 = vst [vmem:[#allocation19_spill] sm:$0xff] %v10460_v15  ;;  %v10483_v50 = vsel %vm8812_vm5, 0, %v3277_v32  ;;  %v14550_v32 = vld [vmem:[#allocation43_spill] sm:$0xff]  ;;  %v3222_v42 = vpack.c.bf16 %v3163_v60, %v10387_v25  ;;  %4915 = vmatprep.subr.bf16.mxu0 %v14402_v63  ;;  %v14552_v51 = vrot.slane %v14551_v18, 7  ;;  %v14555_v37 = vrot.slane %v14551_v18, 1 }
 0x336   : > { %14545 = vst [vmem:[#allocation41_spill] sm:$0xff] %v10466_v59  ;;  %14546 = vst [vmem:[#allocation9_spill] sm:$0xff] %v10469_v16  ;;  %v3672_v44 = vshll.u32 %v10483_v50, 16  ;;  %4043 = vrot.lane.b32.xlu1 %v10483_v50, %s8643_s11  ;;  %v2213_v14 = vadd.f32 %v14550_v32, %v2052_v61  ;;  %6309 = vmatpush1.bf16.msra.mxu1 %v8625_v21  ;;  %v3670_v19 = vshrl.u32 %v10483_v50, 16  ;;  %v14553_v16 = vld [vmem:[#allocation18_spill] sm:$0xff]  ;;  %v10511_v55 = vmul.f32 0.75, %v2279_v39 }
 0x337   : > { %14547 = vst [vmem:[#allocation33_spill] sm:$0xff] %v10471_v24  ;;  %14549 = vst [vmem:[#allocation42_spill] sm:$0xff] %v10483_v50  ;;  %v3223_v43 = vpack.c.bf16 %v3165_v4, %v3164_v33  ;;  %v14554_v35 = vrot.slane %v14553_v16, 7  ;;  %6310 = vmatprep.subr.bf16.mxu1 %v14402_v63  ;;  %v10513_v60 = vmul.f32 0.25, %v2279_v39  ;;  %v3679_v50 = vrot.slane %v3677_v52, 1  ;;  %v8626_v25 = vld [vmem:[%s14007_s5 + $0x18] sm:$0xff]  }
 0x338   : > { %v3674_v1 = vrot.slane %v3672_v44, 1  ;;  %v2277_v21 = vmax.f32 %v2213_v14, 0.0  ;;  %v3279_v44 = vshrl.u32 %v3222_v42, 16  ;;  %v3282_v24 = vshll.u32 %v3222_v42, 16 }
 0x339   : > { %v10507_v61 = vsel %vm847_vm3, %v14554_v35, %v14552_v51  ;;  %v3286_v33 = vshrl.u32 %v3223_v43, 16  ;;  %v14556_v51 = vrot.slane %v14553_v16, 1  ;;  %v10629_v0 = vadd.f32 %v10085_v7, %v10072_v54  ;;  %v14576_v7 = vld [vmem:[#allocation37_spill] sm:$0xff] }
 0x33a   : > { %v3675_v32 = vor.u32 %v3674_v1, %v3670_v19  ;;  %v2309_v4 = vmul.f32 0.75, %v2277_v21  ;;  %v2341_v59 = vmul.f32 0.25, %v2277_v21  ;;  %6311 = vmatpush1.bf16.msra.mxu1 %v8626_v25  ;;  %v3281_v52 = vrot.slane %v3279_v44, 7 }
 0x33b   : > { %v2694_v35 = vsel %vm1134_vm7, %v14556_v51, %v14555_v37  ;;  %v3288_v19 = vrot.slane %v3286_v33, 7  ;;  %v3289_v1 = vshll.u32 %v3223_v43, 16  ;;  %6312 = vmatprep.subr.bf16.mxu1 %v14402_v63  ;;  %v10544_v43 = vld [vmem:[%s14007_s5 + $0x50] sm:$0xff]   ;;  %v10551_v25 = vmul.f32 0.75, %v10437_v26 }
 0x33c   : > { %v10524_v39 = vsel %vm882_vm6, %v3675_v32, %v3679_v50  ;;  %v10528_v42 = vadd.f32 %v10281_v5, %v2309_v4  ;;  %v10531_v14 = vadd.f32 %v2341_v59, %v10511_v55  ;;  %v10534_v37 = vadd.f32 %v2341_v59, %v10279_v8  ;;  %4916 = vmatpush1.bf16.msra.mxu0 %v10544_v43 }
 0x33d   : > { %14557 = vst [vmem:[#allocation6_spill] sm:$0xff] %v10524_v39  ;;  %v10537_v21 = vadd.f32 %v10513_v60, %v2309_v4  ;;  %8003 = vmatprep.mubr.msk.bf16.mxu1 %vm1265_vm8, %v10524_v39  ;;  %v10548_v50 = vmul.f32 0.75, %v10443_v53  ;;  %14560 = vst [vmem:[#allocation30_spill] sm:$0xff] %v10551_v25  ;;  %v10554_v8 = vmul.f32 0.75, %v10446_v49  ;;  %v3284_v59 = vor.u32 %v3282_v24, %v3281_v52  ;;  %v8627_v4 = vld [vmem:[%s14007_s5 + $0x20] sm:$0xff]  }
 0x33e   : > { %14558 = vst [vmem:[#allocation21_spill] sm:$0xff] %v10534_v37  ;;  %v3689_v32 = vshll.u32 %v3281_v52, 16  ;;  %v3291_v44 = vor.u32 %v3289_v1, %v3288_v19  ;;  %v3701_v33 = vshll.u32 %v3288_v19, 16  ;;  %6313 = vmatpush1.bf16.msra.mxu1 %v8627_v4  ;;  %4917 = vmatprep.subr.bf16.mxu0 %v14402_v63  ;;  %v10567_v24 = vmul.f32 0.75, %v10440_v31 }
 0x33f   : > { %14559 = vst [vmem:[#allocation29_spill] sm:$0xff] %v10548_v50  ;;  %14561 = vst [vmem:[#allocation43_spill] sm:$0xff] %v10554_v8  ;;  %6314 = vmatprep.subr.bf16.mxu1 %v14402_v63  ;;  %v14563_v19 = vrot.slane %v14553_v16, 7  ;;  %v2878_v4 = vmul.f32 0.75, %v14553_v16  ;;  %v10579_v51 = vmul.f32 0.75, %v10534_v37  ;;  %v14567_v39 = vrot.slane %v10537_v21, 1 }
 0x340   : > { %14562 = vst [vmem:[#allocation22_spill] sm:$0xff] %v10567_v24  ;;  %v14565_v24 = vrot.slane %v10534_v37, 1  ;;  %v14568_v49 = vrot.slane %v10531_v14, 1  ;;  %v10608_v8 = vsel %vm8812_vm5, 0, %v3284_v59  ;;  %v10612_v25 = vsel %vm8812_vm5, 0, %v3291_v44 }
 0x341   : > { %v2647_v1 = vsel %vm847_vm3, %v14553_v16, %v14563_v19  ;;  %14564 = vst [vmem:[#allocation18_spill] sm:$0xff] %v10579_v51  ;;  %v14566_v19 = vrot.slane %v10528_v42, 1  ;;  %v10597_v5 = vsel %vm1134_vm7, %v14567_v39, %v10537_v21  ;;  %14571 = vst [vmem:[#allocation79_spill] sm:$0xff] %v10612_v25  ;;  %v3703_v50 = vrot.slane %v3701_v33, 1  ;;  %4045 = vrot.lane.b32.xlu1 %v10608_v8, %s8643_s11 }
 0x342   : > { %v10585_v52 = vsel %vm1134_vm7, %v14565_v24, %v10534_v37  ;;  %v10603_v31 = vsel %vm1134_vm7, %v14568_v49, %v10531_v14  ;;  %v14569_v24 = vld [vmem:[#allocation34_spill] sm:$0xff]  ;;  %v3682_v39 = vshrl.u32 %v10608_v8, 16  ;;  %v3684_v26 = vshll.u32 %v10608_v8, 16 }
 0x343   : > { %v10591_v16 = vsel %vm1134_vm7, %v14566_v19, %v10528_v42  ;;  %6315 = vmatpush1.bf16.msra.mxu1 %v14569_v24  ;;  %14570 = vst [vmem:[#allocation34_spill] sm:$0xff] %v10608_v8  ;;  %v3691_v19 = vrot.slane %v3689_v32, 1  ;;  %v3694_v49 = vshrl.u32 %v10612_v25, 16  ;;  %v3696_v59 = vshll.u32 %v10612_v25, 16 }
 0x344   : > { %6316 = vmatprep.subr.bf16.mxu1 %v14402_v63  ;;  %v2879_v32 = vmul.f32 0.75, %v14551_v18  ;;  %v2942_v24 = vmul.f32 0.25, %v2647_v1  ;;  %v2943_v44 = vmul.f32 0.25, %v10507_v61  ;;  %v3102_v51 = vmul.f32 0.25, %v2694_v35  ;;  %v14572_v18 = vld [vmem:[#allocation31_spill] sm:$0xff]  ;;  %v14573_v35 = vld [vmem:[#allocation12_spill] sm:$0xff] }
 0x345   : > { %v3686_v33 = vrot.slane %v3684_v26, 1  ;;  %v3698_v53 = vrot.slane %v3696_v59, 1  ;;  %v10625_v37 = vadd.f32 %v10067_v29, %v10048_v40  ;;  %v2073_v59 = vadd.f32 %v10372_v30, %v14573_v35  ;;  %4047 = vrot.lane.b32.xlu1 %v10612_v25, %s8643_s11  ;;  %v14574_v40 = vld [vmem:[#allocation10_spill] sm:$0xff] }
 0x346   : > { %v3006_v8 = vadd.f32 %v2942_v24, %v2878_v4  ;;  %v3007_v15 = vadd.f32 %v2943_v44, %v2879_v32  ;;  %v3166_v12 = vadd.f32 %v3102_v51, %v2878_v4  ;;  %v3167_v1 = vadd.f32 %v14572_v18, %v2879_v32  ;;  %v14578_v51 = vld [vmem:[#allocation26_spill] sm:$0xff] }
 0x347   : > { %6317 = vmatpush1.bf16.msra.mxu1 %v10150_v56  ;;  %v3687_v61 = vor.u32 %v3686_v33, %v3682_v39  ;;  %v3699_v26 = vor.u32 %v3698_v53, %v3694_v49  ;;  %v2065_v29 = vadd.f32 %v10154_v9, %v14574_v40  ;;  %v14577_v56 = vrot.slane %v14576_v7, 7  ;;  %v14586_v33 = vld [vmem:[#allocation53_spill] sm:$0xff] }
 0x348   : > { %6318 = vmatprep.subr.bf16.mxu1 %v14402_v63  ;;  %v10640_v54 = vpack.c.bf16 %v3007_v15, %v3006_v8  ;;  %v14579_v4 = vrot.slane %v14578_v51, 7  ;;  %v14581_v30 = vrot.slane %v14576_v7, 1  ;;  %v14582_v49 = vrot.slane %v14578_v51, 1  ;;  %v14585_v8 = vld [vmem:[#allocation52_spill] sm:$0xff] }
 0x349   : > { %v10657_v9 = vsel %vm882_vm6, %v3687_v61, %v3691_v19  ;;  %v10660_v15 = vsel %vm882_vm6, %v3699_v26, %v3703_v50  ;;  %v2234_v44 = vadd.f32 %v14585_v8, %v2073_v59  ;;  %v2226_v18 = vadd.f32 %v14586_v33, %v2065_v29  ;;  %v10674_v50 = vld [vmem:[%s14007_s5 + $0x58] sm:$0xff]   ;;  %v14591_v33 = vld [vmem:[#allocation54_spill] sm:$0xff] }
 0x34a   : > { %14575 = vst [vmem:[#allocation31_spill] sm:$0xff] %v10640_v54  ;;  %v2504_v32 = vsel %vm847_vm3, %v14579_v4, %v14577_v56  ;;  %v14580_v39 = vmov %v14579_v4  ;;  %v2697_v24 = vsel %vm1134_vm7, %v14582_v49, %v14581_v30  ;;  %14583 = vst [vmem:[#allocation12_spill] sm:$0xff] %v10657_v9  ;;  %8004 = vmatmul.mubr.msk.bf16.gmra.mrb[100].mxu1 %vm1265_vm8, %v10657_v9  ;;  %3583 = vrot.lane.b32.xlu0 %v10640_v54, %s8643_s11  ;;  %v14587_v29 = vld [vmem:[#allocation13_spill] sm:$0xff]  ;;  %v14588_v4 = vld [vmem:[#allocation48_spill] sm:$0xff] }
 0x34b   : > { %v2648_v53 = vsel %vm847_vm3, %v14578_v51, %v14580_v39  ;;  %14584 = vst [vmem:[#allocation10_spill] sm:$0xff] %v10660_v15  ;;  %6319 = vmatpush1.bf16.msra.mxu1 %v10266_v20  ;;  %v2880_v35 = vmul.f32 0.75, %v14578_v51  ;;  %v2881_v19 = vmul.f32 0.75, %v14576_v7  ;;  %v2945_v40 = vmul.f32 0.25, %v2504_v32  ;;  %8007 = vmatprep.mubr.msk.bf16.mxu1 %vm1265_vm8, %v10660_v15  ;;  %v14589_v39 = vld [vmem:[#allocation11_spill] sm:$0xff] }
 0x34c   : > { %v2944_v61 = vmul.f32 0.25, %v2648_v53  ;;  %v2282_v20 = vmax.f32 %v2234_v44, 0.0  ;;  %v2280_v26 = vmax.f32 %v2226_v18, 0.0  ;;  %v3104_v59 = vmul.f32 0.25, %v2697_v24  ;;  %6320 = vmatprep.subr.bf16.mxu1 %v14402_v63  ;;  %4918 = vmatpush1.bf16.msra.mxu0 %v10674_v50 }
 0x34d   : > { %v2076_v56 = vadd.f32 %v10376_v36, %v14587_v29  ;;  %v3009_v7 = vadd.f32 %v2945_v40, %v2881_v19  ;;  %v3169_v32 = vadd.f32 %v14588_v4, %v2881_v19  ;;  %v2068_v53 = vadd.f32 %v10158_v28, %v14589_v39  ;;  %4919 = vmatprep.subr.bf16.mxu0 %v14402_v63  ;;  %v14592_v19 = vld [vmem:[#allocation55_spill] sm:$0xff] }
 0x34e   : > { %v3008_v51 = vadd.f32 %v2944_v61, %v2880_v35  ;;  %v10685_v30 = vmul.f32 0.75, %v2282_v20  ;;  %v10687_v49 = vmul.f32 0.25, %v2282_v20  ;;  %v2312_v8 = vmul.f32 0.75, %v2280_v26 }
 0x34f   : > { %v2344_v24 = vmul.f32 0.25, %v2280_v26  ;;  %6321 = vmatpush1.bf16.msra.mxu1 %v10368_v3  ;;  %v3168_v44 = vadd.f32 %v3104_v59, %v2880_v35  ;;  %v2237_v18 = vadd.f32 %v14591_v33, %v2076_v56  ;;  %v2229_v61 = vadd.f32 %v14592_v19, %v2068_v53 }
 0x350   : > { %v10691_v36 = vpack.c.bf16 %v3009_v7, %v3008_v51  ;;  %6322 = vmatprep.subr.bf16.mxu1 %v14402_v63  ;;  %v10697_v28 = vadd.f32 %v10427_v34, %v2312_v8  ;;  %v10706_v3 = vadd.f32 %v10687_v49, %v2312_v8  ;;  %v3224_v59 = vpack.c.bf16 %v3167_v1, %v3166_v12  ;;  %v10715_v34 = vld [vmem:[%s14007_s5 + $0x60] sm:$0xff]  }
 0x351   : > { %v10700_v40 = vadd.f32 %v2344_v24, %v10685_v30  ;;  %v10703_v20 = vadd.f32 %v2344_v24, %v10425_v2  ;;  %v2283_v35 = vmax.f32 %v2237_v18, 0.0  ;;  %v2281_v26 = vmax.f32 %v2229_v61, 0.0  ;;  %4920 = vmatpush1.bf16.msra.mxu0 %v10715_v34 }
 0x352   : > { %14590 = vst [vmem:[#allocation37_spill] sm:$0xff] %v10691_v36  ;;  %14593 = vst [vmem:[#allocation26_spill] sm:$0xff] %v10697_v28  ;;  %3585 = vrot.lane.b32.xlu0 %v10691_v36, %s8643_s11  ;;  %v10710_v29 = vpack.c.bf16 %v3169_v32, %v3168_v44  ;;  %v10718_v56 = vmul.f32 0.75, %v10528_v42  ;;  %v10721_v2 = vmul.f32 0.75, %v10537_v21  ;;  %v10724_v51 = vmul.f32 0.75, %v10531_v14  ;;  %4921 = vmatprep.subr.bf16.mxu0 %v14402_v63  ;;  %v14602_v32 = vld [vmem:[#allocation24_spill] sm:$0xff] }
 0x353   : > { %14594 = vst [vmem:[#allocation52_spill] sm:$0xff] %v10700_v40  ;;  %14595 = vst [vmem:[#allocation53_spill] sm:$0xff] %v10706_v3  ;;  %v10727_v7 = vmul.f32 0.25, %v10585_v52  ;;  %6323 = vmatpush1.bf16.msra.mxu1 %v10479_v57  ;;  %v10731_v12 = vmul.f32 0.25, %v10591_v16  ;;  %v10734_v1 = vmul.f32 0.25, %v10597_v5  ;;  %v10737_v4 = vmul.f32 0.25, %v10603_v31 }
 0x354   : > { %6324 = vmatprep.subr.bf16.mxu1 %v14402_v63  ;;  %v10747_v5 = vmul.f32 0.75, %v2283_v35  ;;  %v10749_v31 = vmul.f32 0.25, %v2283_v35  ;;  %v2313_v53 = vmul.f32 0.75, %v2281_v26  ;;  %v2345_v8 = vmul.f32 0.25, %v2281_v26 }
 0x355   : > { %v3293_v33 = vshrl.u32 %v3224_v59, 16  ;;  %v3300_v18 = vshrl.u32 %v10710_v29, 16  ;;  %v10770_v52 = vmul.f32 0.75, %v10703_v20  ;;  %v14603_v44 = vrot.slane %v14602_v32, 7 }
 0x356   : > { %v10756_v19 = vadd.f32 %v10513_v60, %v2313_v53  ;;  %v10759_v61 = vadd.f32 %v2345_v8, %v10747_v5  ;;  %v10762_v35 = vadd.f32 %v2345_v8, %v10511_v55  ;;  %v10765_v26 = vadd.f32 %v10749_v31, %v2313_v53  ;;  %v14600_v60 = vld [vmem:[#allocation35_spill] sm:$0xff] }
 0x357   : > { %6325 = vmatpush1.bf16.msra.mxu1 %v10544_v43  ;;  %14598 = vst [vmem:[#allocation11_spill] sm:$0xff] %v10770_v52  ;;  %v10773_v43 = vmul.f32 0.75, %v10697_v28  ;;  %v14601_v39 = vrot.slane %v14600_v60, 7  ;;  %v10781_v8 = vmul.f32 0.75, %v10706_v3  ;;  %v10784_v53 = vmul.f32 0.75, %v10700_v40 }
 0x358   : > { %14596 = vst [vmem:[#allocation13_spill] sm:$0xff] %v10756_v19  ;;  %14597 = vst [vmem:[#allocation48_spill] sm:$0xff] %v10765_v26  ;;  %6326 = vmatprep.subr.bf16.mxu1 %v14402_v63  ;;  %v3296_v24 = vshll.u32 %v3224_v59, 16  ;;  %v3303_v57 = vshll.u32 %v10710_v29, 16  ;;  %v14135_v16 = vrot.slane %v10762_v35, 1  ;;  %v14136_v54 = vrot.slane %v10756_v19, 1 }
 0x359   : > { %14599 = vst [vmem:[#allocation54_spill] sm:$0xff] %v10773_v43  ;;  %v2507_v55 = vsel %vm847_vm3, %v14603_v44, %v14601_v39  ;;  %14604 = vst [vmem:[#allocation55_spill] sm:$0xff] %v10781_v8  ;;  %v3295_v36 = vrot.slane %v3293_v33, 7  ;;  %v3302_v25 = vrot.slane %v3300_v18, 7  ;;  %v14606_v40 = vmov %v14603_v44  ;;  %v8604_v29 = vld [vmem:[%s14007_s5 + $0x68] sm:$0xff]  }
 0x35a   : > { %14605 = vst [vmem:[#allocation35_spill] sm:$0xff] %v10784_v53  ;;  %v2649_v59 = vsel %vm847_vm3, %v14602_v32, %v14606_v40  ;;  %v10805_v39 = vmul.f32 0.75, %v10762_v35  ;;  %v10811_v40 = vsel %vm1134_vm7, %v14135_v16, %v10762_v35  ;;  %v10817_v15 = vsel %vm1134_vm7, %v14136_v54, %v10756_v19  ;;  %4922 = vmatpush1.bf16.msra.mxu0 %v8604_v29 }
 0x35b   : > { %6327 = vmatpush1.bf16.msra.mxu1 %v10674_v50  ;;  %v10820_v33 = vmul.f32 0.75, %v10756_v19  ;;  %v10823_v50 = vmul.f32 0.75, %v10765_v26  ;;  %v3298_v18 = vor.u32 %v3296_v24, %v3295_v36  ;;  %v3713_v44 = vshll.u32 %v3295_v36, 16  ;;  %4923 = vmatprep.subr.bf16.mxu0 %v14402_v63 }
 0x35c   : > { %6328 = vmatprep.subr.bf16.mxu1 %v14402_v63  ;;  %14607 = vst [vmem:[#allocation24_spill] sm:$0xff] %v10805_v39  ;;  %v3305_v53 = vor.u32 %v3303_v57, %v3302_v25  ;;  %v3725_v8 = vshll.u32 %v3302_v25, 16  ;;  %v14610_v16 = vrot.slane %v10765_v26, 1  ;;  %v14611_v3 = vrot.slane %v14600_v60, 1 }
 0x35d   : > { %14608 = vst [vmem:[#allocation80_spill] sm:$0xff] %v10820_v33  ;;  %14609 = vst [vmem:[#allocation81_spill] sm:$0xff] %v10823_v50  ;;  %v14612_v43 = vrot.slane %v14602_v32, 1  ;;  %v2882_v36 = vmul.f32 0.75, %v14602_v32  ;;  %v2946_v57 = vmul.f32 0.25, %v2649_v59  ;;  %v10842_v25 = vsel %vm8812_vm5, 0, %v3298_v18 }
 0x35e   : > { %v10831_v54 = vsel %vm1134_vm7, %v14610_v16, %v10765_v26  ;;  %14613 = vst [vmem:[#allocation82_spill] sm:$0xff] %v10842_v25  ;;  %v10846_v16 = vsel %vm8812_vm5, 0, %v3305_v53  ;;  %v10849_v24 = vmul.f32 0.75, %v14600_v60  ;;  %v3706_v26 = vshrl.u32 %v10842_v25, 16  ;;  %4049 = vrot.lane.b32.xlu1 %v10842_v25, %s8643_s11 }
 0x35f   : > { %6329 = vmatpush1.bf16.msra.mxu1 %v10715_v34  ;;  %v2700_v50 = vsel %vm1134_vm7, %v14612_v43, %v14611_v3  ;;  %v3715_v34 = vrot.slane %v3713_v44, 1  ;;  %14614 = vst [vmem:[#allocation83_spill] sm:$0xff] %v10846_v16  ;;  %v3708_v3 = vshll.u32 %v10842_v25, 16  ;;  %v3720_v32 = vshll.u32 %v10846_v16, 16 }
 0x360   : > { %6330 = vmatprep.subr.bf16.mxu1 %v14402_v63  ;;  %v3727_v43 = vrot.slane %v3725_v8, 1  ;;  %v3718_v59 = vshrl.u32 %v10846_v16, 16  ;;  %v2947_v44 = vmul.f32 0.25, %v2507_v55  ;;  %v3010_v18 = vadd.f32 %v2946_v57, %v2882_v36  ;;  %v14615_v8 = vld [vmem:[#allocation14_spill] sm:$0xff] }
 0x361   : > { %v3106_v33 = vmul.f32 0.25, %v2700_v50  ;;  %v3710_v53 = vrot.slane %v3708_v3, 1  ;;  %v3722_v9 = vrot.slane %v3720_v32, 1  ;;  %v7813_v60 = vadd.f32 %v10122_v27, %v10116_v47  ;;  %v14616_v57 = vld [vmem:[#allocation38_spill] sm:$0xff]  ;;  %v14620_v27 = vld [vmem:[#allocation16_spill] sm:$0xff] }
 0x362   : > { %v7816_v28 = vadd.f32 %v10137_v62, %v10129_v46  ;;  %v3011_v25 = vadd.f32 %v2947_v44, %v10849_v24  ;;  %v2081_v55 = vadd.f32 %v10625_v37, %v14615_v8  ;;  %v14617_v50 = vrot.slane %v14616_v57, 7  ;;  %4051 = vrot.lane.b32.xlu1 %v10846_v16, %s8643_s11 }
 0x363   : > { %6331 = vmatpush1.bf16.msra.mxu1 %v8604_v29  ;;  %v10863_v19 = vadd.f32 %v3106_v33, %v2882_v36  ;;  %v14618_v29 = vld [vmem:[#allocation27_spill] sm:$0xff]  ;;  %v3711_v39 = vor.u32 %v3710_v53, %v3706_v26  ;;  %v3723_v47 = vor.u32 %v3722_v9, %v3718_v59  ;;  %v2089_v52 = vadd.f32 %v7813_v60, %v14620_v27 }
 0x364   : > { %6332 = vmatprep.subr.bf16.mxu1 %v14402_v63  ;;  %v14619_v3 = vrot.slane %v14618_v29, 7  ;;  %v10879_v33 = vpack.c.bf16 %v3011_v25, %v3010_v18  ;;  %v2242_v37 = vadd.f32 %v10118_v10, %v2081_v55  ;;  %v14623_v36 = vrot.slane %v14616_v57, 1 }
 0x365   : > { %v14624_v44 = vrot.slane %v14618_v29, 1  ;;  %v2884_v26 = vmul.f32 0.75, %v14618_v29  ;;  %v10889_v59 = vsel %vm882_vm6, %v3711_v39, %v3715_v34  ;;  %v10892_v53 = vsel %vm882_vm6, %v3723_v47, %v3727_v43 }
 0x366   : > { %v2510_v32 = vsel %vm847_vm3, %v14619_v3, %v14617_v50  ;;  %v14621_v62 = vmov %v14619_v3  ;;  %14622 = vst [vmem:[#allocation14_spill] sm:$0xff] %v10879_v33  ;;  %14625 = vst [vmem:[#allocation38_spill] sm:$0xff] %v10889_v59  ;;  %v2250_v60 = vadd.f32 %v10110_v41, %v2089_v52  ;;  %v2885_v25 = vmul.f32 0.75, %v14616_v57  ;;  %8008 = vmatmul.mubr.msk.bf16.gmra.mrb[104].mxu1 %vm1265_vm8, %v10889_v59  ;;  %v14628_v52 = vld [vmem:[#allocation17_spill] sm:$0xff]  ;;  %v14629_v57 = vld [vmem:[#allocation15_spill] sm:$0xff] }
 0x367   : > { %v2650_v46 = vsel %vm847_vm3, %v14618_v29, %v14621_v62  ;;  %v2703_v9 = vsel %vm1134_vm7, %v14624_v44, %v14623_v36  ;;  %14626 = vst [vmem:[#allocation27_spill] sm:$0xff] %v10892_v53  ;;  %3587 = vrot.lane.b32.xlu0 %v10879_v33, %s8643_s11  ;;  %v2284_v10 = vmax.f32 %v2242_v37, 0.0  ;;  %v2949_v8 = vmul.f32 0.25, %v2510_v32  ;;  %8011 = vmatprep.mubr.msk.bf16.mxu1 %vm1265_vm8, %v10892_v53  ;;  %v8605_v32 = vld [vmem:[%s14007_s5 + $0x70] sm:$0xff]  }
 0x368   : > { %v2948_v18 = vmul.f32 0.25, %v2650_v46  ;;  %v3108_v55 = vmul.f32 0.25, %v2703_v9  ;;  %v14627_v39 = vrot.slane %v10759_v61, 1  ;;  %v2286_v41 = vmax.f32 %v2250_v60, 0.0  ;;  %4924 = vmatpush1.bf16.msra.mxu0 %v8605_v32  ;;  %6333 = vmatpush1.bf16.msra.mxu1 %v8605_v32 }
 0x369   : > { %v2092_v43 = vadd.f32 %v7816_v28, %v14628_v52  ;;  %v2084_v50 = vadd.f32 %v10629_v0, %v14629_v57  ;;  %v2316_v29 = vmul.f32 0.75, %v2284_v10  ;;  %v2348_v3 = vmul.f32 0.25, %v2284_v10  ;;  %4925 = vmatprep.subr.bf16.mxu0 %v14402_v63  ;;  %6334 = vmatprep.subr.bf16.mxu1 %v14402_v63 }
 0x36a   : > { %v2860_v34 = vsel %vm1134_vm7, %v14627_v39, %v10759_v61  ;;  %v3012_v47 = vadd.f32 %v2948_v18, %v2884_v26  ;;  %v3013_v27 = vadd.f32 %v2949_v8, %v2885_v25  ;;  %v2318_v62 = vmul.f32 0.75, %v2286_v41  ;;  %v14635_v8 = vld [vmem:[#allocation50_spill] sm:$0xff] }
 0x36b   : > { %v2382_v46 = vmul.f32 0.25, %v2286_v41  ;;  %v3172_v37 = vadd.f32 %v3108_v55, %v2884_v26  ;;  %v2253_v36 = vadd.f32 %v10124_v6, %v2092_v43  ;;  %v10914_v44 = vadd.f32 %v10687_v49, %v2316_v29  ;;  %v14634_v49 = vld [vmem:[#allocation49_spill] sm:$0xff] }
 0x36c   : > { %v10917_v28 = vadd.f32 %v2348_v3, %v10685_v30  ;;  %v10919_v0 = vpack.c.bf16 %v3013_v27, %v3012_v47  ;;  %v2245_v9 = vadd.f32 %v10131_v48, %v2084_v50  ;;  %v10924_v10 = vadd.f32 %v2348_v3, %v2318_v62 }
 0x36d   : > { %v10922_v60 = vadd.f32 %v2382_v46, %v2318_v62  ;;  %v10926_v18 = vadd.f32 %v2382_v46, %v2316_v29  ;;  %v2287_v26 = vmax.f32 %v2253_v36, 0.0  ;;  %v10930_v6 = vmul.f32 0.75, %v10759_v61  ;;  %v14637_v36 = vld [vmem:[#allocation36_spill] sm:$0xff] }
 0x36e   : > { %14630 = vst [vmem:[#allocation16_spill] sm:$0xff] %v10919_v0  ;;  %14632 = vst [vmem:[#allocation15_spill] sm:$0xff] %v10924_v10  ;;  %v10933_v30 = vmul.f32 0.25, %v10811_v40  ;;  %v3171_v48 = vadd.f32 %v14634_v49, %v10849_v24  ;;  %v3173_v55 = vadd.f32 %v14635_v8, %v2885_v25  ;;  %3589 = vrot.lane.b32.xlu0 %v10919_v0, %s8643_s11  ;;  %v10942_v39 = vmul.f32 0.25, %v10817_v15  ;;  %v8606_v15 = vld [vmem:[%s14007_s5 + $0x78] sm:$0xff]  }
 0x36f   : > { %14631 = vst [vmem:[#allocation17_spill] sm:$0xff] %v10922_v60  ;;  %14633 = vst [vmem:[#allocation84_spill] sm:$0xff] %v10926_v18  ;;  %v10945_v41 = vmul.f32 0.25, %v10831_v54  ;;  %v10947_v52 = vmul.f32 0.25, %v2860_v34  ;;  %v10958_v50 = vmul.f32 0.75, %v10922_v60  ;;  %v2319_v29 = vmul.f32 0.75, %v2287_v26  ;;  %4926 = vmatpush1.bf16.msra.mxu0 %v8606_v15  ;;  %6335 = vmatpush1.bf16.msra.mxu1 %v8606_v15 }
 0x370   : > { %v2383_v3 = vmul.f32 0.25, %v2287_v26  ;;  %v2285_v47 = vmax.f32 %v2245_v9, 0.0  ;;  %v3226_v27 = vpack.c.bf16 %v3171_v48, %v10863_v19  ;;  %v3227_v32 = vpack.c.bf16 %v3173_v55, %v3172_v37  ;;  %v14639_v8 = vld [vmem:[#allocation25_spill] sm:$0xff]  ;;  %5184 = vmatprep.subr.bf16.mxu0 %v14402_v63  ;;  %6593 = vmatprep.subr.bf16.mxu1 %v14402_v63 }
 0x371   : > { %14636 = vst [vmem:[#allocation49_spill] sm:$0xff] %v10958_v50  ;;  %v10965_v46 = vmul.f32 0.75, %v10917_v28  ;;  %v14638_v49 = vrot.slane %v14637_v36, 7  ;;  %v14640_v24 = vrot.slane %v14639_v8, 7  ;;  %v14641_v40 = vrot.slane %v14637_v36, 1 }
 0x372   : > { %v14642_v9 = vrot.slane %v14639_v8, 1  ;;  %v10979_v37 = vadd.f32 %v2383_v3, %v2319_v29  ;;  %v2317_v26 = vmul.f32 0.75, %v2285_v47  ;;  %v2349_v48 = vmul.f32 0.25, %v2285_v47 }
 0x373   : > { %v2513_v54 = vsel %vm847_vm3, %v14640_v24, %v14638_v49  ;;  %v3307_v55 = vshrl.u32 %v3226_v27, 16  ;;  %v10982_v15 = vmul.f32 0.75, %v10914_v44  ;;  %v10985_v24 = vmul.f32 0.75, %v10926_v18 }
 0x374   : > { %v2706_v19 = vsel %vm1134_vm7, %v14642_v9, %v14641_v40  ;;  %14643 = vst [vmem:[#allocation50_spill] sm:$0xff] %v10979_v37  ;;  %v10988_v49 = vmul.f32 0.75, %v10924_v10  ;;  %v14647_v40 = vrot.slane %v14639_v8, 7  ;;  %v14159_v43 = vrot.slane %v10979_v37, 1 }
 0x375   : > { %14644 = vst [vmem:[#allocation36_spill] sm:$0xff] %v10982_v15  ;;  %14645 = vst [vmem:[#allocation25_spill] sm:$0xff] %v10985_v24  ;;  %v10996_v62 = vadd.f32 %v10749_v31, %v2317_v26  ;;  %v3310_v47 = vshll.u32 %v3226_v27, 16  ;;  %v2886_v34 = vmul.f32 0.75, %v14639_v8  ;;  %v10999_v57 = vadd.f32 %v2349_v48, %v2319_v29 }
 0x376   : > { %14646 = vst [vmem:[#allocation85_spill] sm:$0xff] %v10988_v49  ;;  %v2651_v9 = vsel %vm847_vm3, %v14639_v8, %v14647_v40  ;;  %v11002_v25 = vadd.f32 %v2349_v48, %v10747_v5  ;;  %v11004_v33 = vadd.f32 %v2383_v3, %v2317_v26  ;;  %v3314_v0 = vshrl.u32 %v3227_v32, 16 }
 0x377   : > { %14648 = vst [vmem:[#allocation86_spill] sm:$0xff] %v10999_v57  ;;  %v2865_v40 = vsel %vm1134_vm7, %v14159_v43, %v10979_v37  ;;  %v14160_v16 = vrot.slane %v10996_v62, 1  ;;  %v3309_v31 = vrot.slane %v3307_v55, 7  ;;  %v3317_v50 = vshll.u32 %v3227_v32, 16 }
 0x378   : > { %14649 = vst [vmem:[#allocation87_spill] sm:$0xff] %v11004_v33  ;;  %v11012_v27 = vmul.f32 0.75, %v10979_v37  ;;  %v11014_v29 = vmul.f32 0.25, %v2865_v40  ;;  %v11017_v5 = vmul.f32 0.75, %v10996_v62  ;;  %v2887_v3 = vmul.f32 0.75, %v14637_v36 }
 0x379   : > { %v14168_v8 = vrot.slane %v11002_v25, 1  ;;  %v14172_v26 = vrot.slane %v11004_v33, 1  ;;  %v2862_v32 = vsel %vm1134_vm7, %v14160_v16, %v10996_v62  ;;  %v11028_v55 = vmul.f32 0.75, %v11002_v25 }
 0x37a   : > { %14650 = vst [vmem:[#allocation88_spill] sm:$0xff] %v11012_v27  ;;  %14651 = vst [vmem:[#allocation89_spill] sm:$0xff] %v11014_v29  ;;  %v11031_v40 = vmul.f32 0.75, %v11004_v33  ;;  %v11034_v43 = vmul.f32 0.75, %v10999_v57  ;;  %v11036_v36 = vmul.f32 0.25, %v2862_v32  ;;  %v14655_v29 = vrot.slane %v10999_v57, 1 }
 0x37b   : > { %v2861_v48 = vsel %vm1134_vm7, %v14168_v8, %v11002_v25  ;;  %v2863_v16 = vsel %vm1134_vm7, %v14172_v26, %v11004_v33  ;;  %v3312_v60 = vor.u32 %v3310_v47, %v3309_v31  ;;  %v3737_v49 = vshll.u32 %v3309_v31, 16 }
 0x37c   : > { %14652 = vst [vmem:[#allocation90_spill] sm:$0xff] %v11031_v40  ;;  %14653 = vst [vmem:[#allocation91_spill] sm:$0xff] %v11034_v43  ;;  %v2864_v27 = vsel %vm1134_vm7, %v14655_v29, %v10999_v57  ;;  %v11050_v37 = vmul.f32 0.25, %v2861_v48  ;;  %v11052_v32 = vmul.f32 0.25, %v2863_v16  ;;  %v3316_v43 = vrot.slane %v3314_v0, 7 }
 0x37d   : > { %14654 = vst [vmem:[#allocation92_spill] sm:$0xff] %v11036_v36  ;;  %v11054_v63 = vmul.f32 0.25, %v2864_v27  ;;  %v11058_v8 = vsel %vm8812_vm5, 0, %v3312_v60  ;;  %v2950_v10 = vmul.f32 0.25, %v2651_v9  ;;  %v2951_v26 = vmul.f32 0.25, %v2513_v54  ;;  %v14659_v60 = vld [vmem:[#allocation51_spill] sm:$0xff] }
 0x37e   : > { %14656 = vst [vmem:[#allocation93_spill] sm:$0xff] %v11052_v32  ;;  %14658 = vst [vmem:[#allocation95_spill] sm:$0xff] %v11058_v8  ;;  %v3730_v24 = vshrl.u32 %v11058_v8, 16  ;;  %v3732_v53 = vshll.u32 %v11058_v8, 16  ;;  %v3739_v29 = vrot.slane %v3737_v49, 1  ;;  %4053 = vrot.lane.b32.xlu1 %v11058_v8, %s8643_s11  ;;  %v3110_v16 = vmul.f32 0.25, %v2706_v19 }
 0x37f   : > { %14657 = vst [vmem:[#allocation94_spill] sm:$0xff] %v11054_v63  ;;  %v3319_v47 = vor.u32 %v3317_v50, %v3316_v43  ;;  %v3749_v27 = vshll.u32 %v3316_v43, 16  ;;  %v3014_v48 = vadd.f32 %v2950_v10, %v2886_v34  ;;  %v3015_v31 = vadd.f32 %v2951_v26, %v2887_v3 }
 0x380   : > { %v3734_v63 = vrot.slane %v3732_v53, 1  ;;  %v3174_v57 = vadd.f32 %v3110_v16, %v2886_v34  ;;  %v3175_v32 = vadd.f32 %v14659_v60, %v2887_v3  ;;  %v14660_v0 = vrot.slane %v10108_v23, 7 }
 0x381   : > { %v14661_v54 = vrot.slane %v10014_v17, 7  ;;  %v11072_v49 = vsel %vm8812_vm5, 0, %v3319_v47  ;;  %v3751_v8 = vrot.slane %v3749_v27, 1  ;;  %v11074_v19 = vpack.c.bf16 %v3015_v31, %v3014_v48 }
 0x382   : > { %14662 = vst [vmem:[#allocation51_spill] sm:$0xff] %v11072_v49  ;;  %v3735_v43 = vor.u32 %v3734_v63, %v3730_v24  ;;  %v3742_v50 = vshrl.u32 %v11072_v49, 16  ;;  %v3744_v34 = vshll.u32 %v11072_v49, 16  ;;  %4055 = vrot.lane.b32.xlu1 %v11072_v49, %s8643_s11  ;;  %v14665_v3 = vrot.slane %v10108_v23, 1  ;;  %v14710_v49 = vld [vmem:[#allocation65_spill] sm:$0xff] }
 0x383   : > { %v2516_v9 = vsel %vm847_vm3, %v14661_v54, %v14660_v0  ;;  %14663 = vst [vmem:[#allocation96_spill] sm:$0xff] %v11074_v19  ;;  %v14664_v10 = vmov %v14661_v54  ;;  %v14666_v26 = vrot.slane %v10014_v17, 1  ;;  %3591 = vrot.lane.b32.xlu0 %v11074_v19, %s8643_s11  ;;  %v2888_v47 = vmul.f32 0.75, %v10014_v17 }
 0x384   : > { %v2652_v53 = vsel %vm847_vm3, %v10014_v17, %v14664_v10  ;;  %v2889_v63 = vmul.f32 0.75, %v10108_v23  ;;  %v2953_v27 = vmul.f32 0.25, %v2516_v9  ;;  %v11094_v48 = vsel %vm882_vm6, %v3735_v43, %v3739_v29  ;;  %v14669_v17 = vld [vmem:[#allocation45_spill] sm:$0xff] }
 0x385   : > { %v2709_v16 = vsel %vm1134_vm7, %v14666_v26, %v14665_v3  ;;  %v2952_v24 = vmul.f32 0.25, %v2652_v53  ;;  %14667 = vst [vmem:[#allocation97_spill] sm:$0xff] %v11094_v48  ;;  %v3746_v31 = vrot.slane %v3744_v34, 1  ;;  %v3228_v0 = vpack.c.bf16 %v3175_v32, %v3174_v57  ;;  %8012 = vmatmul.mubr.msk.bf16.gmra.mrb[108].mxu1 %vm1265_vm8, %v11094_v48  ;;  %v14734_v48 = vld [vmem:[#allocation9_spill] sm:$0xff] }
 0x386   : > { %v3112_v60 = vmul.f32 0.25, %v2709_v16  ;;  %v3017_v10 = vadd.f32 %v2953_v27, %v2889_v63  ;;  %v3177_v3 = vadd.f32 %v10233_v45, %v2889_v63  ;;  %v14668_v26 = vrot.slane %v10098_v58, 7 }
 0x387   : > { %v3016_v54 = vadd.f32 %v2952_v24, %v2888_v47  ;;  %v14670_v19 = vrot.slane %v14669_v17, 7  ;;  %v3747_v9 = vor.u32 %v3746_v31, %v3742_v50  ;;  %v3321_v29 = vshrl.u32 %v3228_v0, 16 }
 0x388   : > { %v3176_v53 = vadd.f32 %v3112_v60, %v2888_v47  ;;  %v3324_v43 = vshll.u32 %v3228_v0, 16  ;;  %v14673_v16 = vrot.slane %v10098_v58, 1  ;;  %v14674_v45 = vrot.slane %v14669_v17, 1 }
 0x389   : > { %v2519_v23 = vsel %vm847_vm3, %v14670_v19, %v14668_v26  ;;  %v11104_v34 = vpack.c.bf16 %v3017_v10, %v3016_v54  ;;  %v14672_v57 = vmov %v14670_v19  ;;  %v2890_v24 = vmul.f32 0.75, %v14669_v17  ;;  %v14677_v10 = vld [vmem:[#allocation47_spill] sm:$0xff] }
 0x38a   : > { %v2653_v32 = vsel %vm847_vm3, %v14669_v17, %v14672_v57  ;;  %v2712_v63 = vsel %vm1134_vm7, %v14674_v45, %v14673_v16  ;;  %v11117_v19 = vsel %vm882_vm6, %v3747_v9, %v3751_v8  ;;  %v3323_v50 = vrot.slane %v3321_v29, 7 }
 0x38b   : > { %14671 = vst [vmem:[#allocation45_spill] sm:$0xff] %v11104_v34  ;;  %14675 = vst [vmem:[#allocation98_spill] sm:$0xff] %v11117_v19  ;;  %v3229_v47 = vpack.c.bf16 %v3177_v3, %v3176_v53  ;;  %v2891_v27 = vmul.f32 0.75, %v10098_v58  ;;  %8015 = vmatprep.mubr.msk.bf16.mxu1 %vm1265_vm8, %v11117_v19  ;;  %3593 = vrot.lane.b32.xlu0 %v11104_v34, %s8643_s11  ;;  %v2954_v31 = vmul.f32 0.25, %v2653_v32  ;;  %v2955_v60 = vmul.f32 0.25, %v2519_v23 }
 0x38c   : > { %v3114_v0 = vmul.f32 0.25, %v2712_v63  ;;  %v14676_v54 = vrot.slane %v10101_v13, 7  ;;  %v14678_v26 = vrot.slane %v14677_v10, 7  ;;  %v3326_v17 = vor.u32 %v3324_v43, %v3323_v50 }
 0x38d   : > { %v3761_v9 = vshll.u32 %v3323_v50, 16  ;;  %v3328_v3 = vshrl.u32 %v3229_v47, 16  ;;  %v3331_v53 = vshll.u32 %v3229_v47, 16  ;;  %v3018_v58 = vadd.f32 %v2954_v31, %v2890_v24 }
 0x38e   : > { %v2522_v8 = vsel %vm847_vm3, %v14678_v26, %v14676_v54  ;;  %v3019_v29 = vadd.f32 %v2955_v60, %v2891_v27  ;;  %v3178_v57 = vadd.f32 %v3114_v0, %v2890_v24  ;;  %v3179_v16 = vadd.f32 %v10204_v38, %v2891_v27 }
 0x38f   : > { %v11132_v32 = vsel %vm8812_vm5, 0, %v3326_v17  ;;  %v3763_v23 = vrot.slane %v3761_v9, 1  ;;  %v3330_v45 = vrot.slane %v3328_v3, 7  ;;  %v14680_v63 = vmov %v14678_v26 }
 0x390   : > { %14679 = vst [vmem:[#allocation47_spill] sm:$0xff] %v11132_v32  ;;  %v2654_v54 = vsel %vm847_vm3, %v14677_v10, %v14680_v63  ;;  %v3754_v43 = vshrl.u32 %v11132_v32, 16  ;;  %v3756_v50 = vshll.u32 %v11132_v32, 16  ;;  %4057 = vrot.lane.b32.xlu1 %v11132_v32, %s8643_s11  ;;  %v11142_v24 = vpack.c.bf16 %v3019_v29, %v3018_v58 }
 0x391   : > { %v14682_v38 = vrot.slane %v10101_v13, 1  ;;  %v14683_v47 = vrot.slane %v14677_v10, 1  ;;  %v3333_v31 = vor.u32 %v3331_v53, %v3330_v45  ;;  %v3773_v60 = vshll.u32 %v3330_v45, 16 }
 0x392   : > { %14681 = vst [vmem:[#allocation99_spill] sm:$0xff] %v11142_v24  ;;  %v2892_v0 = vmul.f32 0.75, %v14677_v10  ;;  %v2893_v26 = vmul.f32 0.75, %v10101_v13  ;;  %v3758_v17 = vrot.slane %v3756_v50, 1  ;;  %3595 = vrot.lane.b32.xlu0 %v11142_v24, %s8643_s11  ;;  %v2956_v9 = vmul.f32 0.25, %v2654_v54  ;;  %v14686_v24 = vld [vmem:[#allocation57_spill] sm:$0xff] }
 0x393   : > { %v2715_v27 = vsel %vm1134_vm7, %v14683_v47, %v14682_v38  ;;  %v2957_v3 = vmul.f32 0.25, %v2522_v8  ;;  %v11155_v29 = vsel %vm8812_vm5, 0, %v3333_v31  ;;  %v3775_v63 = vrot.slane %v3773_v60, 1 }
 0x394   : > { %v3116_v58 = vmul.f32 0.25, %v2715_v27  ;;  %14684 = vst [vmem:[#allocation100_spill] sm:$0xff] %v11155_v29  ;;  %v3181_v38 = vadd.f32 %v10208_v22, %v2893_v26  ;;  %v3230_v53 = vpack.c.bf16 %v3179_v16, %v3178_v57  ;;  %v3759_v45 = vor.u32 %v3758_v17, %v3754_v43  ;;  %4059 = vrot.lane.b32.xlu1 %v11155_v29, %s8643_s11  ;;  %v14688_v57 = vld [vmem:[#allocation46_spill] sm:$0xff] }
 0x395   : > { %v3766_v10 = vshrl.u32 %v11155_v29, 16  ;;  %v3768_v13 = vshll.u32 %v11155_v29, 16  ;;  %v3020_v50 = vadd.f32 %v2956_v9, %v2892_v0  ;;  %v3021_v54 = vadd.f32 %v2957_v3, %v2893_v26 }
 0x396   : > { %v3180_v8 = vadd.f32 %v3116_v58, %v2892_v0  ;;  %v3335_v47 = vshrl.u32 %v3230_v53, 16  ;;  %v3338_v27 = vshll.u32 %v3230_v53, 16  ;;  %v11163_v31 = vsel %vm882_vm6, %v3759_v45, %v3763_v23 }
 0x397   : > { %14685 = vst [vmem:[#allocation101_spill] sm:$0xff] %v11163_v31  ;;  %v3770_v60 = vrot.slane %v3768_v13, 1  ;;  %v14687_v22 = vrot.slane %v14686_v24, 7  ;;  %v14689_v16 = vrot.slane %v14688_v57, 7  ;;  %8016 = vmatmul.mubr.msk.bf16.gmra.mrb[112].mxu1 %vm1265_vm8, %v11163_v31  ;;  %v11176_v0 = vpack.c.bf16 %v3021_v54, %v3020_v50 }
 0x398   : > { %v3337_v26 = vrot.slane %v3335_v47, 7  ;;  %v3231_v23 = vpack.c.bf16 %v3181_v38, %v3180_v8  ;;  %v14692_v9 = vrot.slane %v14686_v24, 1  ;;  %v14693_v3 = vrot.slane %v14688_v57, 1 }
 0x399   : > { %v2525_v43 = vsel %vm847_vm3, %v14689_v16, %v14687_v22  ;;  %v14690_v17 = vmov %v14689_v16  ;;  %14691 = vst [vmem:[#allocation57_spill] sm:$0xff] %v11176_v0  ;;  %v3771_v53 = vor.u32 %v3770_v60, %v3766_v10  ;;  %v2894_v45 = vmul.f32 0.75, %v14688_v57  ;;  %3597 = vrot.lane.b32.xlu0 %v11176_v0, %s8643_s11  ;;  %v14696_v60 = vld [vmem:[#allocation64_spill] sm:$0xff] }
 0x39a   : > { %v2655_v29 = vsel %vm847_vm3, %v14688_v57, %v14690_v17  ;;  %v2718_v58 = vsel %vm1134_vm7, %v14693_v3, %v14692_v9  ;;  %v2895_v13 = vmul.f32 0.75, %v14686_v24  ;;  %v3340_v16 = vor.u32 %v3338_v27, %v3337_v26  ;;  %v14697_v3 = vld [vmem:[#allocation70_spill] sm:$0xff] }
 0x39b   : > { %v2958_v22 = vmul.f32 0.25, %v2655_v29  ;;  %v3785_v50 = vshll.u32 %v3337_v26, 16  ;;  %v3342_v54 = vshrl.u32 %v3231_v23, 16  ;;  %v3345_v47 = vshll.u32 %v3231_v23, 16 }
 0x39c   : > { %v11188_v38 = vsel %vm882_vm6, %v3771_v53, %v3775_v63  ;;  %v2959_v8 = vmul.f32 0.25, %v2525_v43  ;;  %v3118_v32 = vmul.f32 0.25, %v2718_v58  ;;  %v11194_v24 = vsel %vm8812_vm5, 0, %v3340_v16  ;;  %v14699_v53 = vld [vmem:[#allocation61_spill] sm:$0xff] }
 0x39d   : > { %14694 = vst [vmem:[#allocation46_spill] sm:$0xff] %v11188_v38  ;;  %v3022_v17 = vadd.f32 %v2958_v22, %v2894_v45  ;;  %8019 = vmatprep.mubr.msk.bf16.mxu1 %vm1265_vm8, %v11188_v38  ;;  %14695 = vst [vmem:[#allocation102_spill] sm:$0xff] %v11194_v24  ;;  %v3787_v29 = vrot.slane %v3785_v50, 1  ;;  %v3344_v10 = vrot.slane %v3342_v54, 7  ;;  %v3183_v27 = vadd.f32 %v14696_v60, %v2895_v13 }
 0x39e   : > { %v3778_v57 = vshrl.u32 %v11194_v24, 16  ;;  %v3780_v26 = vshll.u32 %v11194_v24, 16  ;;  %4061 = vrot.lane.b32.xlu1 %v11194_v24, %s8643_s11  ;;  %v3023_v63 = vadd.f32 %v2959_v8, %v2895_v13  ;;  %v3182_v43 = vadd.f32 %v3118_v32, %v2894_v45 }
 0x39f   : > { %v3347_v23 = vor.u32 %v3345_v47, %v3344_v10  ;;  %v3797_v9 = vshll.u32 %v3344_v10, 16  ;;  %v14698_v58 = vrot.slane %v14697_v3, 7  ;;  %v14700_v22 = vrot.slane %v14699_v53, 7 }
 0x3a0   : > { %v3782_v60 = vrot.slane %v3780_v26, 1  ;;  %v11210_v0 = vpack.c.bf16 %v3023_v63, %v3022_v17  ;;  %v14703_v24 = vrot.slane %v14697_v3, 1  ;;  %v14704_v32 = vrot.slane %v14699_v53, 1 }
 0x3a1   : > { %v2528_v16 = vsel %vm847_vm3, %v14700_v22, %v14698_v58  ;;  %v14701_v50 = vmov %v14700_v22  ;;  %v2896_v13 = vmul.f32 0.75, %v14699_v53  ;;  %v11220_v47 = vsel %vm8812_vm5, 0, %v3347_v23  ;;  %v14706_v23 = vld [vmem:[#allocation19_spill] sm:$0xff] }
 0x3a2   : > { %v2656_v54 = vsel %vm847_vm3, %v14699_v53, %v14701_v50  ;;  %14702 = vst [vmem:[#allocation64_spill] sm:$0xff] %v11210_v0  ;;  %v2721_v45 = vsel %vm1134_vm7, %v14704_v32, %v14703_v24  ;;  %14705 = vst [vmem:[#allocation70_spill] sm:$0xff] %v11220_v47  ;;  %v3799_v8 = vrot.slane %v3797_v9, 1  ;;  %v2897_v10 = vmul.f32 0.75, %v14697_v3  ;;  %3599 = vrot.lane.b32.xlu0 %v11210_v0, %s8643_s11 }
 0x3a3   : > { %v2960_v58 = vmul.f32 0.25, %v2656_v54  ;;  %v3783_v22 = vor.u32 %v3782_v60, %v3778_v57  ;;  %v3790_v17 = vshrl.u32 %v11220_v47, 16  ;;  %v3792_v26 = vshll.u32 %v11220_v47, 16  ;;  %4063 = vrot.lane.b32.xlu1 %v11220_v47, %s8643_s11  ;;  %v14708_v60 = vld [vmem:[#allocation2_spill] sm:$0xff] }
 0x3a4   : > { %v2961_v24 = vmul.f32 0.25, %v2528_v16  ;;  %v3120_v53 = vmul.f32 0.25, %v2721_v45  ;;  %v3185_v50 = vadd.f32 %v14706_v23, %v2897_v10  ;;  %v3232_v9 = vpack.c.bf16 %v3183_v27, %v3182_v43  ;;  %v14713_v27 = vld [vmem:[#allocation69_spill] sm:$0xff]  ;;  %v14715_v43 = vld [vmem:[#allocation62_spill] sm:$0xff] }
 0x3a5   : > { %v3024_v63 = vadd.f32 %v2960_v58, %v2896_v13  ;;  %v11231_v3 = vsel %vm882_vm6, %v3783_v22, %v3787_v29  ;;  %v3794_v57 = vrot.slane %v3792_v26, 1  ;;  %v14709_v32 = vshrl.u32 %v14708_v60, 16  ;;  %v14711_v58 = vld [vmem:[#allocation58_spill] sm:$0xff]  ;;  %v14717_v26 = vld [vmem:[#allocation23_spill] sm:$0xff] }
 0x3a6   : > { %14707 = vst [vmem:[#allocation61_spill] sm:$0xff] %v11231_v3  ;;  %v3025_v54 = vadd.f32 %v2961_v24, %v2897_v10  ;;  %8020 = vmatmul.mubr.msk.bf16.gmra.mrb[116].mxu1 %vm1265_vm8, %v11231_v3  ;;  %v3184_v0 = vadd.f32 %v3120_v53, %v2896_v13  ;;  %v3349_v47 = vshrl.u32 %v3232_v9, 16  ;;  %v3352_v16 = vshll.u32 %v3232_v9, 16  ;;  %v14718_v24 = vld [vmem:[#allocation33_spill] sm:$0xff]  ;;  %v14722_v9 = vld [vmem:[#allocation60_spill] sm:$0xff] }
 0x3a7   : > { %v3639_v34 = vor.u32 %v14710_v49, %v14709_v32  ;;  %v3641_v45 = vshll.u32 %v14711_v58, 16  ;;  %v3795_v38 = vor.u32 %v3794_v57, %v3790_v17  ;;  %v14714_v29 = vrot.slane %v14713_v27, 1  ;;  %v14720_v17 = vld [vmem:[#allocation68_spill] sm:$0xff]  ;;  %v14724_v58 = vld [vmem:[#allocation77_spill] sm:$0xff] }
 0x3a8   : > { %v11239_v23 = vpack.c.bf16 %v3025_v54, %v3024_v63  ;;  %v14716_v22 = vrot.slane %v14715_v43, 1  ;;  %v3191_v49 = vadd.f32 %v14718_v24, %v14717_v26  ;;  %v3351_v32 = vrot.slane %v3349_v47, 7  ;;  %v14726_v24 = vld [vmem:[#allocation71_spill] sm:$0xff] }
 0x3a9   : > { %v3233_v19 = vpack.c.bf16 %v3185_v50, %v3184_v0  ;;  %v3643_v3 = vrot.slane %v3641_v45, 1  ;;  %v11249_v53 = vsel %vm882_vm6, %v3795_v38, %v3799_v8  ;;  %v14721_v63 = vrot.slane %v14720_v17, 1  ;;  %v14728_v0 = vld [vmem:[#allocation63_spill] sm:$0xff] }
 0x3aa   : > { %14712 = vst [vmem:[#allocation19_spill] sm:$0xff] %v11239_v23  ;;  %v2730_v10 = vsel %vm1134_vm7, %v14716_v22, %v14714_v29  ;;  %14719 = vst [vmem:[#allocation65_spill] sm:$0xff] %v11249_v53  ;;  %3601 = vrot.lane.b32.xlu0 %v11239_v23, %s8643_s11  ;;  %v14723_v57 = vrot.slane %v14722_v9, 1  ;;  %v14725_v29 = vld [vmem:[#allocation41_spill] sm:$0xff]  ;;  %v14727_v47 = vrot.slane %v14726_v24, 1  ;;  %v14729_v50 = vrot.slane %v14728_v0, 1  ;;  %8023 = vmatprep.mubr.msk.bf16.mxu1 %vm1265_vm8, %v11249_v53 }
 0x3ab   : > { %v3126_v13 = vmul.f32 0.25, %v2730_v10  ;;  %v3187_v22 = vadd.f32 %v14725_v29, %v14724_v58  ;;  %v3354_v38 = vor.u32 %v3352_v16, %v3351_v32  ;;  %v3809_v8 = vshll.u32 %v3351_v32, 16 }
 0x3ac   : > { %v2724_v54 = vsel %vm1134_vm7, %v14723_v57, %v14721_v63  ;;  %v2727_v45 = vsel %vm1134_vm7, %v14729_v50, %v14727_v47  ;;  %v3356_v10 = vshrl.u32 %v3233_v19, 16  ;;  %v3359_v23 = vshll.u32 %v3233_v19, 16  ;;  %v14731_v63 = vld [vmem:[#allocation75_spill] sm:$0xff]  ;;  %v14733_v50 = vld [vmem:[#allocation78_spill] sm:$0xff] }
 0x3ad   : > { %v11268_v60 = vsel %vm882_vm6, %v3639_v34, %v3643_v3  ;;  %v3190_v57 = vadd.f32 %v3126_v13, %v14731_v63  ;;  %v3122_v31 = vmul.f32 0.25, %v2724_v54  ;;  %v3124_v29 = vmul.f32 0.25, %v2727_v45  ;;  %v14735_v3 = vld [vmem:[#allocation72_spill] sm:$0xff]  ;;  %v14736_v45 = vld [vmem:[#allocation74_spill] sm:$0xff] }
 0x3ae   : > { %14730 = vst [vmem:[#allocation58_spill] sm:$0xff] %v11268_v60  ;;  %v11273_v40 = vsel %vm8812_vm5, 0, %v3354_v38  ;;  %v3811_v15 = vrot.slane %v3809_v8, 1  ;;  %v3358_v47 = vrot.slane %v3356_v10, 7  ;;  %v3189_v53 = vadd.f32 %v14734_v48, %v14733_v50  ;;  %4113 = vrot.lane.b32.xlu0 %v11268_v60, %s8643_s11 }
 0x3af   : > { %14732 = vst [vmem:[#allocation69_spill] sm:$0xff] %v11273_v40  ;;  %v3802_v16 = vshrl.u32 %v11273_v40, 16  ;;  %v3804_v19 = vshll.u32 %v11273_v40, 16  ;;  %4065 = vrot.lane.b32.xlu1 %v11273_v40, %s8643_s11  ;;  %v3236_v34 = vpack.c.bf16 %v3191_v49, %v3190_v57  ;;  %v3186_v32 = vadd.f32 %v3122_v31, %v14735_v3 }
 0x3b0   : > { %v3361_v13 = vor.u32 %v3359_v23, %v3358_v47  ;;  %v3821_v54 = vshll.u32 %v3358_v47, 16  ;;  %v3188_v38 = vadd.f32 %v3124_v29, %v14736_v45  ;;  %v14737_v8 = vrot.slane %v14726_v24, 7 }
 0x3b1   : > { %v14738_v48 = vrot.slane %v14728_v0, 7  ;;  %v3806_v18 = vrot.slane %v3804_v19, 1  ;;  %v3377_v33 = vshrl.u32 %v3236_v34, 16  ;;  %v3380_v36 = vshll.u32 %v3236_v34, 16 }
 0x3b2   : > { %v3234_v40 = vpack.c.bf16 %v3187_v22, %v3186_v32  ;;  %v11292_v60 = vsel %vm8812_vm5, 0, %v3361_v13  ;;  %v3823_v49 = vrot.slane %v3821_v54, 1  ;;  %v3235_v31 = vpack.c.bf16 %v3189_v53, %v3188_v38 }
 0x3b3   : > { %v2534_v10 = vsel %vm847_vm3, %v14738_v48, %v14737_v8  ;;  %14739 = vst [vmem:[#allocation62_spill] sm:$0xff] %v11292_v60  ;;  %v14740_v23 = vmov %v14738_v48  ;;  %v3807_v24 = vor.u32 %v3806_v18, %v3802_v16  ;;  %v3814_v29 = vshrl.u32 %v11292_v60, 16  ;;  %4067 = vrot.lane.b32.xlu1 %v11292_v60, %s8643_s11 }
 0x3b4   : > { %v2658_v57 = vsel %vm847_vm3, %v14728_v0, %v14740_v23  ;;  %v3816_v47 = vshll.u32 %v11292_v60, 16  ;;  %v3379_v22 = vrot.slane %v3377_v33, 7  ;;  %v3363_v19 = vshrl.u32 %v3234_v40, 16 }
 0x3b5   : > { %v3366_v34 = vshll.u32 %v3234_v40, 16  ;;  %v3370_v32 = vshrl.u32 %v3235_v31, 16  ;;  %v3373_v13 = vshll.u32 %v3235_v31, 16  ;;  %v11303_v53 = vsel %vm882_vm6, %v3807_v24, %v3811_v15 }
 0x3b6   : > { %14741 = vst [vmem:[#allocation23_spill] sm:$0xff] %v11303_v53  ;;  %v3818_v54 = vrot.slane %v3816_v47, 1  ;;  %v3382_v38 = vor.u32 %v3380_v36, %v3379_v22  ;;  %v2964_v8 = vmul.f32 0.25, %v2658_v57  ;;  %8024 = vmatmul.mubr.msk.bf16.gmra.mrb[120].mxu1 %vm1265_vm8, %v11303_v53  ;;  %v3365_v18 = vrot.slane %v3363_v19, 7  ;;  %v14802_v53 = vld [vmem:[#allocation80_spill] sm:$0xff] }
 0x3b7   : > { %v3372_v0 = vrot.slane %v3370_v32, 7  ;;  %v2965_v16 = vmul.f32 0.25, %v2534_v10  ;;  %v3857_v48 = vshll.u32 %v3379_v22, 16  ;;  %v14743_v15 = vrot.slane %v14720_v17, 7 }
 0x3b8   : > { %v3819_v23 = vor.u32 %v3818_v54, %v3814_v29  ;;  %v11309_v33 = vsel %vm8812_vm5, 0, %v3382_v38  ;;  %v3028_v40 = vadd.f32 %v2964_v8, %v14736_v45  ;;  %v14744_v31 = vrot.slane %v14722_v9, 7 }
 0x3b9   : > { %14742 = vst [vmem:[#allocation33_spill] sm:$0xff] %v11309_v33  ;;  %v3850_v57 = vshrl.u32 %v11309_v33, 16  ;;  %v3852_v24 = vshll.u32 %v11309_v33, 16  ;;  %4073 = vrot.lane.b32.xlu0 %v11309_v33, %s8643_s11  ;;  %v3368_v10 = vor.u32 %v3366_v34, %v3365_v18  ;;  %v3833_v29 = vshll.u32 %v3365_v18, 16  ;;  %v11352_v33 = vpop.permute.xlu0 %3569 }
 0x3ba   : > { %v2531_v36 = vsel %vm847_vm3, %v14744_v31, %v14743_v15  ;;  %v11322_v47 = vsel %vm882_vm6, %v3819_v23, %v3823_v49  ;;  %v3375_v22 = vor.u32 %v3373_v13, %v3372_v0  ;;  %v3845_v45 = vshll.u32 %v3372_v0, 16  ;;  %14754 = vst [vmem:[#allocation71_spill] sm:$0xff] %v11352_v33 }
 0x3bb   : > { %14745 = vst [vmem:[#allocation68_spill] sm:$0xff] %v11322_v47  ;;  %v3029_v17 = vadd.f32 %v2965_v16, %v14733_v50  ;;  %8027 = vmatprep.mubr.msk.bf16.mxu1 %vm1265_vm8, %v11322_v47  ;;  %v3854_v19 = vrot.slane %v3852_v24, 1  ;;  %v11329_v32 = vsel %vm8812_vm5, 0, %v3368_v10  ;;  %v3835_v54 = vrot.slane %v3833_v29, 1  ;;  %v14750_v24 = vld [vmem:[#allocation21_spill] sm:$0xff]  ;;  %v14752_v29 = vld [vmem:[#allocation4_spill] sm:$0xff] }
 0x3bc   : > { %14746 = vst [vmem:[#allocation60_spill] sm:$0xff] %v11329_v32  ;;  %v3859_v38 = vrot.slane %v3857_v48, 1  ;;  %v3826_v34 = vshrl.u32 %v11329_v32, 16  ;;  %v3828_v8 = vshll.u32 %v11329_v32, 16  ;;  %4069 = vrot.lane.b32.xlu1 %v11329_v32, %s8643_s11  ;;  %v11337_v50 = vsel %vm8812_vm5, 0, %v3375_v22 }
 0x3bd   : > { %14747 = vst [vmem:[#allocation77_spill] sm:$0xff] %v11337_v50  ;;  %v3847_v49 = vrot.slane %v3845_v45, 1  ;;  %v3838_v13 = vshrl.u32 %v11337_v50, 16  ;;  %v3840_v18 = vshll.u32 %v11337_v50, 16  ;;  %v11341_v0 = vpack.c.bf16 %v3029_v17, %v3028_v40 }
 0x3be   : > { %v3855_v16 = vor.u32 %v3854_v19, %v3850_v57  ;;  %v3830_v48 = vrot.slane %v3828_v8, 1  ;;  %v14749_v23 = vmov %v14744_v31  ;;  %v2963_v31 = vmul.f32 0.25, %v2531_v36  ;;  %v14756_v36 = vld [vmem:[#allocation18_spill] sm:$0xff] }
 0x3bf   : > { %14748 = vst [vmem:[#allocation41_spill] sm:$0xff] %v11341_v0  ;;  %v2657_v15 = vsel %vm847_vm3, %v14722_v9, %v14749_v23  ;;  %v14751_v10 = vrot.slane %v14750_v24, 1  ;;  %v14753_v22 = vrot.slane %v14752_v29, 1  ;;  %v3842_v32 = vrot.slane %v3840_v18, 1  ;;  %3605 = vrot.lane.b32.xlu0 %v11341_v0, %s8643_s11  ;;  %v14758_v18 = vld [vmem:[#allocation32_spill] sm:$0xff] }
 0x3c0   : > { %v11357_v40 = vsel %vm882_vm6, %v3855_v16, %v3859_v38  ;;  %v2962_v57 = vmul.f32 0.25, %v2657_v15  ;;  %v3831_v19 = vor.u32 %v3830_v48, %v3826_v34  ;;  %4071 = vrot.lane.b32.xlu1 %v11337_v50, %s8643_s11  ;;  %v3027_v9 = vadd.f32 %v2963_v31, %v14724_v58  ;;  %v14760_v16 = vld [vmem:[#allocation29_spill] sm:$0xff]  ;;  %v14775_v50 = vld [vmem:[#allocation43_spill] sm:$0xff] }
 0x3c1   : > { %v2733_v45 = vsel %vm1134_vm7, %v14753_v22, %v14751_v10  ;;  %14755 = vst [vmem:[#allocation63_spill] sm:$0xff] %v11357_v40  ;;  %v3193_v8 = vadd.f32 %v10727_v7, %v14756_v36  ;;  %v14757_v23 = vrot.slane %v10528_v42, 1  ;;  %v14759_v10 = vrot.slane %v14758_v18, 1 }
 0x3c2   : > { %v3128_v17 = vmul.f32 0.25, %v2733_v45  ;;  %v3843_v60 = vor.u32 %v3842_v32, %v3838_v13  ;;  %v3026_v38 = vadd.f32 %v2962_v57, %v14735_v3  ;;  %v11372_v48 = vsel %vm882_vm6, %v3831_v19, %v3835_v54  ;;  %v14766_v54 = vld [vmem:[#allocation5_spill] sm:$0xff]  ;;  %v14768_v57 = vld [vmem:[#allocation30_spill] sm:$0xff] }
 0x3c3   : > { %v2736_v22 = vsel %vm1134_vm7, %v14759_v10, %v14757_v23  ;;  %14761 = vst [vmem:[#allocation75_spill] sm:$0xff] %v11372_v48  ;;  %v3195_v58 = vadd.f32 %v10731_v12, %v10718_v56  ;;  %v14762_v7 = vrot.slane %v14750_v24, 7  ;;  %v14763_v31 = vrot.slane %v14752_v29, 7  ;;  %8028 = vmatmul.mubr.msk.bf16.gmra.mrb[124].mxu1 %vm1265_vm8, %v11372_v48  ;;  %4117 = vrot.lane.b32.xlu0 %v14766_v54, %s8643_s11  ;;  %v14770_v10 = vld [vmem:[#allocation20_spill] sm:$0xff] }
 0x3c4   : > { %v3192_v15 = vadd.f32 %v3128_v17, %v14760_v16  ;;  %v3130_v34 = vmul.f32 0.25, %v2736_v22  ;;  %v11388_v32 = vsel %vm882_vm6, %v3843_v60, %v3847_v49  ;;  %v11392_v12 = vpack.c.bf16 %v3027_v9, %v3026_v38 }
 0x3c5   : > { %v2540_v45 = vsel %vm847_vm3, %v14763_v31, %v14762_v7  ;;  %v14764_v23 = vmov %v14763_v31  ;;  %14765 = vst [vmem:[#allocation78_spill] sm:$0xff] %v11388_v32  ;;  %8031 = vmatprep.mubr.msk.bf16.mxu1 %vm1265_vm8, %v11388_v32  ;;  %v14771_v22 = vrot.slane %v14770_v10, 1  ;;  %v3197_v49 = vadd.f32 %v10734_v1, %v10721_v2  ;;  %v11404_v7 = vpop.permute.xlu0 %3571 }
 0x3c6   : > { %v2660_v3 = vsel %vm847_vm3, %v14752_v29, %v14764_v23  ;;  %14767 = vst [vmem:[#allocation9_spill] sm:$0xff] %v11392_v12  ;;  %v3237_v13 = vpack.c.bf16 %v3193_v8, %v3192_v15  ;;  %v3194_v17 = vadd.f32 %v3130_v34, %v14768_v57  ;;  %v2969_v19 = vmul.f32 0.25, %v2540_v45  ;;  %3603 = vrot.lane.b32.xlu1 %v11392_v12, %s8643_s11  ;;  %v14780_v12 = vld [vmem:[#allocation76_spill] sm:$0xff] }
 0x3c7   : > { %v2968_v24 = vmul.f32 0.25, %v2660_v3  ;;  %v14769_v29 = vrot.slane %v10537_v21, 1  ;;  %v14772_v45 = vrot.slane %v14713_v27, 7  ;;  %v14773_v23 = vrot.slane %v14715_v43, 7 }
 0x3c8   : > { %v3384_v9 = vshrl.u32 %v3237_v13, 16  ;;  %v3387_v8 = vshll.u32 %v3237_v13, 16  ;;  %v3238_v34 = vpack.c.bf16 %v3195_v58, %v3194_v17  ;;  %v3033_v31 = vadd.f32 %v2969_v19, %v14756_v36  ;;  %v14778_v36 = vld [vmem:[#allocation28_spill] sm:$0xff] }
 0x3c9   : > { %v2739_v60 = vsel %vm1134_vm7, %v14771_v22, %v14769_v29  ;;  %v3032_v38 = vadd.f32 %v2968_v24, %v14760_v16  ;;  %v2537_v3 = vsel %vm847_vm3, %v14773_v23, %v14772_v45  ;;  %v14774_v1 = vmov %v14773_v23 }
 0x3ca   : > { %v3132_v15 = vmul.f32 0.25, %v2739_v60  ;;  %v2659_v29 = vsel %vm847_vm3, %v14715_v43, %v14774_v1  ;;  %v3386_v22 = vrot.slane %v3384_v9, 7  ;;  %v2967_v16 = vmul.f32 0.25, %v2537_v3  ;;  %4115 = vrot.lane.b32.xlu1 %v14780_v12, %s8643_s11 }
 0x3cb   : > { %v2966_v0 = vmul.f32 0.25, %v2659_v29  ;;  %v3391_v24 = vshrl.u32 %v3238_v34, 16  ;;  %v3394_v58 = vshll.u32 %v3238_v34, 16  ;;  %v11420_v17 = vpack.c.bf16 %v3033_v31, %v3032_v38  ;;  %v11433_v31 = vpop.permute.xlu0 %3573  ;;  %8032 = vmatmul.mubr.msk.bf16.gmra.mrb[128].mxu1 %vm1265_vm8, %v11357_v40  ;;  %v14788_v40 = vld [vmem:[#allocation24_spill] sm:$0xff] }
 0x3cc   : > { %v3196_v13 = vadd.f32 %v3132_v15, %v14775_v50  ;;  %v14777_v27 = vrot.slane %v10531_v14, 1  ;;  %v14779_v19 = vrot.slane %v14778_v36, 1  ;;  %v3389_v45 = vor.u32 %v3387_v8, %v3386_v22 }
 0x3cd   : > { %14776 = vst [vmem:[#allocation72_spill] sm:$0xff] %v11420_v17  ;;  %v3869_v23 = vshll.u32 %v3386_v22, 16  ;;  %v3030_v9 = vadd.f32 %v2966_v0, %v14731_v63  ;;  %v3393_v15 = vrot.slane %v3391_v24, 7  ;;  %v3031_v3 = vadd.f32 %v2967_v16, %v14717_v26  ;;  %v14783_v16 = vld [vmem:[#allocation22_spill] sm:$0xff] }
 0x3ce   : > { %v2742_v60 = vsel %vm1134_vm7, %v14779_v19, %v14777_v27  ;;  %v3239_v43 = vpack.c.bf16 %v3197_v49, %v3196_v13  ;;  %v3199_v38 = vadd.f32 %v10737_v4, %v10724_v51  ;;  %v11439_v8 = vsel %vm8812_vm5, 0, %v3389_v45 }
 0x3cf   : > { %v3134_v34 = vmul.f32 0.25, %v2742_v60  ;;  %14781 = vst [vmem:[#allocation74_spill] sm:$0xff] %v11439_v8  ;;  %v3871_v1 = vrot.slane %v3869_v23, 1  ;;  %v3862_v63 = vshrl.u32 %v11439_v8, 16  ;;  %v3864_v26 = vshll.u32 %v11439_v8, 16  ;;  %4075 = vrot.lane.b32.xlu1 %v11439_v8, %s8643_s11 }
 0x3d0   : > { %v3398_v49 = vshrl.u32 %v3239_v43, 16  ;;  %v3401_v29 = vshll.u32 %v3239_v43, 16  ;;  %v3396_v0 = vor.u32 %v3394_v58, %v3393_v15  ;;  %v3881_v22 = vshll.u32 %v3393_v15, 16  ;;  %v11457_v15 = vpop.permute.xlu1 %4037 }
 0x3d1   : > { %v11445_v13 = vpack.c.bf16 %v3031_v3, %v3030_v9  ;;  %v3198_v24 = vadd.f32 %v3134_v34, %v14783_v16  ;;  %v14784_v27 = vrot.slane %v10762_v35, 1  ;;  %v14785_v19 = vrot.slane %v10703_v20, 1 }
 0x3d2   : > { %v3400_v4 = vrot.slane %v3398_v49, 7  ;;  %v3866_v45 = vrot.slane %v3864_v26, 1  ;;  %v11455_v23 = vsel %vm8812_vm5, 0, %v3396_v0  ;;  %v3883_v58 = vrot.slane %v3881_v22, 1  ;;  %v14787_v26 = vld [vmem:[#allocation11_spill] sm:$0xff]  ;;  %v11466_v22 = vpop.permute.xlu0 %3575 }
 0x3d3   : > { %14782 = vst [vmem:[#allocation21_spill] sm:$0xff] %v11445_v13  ;;  %v2745_v60 = vsel %vm1134_vm7, %v14785_v19, %v14784_v27  ;;  %14786 = vst [vmem:[#allocation4_spill] sm:$0xff] %v11455_v23  ;;  %v3874_v9 = vshrl.u32 %v11455_v23, 16  ;;  %v3876_v3 = vshll.u32 %v11455_v23, 16  ;;  %4077 = vrot.lane.b32.xlu0 %v11455_v23, %s8643_s11  ;;  %v3240_v27 = vpack.c.bf16 %v3199_v38, %v3198_v24 }
 0x3d4   : > { %v3136_v43 = vmul.f32 0.25, %v2745_v60  ;;  %v3403_v34 = vor.u32 %v3401_v29, %v3400_v4  ;;  %v3893_v49 = vshll.u32 %v3400_v4, 16  ;;  %v3867_v8 = vor.u32 %v3866_v45, %v3862_v63  ;;  %3607 = vrot.lane.b32.xlu1 %v11445_v13, %s8643_s11  ;;  %v11492_v23 = vpop.permute.xlu1 %4039 }
 0x3d5   : > { %v3201_v0 = vadd.f32 %v10933_v30, %v14788_v40  ;;  %v3878_v60 = vrot.slane %v3876_v3, 1  ;;  %v14790_v29 = vrot.slane %v10537_v21, 7  ;;  %v14791_v38 = vrot.slane %v14770_v10, 7 }
 0x3d6   : > { %v3200_v19 = vadd.f32 %v3136_v43, %v14787_v26  ;;  %v11470_v48 = vsel %vm8812_vm5, 0, %v3403_v34  ;;  %v3895_v32 = vrot.slane %v3893_v49, 1  ;;  %v11480_v4 = vsel %vm882_vm6, %v3867_v8, %v3871_v1 }
 0x3d7   : > { %14789 = vst [vmem:[#allocation18_spill] sm:$0xff] %v11470_v48  ;;  %v2546_v63 = vsel %vm847_vm3, %v14791_v38, %v14790_v29  ;;  %14792 = vst [vmem:[#allocation32_spill] sm:$0xff] %v11480_v4  ;;  %v3886_v30 = vshrl.u32 %v11470_v48, 16  ;;  %v3888_v24 = vshll.u32 %v11470_v48, 16  ;;  %v3405_v45 = vshrl.u32 %v3240_v27, 16  ;;  %8035 = vmatprep.mubr.msk.bf16.mxu1 %vm1265_vm8, %v11480_v4  ;;  %3609 = vrot.lane.b32.xlu0 %v11420_v17, %s8643_s11  ;;  %v14795_v4 = vld [vmem:[#allocation6_spill] sm:$0xff] }
 0x3d8   : > { %v3879_v43 = vor.u32 %v3878_v60, %v3874_v9  ;;  %v3408_v21 = vshll.u32 %v3240_v27, 16  ;;  %v3241_v3 = vpack.c.bf16 %v3201_v0, %v3200_v19  ;;  %v14793_v34 = vmov %v14791_v38  ;;  %4119 = vrot.lane.b32.xlu1 %v14795_v4, %s8643_s11  ;;  %v14796_v19 = vld [vmem:[#allocation13_spill] sm:$0xff]  ;;  %v14798_v60 = vld [vmem:[#allocation26_spill] sm:$0xff] }
 0x3d9   : > { %v2662_v8 = vsel %vm847_vm3, %v14770_v10, %v14793_v34  ;;  %v3890_v1 = vrot.slane %v3888_v24, 1  ;;  %v3407_v49 = vrot.slane %v3405_v45, 7  ;;  %v2973_v38 = vmul.f32 0.25, %v2546_v63  ;;  %v14801_v34 = vld [vmem:[#allocation12_spill] sm:$0xff] }
 0x3da   : > { %v2972_v29 = vmul.f32 0.25, %v2662_v8  ;;  %v11495_v13 = vsel %vm882_vm6, %v3879_v43, %v3883_v58  ;;  %v3412_v9 = vshrl.u32 %v3241_v3, 16  ;;  %v3415_v27 = vshll.u32 %v3241_v3, 16  ;;  %v11507_v43 = vpop.permute.xlu0 %3577 }
 0x3db   : > { %14794 = vst [vmem:[#allocation29_spill] sm:$0xff] %v11495_v13  ;;  %v14797_v0 = vrot.slane %v14796_v19, 1  ;;  %v14799_v17 = vrot.slane %v14798_v60, 1  ;;  %8036 = vmatmul.mubr.msk.bf16.gmra.mrb[132].mxu1 %vm1265_vm8, %v11495_v13  ;;  %v3891_v63 = vor.u32 %v3890_v1, %v3886_v30  ;;  %v3410_v24 = vor.u32 %v3408_v21, %v3407_v49  ;;  %14800 = vst [vmem:[#allocation30_spill] sm:$0xff] %v11507_v43  ;;  %v14813_v13 = vld [vmem:[#allocation53_spill] sm:$0xff] }
 0x3dc   : > { %v3905_v45 = vshll.u32 %v3407_v49, 16  ;;  %v3036_v58 = vadd.f32 %v2972_v29, %v14775_v50  ;;  %4121 = vrot.lane.b32.xlu0 %v14801_v34, %s8643_s11  ;;  %v3414_v3 = vrot.slane %v3412_v9, 7  ;;  %v3037_v8 = vadd.f32 %v2973_v38, %v10721_v2  ;;  %4079 = vrot.lane.b32.xlu1 %v11470_v48, %s8643_s11  ;;  %v14808_v9 = vld [vmem:[#allocation54_spill] sm:$0xff]  ;;  %v14811_v48 = vld [vmem:[#allocation48_spill] sm:$0xff] }
 0x3dd   : > { %v2748_v10 = vsel %vm1134_vm7, %v14799_v17, %v14797_v0  ;;  %v3203_v17 = vadd.f32 %v10942_v39, %v14802_v53  ;;  %v11515_v0 = vsel %vm882_vm6, %v3891_v63, %v3895_v32  ;;  %v11519_v30 = vsel %vm8812_vm5, 0, %v3410_v24 }
 0x3de   : > { %v3138_v47 = vmul.f32 0.25, %v2748_v10  ;;  %14803 = vst [vmem:[#allocation20_spill] sm:$0xff] %v11515_v0  ;;  %14804 = vst [vmem:[#allocation43_spill] sm:$0xff] %v11519_v30  ;;  %v3907_v50 = vrot.slane %v3905_v45, 1  ;;  %v14805_v21 = vrot.slane %v10528_v42, 7  ;;  %v14806_v1 = vrot.slane %v14758_v18, 7  ;;  %8039 = vmatprep.mubr.msk.bf16.mxu1 %vm1265_vm8, %v11515_v0  ;;  %v11539_v45 = vpop.permute.xlu1 %4041 }
 0x3df   : > { %v3898_v2 = vshrl.u32 %v11519_v30, 16  ;;  %v3900_v39 = vshll.u32 %v11519_v30, 16  ;;  %v3417_v32 = vor.u32 %v3415_v27, %v3414_v3  ;;  %v3917_v29 = vshll.u32 %v3414_v3, 16 }
 0x3e0   : > { %v2543_v49 = vsel %vm847_vm3, %v14806_v1, %v14805_v21  ;;  %v11532_v38 = vpack.c.bf16 %v3037_v8, %v3036_v58  ;;  %v3202_v42 = vadd.f32 %v3138_v47, %v14808_v9  ;;  %v14809_v10 = vmov %v14806_v1  ;;  %4081 = vrot.lane.b32.xlu0 %v11519_v30, %s8643_s11 }
 0x3e1   : > { %v2661_v63 = vsel %vm847_vm3, %v14758_v18, %v14809_v10  ;;  %v2971_v24 = vmul.f32 0.25, %v2543_v49  ;;  %v3902_v21 = vrot.slane %v3900_v39, 1  ;;  %v11545_v27 = vsel %vm8812_vm5, 0, %v3417_v32  ;;  %v11550_v49 = vpop.permute.xlu0 %3579 }
 0x3e2   : > { %14807 = vst [vmem:[#allocation28_spill] sm:$0xff] %v11532_v38  ;;  %14810 = vst [vmem:[#allocation22_spill] sm:$0xff] %v11545_v27  ;;  %v3919_v58 = vrot.slane %v3917_v29, 1  ;;  %v2970_v3 = vmul.f32 0.25, %v2661_v63  ;;  %v3910_v47 = vshrl.u32 %v11545_v27, 16  ;;  %v3912_v8 = vshll.u32 %v11545_v27, 16 }
 0x3e3   : > { %v3242_v1 = vpack.c.bf16 %v3203_v17, %v3202_v42  ;;  %v3035_v18 = vadd.f32 %v2971_v24, %v10718_v56  ;;  %v3903_v10 = vor.u32 %v3902_v21, %v3898_v2  ;;  %v14812_v30 = vrot.slane %v14811_v48, 1  ;;  %v14815_v29 = vld [vmem:[#allocation81_spill] sm:$0xff]  ;;  %v14821_v21 = vld [vmem:[#allocation55_spill] sm:$0xff] }
 0x3e4   : > { %v3034_v39 = vadd.f32 %v2970_v3, %v14768_v57  ;;  %v14814_v0 = vrot.slane %v14813_v13, 1  ;;  %v3205_v63 = vadd.f32 %v10945_v41, %v14815_v29  ;;  %v3914_v34 = vrot.slane %v3912_v8, 1  ;;  %3613 = vrot.lane.b32.xlu0 %v11532_v38, %s8643_s11 }
 0x3e5   : > { %v3419_v43 = vshrl.u32 %v3242_v1, 16  ;;  %v3422_v4 = vshll.u32 %v3242_v1, 16  ;;  %v11561_v56 = vsel %vm882_vm6, %v3903_v10, %v3907_v50  ;;  %v14818_v2 = vrot.slane %v10762_v35, 7  ;;  %v11579_v1 = vpop.permute.xlu1 %4043  ;;  %v14823_v10 = vld [vmem:[#allocation52_spill] sm:$0xff] }
 0x3e6   : > { %v2751_v32 = vsel %vm1134_vm7, %v14814_v0, %v14812_v30  ;;  %14816 = vst [vmem:[#allocation11_spill] sm:$0xff] %v11561_v56  ;;  %v11565_v57 = vpack.c.bf16 %v3035_v18, %v3034_v39  ;;  %v14819_v42 = vrot.slane %v10703_v20, 7  ;;  %8040 = vmatmul.mubr.msk.bf16.gmra.mrb[136].mxu1 %vm1265_vm8, %v11561_v56  ;;  %v3915_v50 = vor.u32 %v3914_v34, %v3910_v47 }
 0x3e7   : > { %v3140_v17 = vmul.f32 0.25, %v2751_v32  ;;  %v3421_v24 = vrot.slane %v3419_v43, 7  ;;  %v14822_v18 = vrot.slane %v10759_v61, 1  ;;  %v14824_v39 = vrot.slane %v14823_v10, 1 }
 0x3e8   : > { %14817 = vst [vmem:[#allocation24_spill] sm:$0xff] %v11565_v57  ;;  %v2552_v0 = vsel %vm847_vm3, %v14819_v42, %v14818_v2  ;;  %v14820_v41 = vmov %v14819_v42  ;;  %3611 = vrot.lane.b32.xlu1 %v11565_v57, %s8643_s11  ;;  %v3207_v32 = vadd.f32 %v10947_v52, %v10930_v6  ;;  %v14825_v43 = vrot.slane %v11002_v25, 1  ;;  %4125 = vrot.lane.b32.xlu0 %v10889_v59, %s8643_s11 }
 0x3e9   : > { %v2664_v30 = vsel %vm847_vm3, %v10703_v20, %v14820_v41  ;;  %v3204_v3 = vadd.f32 %v3140_v17, %v14821_v21  ;;  %v2977_v35 = vmul.f32 0.25, %v2552_v0  ;;  %v2754_v20 = vsel %vm1134_vm7, %v14824_v39, %v14822_v18  ;;  %v11598_v41 = vpop.permute.xlu0 %3581 }
 0x3ea   : > { %v2976_v8 = vmul.f32 0.25, %v2664_v30  ;;  %v14826_v34 = vrot.slane %v10917_v28, 1  ;;  %v11596_v17 = vsel %vm882_vm6, %v3915_v50, %v3919_v58  ;;  %v3424_v2 = vor.u32 %v3422_v4, %v3421_v24  ;;  %14828 = vst [vmem:[#allocation26_spill] sm:$0xff] %v11598_v41 }
 0x3eb   : > { %14827 = vst [vmem:[#allocation13_spill] sm:$0xff] %v11596_v17  ;;  %v3929_v42 = vshll.u32 %v3421_v24, 16  ;;  %v3243_v0 = vpack.c.bf16 %v3205_v63, %v3204_v3  ;;  %8043 = vmatprep.mubr.msk.bf16.mxu1 %vm1265_vm8, %v11596_v17  ;;  %v3041_v30 = vadd.f32 %v2977_v35, %v14788_v40  ;;  %v3142_v18 = vmul.f32 0.25, %v2754_v20 }
 0x3ec   : > { %v2757_v47 = vsel %vm1134_vm7, %v14826_v34, %v14825_v43  ;;  %v3040_v52 = vadd.f32 %v2976_v8, %v14787_v26  ;;  %v11608_v58 = vsel %vm8812_vm5, 0, %v3424_v2  ;;  %v14830_v43 = vld [vmem:[#allocation10_spill] sm:$0xff]  ;;  %v14832_v26 = vld [vmem:[#allocation35_spill] sm:$0xff]  ;;  %v3209_v20 = vadd.f32 %v11050_v37, %v11028_v55 }
 0x3ed   : > { %v3144_v39 = vmul.f32 0.25, %v2757_v47  ;;  %14829 = vst [vmem:[#allocation80_spill] sm:$0xff] %v11608_v58  ;;  %v3931_v4 = vrot.slane %v3929_v42, 1  ;;  %v3426_v63 = vshrl.u32 %v3243_v0, 16  ;;  %v3429_v50 = vshll.u32 %v3243_v0, 16  ;;  %4123 = vrot.lane.b32.xlu1 %v14830_v43, %s8643_s11  ;;  %v11625_v0 = vpop.permute.xlu1 %4045  ;;  %4085 = vrot.lane.b32.xlu0 %v11608_v58, %s8643_s11  ;;  %v11633_v56 = vpop.permute.xlu0 %3583  ;;  %v14884_v43 = vld [vmem:[#allocation17_spill] sm:$0xff] }
 0x3ee   : > { %v3922_v24 = vshrl.u32 %v11608_v58, 16  ;;  %v3924_v3 = vshll.u32 %v11608_v58, 16  ;;  %v11614_v34 = vpack.c.bf16 %v3041_v30, %v3040_v52  ;;  %v3206_v40 = vadd.f32 %v3142_v18, %v14832_v26  ;;  %14836 = vst [vmem:[#allocation48_spill] sm:$0xff] %v11633_v56  ;;  %v14860_v56 = vld [vmem:[#allocation25_spill] sm:$0xff] }
 0x3ef   : > { %v3428_v8 = vrot.slane %v3426_v63, 7  ;;  %v3208_v35 = vadd.f32 %v3144_v39, %v10965_v46  ;;  %v14833_v47 = vrot.slane %v10531_v14, 7  ;;  %v14834_v2 = vrot.slane %v14778_v36, 7 }
 0x3f0   : > { %14831 = vst [vmem:[#allocation54_spill] sm:$0xff] %v11614_v34  ;;  %v3926_v38 = vrot.slane %v3924_v3, 1  ;;  %v3244_v52 = vpack.c.bf16 %v3207_v32, %v3206_v40 }
 0x3f1   : > { %v2549_v42 = vsel %vm847_vm3, %v14834_v2, %v14833_v47  ;;  %v14835_v30 = vmov %v14834_v2  ;;  %v3431_v37 = vor.u32 %v3429_v50, %v3428_v8  ;;  %v3941_v63 = vshll.u32 %v3428_v8, 16  ;;  %4083 = vrot.lane.b32.xlu1 %v11545_v27, %s8643_s11  ;;  %3617 = vrot.lane.b32.xlu0 %v11614_v34, %s8643_s11  ;;  %v14845_v27 = vld [vmem:[#allocation84_spill] sm:$0xff] }
 0x3f2   : > { %v2663_v18 = vsel %vm847_vm3, %v14778_v36, %v14835_v30  ;;  %v2975_v39 = vmul.f32 0.25, %v2549_v42  ;;  %v3245_v14 = vpack.c.bf16 %v3209_v20, %v3208_v35  ;;  %v3927_v47 = vor.u32 %v3926_v38, %v3922_v24  ;;  %v14841_v30 = vld [vmem:[#allocation92_spill] sm:$0xff] }
 0x3f3   : > { %v2974_v57 = vmul.f32 0.25, %v2663_v18  ;;  %v3433_v2 = vshrl.u32 %v3244_v52, 16  ;;  %v3436_v17 = vshll.u32 %v3244_v52, 16  ;;  %v11640_v3 = vsel %vm8812_vm5, 0, %v3431_v37 }
 0x3f4   : > { %v3039_v32 = vadd.f32 %v2975_v39, %v10724_v51  ;;  %14837 = vst [vmem:[#allocation53_spill] sm:$0xff] %v11640_v3  ;;  %v3943_v36 = vrot.slane %v3941_v63, 1  ;;  %v3440_v40 = vshrl.u32 %v3245_v14, 16  ;;  %v3443_v50 = vshll.u32 %v3245_v14, 16  ;;  %v11659_v39 = vpop.permute.xlu1 %4047 }
 0x3f5   : > { %v11643_v8 = vsel %vm882_vm6, %v3927_v47, %v3931_v4  ;;  %v3934_v35 = vshrl.u32 %v11640_v3, 16  ;;  %v3936_v38 = vshll.u32 %v11640_v3, 16  ;;  %v3435_v24 = vrot.slane %v3433_v2, 7 }
 0x3f6   : > { %14838 = vst [vmem:[#allocation81_spill] sm:$0xff] %v11643_v8  ;;  %8044 = vmatmul.mubr.msk.bf16.gmra.mrb[140].mxu1 %vm1265_vm8, %v11643_v8  ;;  %v3442_v51 = vrot.slane %v3440_v40, 7  ;;  %v3038_v20 = vadd.f32 %v2974_v57, %v14783_v16  ;;  %v14839_v42 = vrot.slane %v10996_v62, 1  ;;  %v14840_v52 = vrot.slane %v10914_v44, 1  ;;  %v14843_v16 = vld [vmem:[#allocation87_spill] sm:$0xff] }
 0x3f7   : > { %v3211_v18 = vadd.f32 %v14841_v30, %v11017_v5  ;;  %v3938_v37 = vrot.slane %v3936_v38, 1  ;;  %v3438_v63 = vor.u32 %v3436_v17, %v3435_v24  ;;  %v3953_v14 = vshll.u32 %v3435_v24, 16  ;;  %v14849_v38 = vld [vmem:[#allocation97_spill] sm:$0xff] }
 0x3f8   : > { %v2760_v4 = vsel %vm1134_vm7, %v14840_v52, %v14839_v42  ;;  %v3445_v2 = vor.u32 %v3443_v50, %v3442_v51  ;;  %v3965_v58 = vshll.u32 %v3442_v51, 16  ;;  %v11661_v40 = vpack.c.bf16 %v3039_v32, %v3038_v20  ;;  %v11668_v42 = vpop.permute.xlu0 %3585  ;;  %4129 = vrot.lane.b32.xlu0 %v14849_v38, %s8643_s11  ;;  %v14850_v50 = vld [vmem:[#allocation36_spill] sm:$0xff] }
 0x3f9   : > { %v3146_v47 = vmul.f32 0.25, %v2760_v4  ;;  %v14844_v57 = vrot.slane %v14843_v16, 1  ;;  %v14846_v34 = vrot.slane %v14845_v27, 1  ;;  %14847 = vst [vmem:[#allocation52_spill] sm:$0xff] %v11668_v42  ;;  %v3939_v52 = vor.u32 %v3938_v37, %v3934_v35 }
 0x3fa   : > { %14842 = vst [vmem:[#allocation55_spill] sm:$0xff] %v11661_v40  ;;  %v11672_v30 = vsel %vm8812_vm5, 0, %v3438_v63  ;;  %v3955_v17 = vrot.slane %v3953_v14, 1  ;;  %v3967_v20 = vrot.slane %v3965_v58, 1  ;;  %3615 = vrot.lane.b32.xlu1 %v11661_v40, %s8643_s11  ;;  %v14855_v58 = vrot.slane %v14811_v48, 7  ;;  %v14859_v48 = vld [vmem:[#allocation27_spill] sm:$0xff] }
 0x3fb   : > { %v2763_v8 = vsel %vm1134_vm7, %v14846_v34, %v14844_v57  ;;  %14848 = vst [vmem:[#allocation35_spill] sm:$0xff] %v11672_v30  ;;  %v3210_v32 = vadd.f32 %v3146_v47, %v14850_v50  ;;  %v3946_v24 = vshrl.u32 %v11672_v30, 16  ;;  %v3948_v51 = vshll.u32 %v11672_v30, 16  ;;  %v14853_v57 = vld [vmem:[#allocation90_spill] sm:$0xff] }
 0x3fc   : > { %v11681_v34 = vsel %vm8812_vm5, 0, %v3445_v2  ;;  %v11686_v35 = vsel %vm882_vm6, %v3939_v52, %v3943_v36  ;;  %v3148_v47 = vmul.f32 0.25, %v2763_v8  ;;  %v14854_v2 = vld [vmem:[#allocation93_spill] sm:$0xff]  ;;  %v14856_v40 = vrot.slane %v14813_v13, 7  ;;  %v11699_v52 = vpop.permute.xlu1 %4049  ;;  %4089 = vrot.lane.b32.xlu0 %v11672_v30, %s8643_s11  ;;  %v11710_v59 = vpop.permute.xlu0 %3587  ;;  %v14862_v30 = vld [vmem:[#allocation3_spill] sm:$0xff] }
 0x3fd   : > { %14851 = vst [vmem:[#allocation92_spill] sm:$0xff] %v11681_v34  ;;  %14852 = vst [vmem:[#allocation87_spill] sm:$0xff] %v11686_v35  ;;  %v3958_v4 = vshrl.u32 %v11681_v34, 16  ;;  %v3960_v37 = vshll.u32 %v11681_v34, 16  ;;  %v3246_v63 = vpack.c.bf16 %v3211_v18, %v3210_v32  ;;  %8047 = vmatprep.mubr.msk.bf16.mxu1 %vm1265_vm8, %v11686_v35  ;;  %v3950_v14 = vrot.slane %v3948_v51, 1 }
 0x3fe   : > { %v3213_v38 = vadd.f32 %v14854_v2, %v14853_v57  ;;  %v2558_v36 = vsel %vm847_vm3, %v14856_v40, %v14855_v58  ;;  %14857 = vst [vmem:[#allocation84_spill] sm:$0xff] %v11699_v52  ;;  %v14858_v51 = vmov %v14856_v40  ;;  %4127 = vrot.lane.b32.xlu1 %v14859_v48, %s8643_s11  ;;  %v3212_v35 = vadd.f32 %v3148_v47, %v14860_v56 }
 0x3ff   : > { %v3962_v42 = vrot.slane %v3960_v37, 1  ;;  %v3447_v18 = vshrl.u32 %v3246_v63, 16  ;;  %v3450_v32 = vshll.u32 %v3246_v63, 16  ;;  %v2666_v8 = vsel %vm847_vm3, %v14813_v13, %v14858_v51  ;;  %14861 = vst [vmem:[#allocation36_spill] sm:$0xff] %v11710_v59  ;;  %v11718_v13 = vld [vmem:[%s14007_s5 + $0x80] sm:$0xff]   ;;  %v14865_v51 = vld [vmem:[#allocation15_spill] sm:$0xff] }
 0x400   : > { %v3951_v2 = vor.u32 %v3950_v14, %v3946_v24  ;;  %v2980_v40 = vmul.f32 0.25, %v2666_v8  ;;  %v2981_v58 = vmul.f32 0.25, %v2558_v36  ;;  %v4278_v63 = vsel %vm1265_vm8, %v14862_v30, %v11457_v15  ;;  %v14863_v24 = vld [vmem:[#allocation86_spill] sm:$0xff] }
 0x401   : > { %v3963_v37 = vor.u32 %v3962_v42, %v3958_v4  ;;  %v3449_v41 = vrot.slane %v3447_v18, 7  ;;  %v14864_v14 = vrot.slane %v14863_v24, 1  ;;  %v14866_v48 = vrot.slane %v14865_v51, 1  ;;  %4927 = vmatprep.mubr.bf16.mxu0 %v4278_v63 }
 0x402   : > { %v11726_v36 = vsel %vm882_vm6, %v3951_v2, %v3955_v17  ;;  %v3247_v42 = vpack.c.bf16 %v3213_v38, %v3212_v35  ;;  %v3044_v4 = vadd.f32 %v2980_v40, %v14821_v21  ;;  %v3045_v18 = vadd.f32 %v2981_v58, %v14815_v29  ;;  %7497 = vmatmul.mubr.msk.bf16.vlgmr.msra.gmra.mrb[96].mxu0 %vm9336_vm9, %v11352_v33  ;;  %v14875_v58 = vld [vmem:[#allocation85_spill] sm:$0xff] }
 0x403   : > { %v2766_v47 = vsel %vm1134_vm7, %v14866_v48, %v14864_v14  ;;  %14867 = vst [vmem:[#allocation90_spill] sm:$0xff] %v11726_v36  ;;  %v2563_v15 = vrot.slane %v11002_v25, 7  ;;  %8048 = vmatmul.mubr.msk.bf16.gmra.mrb[144].mxu1 %vm1265_vm8, %v11726_v36  ;;  %v11734_v8 = vsel %vm882_vm6, %v3963_v37, %v3967_v20  ;;  %v3452_v59 = vor.u32 %v3450_v32, %v3449_v41  ;;  %v14871_v25 = vld [vmem:[#allocation91_spill] sm:$0xff]  ;;  %v14872_v20 = vld [vmem:[#allocation94_spill] sm:$0xff]  ;;  %v11748_v32 = vpop.permute.xlu1 %4051 }
 0x404   : > { %14868 = vst [vmem:[#allocation93_spill] sm:$0xff] %v11734_v8  ;;  %v3150_v17 = vmul.f32 0.25, %v2766_v47  ;;  %8051 = vmatprep.mubr.msk.bf16.mxu1 %vm1265_vm8, %v11734_v8  ;;  %v3454_v29 = vshrl.u32 %v3247_v42, 16  ;;  %v11742_v21 = vpack.c.bf16 %v3045_v18, %v3044_v4  ;;  %4087 = vrot.lane.b32.xlu1 %v11640_v3, %s8643_s11  ;;  %v3215_v35 = vadd.f32 %v14872_v20, %v14871_v25  ;;  %v11764_v4 = vld [vmem:[%s14007_s5 + $0x88] sm:$0xff]   ;;  %v14881_v3 = vld [vmem:[#allocation58_spill] sm:$0xff] }
 0x405   : > { %14873 = vst [vmem:[#allocation86_spill] sm:$0xff] %v11748_v32  ;;  %v11752_v2 = vsel %vm8812_vm5, 0, %v3452_v59  ;;  %v3977_v40 = vshll.u32 %v3449_v41, 16  ;;  %5185 = vmatpush1.bf16.msra.mxu0 %v11718_v13  ;;  %v14876_v63 = vrot.slane %v14796_v19, 7  ;;  %v14877_v14 = vrot.slane %v14798_v60, 7  ;;  %v14882_v8 = vld [vmem:[#allocation50_spill] sm:$0xff] }
 0x406   : > { %14870 = vst [vmem:[#allocation25_spill] sm:$0xff] %v11742_v21  ;;  %14874 = vst [vmem:[#allocation15_spill] sm:$0xff] %v11752_v2  ;;  %v3214_v37 = vadd.f32 %v3150_v17, %v14875_v58  ;;  %v3972_v18 = vshll.u32 %v11752_v2, 16  ;;  %v3456_v59 = vrot.slane %v3454_v29, 7  ;;  %v3457_v20 = vshll.u32 %v3247_v42, 16  ;;  %3621 = vrot.lane.b32.xlu0 %v11742_v21, %s8643_s11 }
 0x407   : > { %v2555_v47 = vsel %vm847_vm3, %v14877_v14, %v14876_v63  ;;  %v14878_v41 = vmov %v14877_v14  ;;  %v14879_v17 = vmov 0   ;;  %v11774_v63 = vpop.permute.xlu0 %3589  ;;  %v4282_v29 = vsel %vm1265_vm8, %v14881_v3, %v11492_v23 }
 0x408   : > { %v2665_v19 = vsel %vm847_vm3, %v14798_v60, %v14878_v41  ;;  %5186 = vmatprep.subr.bf16.mxu0 %v14879_v17  ;;  %14880 = vst [vmem:[#allocation91_spill] sm:$0xff] %v11774_v63  ;;  %v3248_v14 = vpack.c.bf16 %v3215_v35, %v3214_v37  ;;  %v2979_v33 = vmul.f32 0.25, %v2555_v47  ;;  %v3970_v42 = vshrl.u32 %v11752_v2, 16  ;;  %4935 = vmatprep.mubr.bf16.mxu0 %v4282_v29  ;;  %v11794_v29 = vpop.permute.xlu1 %4053 }
 0x409   : > { %v2978_v38 = vmul.f32 0.25, %v2665_v19  ;;  %v3974_v36 = vrot.slane %v3972_v18, 1  ;;  %v3459_v21 = vor.u32 %v3457_v20, %v3456_v59  ;;  %v14883_v32 = vrot.slane %v14882_v8, 1  ;;  %5187 = vmatpush1.bf16.msra.mxu0 %v11764_v4  ;;  %v14887_v20 = vld [vmem:[#allocation101_spill] sm:$0xff] }
 0x40a   : > { %v14885_v60 = vrot.slane %v14884_v43, 1  ;;  %v3979_v52 = vrot.slane %v3977_v40, 1  ;;  %v3461_v63 = vshrl.u32 %v3248_v14, 16  ;;  %v3043_v37 = vadd.f32 %v2979_v33, %v14802_v53  ;;  %4133 = vrot.lane.b32.xlu0 %v14887_v20, %s8643_s11  ;;  %5188 = vmatprep.subr.bf16.mxu0 %v14879_v17  ;;  %v11800_v53 = vld [vmem:[%s14007_s5 + $0x90] sm:$0xff]  }
 0x40b   : > { %v3042_v35 = vadd.f32 %v2978_v38, %v14808_v9  ;;  %v3975_v23 = vor.u32 %v3974_v36, %v3970_v42  ;;  %v11790_v47 = vsel %vm8812_vm5, 0, %v3459_v21  ;;  %v3989_v18 = vshll.u32 %v3456_v59, 16  ;;  %v14891_v59 = vld [vmem:[#allocation88_spill] sm:$0xff]  ;;  %v14892_v42 = vld [vmem:[#allocation89_spill] sm:$0xff]  ;;  %v11814_v20 = vpop.permute.xlu0 %3591 }
 0x40c   : > { %v2769_v41 = vsel %vm1134_vm7, %v14885_v60, %v14883_v32  ;;  %14886 = vst [vmem:[#allocation94_spill] sm:$0xff] %v11790_v47  ;;  %v3984_v33 = vshll.u32 %v11790_v47, 16  ;;  %v3463_v9 = vrot.slane %v3461_v63, 7  ;;  %v3464_v36 = vshll.u32 %v3248_v14, 16  ;;  %v14890_v32 = vld [vmem:[#allocation49_spill] sm:$0xff] }
 0x40d   : > { %v3152_v19 = vmul.f32 0.25, %v2769_v41  ;;  %v11803_v38 = vpack.c.bf16 %v3043_v37, %v3042_v35  ;;  %v11806_v21 = vsel %vm882_vm6, %v3975_v23, %v3979_v52  ;;  %v3217_v60 = vadd.f32 %v14892_v42, %v14891_v59  ;;  %v14895_v42 = vld [vmem:[#allocation2_spill] sm:$0xff]  ;;  %5189 = vmatpush1.bf16.msra.mxu0 %v11800_v53 }
 0x40e   : > { %14889 = vst [vmem:[#allocation50_spill] sm:$0xff] %v11806_v21  ;;  %v14893_v41 = vrot.slane %v10917_v28, 7  ;;  %8052 = vmatmul.mubr.msk.bf16.gmra.mrb[148].mxu1 %vm1265_vm8, %v11806_v21  ;;  %v3982_v63 = vshrl.u32 %v11790_v47, 16  ;;  %v3986_v14 = vrot.slane %v3984_v33, 1  ;;  %v3466_v35 = vor.u32 %v3464_v36, %v3463_v9  ;;  %4093 = vrot.lane.b32.xlu0 %v11752_v2, %s8643_s11  ;;  %v11834_v33 = vld [vmem:[%s14007_s5 + $0x98] sm:$0xff]  }
 0x40f   : > { %14888 = vst [vmem:[#allocation85_spill] sm:$0xff] %v11803_v38  ;;  %v3216_v40 = vadd.f32 %v3152_v19, %v14890_v32  ;;  %3619 = vrot.lane.b32.xlu1 %v11803_v38, %s8643_s11  ;;  %v3991_v38 = vrot.slane %v3989_v18, 1  ;;  %5190 = vmatprep.subr.bf16.mxu0 %v14879_v17  ;;  %v11866_v2 = vpop.permute.xlu0 %3593 }
 0x410   : > { %v2564_v3 = vsel %vm847_vm3, %v14893_v41, %v2563_v15  ;;  %v14894_v52 = vmov %v14893_v41  ;;  %v4184_v41 = vsel %vm1265_vm8, %v14895_v42, %v11404_v7  ;;  %v3987_v36 = vor.u32 %v3986_v14, %v3982_v63  ;;  %v11846_v63 = vpop.permute.xlu1 %4055  ;;  %14902 = vst [vmem:[#allocation88_spill] sm:$0xff] %v11866_v2 }
 0x411   : > { %v2668_v37 = vsel %vm847_vm3, %v10917_v28, %v14894_v52  ;;  %v3249_v23 = vpack.c.bf16 %v3217_v60, %v3216_v40  ;;  %v2985_v19 = vmul.f32 0.25, %v2564_v3  ;;  %v11838_v28 = vsel %vm8812_vm5, 0, %v3466_v35  ;;  %4936 = vmatmul.mubr.bf16.gmra.mrb[100].mxu0 %v4184_v41  ;;  %v14898_v35 = vld [vmem:[#allocation98_spill] sm:$0xff] }
 0x412   : > { %v2984_v15 = vmul.f32 0.25, %v2668_v37  ;;  %14896 = vst [vmem:[#allocation17_spill] sm:$0xff] %v11838_v28  ;;  %v4286_v3 = vsel %vm1265_vm8, %v14780_v12, %v11539_v45  ;;  %v3994_v40 = vshrl.u32 %v11838_v28, 16  ;;  %v3996_v60 = vshll.u32 %v11838_v28, 16  ;;  %5191 = vmatpush1.bf16.msra.mxu0 %v11834_v33 }
 0x413   : > { %v4001_v52 = vshll.u32 %v3463_v9, 16  ;;  %v3468_v37 = vshrl.u32 %v3249_v23, 16  ;;  %4943 = vmatprep.mubr.bf16.mxu0 %v4286_v3  ;;  %v11849_v18 = vsel %vm882_vm6, %v3987_v36, %v3991_v38  ;;  %v3471_v14 = vshll.u32 %v3249_v23, 16  ;;  %4131 = vrot.lane.b32.xlu1 %v14898_v35, %s8643_s11 }
 0x414   : > { %14897 = vst [vmem:[#allocation49_spill] sm:$0xff] %v11849_v18  ;;  %v3048_v45 = vadd.f32 %v2984_v15, %v10965_v46  ;;  %v3049_v42 = vadd.f32 %v2985_v19, %v11028_v55  ;;  %8055 = vmatprep.mubr.msk.bf16.mxu1 %vm1265_vm8, %v11849_v18  ;;  %v3998_v41 = vrot.slane %v3996_v60, 1  ;;  %v14899_v3 = vrot.slane %v10759_v61, 7  ;;  %v11872_v46 = vld [vmem:[%s14007_s5 + $0xa0] sm:$0xff]   ;;  %5192 = vmatprep.subr.bf16.mxu0 %v14879_v17  ;;  %v11878_v19 = vpop.f32.mrb[96].mxu1 }
 0x415   : > { %v3470_v9 = vrot.slane %v3468_v37, 7  ;;  %v14900_v12 = vrot.slane %v14823_v10, 7  ;;  %v2566_v61 = vrot.slane %v10996_v62, 7  ;;  %14903 = vst [vmem:[#allocation89_spill] sm:$0xff] %v11878_v19  ;;  %v4003_v60 = vrot.slane %v4001_v52, 1  ;;  %v11885_v2 = vpop.f32.mrb[97].mxu1 }
 0x416   : > { %v11875_v55 = vpack.c.bf16 %v3049_v42, %v3048_v45  ;;  %v2572_v62 = vrot.slane %v14863_v24, 7  ;;  %v14907_v52 = vrot.slane %v14843_v16, 7  ;;  %v11912_v16 = vpop.permute.xlu1 %4057  ;;  %5193 = vmatpush1.bf16.msra.mxu0 %v11872_v46 }
 0x417   : > { %v2561_v38 = vsel %vm847_vm3, %v14900_v12, %v14899_v3  ;;  %v14901_v23 = vmov %v14900_v12  ;;  %v3473_v37 = vor.u32 %v3471_v14, %v3470_v9  ;;  %v14904_v3 = vld [vmem:[#allocation67_spill] sm:$0xff]  ;;  %4091 = vrot.lane.b32.xlu1 %v11681_v34, %s8643_s11  ;;  %v14908_v14 = vrot.slane %v14845_v27, 7  ;;  %5194 = vmatprep.subr.bf16.mxu0 %v14879_v17 }
 0x418   : > { %v2667_v36 = vsel %vm847_vm3, %v14823_v10, %v14901_v23  ;;  %v2983_v12 = vmul.f32 0.25, %v2561_v38  ;;  %v3999_v10 = vor.u32 %v3998_v41, %v3994_v40  ;;  %v11883_v23 = vsel %vm1265_vm8, %v14904_v3, %v11433_v31  ;;  %14906 = vst [vmem:[#allocation67_spill] sm:$0xff] %v11885_v2  ;;  %3625 = vrot.lane.b32.xlu0 %v11875_v55, %s8643_s11  ;;  %v11899_v41 = vpop.f32.mrb[98].mxu1  ;;  %v11954_v2 = vld [vmem:[%s14007_s5 + $0xb0] sm:$0xff]  }
 0x419   : > { %v2982_v15 = vmul.f32 0.25, %v2667_v36  ;;  %14905 = vst [vmem:[#allocation2_spill] sm:$0xff] %v11883_v23  ;;  %v2570_v42 = vsel %vm847_vm3, %v14908_v14, %v14907_v52  ;;  %14909 = vst [vmem:[#allocation103_spill] sm:$0xff] %v11899_v41  ;;  %v11906_v38 = vsel %vm8812_vm5, 0, %v3473_v37  ;;  %v4109_v36 = vshll.u32 %v3470_v9, 16  ;;  %4944 = vmatmul.mubr.bf16.gmra.mrb[104].mxu0 %v11883_v23  ;;  %v11933_v52 = vpop.permute.xlu0 %3595  ;;  %v14962_v23 = vld [vmem:[#allocation27_spill] sm:$0xff] }
 0x41a   : > { %v3047_v40 = vadd.f32 %v2983_v12, %v10930_v6  ;;  %v11902_v24 = vsel %vm882_vm6, %v3999_v10, %v4003_v60  ;;  %14911 = vst [vmem:[#allocation105_spill] sm:$0xff] %v11906_v38  ;;  %v11920_v12 = vpop.f32.mrb[99].mxu1  ;;  %v4104_v11 = vshll.u32 %v11906_v38, 16  ;;  %v2571_v60 = vrot.slane %v14865_v51, 7 }
 0x41b   : > { %v3046_v45 = vadd.f32 %v2982_v15, %v14832_v26  ;;  %14910 = vst [vmem:[#allocation104_spill] sm:$0xff] %v11902_v24  ;;  %v14912_v26 = vmov %v14908_v14  ;;  %v11918_v15 = vld [vmem:[%s14007_s5 + $0xa8] sm:$0xff]   ;;  %14913 = vst [vmem:[#allocation106_spill] sm:$0xff] %v11920_v12  ;;  %8056 = vmatmul.mubr.msk.bf16.gmra.mrb[152].mxu1 %vm1265_vm8, %v11902_v24  ;;  %v4102_v37 = vshrl.u32 %v11906_v38, 16  ;;  %v2989_v3 = vmul.f32 0.25, %v2570_v42 }
 0x41c   : > { %v2670_v6 = vsel %vm847_vm3, %v14845_v27, %v14912_v26  ;;  %v4290_v27 = vsel %vm1265_vm8, %v14766_v54, %v11579_v1  ;;  %v4106_v14 = vrot.slane %v4104_v11, 1  ;;  %v14917_v26 = vrot.slane %v10914_v44, 7  ;;  %5195 = vmatpush1.bf16.msra.mxu0 %v11918_v15 }
 0x41d   : > { %v11925_v9 = vpack.c.bf16 %v3047_v40, %v3046_v45  ;;  %v2988_v10 = vmul.f32 0.25, %v2670_v6  ;;  %4951 = vmatprep.mubr.bf16.mxu0 %v4290_v27  ;;  %v14915_v45 = vld [vmem:[#allocation61_spill] sm:$0xff]  ;;  %v14916_v40 = vld [vmem:[#allocation39_spill] sm:$0xff]  ;;  %v3053_v11 = vadd.f32 %v2989_v3, %v14853_v57  ;;  %5196 = vmatprep.subr.bf16.mxu0 %v14879_v17  ;;  %v2575_v3 = vrot.slane %v14882_v8, 7 }
 0x41e   : > { %4137 = vrot.lane.b32.xlu0 %v14915_v45, %s8643_s11  ;;  %v5764_v1 = vshll.u32 %v14916_v40, 16  ;;  %v2567_v6 = vsel %vm847_vm3, %v14917_v26, %v2566_v61  ;;  %v14918_v27 = vmov %v14917_v26  ;;  %v4107_v54 = vor.u32 %v4106_v14, %v4102_v37 }
 0x41f   : > { %14914 = vst [vmem:[#allocation107_spill] sm:$0xff] %v11925_v9  ;;  %3623 = vrot.lane.b32.xlu1 %v11925_v9, %s8643_s11  ;;  %v2669_v42 = vsel %vm847_vm3, %v10914_v44, %v14918_v27  ;;  %v3052_v41 = vadd.f32 %v2988_v10, %v14860_v56  ;;  %v2987_v12 = vmul.f32 0.25, %v2567_v6  ;;  %v4111_v61 = vrot.slane %v4109_v36, 1  ;;  %v11962_v10 = vpop.permute.xlu1 %4059  ;;  %v12000_v27 = vld [vmem:[%s14007_s5 + $0xb8] sm:$0xff]  }
 0x420   : > { %v2986_v19 = vmul.f32 0.25, %v2669_v42  ;;  %v2573_v26 = vsel %vm847_vm3, %v2571_v60, %v2572_v62  ;;  %v14920_v62 = vld [vmem:[#allocation46_spill] sm:$0xff]  ;;  %5197 = vmatpush1.bf16.msra.mxu0 %v11954_v2  ;;  %v2574_v37 = vrot.slane %v14884_v43, 7  ;;  %v5762_v42 = vshrl.u32 %v14916_v40, 16 }
 0x421   : > { %v11958_v44 = vpack.c.bf16 %v3053_v11, %v3052_v41  ;;  %v3051_v57 = vadd.f32 %v2987_v12, %v11017_v5  ;;  %v11966_v6 = vsel %vm882_vm6, %v4107_v54, %v4111_v61  ;;  %v2671_v41 = vsel %vm847_vm3, %v14865_v51, %v2571_v60  ;;  %v11983_v12 = vpop.permute.xlu0 %3597  ;;  %v14923_v60 = vld [vmem:[#allocation6_spill] sm:$0xff]  ;;  %5198 = vmatprep.subr.bf16.mxu0 %v14879_v17 }
 0x422   : > { %v3050_v56 = vadd.f32 %v2986_v19, %v14850_v50  ;;  %14919 = vst [vmem:[#allocation39_spill] sm:$0xff] %v11966_v6  ;;  %4097 = vrot.lane.b32.xlu0 %v11838_v28, %s8643_s11  ;;  %v2991_v36 = vmul.f32 0.25, %v2573_v26  ;;  %8059 = vmatprep.mubr.msk.bf16.mxu1 %vm1265_vm8, %v11966_v6  ;;  %v5766_v5 = vrot.slane %v5764_v1, 1  ;;  %v14921_v50 = vld [vmem:[#allocation73_spill] sm:$0xff]  ;;  %v2990_v19 = vmul.f32 0.25, %v2671_v41 }
 0x423   : > { %4135 = vrot.lane.b32.xlu1 %v14920_v62, %s8643_s11  ;;  %v11979_v8 = vsel %vm1265_vm8, %v14921_v50, %v11466_v22  ;;  %8060 = vmatmul.mubr.msk.bf16.gmra.mrb[156].mxu1 %vm1265_vm8, %v14862_v30  ;;  %v6050_v51 = vsel %vm1265_vm8, %v14862_v30, %v11404_v7  ;;  %v4294_v14 = vsel %vm1265_vm8, %v14923_v60, %v11625_v0  ;;  %v14926_v50 = vld [vmem:[#allocation30_spill] sm:$0xff]  ;;  %v14953_v60 = vld [vmem:[#allocation13_spill] sm:$0xff] }
 0x424   : > { %14922 = vst [vmem:[#allocation73_spill] sm:$0xff] %v11979_v8  ;;  %v11981_v54 = vpack.c.bf16 %v3051_v57, %v3050_v56  ;;  %4952 = vmatmul.mubr.bf16.gmra.mrb[108].mxu0 %v11979_v8  ;;  %v3055_v1 = vadd.f32 %v2991_v36, %v14871_v25  ;;  %6336 = vmatprep.mubr.bf16.mxu1 %v6050_v51  ;;  %v12010_v25 = vpop.permute.xlu1 %4061  ;;  %v14924_v57 = vld [vmem:[#allocation56_spill] sm:$0xff]  ;;  %v14960_v8 = vld [vmem:[#allocation82_spill] sm:$0xff] }
 0x425   : > { %4959 = vmatprep.mubr.bf16.mxu0 %v4294_v14  ;;  %v3054_v11 = vadd.f32 %v2990_v19, %v14875_v58  ;;  %v5767_v7 = vor.u32 %v5766_v5, %v5762_v42  ;;  %v2576_v61 = vsel %vm847_vm3, %v2574_v37, %v2575_v3  ;;  %v2672_v26 = vsel %vm847_vm3, %v14884_v43, %v2574_v37  ;;  %v12017_v58 = vpop.permute.xlu0 %3599  ;;  %v14925_v5 = vld [vmem:[#allocation23_spill] sm:$0xff]  ;;  %v14927_v19 = vld [vmem:[#allocation42_spill] sm:$0xff]  ;;  %v14930_v42 = vld [vmem:[#allocation12_spill] sm:$0xff] }
 0x426   : > { %3629 = vrot.lane.b32.xlu0 %v11958_v44, %s8643_s11  ;;  %v2993_v56 = vmul.f32 0.25, %v2576_v61  ;;  %5199 = vmatpush1.bf16.msra.mxu0 %v12000_v27  ;;  %v5771_v41 = vshll.u32 %v14924_v57, 16  ;;  %v2992_v36 = vmul.f32 0.25, %v2672_v26  ;;  %v12033_v37 = vsel %vm1265_vm8, %v14927_v19, %v14926_v50  ;;  %v12039_v14 = vld [vmem:[%s14007_s5 + $0xc0] sm:$0xff]   ;;  %v14932_v26 = vld [vmem:[#allocation68_spill] sm:$0xff] }
 0x427   : > { %4095 = vrot.lane.b32.xlu1 %v11790_v47, %s8643_s11  ;;  %v12008_v0 = vpack.c.bf16 %v3055_v1, %v3054_v11  ;;  %5200 = vmatprep.subr.bf16.mxu0 %v14879_v17  ;;  %v12028_v43 = vsel %vm882_vm6, %v5767_v7, %v14862_v30  ;;  %14928 = vst [vmem:[#allocation56_spill] sm:$0xff] %v12033_v37  ;;  %v14929_v1 = vld [vmem:[#allocation8_spill] sm:$0xff]  ;;  %v14963_v47 = vld [vmem:[#allocation93_spill] sm:$0xff] }
 0x428   : > { %v3057_v3 = vadd.f32 %v2993_v56, %v14891_v59  ;;  %v3056_v51 = vadd.f32 %v2992_v36, %v14890_v32  ;;  %v6053_v59 = vsel %vm1265_vm8, %v12028_v43, %v11433_v31  ;;  %v4298_v11 = vsel %vm1265_vm8, %v14930_v42, %v11659_v39  ;;  %v12051_v32 = vpop.permute.xlu1 %4063  ;;  %v14933_v56 = vld [vmem:[#allocation65_spill] sm:$0xff]  ;;  %v12067_v39 = vld [vmem:[%s14007_s5 + $0xc8] sm:$0xff]  }
 0x429   : > { %v5773_v7 = vrot.slane %v5771_v41, 1  ;;  %v12059_v31 = vpop.permute.xlu0 %3601  ;;  %v5769_v36 = vshrl.u32 %v14924_v57, 16  ;;  %v4310_v28 = vsel %vm1265_vm8, %v14962_v23, %v11794_v29  ;;  %v14966_v23 = vld [vmem:[#allocation66_spill] sm:$0xff] }
 0x42a   : > { %4141 = vrot.lane.b32.xlu0 %v14925_v5, %s8643_s11  ;;  %v12053_v61 = vpack.c.bf16 %v3057_v3, %v3056_v51  ;;  %5201 = vmatpush1.bf16.msra.mxu0 %v12039_v14  ;;  %v14934_v3 = vld [vmem:[#allocation78_spill] sm:$0xff] }
 0x42b   : > { %3627 = vrot.lane.b32.xlu1 %v11981_v54, %s8643_s11  ;;  %7533 = vmatmul.mubr.msk.bf16.vlgmr.msra.gmra.mrb[160].mxu1 %vm9336_vm9, %v14929_v1  ;;  %v5774_v41 = vor.u32 %v5773_v7, %v5769_v36  ;;  %v14938_v7 = vld [vmem:[#allocation10_spill] sm:$0xff] }
 0x42c   : > { %4960 = vmatmul.mubr.bf16.gmra.mrb[112].mxu0 %v12033_v37  ;;  %6344 = vmatprep.mubr.bf16.mxu1 %v6053_v59  ;;  %14931 = vst [vmem:[#allocation30_spill] sm:$0xff] %v12053_v61  ;;  %v12080_v51 = vpop.permute.xlu1 %4065  ;;  %v14959_v37 = vld [vmem:[#allocation48_spill] sm:$0xff] }
 0x42d   : > { %4967 = vmatprep.mubr.bf16.mxu0 %v4298_v11  ;;  %6594 = vmatpush1.bf16.msra.mxu1 %v11718_v13  ;;  %v14935_v13 = vld [vmem:[#allocation34_spill] sm:$0xff]  ;;  %v4114_v59 = vpop.permute.xlu0 %4113  ;;  %v14937_v11 = vld [vmem:[#allocation84_spill] sm:$0xff] }
 0x42e   : > { %4143 = vrot.lane.b32.xlu0 %v14932_v26, %s8643_s11  ;;  %6595 = vmatprep.subr.bf16.mxu1 %v14879_v17  ;;  %v12078_v19 = vsel %vm1265_vm8, %v14935_v13, %v11550_v49  ;;  %v4302_v36 = vsel %vm1265_vm8, %v14938_v7, %v14937_v11  ;;  %v12090_v1 = vsel %vm1265_vm8, %v14916_v40, %v4114_v59  ;;  %v12096_v13 = vld [vmem:[%s14007_s5 + $0xd0] sm:$0xff]   ;;  %v12110_v59 = vpop.f32.mrb[100].mxu1  ;;  %v14952_v7 = vld [vmem:[#allocation38_spill] sm:$0xff] }
 0x42f   : > { %4139 = vrot.lane.b32.xlu1 %v14933_v56, %s8643_s11  ;;  %5202 = vmatprep.subr.bf16.mxu0 %v14879_v17  ;;  %14936 = vst [vmem:[#allocation42_spill] sm:$0xff] %v12078_v19  ;;  %14939 = vst [vmem:[#allocation34_spill] sm:$0xff] %v12090_v1  ;;  %v14941_v11 = vld [vmem:[#allocation32_spill] sm:$0xff] }
 0x430   : > { %5203 = vmatpush1.bf16.msra.mxu0 %v12067_v39  ;;  %14942 = vst [vmem:[#allocation108_spill] sm:$0xff] %v12110_v59 }
 0x431   : > { %6596 = vmatpush1.bf16.msra.mxu1 %v11764_v4  ;;  %v12101_v4 = vsel %vm882_vm6, %v5774_v41, %v14862_v30  ;;  %5204 = vmatprep.subr.bf16.mxu0 %v14879_v17  ;;  %v12117_v41 = vpop.permute.xlu1 %4067 }
 0x432   : > { %4147 = vrot.lane.b32.xlu0 %v14934_v3, %s8643_s11  ;;  %6597 = vmatprep.subr.bf16.mxu1 %v14879_v17  ;;  %14940 = vst [vmem:[#allocation84_spill] sm:$0xff] %v12101_v4  ;;  %v6056_v40 = vsel %vm1265_vm8, %v12101_v4, %v11466_v22  ;;  %v14945_v22 = vld [vmem:[#allocation20_spill] sm:$0xff] }
 0x433   : > { %4099 = vrot.lane.b32.xlu1 %v11906_v38, %s8643_s11  ;;  %6345 = vmatmul.mubr.bf16.gmra.mrb[164].mxu1 %v12090_v1  ;;  %v14948_v38 = vld [vmem:[#allocation26_spill] sm:$0xff]  ;;  %v12163_v1 = vsel %vm1265_vm8, %v14960_v8, %v14959_v37  ;;  %v14964_v8 = vld [vmem:[#allocation11_spill] sm:$0xff] }
 0x434   : > { %4968 = vmatmul.mubr.bf16.gmra.mrb[116].mxu0 %v12078_v19  ;;  %6352 = vmatprep.mubr.bf16.mxu1 %v6056_v40  ;;  %v14946_v40 = vld [vmem:[#allocation75_spill] sm:$0xff] }
 0x435   : > { %4975 = vmatprep.mubr.bf16.mxu0 %v4302_v36  ;;  %v12113_v36 = vpop.f32.mrb[101].mxu1  ;;  %6598 = vmatpush1.bf16.msra.mxu1 %v11800_v53  ;;  %v14949_v53 = vld [vmem:[#allocation79_spill] sm:$0xff]  ;;  %v12144_v19 = vpop.permute.xlu1 %4069 }
 0x436   : > { %4151 = vrot.lane.b32.xlu0 %v14941_v11, %s8643_s11  ;;  %14943 = vst [vmem:[#allocation109_spill] sm:$0xff] %v12113_v36  ;;  %5205 = vmatpush1.bf16.msra.mxu0 %v12096_v13  ;;  %v12119_v48 = vpop.f32.mrb[102].mxu1  ;;  %v12132_v36 = vsel %vm1265_vm8, %v14949_v53, %v14948_v38  ;;  %v12146_v53 = vpop.permute.xlu0 %4073 }
 0x437   : > { %3631 = vrot.lane.b32.xlu1 %v12008_v0, %s8643_s11  ;;  %14944 = vst [vmem:[#allocation110_spill] sm:$0xff] %v12119_v48  ;;  %6599 = vmatprep.subr.bf16.mxu1 %v14879_v17  ;;  %v12127_v59 = vpop.f32.mrb[103].mxu1  ;;  %14950 = vst [vmem:[#allocation26_spill] sm:$0xff] %v12132_v36  ;;  %v14951_v48 = vld [vmem:[#allocation86_spill] sm:$0xff] }
 0x438   : > { %5206 = vmatprep.subr.bf16.mxu0 %v14879_v17  ;;  %14947 = vst [vmem:[#allocation111_spill] sm:$0xff] %v12127_v59  ;;  %v4306_v42 = vsel %vm1265_vm8, %v14952_v7, %v14951_v48  ;;  %v14954_v59 = vld [vmem:[#allocation63_spill] sm:$0xff]  ;;  %14955 = vst [vmem:[#allocation79_spill] sm:$0xff] %v12146_v53  ;;  %v12152_v48 = vld [vmem:[%s14007_s5 + $0xd8] sm:$0xff]  }
 0x439   : > { %6600 = vmatpush1.bf16.msra.mxu1 %v11834_v33  ;;  %v14956_v33 = vld [vmem:[#allocation87_spill] sm:$0xff]  ;;  %14961 = vst [vmem:[#allocation86_spill] sm:$0xff] %v12163_v1 }
 0x43a   : > { %4155 = vrot.lane.b32.xlu0 %v14945_v22, %s8643_s11  ;;  %6601 = vmatprep.subr.bf16.mxu1 %v14879_v17  ;;  %v14958_v7 = vld [vmem:[#allocation59_spill] sm:$0xff]  ;;  %v12178_v34 = vpop.permute.xlu0 %3605  ;;  %v14971_v22 = vld [vmem:[#allocation97_spill] sm:$0xff] }
 0x43b   : > { %4145 = vrot.lane.b32.xlu1 %v14946_v40, %s8643_s11  ;;  %5207 = vmatpush1.bf16.msra.mxu0 %v12152_v48  ;;  %14965 = vst [vmem:[#allocation59_spill] sm:$0xff] %v12178_v34  ;;  %v5776_v29 = vshrl.u32 %v14958_v7, 16  ;;  %v14996_v34 = vld [vmem:[#allocation51_spill] sm:$0xff] }
 0x43c   : > { %4976 = vmatmul.mubr.bf16.gmra.mrb[120].mxu0 %v12132_v36  ;;  %v5778_v36 = vshll.u32 %v14958_v7, 16  ;;  %5208 = vmatprep.subr.bf16.mxu0 %v14879_v17 }
 0x43d   : > { %4983 = vmatprep.mubr.bf16.mxu0 %v4306_v42  ;;  %6602 = vmatpush1.bf16.msra.mxu1 %v11872_v46  ;;  %v14957_v42 = vld [vmem:[#allocation29_spill] sm:$0xff]  ;;  %v12165_v46 = vpop.permute.xlu1 %4071 }
 0x43e   : > { %4159 = vrot.lane.b32.xlu0 %v14953_v60, %s8643_s11  ;;  %6603 = vmatprep.subr.bf16.mxu1 %v14879_v17  ;;  %v5785_v60 = vshll.u32 %v14966_v23, 16 }
 0x43f   : > { %4149 = vrot.lane.b32.xlu1 %v14954_v59, %s8643_s11  ;;  %v14972_v59 = vld [vmem:[#allocation40_spill] sm:$0xff] }
 0x441   : > { %6604 = vmatpush1.bf16.msra.mxu1 %v11918_v15 }
 0x442   : > { %4163 = vrot.lane.b32.xlu0 %v14956_v33, %s8643_s11  ;;  %v5780_v33 = vrot.slane %v5778_v36, 1  ;;  %6605 = vmatprep.subr.bf16.mxu1 %v14879_v17 }
 0x443   : > { %4153 = vrot.lane.b32.xlu1 %v14957_v42, %s8643_s11  ;;  %v4118_v42 = vpop.permute.xlu0 %4117 }
 0x444   : > { %4984 = vmatmul.mubr.bf16.gmra.mrb[124].mxu0 %v12163_v1  ;;  %v12181_v1 = vpop.permute.xlu1 %3603  ;;  %v5781_v15 = vor.u32 %v5780_v33, %v5776_v29 }
 0x445   : > { %4991 = vmatprep.mubr.bf16.mxu0 %v4310_v28  ;;  %6606 = vmatpush1.bf16.msra.mxu1 %v11954_v2  ;;  %v14967_v28 = vld [vmem:[#allocation81_spill] sm:$0xff]  ;;  %v4314_v2 = vsel %vm1265_vm8, %v14971_v22, %v11846_v63 }
 0x446   : > { %4167 = vrot.lane.b32.xlu0 %v14963_v47, %s8643_s11  ;;  %v14968_v47 = vld [vmem:[#allocation52_spill] sm:$0xff]  ;;  %6607 = vmatprep.subr.bf16.mxu1 %v14879_v17  ;;  %v12212_v63 = vsel %vm882_vm6, %v5781_v15, %v14862_v30  ;;  %v12226_v15 = vld [vmem:[%s14007_s5 + $0xe0] sm:$0xff]  }
 0x447   : > { %4157 = vrot.lane.b32.xlu1 %v14964_v8, %s8643_s11  ;;  %v14969_v8 = vld [vmem:[#allocation83_spill] sm:$0xff]  ;;  %14975 = vst [vmem:[#allocation66_spill] sm:$0xff] %v12212_v63  ;;  %5209 = vmatpush1.bf16.msra.mxu0 %v12226_v15 }
 0x448   : > { %v12193_v36 = vsel %vm1265_vm8, %v14969_v8, %v14968_v47  ;;  %v4116_v11 = vpop.permute.xlu1 %4115  ;;  %v14974_v8 = vld [vmem:[#allocation90_spill] sm:$0xff]  ;;  %5210 = vmatprep.subr.bf16.mxu0 %v14879_v17 }
 0x449   : > { %14970 = vst [vmem:[#allocation48_spill] sm:$0xff] %v12193_v36  ;;  %v12203_v33 = vsel %vm1265_vm8, %v14924_v57, %v4116_v11  ;;  %6608 = vmatpush1.bf16.msra.mxu1 %v12000_v27  ;;  %v6059_v57 = vsel %vm1265_vm8, %v12212_v63, %v14926_v50  ;;  %v12233_v50 = vpop.permute.xlu0 %4077 }
 0x44a   : > { %4171 = vrot.lane.b32.xlu0 %v11849_v18, %s8643_s11  ;;  %v5787_v18 = vrot.slane %v5785_v60, 1  ;;  %14973 = vst [vmem:[#allocation82_spill] sm:$0xff] %v12203_v33  ;;  %v5783_v60 = vshrl.u32 %v14966_v23, 16  ;;  %6353 = vmatmul.mubr.bf16.gmra.mrb[168].mxu1 %v12203_v33  ;;  %14978 = vst [vmem:[#allocation83_spill] sm:$0xff] %v12233_v50  ;;  %v14986_v50 = vld [vmem:[#allocation16_spill] sm:$0xff] }
 0x44b   : > { %4161 = vrot.lane.b32.xlu1 %v14967_v28, %s8643_s11  ;;  %v5799_v28 = vshll.u32 %v14972_v59, 16  ;;  %6609 = vmatprep.subr.bf16.mxu1 %v14879_v17 }
 0x44c   : > { %4992 = vmatmul.mubr.bf16.gmra.mrb[128].mxu0 %v12193_v36  ;;  %6360 = vmatprep.mubr.bf16.mxu1 %v6059_v57  ;;  %v12220_v27 = vpop.permute.xlu1 %4075  ;;  %v5788_v11 = vor.u32 %v5787_v18, %v5783_v60  ;;  %v14979_v57 = vld [vmem:[#allocation44_spill] sm:$0xff]  ;;  %v14981_v36 = vld [vmem:[#allocation95_spill] sm:$0xff] }
 0x44d   : > { %4999 = vmatprep.mubr.bf16.mxu0 %v4314_v2  ;;  %14976 = vst [vmem:[#allocation52_spill] sm:$0xff] %v12220_v27  ;;  %v5801_v29 = vrot.slane %v5799_v28, 1  ;;  %v14977_v2 = vld [vmem:[#allocation37_spill] sm:$0xff]  ;;  %6610 = vmatpush1.bf16.msra.mxu1 %v12039_v14  ;;  %v5792_v18 = vshll.u32 %v14979_v57, 16  ;;  %v5797_v28 = vshrl.u32 %v14972_v59, 16  ;;  %v14980_v60 = vld [vmem:[#allocation36_spill] sm:$0xff]  ;;  %v4318_v14 = vsel %vm1265_vm8, %v14898_v35, %v11912_v16  ;;  %v12264_v16 = vpop.permute.xlu0 %3609 }
 0x44e   : > { %4173 = vrot.lane.b32.xlu0 %v11902_v24, %s8643_s11  ;;  %v5813_v22 = vshll.u32 %v14977_v2, 16  ;;  %v12240_v33 = vsel %vm1265_vm8, %v14981_v36, %v14980_v60  ;;  %6611 = vmatprep.subr.bf16.mxu1 %v14879_v17  ;;  %v12250_v24 = vpop.f32.mrb[104].mxu1  ;;  %v12255_v36 = vsel %vm882_vm6, %v5788_v11, %v14862_v30  ;;  %v5827_v27 = vshll.u32 %v14986_v50, 16  ;;  %14988 = vst [vmem:[#allocation16_spill] sm:$0xff] %v12264_v16  ;;  %v14992_v35 = vld [vmem:[#allocation45_spill] sm:$0xff] }
 0x44f   : > { %4165 = vrot.lane.b32.xlu1 %v14974_v8, %s8643_s11  ;;  %14982 = vst [vmem:[#allocation40_spill] sm:$0xff] %v12240_v33  ;;  %14984 = vst [vmem:[#allocation44_spill] sm:$0xff] %v12250_v24  ;;  %v5794_v24 = vrot.slane %v5792_v18, 1  ;;  %v12268_v11 = vsel %vm1265_vm8, %v14958_v7, %v4118_v42  ;;  %v5841_v18 = vshll.u32 %v14992_v35, 16 }
 0x450   : > { %14985 = vst [vmem:[#allocation36_spill] sm:$0xff] %v12255_v36  ;;  %v5815_v8 = vrot.slane %v5813_v22, 1  ;;  %14989 = vst [vmem:[#allocation112_spill] sm:$0xff] %v12268_v11  ;;  %v5811_v22 = vshrl.u32 %v14977_v2, 16 }
 0x451   : > { %6612 = vmatpush1.bf16.msra.mxu1 %v12067_v39  ;;  %v14998_v39 = vld [vmem:[#allocation101_spill] sm:$0xff] }
 0x452   : > { %5988 = vrot.lane.b32.xlu0 %v12101_v4, %s8643_s11  ;;  %v12248_v4 = vpop.permute.xlu1 %3607  ;;  %6361 = vmatmul.mubr.bf16.gmra.mrb[172].mxu1 %v12268_v11  ;;  %v5816_v42 = vor.u32 %v5815_v8, %v5811_v22  ;;  %v4322_v8 = vsel %vm1265_vm8, %v14998_v39, %v11962_v10  ;;  %v14999_v22 = vld [vmem:[#allocation57_spill] sm:$0xff] }
 0x453   : > { %4169 = vrot.lane.b32.xlu1 %v11806_v21, %s8643_s11  ;;  %14983 = vst [vmem:[#allocation37_spill] sm:$0xff] %v12248_v4  ;;  %v5802_v21 = vor.u32 %v5801_v29, %v5797_v28  ;;  %v6062_v28 = vsel %vm1265_vm8, %v12255_v36, %v11550_v49  ;;  %v14994_v4 = vld [vmem:[#allocation31_spill] sm:$0xff]  ;;  %v4122_v49 = vpop.permute.xlu0 %4121  ;;  %6613 = vmatprep.subr.bf16.mxu1 %v14879_v17 }
 0x454   : > { %5000 = vmatmul.mubr.bf16.gmra.mrb[132].mxu0 %v12240_v33  ;;  %v12258_v33 = vpop.f32.mrb[105].mxu1  ;;  %6368 = vmatprep.mubr.bf16.mxu1 %v6062_v28  ;;  %v5806_v11 = vshll.u32 %v14994_v4, 16  ;;  %v5825_v28 = vshrl.u32 %v14986_v50, 16 }
 0x455   : > { %5007 = vmatprep.mubr.bf16.mxu0 %v4318_v14  ;;  %14987 = vst [vmem:[#allocation95_spill] sm:$0xff] %v12258_v33  ;;  %v12270_v29 = vpop.f32.mrb[106].mxu1  ;;  %v5790_v33 = vshrl.u32 %v14979_v57, 16  ;;  %v12283_v7 = vsel %vm882_vm6, %v5802_v21, %v14862_v30  ;;  %6614 = vmatpush1.bf16.msra.mxu1 %v12096_v13  ;;  %v5804_v13 = vshrl.u32 %v14994_v4, 16 }
 0x456   : > { %5992 = vrot.lane.b32.xlu0 %v12255_v36, %s8643_s11  ;;  %14990 = vst [vmem:[#allocation113_spill] sm:$0xff] %v12270_v29  ;;  %v12277_v14 = vpop.f32.mrb[107].mxu1  ;;  %v4120_v16 = vpop.permute.xlu1 %4119  ;;  %14993 = vst [vmem:[#allocation45_spill] sm:$0xff] %v12283_v7  ;;  %v5829_v29 = vrot.slane %v5827_v27, 1  ;;  %v5843_v27 = vrot.slane %v5841_v18, 1  ;;  %v5808_v3 = vrot.slane %v5806_v11, 1  ;;  %6615 = vmatprep.subr.bf16.mxu1 %v14879_v17 }
 0x457   : > { %4178 = vrot.lane.b32.xlu1 %v12053_v61, %s8643_s11  ;;  %14991 = vst [vmem:[#allocation114_spill] sm:$0xff] %v12277_v14  ;;  %v5795_v36 = vor.u32 %v5794_v24, %v5790_v33  ;;  %v14995_v14 = vld [vmem:[#allocation91_spill] sm:$0xff]  ;;  %v12305_v24 = vsel %vm882_vm6, %v5816_v42, %v14862_v30  ;;  %v5839_v18 = vshrl.u32 %v14992_v35, 16  ;;  %v12322_v11 = vsel %vm1265_vm8, %v14966_v23, %v4120_v16 }
 0x458   : > { %v12295_v21 = vsel %vm1265_vm8, %v14996_v34, %v14995_v14  ;;  %15000 = vst [vmem:[#allocation91_spill] sm:$0xff] %v12305_v24  ;;  %v5830_v33 = vor.u32 %v5829_v29, %v5825_v28  ;;  %v15001_v34 = vld [vmem:[#allocation14_spill] sm:$0xff]  ;;  %15004 = vst [vmem:[#allocation115_spill] sm:$0xff] %v12322_v11  ;;  %v12324_v29 = vpop.permute.xlu0 %4081  ;;  %v5809_v16 = vor.u32 %v5808_v3, %v5804_v13 }
 0x459   : > { %14997 = vst [vmem:[#allocation31_spill] sm:$0xff] %v12295_v21  ;;  %v5820_v53 = vshll.u32 %v15001_v34, 16  ;;  %v12315_v10 = vsel %vm882_vm6, %v5795_v36, %v14862_v30  ;;  %15005 = vst [vmem:[#allocation116_spill] sm:$0xff] %v12324_v29  ;;  %v5844_v36 = vor.u32 %v5843_v27, %v5839_v18  ;;  %v15008_v29 = vld [vmem:[#allocation96_spill] sm:$0xff]  ;;  %6616 = vmatpush1.bf16.msra.mxu1 %v12152_v48  ;;  %v15009_v27 = vld [vmem:[#allocation47_spill] sm:$0xff] }
 0x45a   : > { %5996 = vrot.lane.b32.xlu0 %v12283_v7, %s8643_s11  ;;  %15002 = vst [vmem:[#allocation51_spill] sm:$0xff] %v12315_v10  ;;  %v12318_v42 = vpop.permute.xlu1 %4079  ;;  %6369 = vmatmul.mubr.bf16.gmra.mrb[176].mxu1 %v12322_v11  ;;  %v6065_v28 = vsel %vm1265_vm8, %v12315_v10, %v14948_v38  ;;  %v12335_v23 = vsel %vm882_vm6, %v5830_v33, %v14862_v30  ;;  %v5853_v38 = vshrl.u32 %v14999_v22, 16 }
 0x45b   : > { %5986 = vrot.lane.b32.xlu1 %v12028_v43, %s8643_s11  ;;  %v5855_v43 = vshll.u32 %v14999_v22, 16  ;;  %15003 = vst [vmem:[#allocation14_spill] sm:$0xff] %v12318_v42  ;;  %6376 = vmatprep.mubr.bf16.mxu1 %v6065_v28  ;;  %15007 = vst [vmem:[#allocation117_spill] sm:$0xff] %v12335_v23  ;;  %v5834_v42 = vshll.u32 %v15008_v29, 16  ;;  %v4326_v3 = vsel %vm1265_vm8, %v14920_v62, %v12010_v25  ;;  %v15013_v28 = vld [vmem:[#allocation9_spill] sm:$0xff]  ;;  %v15016_v22 = vld [vmem:[#allocation99_spill] sm:$0xff] }
 0x45c   : > { %5008 = vmatmul.mubr.bf16.gmra.mrb[136].mxu0 %v12295_v21  ;;  %v5822_v21 = vrot.slane %v5820_v53, 1  ;;  %v5818_v53 = vshrl.u32 %v15001_v34, 16  ;;  %6617 = vmatprep.subr.bf16.mxu1 %v14879_v17  ;;  %v12356_v48 = vsel %vm882_vm6, %v5844_v36, %v14862_v30  ;;  %v12366_v25 = vsel %vm882_vm6, %v5809_v16, %v14862_v30 }
 0x45d   : > { %5015 = vmatprep.mubr.bf16.mxu0 %v4322_v8  ;;  %v5857_v8 = vrot.slane %v5855_v43, 1  ;;  %v12347_v43 = vsel %vm1265_vm8, %v15009_v27, %v11814_v20  ;;  %15011 = vst [vmem:[#allocation47_spill] sm:$0xff] %v12356_v48  ;;  %v5876_v27 = vshll.u32 %v15013_v28, 16  ;;  %15015 = vst [vmem:[#allocation120_spill] sm:$0xff] %v12366_v25  ;;  %v5836_v11 = vrot.slane %v5834_v42, 1  ;;  %6618 = vmatpush1.bf16.msra.mxu1 %v12226_v15 }
 0x45e   : > { %6000 = vrot.lane.b32.xlu0 %v12305_v24, %s8643_s11  ;;  %15010 = vst [vmem:[#allocation96_spill] sm:$0xff] %v12347_v43  ;;  %v12359_v13 = vpop.permute.xlu1 %3611  ;;  %v5823_v62 = vor.u32 %v5822_v21, %v5818_v53  ;;  %v5848_v36 = vshll.u32 %v15016_v22, 16  ;;  %v8620_v21 = vld [vmem:[%s14007_s5 + $0xe8] sm:$0xff]   ;;  %v5832_v42 = vshrl.u32 %v15008_v29, 16  ;;  %v6068_v15 = vsel %vm1265_vm8, %v12283_v7, %v14959_v37  ;;  %6619 = vmatprep.subr.bf16.mxu1 %v14879_v17  ;;  %v15021_v37 = vld [vmem:[#allocation64_spill] sm:$0xff] }
 0x45f   : > { %5990 = vrot.lane.b32.xlu1 %v12212_v63, %s8643_s11  ;;  %v15006_v63 = vld [vmem:[#allocation19_spill] sm:$0xff]  ;;  %v5858_v33 = vor.u32 %v5857_v8, %v5853_v38  ;;  %15012 = vst [vmem:[#allocation118_spill] sm:$0xff] %v12359_v13  ;;  %v12377_v8 = vsel %vm1265_vm8, %v14979_v57, %v4122_v49  ;;  %v5878_v49 = vrot.slane %v5876_v27, 1  ;;  %5211 = vmatpush1.bf16.msra.mxu0 %v8620_v21  ;;  %v5862_v7 = vshll.u32 %v15021_v37, 16  ;;  %v15022_v27 = vld [vmem:[#allocation88_spill] sm:$0xff] }
 0x460   : > { %v5869_v39 = vshll.u32 %v15006_v63, 16  ;;  %15017 = vst [vmem:[#allocation99_spill] sm:$0xff] %v12377_v8  ;;  %5212 = vmatprep.subr.bf16.mxu0 %v14879_v17 }
 0x461   : > { %v12390_v16 = vsel %vm882_vm6, %v5858_v33, %v14862_v30  ;;  %6620 = vmatpush1.bf16.msra.mxu1 %v8620_v21  ;;  %v5874_v33 = vshrl.u32 %v15013_v28, 16  ;;  %v5864_v13 = vrot.slane %v5862_v7, 1 }
 0x462   : > { %6004 = vrot.lane.b32.xlu0 %v12335_v23, %s8643_s11  ;;  %v5871_v18 = vrot.slane %v5869_v39, 1  ;;  %v5867_v39 = vshrl.u32 %v15006_v63, 16  ;;  %6377 = vmatmul.mubr.bf16.gmra.mrb[180].mxu1 %v12377_v8  ;;  %15018 = vst [vmem:[#allocation121_spill] sm:$0xff] %v12390_v16  ;;  %v4124_v38 = vpop.permute.xlu1 %4123  ;;  %v5837_v8 = vor.u32 %v5836_v11, %v5832_v42  ;;  %v5850_v63 = vrot.slane %v5848_v36, 1 }
 0x463   : > { %5994 = vrot.lane.b32.xlu1 %v12315_v10, %s8643_s11  ;;  %v12362_v10 = vpop.permute.xlu0 %3613  ;;  %6384 = vmatprep.mubr.bf16.mxu1 %v6068_v15  ;;  %v5846_v11 = vshrl.u32 %v15016_v22, 16  ;;  %v5879_v21 = vor.u32 %v5878_v49, %v5874_v33  ;;  %v4330_v42 = vsel %vm1265_vm8, %v14915_v45, %v12051_v32  ;;  %v12433_v49 = vsel %vm1265_vm8, %v14972_v59, %v4124_v38  ;;  %v15030_v33 = vld [vmem:[#allocation55_spill] sm:$0xff] }
 0x464   : > { %5016 = vmatmul.mubr.bf16.gmra.mrb[140].mxu0 %v12347_v43  ;;  %15014 = vst [vmem:[#allocation119_spill] sm:$0xff] %v12362_v10  ;;  %v5872_v57 = vor.u32 %v5871_v18, %v5867_v39  ;;  %v12395_v43 = vsel %vm882_vm6, %v5823_v62, %v14862_v30  ;;  %v15023_v39 = vld [vmem:[#allocation100_spill] sm:$0xff]  ;;  %6621 = vmatprep.subr.bf16.mxu1 %v14879_v17  ;;  %15028 = vst [vmem:[#allocation123_spill] sm:$0xff] %v12433_v49 }
 0x465   : > { %5023 = vmatprep.mubr.bf16.mxu0 %v4326_v3  ;;  %v15019_v3 = vld [vmem:[#allocation21_spill] sm:$0xff]  ;;  %15020 = vst [vmem:[#allocation122_spill] sm:$0xff] %v12395_v43  ;;  %v12407_v62 = vsel %vm1265_vm8, %v15023_v39, %v15022_v27  ;;  %v12421_v39 = vsel %vm882_vm6, %v5837_v8, %v14862_v30  ;;  %v5851_v28 = vor.u32 %v5850_v63, %v5846_v11  ;;  %v5860_v8 = vshrl.u32 %v15021_v37, 16 }
 0x466   : > { %6008 = vrot.lane.b32.xlu0 %v12356_v48, %s8643_s11  ;;  %v5890_v53 = vshll.u32 %v15019_v3, 16  ;;  %15024 = vst [vmem:[#allocation64_spill] sm:$0xff] %v12407_v62  ;;  %v12413_v36 = vsel %vm882_vm6, %v5872_v57, %v14862_v30  ;;  %15026 = vst [vmem:[#allocation100_spill] sm:$0xff] %v12421_v39  ;;  %v12423_v10 = vpop.permute.xlu1 %4083  ;;  %v5888_v32 = vshrl.u32 %v15019_v3, 16  ;;  %v6071_v63 = vsel %vm1265_vm8, %v12366_v25, %v14968_v47  ;;  %v12456_v47 = vpop.f32.mrb[108].mxu1 }
 0x467   : > { %5998 = vrot.lane.b32.xlu1 %v12366_v25, %s8643_s11  ;;  %v4126_v18 = vpop.permute.xlu0 %4125  ;;  %15025 = vst [vmem:[#allocation88_spill] sm:$0xff] %v12413_v36  ;;  %v12442_v7 = vsel %vm882_vm6, %v5879_v21, %v14862_v30  ;;  %v5918_v11 = vshll.u32 %v15030_v33, 16  ;;  %v12449_v59 = vsel %vm882_vm6, %v5851_v28, %v14862_v30  ;;  %v5865_v38 = vor.u32 %v5864_v13, %v5860_v8  ;;  %v8621_v21 = vld [vmem:[%s14007_s5 + $0xf0] sm:$0xff]   ;;  %v15035_v28 = vld [vmem:[#allocation102_spill] sm:$0xff] }
 0x468   : > { %v5892_v15 = vrot.slane %v5890_v53, 1  ;;  %15029 = vst [vmem:[#allocation124_spill] sm:$0xff] %v12442_v7  ;;  %15032 = vst [vmem:[#allocation125_spill] sm:$0xff] %v12449_v59  ;;  %v12465_v13 = vsel %vm1265_vm8, %v15035_v28, %v11933_v52  ;;  %6622 = vmatpush1.bf16.msra.mxu1 %v8621_v21  ;;  %5213 = vmatpush1.bf16.msra.mxu0 %v8621_v21 }
 0x469   : > { %15036 = vst [vmem:[#allocation102_spill] sm:$0xff] %v12465_v13  ;;  %v5920_v25 = vrot.slane %v5918_v11, 1  ;;  %v12484_v28 = vsel %vm882_vm6, %v5865_v38, %v14862_v30  ;;  %v12496_v11 = vsel %vm1265_vm8, %v14994_v4, %v4126_v18  ;;  %v6074_v38 = vsel %vm1265_vm8, %v12305_v24, %v14980_v60  ;;  %5214 = vmatprep.subr.bf16.mxu0 %v14879_v17  ;;  %v15050_v24 = vld [vmem:[#allocation54_spill] sm:$0xff] }
 0x46a   : > { %6012 = vrot.lane.b32.xlu0 %v12390_v16, %s8643_s11  ;;  %v15027_v16 = vld [vmem:[#allocation24_spill] sm:$0xff]  ;;  %6385 = vmatmul.mubr.bf16.gmra.mrb[184].mxu1 %v12433_v49  ;;  %v5893_v53 = vor.u32 %v5892_v15, %v5888_v32  ;;  %v12469_v32 = vpop.f32.mrb[109].mxu1  ;;  %15042 = vst [vmem:[#allocation130_spill] sm:$0xff] %v12484_v28  ;;  %15045 = vst [vmem:[#allocation131_spill] sm:$0xff] %v12496_v11 }
 0x46b   : > { %6002 = vrot.lane.b32.xlu1 %v12395_v43, %s8643_s11  ;;  %v5904_v57 = vshll.u32 %v15027_v16, 16  ;;  %6392 = vmatprep.mubr.bf16.mxu1 %v6071_v63  ;;  %v5902_v15 = vshrl.u32 %v15027_v16, 16  ;;  %15038 = vst [vmem:[#allocation127_spill] sm:$0xff] %v12469_v32  ;;  %v4334_v63 = vsel %vm1265_vm8, %v14933_v56, %v12080_v51  ;;  %v12480_v3 = vpop.f32.mrb[110].mxu1  ;;  %v5916_v51 = vshrl.u32 %v15030_v33, 16  ;;  %v15047_v56 = vld [vmem:[#allocation28_spill] sm:$0xff] }
 0x46c   : > { %5024 = vmatmul.mubr.bf16.gmra.mrb[144].mxu0 %v12407_v62  ;;  %v15033_v62 = vld [vmem:[#allocation41_spill] sm:$0xff]  ;;  %v12473_v8 = vsel %vm882_vm6, %v5893_v53, %v14862_v30  ;;  %15041 = vst [vmem:[#allocation129_spill] sm:$0xff] %v12480_v3  ;;  %v5946_v3 = vshll.u32 %v11925_v9, 16  ;;  %6623 = vmatprep.subr.bf16.mxu1 %v14879_v17 }
 0x46d   : > { %5031 = vmatprep.mubr.bf16.mxu0 %v4330_v42  ;;  %v12445_v42 = vpop.permute.xlu0 %4085  ;;  %v5906_v45 = vrot.slane %v5904_v57, 1  ;;  %v5883_v49 = vshll.u32 %v15033_v62, 16  ;;  %15034 = vst [vmem:[#allocation41_spill] sm:$0xff] %v12456_v47  ;;  %v12467_v57 = vpop.permute.xlu1 %3615  ;;  %15039 = vst [vmem:[#allocation128_spill] sm:$0xff] %v12473_v8  ;;  %v15040_v47 = vld [vmem:[#allocation85_spill] sm:$0xff]  ;;  %v5921_v21 = vor.u32 %v5920_v25, %v5916_v51  ;;  %v15048_v25 = vld [vmem:[#allocation70_spill] sm:$0xff] }
 0x46e   : > { %6016 = vrot.lane.b32.xlu0 %v12413_v36, %s8643_s11  ;;  %15031 = vst [vmem:[#allocation55_spill] sm:$0xff] %v12445_v42  ;;  %15037 = vst [vmem:[#allocation126_spill] sm:$0xff] %v12467_v57  ;;  %v5932_v16 = vshll.u32 %v15040_v47, 16  ;;  %v15043_v42 = vld [vmem:[#allocation72_spill] sm:$0xff]  ;;  %v5930_v60 = vshrl.u32 %v15040_v47, 16  ;;  %v12521_v17 = vsel %vm1265_vm8, %v15048_v25, %v11983_v12  ;;  %v5948_v51 = vrot.slane %v5946_v3, 1 }
 0x46f   : > { %6006 = vrot.lane.b32.xlu1 %v12421_v39, %s8643_s11  ;;  %v5907_v32 = vor.u32 %v5906_v45, %v5902_v15  ;;  %v5885_v53 = vrot.slane %v5883_v49, 1  ;;  %v5897_v57 = vshll.u32 %v15043_v42, 16  ;;  %v5881_v49 = vshrl.u32 %v15033_v62, 16  ;;  %15049 = vst [vmem:[#allocation28_spill] sm:$0xff] %v12521_v17 }
 0x470   : > { %v5944_v3 = vshrl.u32 %v11925_v9, 16 }
 0x471   : > { %v12498_v45 = vpop.permute.xlu0 %3617  ;;  %v4128_v15 = vpop.permute.xlu1 %4127  ;;  %v12510_v4 = vsel %vm882_vm6, %v5907_v32, %v14862_v30  ;;  %v5886_v18 = vor.u32 %v5885_v53, %v5881_v49  ;;  %v12529_v32 = vsel %vm882_vm6, %v5921_v21, %v14862_v30  ;;  %v5960_v49 = vshll.u32 %v11981_v54, 16 }
 0x472   : > { %6018 = vrot.lane.b32.xlu0 %v12442_v7, %s8643_s11  ;;  %6393 = vmatmul.mubr.bf16.gmra.mrb[188].mxu1 %v12496_v11  ;;  %15046 = vst [vmem:[#allocation132_spill] sm:$0xff] %v12510_v4  ;;  %v5911_v11 = vshll.u32 %v15047_v56, 16 }
 0x473   : > { %6010 = vrot.lane.b32.xlu1 %v12449_v59, %s8643_s11  ;;  %6400 = vmatprep.mubr.bf16.mxu1 %v6074_v38  ;;  %v12535_v25 = vsel %vm882_vm6, %v5886_v18, %v14862_v30  ;;  %v5909_v18 = vshrl.u32 %v15047_v56, 16 }
 0x474   : > { %5032 = vmatmul.mubr.bf16.gmra.mrb[148].mxu0 %v12465_v13  ;;  %v12487_v13 = vpop.f32.mrb[111].mxu1 }
 0x475   : > { %5039 = vmatprep.mubr.bf16.mxu0 %v4334_v63  ;;  %15044 = vst [vmem:[#allocation72_spill] sm:$0xff] %v12487_v13  ;;  %v5934_v63 = vrot.slane %v5932_v16, 1  ;;  %v5899_v13 = vrot.slane %v5897_v57, 1  ;;  %v4338_v16 = vsel %vm1265_vm8, %v14925_v5, %v12117_v41  ;;  %v5895_v57 = vshrl.u32 %v15043_v42, 16  ;;  %v4130_v38 = vpop.permute.xlu0 %4129  ;;  %v12564_v47 = vpop.f32.mrb[112].mxu1 }
 0x476   : > { %6022 = vrot.lane.b32.xlu0 %v12473_v8, %s8643_s11  ;;  %v5913_v41 = vrot.slane %v5911_v11, 1  ;;  %v5925_v5 = vshll.u32 %v15050_v24, 16  ;;  %v12542_v21 = vpop.permute.xlu1 %4087  ;;  %15053 = vst [vmem:[#allocation54_spill] sm:$0xff] %v12564_v47 }
 0x477   : > { %6014 = vrot.lane.b32.xlu1 %v12484_v28, %s8643_s11  ;;  %v5935_v53 = vor.u32 %v5934_v63, %v5930_v60  ;;  %v12547_v63 = vsel %vm1265_vm8, %v14977_v2, %v4128_v15  ;;  %v5949_v60 = vor.u32 %v5948_v51, %v5944_v3 }
 0x478   : > { %15051 = vst [vmem:[#allocation70_spill] sm:$0xff] %v12547_v63  ;;  %v5914_v15 = vor.u32 %v5913_v41, %v5909_v18  ;;  %v5923_v41 = vshrl.u32 %v15050_v24, 16 }
 0x479   : > { %v12556_v11 = vsel %vm882_vm6, %v5935_v53, %v14862_v30  ;;  %v5958_v53 = vshrl.u32 %v11981_v54, 16  ;;  %v12576_v51 = vpop.permute.xlu0 %4089  ;;  %v12588_v18 = vsel %vm882_vm6, %v5949_v60, %v14862_v30 }
 0x47a   : > { %6026 = vrot.lane.b32.xlu0 %v12510_v4, %s8643_s11  ;;  %6401 = vmatmul.mubr.bf16.gmra.mrb[192].mxu1 %v12547_v63  ;;  %v15052_v63 = vld [vmem:[#allocation25_spill] sm:$0xff]  ;;  %v12606_v60 = vsel %vm882_vm6, %v5914_v15, %v14862_v30 }
 0x47b   : > { %4175 = vrot.lane.b32.xlu1 %v11966_v6, %s8643_s11  ;;  %v5900_v6 = vor.u32 %v5899_v13, %v5895_v57  ;;  %v6077_v13 = vsel %vm1265_vm8, %v12395_v43, %v14995_v14  ;;  %v5974_v57 = vshll.u32 %v12008_v0, 16  ;;  %v5939_v9 = vshll.u32 %v15052_v63, 16  ;;  %v8622_v14 = vld [vmem:[%s14007_s5 + $0xf8] sm:$0xff]  }
 0x47c   : > { %5040 = vmatmul.mubr.bf16.gmra.mrb[152].mxu0 %v12521_v17  ;;  %6408 = vmatprep.mubr.bf16.mxu1 %v6077_v13  ;;  %v5927_v17 = vrot.slane %v5925_v5, 1  ;;  %v15055_v5 = vld [vmem:[#allocation69_spill] sm:$0xff]  ;;  %v5937_v15 = vshrl.u32 %v15052_v63, 16 }
 0x47d   : > { %5047 = vmatprep.mubr.bf16.mxu0 %v4338_v16  ;;  %v5962_v16 = vrot.slane %v5960_v49, 1  ;;  %v12561_v2 = vsel %vm882_vm6, %v5900_v6, %v14862_v30  ;;  %v12574_v6 = vpop.f32.mrb[113].mxu1  ;;  %v12581_v49 = vsel %vm1265_vm8, %v15055_v5, %v12017_v58  ;;  %5215 = vmatpush1.bf16.msra.mxu0 %v8622_v14  ;;  %v4342_v5 = vsel %vm1265_vm8, %v14932_v26, %v12144_v19 }
 0x47e   : > { %6030 = vrot.lane.b32.xlu0 %v12529_v32, %s8643_s11  ;;  %15054 = vst [vmem:[#allocation25_spill] sm:$0xff] %v12574_v6  ;;  %15056 = vst [vmem:[#allocation69_spill] sm:$0xff] %v12581_v49  ;;  %v12584_v3 = vpop.f32.mrb[114].mxu1  ;;  %6624 = vmatpush1.bf16.msra.mxu1 %v8622_v14  ;;  %v5976_v43 = vrot.slane %v5974_v57, 1  ;;  %v12601_v14 = vld [vmem:[%s14007_s5 + $0x100] sm:$0xff]   ;;  %v5972_v19 = vshrl.u32 %v12008_v0, 16  ;;  %v12616_v57 = vsel %vm1265_vm8, %v15001_v34, %v4130_v38 }
 0x47f   : > { %6020 = vrot.lane.b32.xlu1 %v12535_v25, %s8643_s11  ;;  %15057 = vst [vmem:[#allocation133_spill] sm:$0xff] %v12584_v3  ;;  %v5963_v47 = vor.u32 %v5962_v16, %v5958_v53  ;;  %v12596_v6 = vpop.f32.mrb[115].mxu1  ;;  %8063 = vmatprep.subr.bf16.mxu0 %v12601_v14  ;;  %v5928_v16 = vor.u32 %v5927_v17, %v5923_v41  ;;  %v5941_v53 = vrot.slane %v5939_v9, 1  ;;  %v5953_v3 = vshll.u32 %v11875_v55, 16 }
 0x480   : > { %15058 = vst [vmem:[#allocation134_spill] sm:$0xff] %v12596_v6  ;;  %v6080_v9 = vsel %vm1265_vm8, %v12335_v23, %v11814_v20  ;;  %v12627_v6 = vpop.permute.xlu0 %3621  ;;  %v15060_v20 = vld [vmem:[#allocation62_spill] sm:$0xff]  ;;  %v12659_v23 = vpop.f32.mrb[116].mxu1 }
 0x481   : > { %v12590_v13 = vpop.permute.xlu1 %3619  ;;  %v12625_v17 = vsel %vm882_vm6, %v5963_v47, %v14862_v30  ;;  %v12631_v34 = vsel %vm882_vm6, %v5928_v16, %v14862_v30  ;;  %v5942_v38 = vor.u32 %v5941_v53, %v5937_v15  ;;  %v5955_v26 = vrot.slane %v5953_v3, 1  ;;  %15063 = vst [vmem:[#allocation137_spill] sm:$0xff] %v12659_v23 }
 0x482   : > { %6034 = vrot.lane.b32.xlu0 %v12556_v11, %s8643_s11  ;;  %6409 = vmatmul.mubr.bf16.gmra.mrb[196].mxu1 %v12616_v57  ;;  %15059 = vst [vmem:[#allocation135_spill] sm:$0xff] %v12625_v17  ;;  %v5951_v47 = vshrl.u32 %v11875_v55, 16  ;;  %v4346_v3 = vsel %vm1265_vm8, %v14946_v40, %v12165_v46  ;;  %v15067_v40 = vld [vmem:[#allocation60_spill] sm:$0xff] }
 0x483   : > { %6024 = vrot.lane.b32.xlu1 %v12561_v2, %s8643_s11  ;;  %6416 = vmatprep.mubr.bf16.mxu1 %v6080_v9 }
 0x484   : > { %5048 = vmatmul.mubr.bf16.gmra.mrb[156].mxu0 %v12581_v49  ;;  %v5967_v49 = vshll.u32 %v11958_v44, 16  ;;  %v5956_v15 = vor.u32 %v5955_v26, %v5951_v47  ;;  %v5965_v26 = vshrl.u32 %v11958_v44, 16 }
 0x485   : > { %5055 = vmatprep.mubr.bf16.mxu0 %v4342_v5  ;;  %v4132_v41 = vpop.permute.xlu1 %4131  ;;  %v5977_v5 = vor.u32 %v5976_v43, %v5972_v19  ;;  %v12641_v43 = vsel %vm1265_vm8, %v15060_v20, %v12059_v31  ;;  %v12656_v19 = vsel %vm882_vm6, %v5942_v38, %v14862_v30  ;;  %v5981_v20 = vshll.u32 %v12053_v61, 16  ;;  %v4134_v38 = vpop.permute.xlu0 %4133 }
 0x486   : > { %6038 = vrot.lane.b32.xlu0 %v12588_v18, %s8643_s11  ;;  %15061 = vst [vmem:[#allocation62_spill] sm:$0xff] %v12641_v43  ;;  %v5969_v9 = vrot.slane %v5967_v49, 1  ;;  %v12667_v46 = vsel %vm1265_vm8, %v14986_v50, %v4132_v41  ;;  %v6083_v49 = vsel %vm1265_vm8, %v12421_v39, %v15022_v27  ;;  %v12691_v27 = vsel %vm1265_vm8, %v15067_v40, %v12181_v1 }
 0x487   : > { %6028 = vrot.lane.b32.xlu1 %v12606_v60, %s8643_s11  ;;  %v12646_v16 = vsel %vm882_vm6, %v5977_v5, %v14862_v30  ;;  %v12669_v5 = vpop.f32.mrb[117].mxu1  ;;  %v5983_v41 = vrot.slane %v5981_v20, 1  ;;  %15068 = vst [vmem:[#allocation60_spill] sm:$0xff] %v12691_v27  ;;  %v12708_v40 = vsel %vm1265_vm8, %v15008_v29, %v4134_v38  ;;  %v15074_v29 = vld [vmem:[#allocation77_spill] sm:$0xff] }
 0x488   : > { %15062 = vst [vmem:[#allocation136_spill] sm:$0xff] %v12646_v16  ;;  %15064 = vst [vmem:[#allocation138_spill] sm:$0xff] %v12669_v5  ;;  %v12676_v47 = vpop.f32.mrb[118].mxu1  ;;  %v5970_v50 = vor.u32 %v5969_v9, %v5965_v26 }
 0x489   : > { %v12652_v53 = vpop.permute.xlu1 %4091  ;;  %15065 = vst [vmem:[#allocation139_spill] sm:$0xff] %v12676_v47  ;;  %v12682_v23 = vpop.f32.mrb[119].mxu1  ;;  %v15070_v47 = vld [vmem:[#allocation78_spill] sm:$0xff] }
 0x48a   : > { %6042 = vrot.lane.b32.xlu0 %v12625_v17, %s8643_s11  ;;  %6417 = vmatmul.mubr.bf16.gmra.mrb[200].mxu1 %v12667_v46  ;;  %15066 = vst [vmem:[#allocation140_spill] sm:$0xff] %v12682_v23  ;;  %v12698_v20 = vpop.permute.xlu0 %4093  ;;  %v12702_v26 = vsel %vm882_vm6, %v5970_v50, %v14862_v30 }
 0x48b   : > { %6032 = vrot.lane.b32.xlu1 %v12631_v34, %s8643_s11  ;;  %6424 = vmatprep.mubr.bf16.mxu1 %v6083_v49  ;;  %v5979_v49 = vshrl.u32 %v12053_v61, 16 }
 0x48c   : > { %5056 = vmatmul.mubr.bf16.gmra.mrb[160].mxu0 %v12641_v43 }
 0x48d   : > { %5063 = vmatprep.mubr.bf16.mxu0 %v4346_v3  ;;  %v12680_v3 = vsel %vm882_vm6, %v5956_v15, %v14862_v30  ;;  %v15069_v15 = vld [vmem:[#allocation79_spill] sm:$0xff]  ;;  %v5984_v23 = vor.u32 %v5983_v41, %v5979_v49 }
 0x48e   : > { %6046 = vrot.lane.b32.xlu0 %v12646_v16, %s8643_s11  ;;  %v4350_v9 = vsel %vm1265_vm8, %v15070_v47, %v15069_v15  ;;  %15071 = vst [vmem:[#allocation79_spill] sm:$0xff] %v12702_v26  ;;  %v6086_v15 = vsel %vm1265_vm8, %v12356_v48, %v11933_v52  ;;  %v12720_v41 = vpop.permute.xlu0 %3625  ;;  %v15073_v49 = vld [vmem:[#allocation59_spill] sm:$0xff]  ;;  %v15077_v52 = vld [vmem:[#allocation52_spill] sm:$0xff] }
 0x48f   : > { %6036 = vrot.lane.b32.xlu1 %v12656_v19, %s8643_s11  ;;  %v12716_v50 = vsel %vm882_vm6, %v5984_v23, %v14862_v30  ;;  %v12725_v38 = vsel %vm1265_vm8, %v15074_v29, %v15073_v49 }
 0x490   : > { %15072 = vst [vmem:[#allocation141_spill] sm:$0xff] %v12716_v50  ;;  %15075 = vst [vmem:[#allocation59_spill] sm:$0xff] %v12725_v38 }
 0x491   : > { %v12686_v5 = vpop.permute.xlu1 %3623 }
 0x492   : > { %6425 = vmatmul.mubr.bf16.gmra.mrb[204].mxu1 %v12708_v40 }
 0x493   : > { %6040 = vrot.lane.b32.xlu1 %v12680_v3, %s8643_s11  ;;  %6432 = vmatprep.mubr.bf16.mxu1 %v6086_v15  ;;  %v15078_v15 = vld [vmem:[#allocation63_spill] sm:$0xff] }
 0x494   : > { %5064 = vmatmul.mubr.bf16.gmra.mrb[164].mxu0 %v12691_v27  ;;  %v4354_v48 = vsel %vm1265_vm8, %v15078_v15, %v15077_v52  ;;  %v15082_v52 = vld [vmem:[#allocation37_spill] sm:$0xff] }
 0x495   : > { %5071 = vmatprep.mubr.bf16.mxu0 %v4350_v9  ;;  %v4136_v39 = vpop.permute.xlu1 %4135  ;;  %v12727_v9 = vpop.f32.mrb[120].mxu1  ;;  %v15096_v27 = vld [vmem:[#allocation29_spill] sm:$0xff] }
 0x496   : > { %15076 = vst [vmem:[#allocation77_spill] sm:$0xff] %v12727_v9  ;;  %v12733_v23 = vpop.f32.mrb[121].mxu1  ;;  %v6089_v9 = vsel %vm1265_vm8, %v12449_v59, %v11983_v12 }
 0x497   : > { %6044 = vrot.lane.b32.xlu1 %v12702_v26, %s8643_s11  ;;  %15079 = vst [vmem:[#allocation52_spill] sm:$0xff] %v12733_v23  ;;  %v12735_v30 = vpop.f32.mrb[122].mxu1  ;;  %v15083_v23 = vld [vmem:[#allocation33_spill] sm:$0xff] }
 0x498   : > { %15080 = vst [vmem:[#allocation142_spill] sm:$0xff] %v12735_v30  ;;  %v12743_v29 = vpop.f32.mrb[123].mxu1  ;;  %v12752_v30 = vsel %vm1265_vm8, %v15083_v23, %v15082_v52  ;;  %v15088_v23 = vld [vmem:[#allocation121_spill] sm:$0xff] }
 0x499   : > { %v12741_v61 = vpop.permute.xlu1 %4095  ;;  %15081 = vst [vmem:[#allocation143_spill] sm:$0xff] %v12743_v29  ;;  %15084 = vst [vmem:[#allocation37_spill] sm:$0xff] %v12752_v30  ;;  %v6092_v59 = vsel %vm1265_vm8, %v15088_v23, %v12017_v58 }
 0x49b   : > { %6048 = vrot.lane.b32.xlu1 %v12716_v50, %s8643_s11  ;;  %v12739_v50 = vsel %vm1265_vm8, %v14992_v35, %v4136_v39  ;;  %v15085_v35 = vld [vmem:[#allocation83_spill] sm:$0xff]  ;;  %v15086_v39 = vld [vmem:[#allocation32_spill] sm:$0xff] }
 0x49c   : > { %5072 = vmatmul.mubr.bf16.gmra.mrb[168].mxu0 %v12725_v38  ;;  %6433 = vmatmul.mubr.bf16.gmra.mrb[208].mxu1 %v12739_v50  ;;  %v4358_v15 = vsel %vm1265_vm8, %v15086_v39, %v15085_v35  ;;  %v15091_v39 = vld [vmem:[#allocation16_spill] sm:$0xff]  ;;  %v15092_v38 = vld [vmem:[#allocation74_spill] sm:$0xff] }
 0x49d   : > { %5079 = vmatprep.mubr.bf16.mxu0 %v4354_v48  ;;  %6440 = vmatprep.mubr.bf16.mxu1 %v6089_v9  ;;  %v4138_v48 = vpop.permute.xlu0 %4137  ;;  %v12758_v29 = vpop.permute.xlu1 %3627 }
 0x49e   : > { %v12762_v47 = vsel %vm1265_vm8, %v15016_v22, %v4138_v48  ;;  %v12766_v9 = vpop.f32.mrb[124].mxu1  ;;  %v12779_v22 = vsel %vm1265_vm8, %v15092_v38, %v15091_v39  ;;  %v6095_v38 = vsel %vm1265_vm8, %v12484_v28, %v12059_v31 }
 0x49f   : > { %15087 = vst [vmem:[#allocation33_spill] sm:$0xff] %v12766_v9  ;;  %15093 = vst [vmem:[#allocation16_spill] sm:$0xff] %v12779_v22  ;;  %v15095_v9 = vld [vmem:[#allocation14_spill] sm:$0xff] }
 0x4a0   : > { %v4362_v43 = vsel %vm1265_vm8, %v15096_v27, %v15095_v9  ;;  %v15102_v27 = vld [vmem:[#allocation118_spill] sm:$0xff] }
 0x4a1   : > { %v12764_v12 = vpop.permute.xlu0 %4097 }
 0x4a4   : > { %5080 = vmatmul.mubr.bf16.gmra.mrb[172].mxu0 %v12752_v30  ;;  %6441 = vmatmul.mubr.bf16.gmra.mrb[212].mxu1 %v12762_v47  ;;  %v12772_v30 = vpop.f32.mrb[125].mxu1 }
 0x4a5   : > { %5087 = vmatprep.mubr.bf16.mxu0 %v4358_v15  ;;  %6448 = vmatprep.mubr.bf16.mxu1 %v6092_v59  ;;  %15089 = vst [vmem:[#allocation83_spill] sm:$0xff] %v12772_v30  ;;  %v12774_v35 = vpop.f32.mrb[126].mxu1  ;;  %v4140_v15 = vpop.permute.xlu1 %4139  ;;  %v15097_v59 = vld [vmem:[#allocation57_spill] sm:$0xff] }
 0x4a6   : > { %15090 = vst [vmem:[#allocation144_spill] sm:$0xff] %v12774_v35  ;;  %v12781_v48 = vpop.f32.mrb[127].mxu1  ;;  %v12787_v58 = vpop.permute.xlu0 %3629  ;;  %v12791_v35 = vsel %vm1265_vm8, %v15097_v59, %v4140_v15  ;;  %v15106_v59 = vld [vmem:[#allocation116_spill] sm:$0xff] }
 0x4a7   : > { %15094 = vst [vmem:[#allocation74_spill] sm:$0xff] %v12781_v48  ;;  %15098 = vst [vmem:[#allocation14_spill] sm:$0xff] %v12791_v35  ;;  %v12793_v30 = vpop.f32.mrb[128].mxu1 }
 0x4a8   : > { %15099 = vst [vmem:[#allocation57_spill] sm:$0xff] %v12793_v30  ;;  %v12799_v48 = vpop.f32.mrb[129].mxu1  ;;  %v15107_v30 = vld [vmem:[#allocation20_spill] sm:$0xff] }
 0x4a9   : > { %15100 = vst [vmem:[#allocation145_spill] sm:$0xff] %v12799_v48  ;;  %v12801_v23 = vpop.f32.mrb[130].mxu1 }
 0x4aa   : > { %15101 = vst [vmem:[#allocation146_spill] sm:$0xff] %v12801_v23  ;;  %v4142_v9 = vpop.permute.xlu0 %4141  ;;  %v12808_v15 = vpop.f32.mrb[131].mxu1 }
 0x4ab   : > { %v12816_v31 = vsel %vm1265_vm8, %v15021_v37, %v4142_v9  ;;  %v15113_v37 = vld [vmem:[#allocation11_spill] sm:$0xff] }
 0x4ac   : > { %5088 = vmatmul.mubr.bf16.gmra.mrb[176].mxu0 %v12779_v22  ;;  %6449 = vmatmul.mubr.bf16.gmra.mrb[216].mxu1 %v12791_v35  ;;  %v4366_v35 = vsel %vm1265_vm8, %v15107_v30, %v15106_v59  ;;  %v15110_v59 = vld [vmem:[#allocation119_spill] sm:$0xff]  ;;  %v4370_v9 = vsel %vm1265_vm8, %v15113_v37, %v12423_v10  ;;  %v15117_v10 = vld [vmem:[#allocation126_spill] sm:$0xff] }
 0x4ad   : > { %5095 = vmatprep.mubr.bf16.mxu0 %v4362_v43  ;;  %6456 = vmatprep.mubr.bf16.mxu1 %v6095_v38  ;;  %v15103_v43 = vld [vmem:[#allocation4_spill] sm:$0xff]  ;;  %v12818_v38 = vpop.permute.xlu1 %4099  ;;  %v15118_v37 = vld [vmem:[#allocation43_spill] sm:$0xff] }
 0x4ae   : > { %v12806_v22 = vsel %vm1265_vm8, %v15103_v43, %v15102_v27  ;;  %15105 = vst [vmem:[#allocation4_spill] sm:$0xff] %v12808_v15  ;;  %v6098_v43 = vsel %vm1265_vm8, %v12413_v36, %v12181_v1  ;;  %v12824_v23 = vpop.f32.mrb[132].mxu1  ;;  %v4144_v15 = vpop.permute.xlu0 %4143 }
 0x4af   : > { %15104 = vst [vmem:[#allocation118_spill] sm:$0xff] %v12806_v22  ;;  %15108 = vst [vmem:[#allocation116_spill] sm:$0xff] %v12824_v23  ;;  %v12826_v48 = vpop.f32.mrb[133].mxu1  ;;  %v15116_v23 = vld [vmem:[#allocation19_spill] sm:$0xff] }
 0x4b0   : > { %15109 = vst [vmem:[#allocation147_spill] sm:$0xff] %v12826_v48  ;;  %v12839_v1 = vpop.f32.mrb[134].mxu1  ;;  %v12845_v48 = vsel %vm1265_vm8, %v15116_v23, %v4144_v15 }
 0x4b1   : > { %v12837_v30 = vpop.permute.xlu1 %3631 }
 0x4b4   : > { %5096 = vmatmul.mubr.bf16.gmra.mrb[180].mxu0 %v12806_v22  ;;  %6457 = vmatmul.mubr.bf16.gmra.mrb[220].mxu1 %v12816_v31  ;;  %v15123_v22 = vld [vmem:[#allocation9_spill] sm:$0xff] }
 0x4b5   : > { %5103 = vmatprep.mubr.bf16.mxu0 %v4366_v35  ;;  %6464 = vmatprep.mubr.bf16.mxu1 %v6098_v43  ;;  %v15111_v35 = vld [vmem:[#allocation18_spill] sm:$0xff]  ;;  %v12841_v43 = vpop.f32.mrb[135].mxu1  ;;  %v4146_v36 = vpop.permute.xlu1 %4145 }
 0x4b6   : > { %v12831_v28 = vsel %vm1265_vm8, %v15111_v35, %v15110_v59  ;;  %15114 = vst [vmem:[#allocation18_spill] sm:$0xff] %v12839_v1  ;;  %15115 = vst [vmem:[#allocation148_spill] sm:$0xff] %v12841_v43  ;;  %v6101_v35 = vsel %vm1265_vm8, %v12442_v7, %v15073_v49  ;;  %v15120_v1 = vld [vmem:[#allocation13_spill] sm:$0xff]  ;;  %v12866_v49 = vsel %vm1265_vm8, %v15123_v22, %v4146_v36 }
 0x4b7   : > { %15112 = vst [vmem:[#allocation119_spill] sm:$0xff] %v12831_v28  ;;  %v15127_v36 = vld [vmem:[#allocation81_spill] sm:$0xff] }
 0x4b8   : > { %v4378_v22 = vsel %vm1265_vm8, %v15127_v36, %v12542_v21 }
 0x4b9   : > { %v12860_v15 = vpop.f32.mrb[136].mxu1 }
 0x4ba   : > { %15121 = vst [vmem:[#allocation19_spill] sm:$0xff] %v12860_v15  ;;  %v12862_v43 = vpop.f32.mrb[137].mxu1 }
 0x4bb   : > { %15122 = vst [vmem:[#allocation126_spill] sm:$0xff] %v12862_v43  ;;  %v4150_v43 = vpop.permute.xlu1 %4149 }
 0x4bc   : > { %5104 = vmatmul.mubr.bf16.gmra.mrb[184].mxu0 %v12831_v28  ;;  %6465 = vmatmul.mubr.bf16.gmra.mrb[224].mxu1 %v12845_v48  ;;  %v12854_v28 = vsel %vm1265_vm8, %v15118_v37, %v15117_v10  ;;  %v6104_v37 = vsel %vm1265_vm8, %v12535_v25, %v15082_v52  ;;  %v6107_v52 = vsel %vm1265_vm8, %v12473_v8, %v15091_v39 }
 0x4bd   : > { %5111 = vmatprep.mubr.bf16.mxu0 %v4370_v9  ;;  %6472 = vmatprep.mubr.bf16.mxu1 %v6101_v35  ;;  %v15119_v9 = vld [vmem:[#allocation55_spill] sm:$0xff]  ;;  %v12868_v35 = vpop.f32.mrb[138].mxu1 }
 0x4be   : > { %v4374_v23 = vsel %vm1265_vm8, %v15120_v1, %v15119_v9  ;;  %15124 = vst [vmem:[#allocation43_spill] sm:$0xff] %v12868_v35  ;;  %v12874_v7 = vpop.f32.mrb[139].mxu1  ;;  %v4148_v9 = vpop.permute.xlu0 %4147 }
 0x4bf   : > { %15125 = vst [vmem:[#allocation55_spill] sm:$0xff] %v12874_v7  ;;  %v12887_v35 = vsel %vm1265_vm8, %v15033_v62, %v4148_v9  ;;  %v15133_v9 = vld [vmem:[#allocation87_spill] sm:$0xff] }
 0x4c0   : > { %v4382_v39 = vsel %vm1265_vm8, %v15133_v9, %v12576_v51 }
 0x4c4   : > { %5112 = vmatmul.mubr.bf16.gmra.mrb[188].mxu0 %v12854_v28  ;;  %6473 = vmatmul.mubr.bf16.gmra.mrb[228].mxu1 %v12866_v49 }
 0x4c5   : > { %5119 = vmatprep.mubr.bf16.mxu0 %v4374_v23  ;;  %6480 = vmatprep.mubr.bf16.mxu1 %v6104_v37  ;;  %v15126_v23 = vld [vmem:[#allocation22_spill] sm:$0xff] }
 0x4c6   : > { %v12879_v15 = vsel %vm1265_vm8, %v15126_v23, %v12498_v45 }
 0x4c9   : > { %v12893_v37 = vpop.f32.mrb[140].mxu1 }
 0x4ca   : > { %15128 = vst [vmem:[#allocation13_spill] sm:$0xff] %v12893_v37  ;;  %v12895_v23 = vpop.f32.mrb[141].mxu1 }
 0x4cb   : > { %15129 = vst [vmem:[#allocation9_spill] sm:$0xff] %v12895_v23  ;;  %v12897_v7 = vpop.f32.mrb[142].mxu1  ;;  %v15136_v23 = vld [vmem:[#allocation53_spill] sm:$0xff] }
 0x4cc   : > { %5120 = vmatmul.mubr.bf16.gmra.mrb[192].mxu0 %v12879_v15  ;;  %6481 = vmatmul.mubr.bf16.gmra.mrb[232].mxu1 %v12887_v35  ;;  %15130 = vst [vmem:[#allocation22_spill] sm:$0xff] %v12897_v7  ;;  %v12899_v21 = vpop.f32.mrb[143].mxu1  ;;  %v6110_v7 = vsel %vm1265_vm8, %v12561_v2, %v15102_v27  ;;  %v12923_v8 = vsel %vm1265_vm8, %v15136_v23, %v12627_v6 }
 0x4cd   : > { %5127 = vmatprep.mubr.bf16.mxu0 %v4378_v22  ;;  %6488 = vmatprep.mubr.bf16.mxu1 %v6107_v52  ;;  %15131 = vst [vmem:[#allocation81_spill] sm:$0xff] %v12899_v21  ;;  %v15132_v22 = vld [vmem:[#allocation80_spill] sm:$0xff]  ;;  %v15134_v52 = vld [vmem:[#allocation21_spill] sm:$0xff]  ;;  %v6113_v23 = vsel %vm1265_vm8, %v12510_v4, %v15110_v59 }
 0x4ce   : > { %v12904_v62 = vsel %vm1265_vm8, %v15132_v22, %v12590_v13  ;;  %v12912_v37 = vsel %vm1265_vm8, %v15134_v52, %v4150_v43  ;;  %v4152_v22 = vpop.permute.xlu0 %4151  ;;  %v15138_v43 = vld [vmem:[#allocation90_spill] sm:$0xff] }
 0x4cf   : > { %v12937_v27 = vsel %vm1265_vm8, %v15043_v42, %v4152_v22 }
 0x4d4   : > { %5128 = vmatmul.mubr.bf16.gmra.mrb[196].mxu0 %v12904_v62  ;;  %6489 = vmatmul.mubr.bf16.gmra.mrb[236].mxu1 %v12912_v37 }
 0x4d5   : > { %5135 = vmatprep.mubr.bf16.mxu0 %v4382_v39  ;;  %6496 = vmatprep.mubr.bf16.mxu1 %v6110_v7  ;;  %v4386_v39 = vsel %vm1265_vm8, %v15138_v43, %v12652_v53 }
 0x4d6   : > { %v12918_v21 = vpop.f32.mrb[144].mxu1 }
 0x4d7   : > { %15135 = vst [vmem:[#allocation80_spill] sm:$0xff] %v12918_v21  ;;  %v12925_v51 = vpop.f32.mrb[145].mxu1  ;;  %v4154_v21 = vpop.permute.xlu1 %4153 }
 0x4d8   : > { %15137 = vst [vmem:[#allocation87_spill] sm:$0xff] %v12925_v51  ;;  %v12931_v52 = vpop.f32.mrb[146].mxu1  ;;  %v15141_v51 = vld [vmem:[#allocation35_spill] sm:$0xff] }
 0x4d9   : > { %15139 = vst [vmem:[#allocation21_spill] sm:$0xff] %v12931_v52  ;;  %v12933_v7 = vpop.f32.mrb[147].mxu1  ;;  %v12946_v53 = vsel %vm1265_vm8, %v15141_v51, %v12686_v5  ;;  %v6116_v51 = vsel %vm1265_vm8, %v12606_v60, %v15117_v10 }
 0x4da   : > { %15140 = vst [vmem:[#allocation53_spill] sm:$0xff] %v12933_v7  ;;  %v15145_v7 = vld [vmem:[#allocation24_spill] sm:$0xff] }
 0x4db   : > { %v12958_v59 = vsel %vm1265_vm8, %v15145_v7, %v4154_v21  ;;  %v15149_v21 = vld [vmem:[#allocation50_spill] sm:$0xff] }
 0x4dc   : > { %5136 = vmatmul.mubr.bf16.gmra.mrb[200].mxu0 %v12923_v8  ;;  %6497 = vmatmul.mubr.bf16.gmra.mrb[240].mxu1 %v12937_v27  ;;  %v4394_v7 = vsel %vm1265_vm8, %v15149_v21, %v12741_v61  ;;  %v4158_v61 = vpop.permute.xlu1 %4157 }
 0x4dd   : > { %5143 = vmatprep.mubr.bf16.mxu0 %v4386_v39  ;;  %6504 = vmatprep.mubr.bf16.mxu1 %v6113_v23  ;;  %v15142_v39 = vld [vmem:[#allocation93_spill] sm:$0xff] }
 0x4de   : > { %v4390_v42 = vsel %vm1265_vm8, %v15142_v39, %v12698_v20  ;;  %v4156_v20 = vpop.permute.xlu0 %4155 }
 0x4e1   : > { %v12952_v22 = vpop.f32.mrb[148].mxu1 }
 0x4e2   : > { %15143 = vst [vmem:[#allocation90_spill] sm:$0xff] %v12952_v22  ;;  %v12954_v52 = vpop.f32.mrb[149].mxu1 }
 0x4e3   : > { %15144 = vst [vmem:[#allocation35_spill] sm:$0xff] %v12954_v52  ;;  %v12960_v23 = vpop.f32.mrb[150].mxu1 }
 0x4e4   : > { %5144 = vmatmul.mubr.bf16.gmra.mrb[204].mxu0 %v12946_v53  ;;  %15146 = vst [vmem:[#allocation93_spill] sm:$0xff] %v12960_v23  ;;  %6505 = vmatmul.mubr.bf16.gmra.mrb[244].mxu1 %v12958_v59  ;;  %v12966_v4 = vpop.f32.mrb[151].mxu1  ;;  %v12979_v23 = vsel %vm1265_vm8, %v15047_v56, %v4156_v20  ;;  %v15155_v20 = vld [vmem:[#allocation49_spill] sm:$0xff] }
 0x4e5   : > { %5151 = vmatprep.mubr.bf16.mxu0 %v4390_v42  ;;  %15147 = vst [vmem:[#allocation24_spill] sm:$0xff] %v12966_v4  ;;  %6512 = vmatprep.mubr.bf16.mxu1 %v6116_v51  ;;  %v15148_v42 = vld [vmem:[#allocation92_spill] sm:$0xff]  ;;  %v6119_v51 = vsel %vm1265_vm8, %v12529_v32, %v12498_v45  ;;  %v13004_v45 = vsel %vm1265_vm8, %v15030_v33, %v4158_v61 }
 0x4e6   : > { %v12971_v22 = vsel %vm1265_vm8, %v15148_v42, %v12720_v41  ;;  %v15161_v61 = vld [vmem:[#allocation104_spill] sm:$0xff] }
 0x4ec   : > { %5152 = vmatmul.mubr.bf16.gmra.mrb[208].mxu0 %v12971_v22  ;;  %6513 = vmatmul.mubr.bf16.gmra.mrb[248].mxu1 %v12979_v23 }
 0x4ed   : > { %5159 = vmatprep.mubr.bf16.mxu0 %v4394_v7  ;;  %6520 = vmatprep.mubr.bf16.mxu1 %v6119_v51  ;;  %v15154_v7 = vld [vmem:[#allocation15_spill] sm:$0xff]  ;;  %v6122_v51 = vsel %vm1265_vm8, %v12631_v34, %v12590_v13  ;;  %v4402_v13 = vsel %vm1265_vm8, %v15161_v61, %v12818_v38  ;;  %v15163_v38 = vld [vmem:[#allocation2_spill] sm:$0xff] }
 0x4ee   : > { %v12981_v10 = vpop.f32.mrb[152].mxu1  ;;  %v12996_v56 = vsel %vm1265_vm8, %v15154_v7, %v12758_v29 }
 0x4ef   : > { %15150 = vst [vmem:[#allocation92_spill] sm:$0xff] %v12981_v10  ;;  %v12987_v42 = vpop.f32.mrb[153].mxu1  ;;  %v4398_v10 = vsel %vm1265_vm8, %v15155_v20, %v12764_v12  ;;  %v4160_v12 = vpop.permute.xlu0 %4159 }
 0x4f0   : > { %15151 = vst [vmem:[#allocation50_spill] sm:$0xff] %v12987_v42  ;;  %v12989_v4 = vpop.f32.mrb[154].mxu1 }
 0x4f1   : > { %15152 = vst [vmem:[#allocation149_spill] sm:$0xff] %v12989_v4  ;;  %v12991_v52 = vpop.f32.mrb[155].mxu1 }
 0x4f2   : > { %15153 = vst [vmem:[#allocation150_spill] sm:$0xff] %v12991_v52 }
 0x4f4   : > { %5160 = vmatmul.mubr.bf16.gmra.mrb[212].mxu0 %v12996_v56  ;;  %6521 = vmatmul.mubr.bf16.gmra.mrb[252].mxu1 %v13004_v45 }
 0x4f5   : > { %5167 = vmatprep.mubr.bf16.mxu0 %v4398_v10  ;;  %6528 = vmatprep.mubr.bf16.mxu1 %v6122_v51  ;;  %v15160_v10 = vld [vmem:[#allocation94_spill] sm:$0xff]  ;;  %v13029_v51 = vsel %vm1265_vm8, %v15050_v24, %v4160_v12 }
 0x4f6   : > { %v13010_v4 = vpop.f32.mrb[156].mxu1  ;;  %v13021_v33 = vsel %vm1265_vm8, %v15160_v10, %v12787_v58  ;;  %v4162_v10 = vpop.permute.xlu1 %4161  ;;  %v15165_v12 = vld [vmem:[#allocation34_spill] sm:$0xff] }
 0x4f7   : > { %15156 = vst [vmem:[#allocation15_spill] sm:$0xff] %v13010_v4  ;;  %v13012_v7 = vpop.f32.mrb[157].mxu1  ;;  %v15162_v4 = vld [vmem:[#allocation17_spill] sm:$0xff] }
 0x4f8   : > { %15157 = vst [vmem:[#allocation49_spill] sm:$0xff] %v13012_v7  ;;  %v13014_v52 = vpop.f32.mrb[158].mxu1 }
 0x4f9   : > { %15158 = vst [vmem:[#allocation151_spill] sm:$0xff] %v13014_v52  ;;  %v13016_v42 = vpop.f32.mrb[159].mxu1  ;;  %v6125_v52 = vsel %vm1265_vm8, %v12556_v11, %v12627_v6  ;;  %v6128_v6 = vsel %vm1265_vm8, %v12656_v19, %v12686_v5  ;;  %v6131_v5 = vsel %vm1265_vm8, %v12588_v18, %v12720_v41  ;;  %v8631_v41 = vld [vmem:[%s14007_s5 + $0x118] sm:$0xff]  }
 0x4fa   : > { %15159 = vst [vmem:[#allocation152_spill] sm:$0xff] %v13016_v42  ;;  %v13038_v42 = vsel %vm1265_vm8, %v15162_v4, %v12837_v30  ;;  %v15166_v4 = vld [vmem:[#allocation73_spill] sm:$0xff] }
 0x4fc   : > { %5168 = vmatmul.mubr.bf16.gmra.mrb[216].mxu0 %v13021_v33  ;;  %6529 = vmatmul.mubr.bf16.gmra.mrb[0].mxu1 %v13029_v51 }
 0x4fd   : > { %5175 = vmatprep.mubr.bf16.mxu0 %v4402_v13  ;;  %6536 = vmatprep.mubr.bf16.mxu1 %v6125_v52  ;;  %v15164_v13 = vld [vmem:[#allocation85_spill] sm:$0xff]  ;;  %v4164_v52 = vpop.permute.xlu0 %4163 }
 0x4fe   : > { %v13044_v24 = vsel %vm1265_vm8, %v15164_v13, %v4162_v10  ;;  %v8629_v10 = vld [vmem:[%s14007_s5 + $0x108] sm:$0xff]   ;;  %v15167_v13 = vld [vmem:[#allocation82_spill] sm:$0xff] }
 0x504   : > { %5176 = vmatmul.mubr.bf16.gmra.mrb[220].mxu0 %v13038_v42  ;;  %6537 = vmatmul.mubr.bf16.gmra.mrb[4].mxu1 %v13044_v24 }
 0x505   : > { %5216 = vmatprep.mubr.bf16.mxu0 %v15163_v38  ;;  %6544 = vmatprep.mubr.bf16.mxu1 %v6128_v6  ;;  %v13055_v38 = vsel %vm1265_vm8, %v15052_v63, %v4164_v52  ;;  %v4166_v63 = vpop.permute.xlu1 %4165  ;;  %v15168_v6 = vld [vmem:[#allocation56_spill] sm:$0xff]  ;;  %v15169_v52 = vld [vmem:[#allocation107_spill] sm:$0xff] }
 0x50c   : > { %5217 = vmatmul.mubr.bf16.vlgmr.msra.gmra.mrb[96].mxu0 %v15165_v12  ;;  %6545 = vmatmul.mubr.bf16.gmra.mrb[8].mxu1 %v13055_v38  ;;  %v13071_v12 = vsel %vm1265_vm8, %v15169_v52, %v4166_v63  ;;  %v4170_v52 = vpop.permute.xlu1 %4169 }
 0x50d   : > { %8064 = vmatpush3.bf16.msra.mxu0 %v12601_v14  ;;  %5224 = vmatprep.mubr.bf16.mxu0 %v15166_v4  ;;  %v8630_v14 = vld [vmem:[%s14007_s5 + $0x110] sm:$0xff]   ;;  %v6134_v4 = vsel %vm1265_vm8, %v12680_v3, %v12758_v29  ;;  %v15172_v29 = vld [vmem:[#allocation115_spill] sm:$0xff] }
 0x50e   : > { %8065 = vmatprep.subr.bf16.mxu0 %v8629_v10  ;;  %6552 = vmatprep.mubr.bf16.mxu1 %v6131_v5  ;;  %v15170_v5 = vld [vmem:[#allocation112_spill] sm:$0xff] }
 0x511   : > { %8066 = vmatpush3.bf16.msra.mxu0 %v8629_v10  ;;  %v4168_v10 = vpop.permute.xlu0 %4167 }
 0x512   : > { %8067 = vmatprep.subr.bf16.mxu0 %v8630_v14  ;;  %v13084_v63 = vsel %vm1265_vm8, %v11875_v55, %v4168_v10  ;;  %v6140_v55 = vsel %vm1265_vm8, %v12702_v26, %v12837_v30  ;;  %v15181_v26 = vld [vmem:[#allocation70_spill] sm:$0xff] }
 0x514   : > { %5225 = vmatmul.mubr.bf16.gmra.mrb[100].mxu0 %v15167_v13  ;;  %6553 = vmatmul.mubr.bf16.gmra.mrb[12].mxu1 %v13071_v12 }
 0x515   : > { %5232 = vmatprep.mubr.bf16.mxu0 %v15168_v6  ;;  %8068 = vmatpush3.bf16.msra.mxu0 %v8630_v14  ;;  %v15171_v14 = vld [vmem:[#allocation42_spill] sm:$0xff]  ;;  %v6137_v6 = vsel %vm1265_vm8, %v12625_v17, %v12787_v58  ;;  %v4172_v10 = vpop.permute.xlu0 %4171  ;;  %v15174_v58 = vld [vmem:[#allocation99_spill] sm:$0xff] }
 0x516   : > { %8069 = vmatprep.subr.bf16.mxu0 %v8631_v41  ;;  %6560 = vmatprep.mubr.bf16.mxu1 %v6134_v4  ;;  %v13094_v4 = vsel %vm1265_vm8, %v11981_v54, %v4170_v52  ;;  %v15176_v52 = vld [vmem:[#allocation123_spill] sm:$0xff] }
 0x519   : > { %8070 = vmatpush3.bf16.msra.mxu0 %v8631_v41  ;;  %v15173_v41 = vld [vmem:[#allocation26_spill] sm:$0xff]  ;;  %v4174_v30 = vpop.permute.xlu0 %4173 }
 0x51a   : > { %v13116_v7 = vsel %vm1265_vm8, %v12008_v0, %v4174_v30  ;;  %v15182_v0 = vld [vmem:[#allocation31_spill] sm:$0xff]  ;;  %v15183_v30 = vld [vmem:[#allocation76_spill] sm:$0xff] }
 0x51c   : > { %5233 = vmatmul.mubr.bf16.gmra.mrb[104].mxu0 %v15170_v5  ;;  %6561 = vmatmul.mubr.bf16.gmra.mrb[16].mxu1 %v13084_v63 }
 0x51d   : > { %5240 = vmatprep.mubr.bf16.mxu0 %v15171_v14  ;;  %6568 = vmatprep.mubr.bf16.mxu1 %v6137_v6  ;;  %v13100_v14 = vpop.permute.xlu1 %4178  ;;  %v15175_v6 = vld [vmem:[#allocation86_spill] sm:$0xff] }
 0x51e   : > { %v6143_v54 = vsel %vm1265_vm8, %v12646_v16, %v13100_v14  ;;  %v15180_v16 = vld [vmem:[#allocation58_spill] sm:$0xff] }
 0x524   : > { %5241 = vmatmul.mubr.bf16.gmra.mrb[108].mxu0 %v15172_v29  ;;  %6569 = vmatmul.mubr.bf16.gmra.mrb[20].mxu1 %v13094_v4 }
 0x525   : > { %5248 = vmatprep.mubr.bf16.mxu0 %v15173_v41  ;;  %6576 = vmatprep.mubr.bf16.mxu1 %v6140_v55  ;;  %v13106_v41 = vsel %vm1265_vm8, %v11958_v44, %v4172_v10  ;;  %v15177_v55 = vld [vmem:[#allocation48_spill] sm:$0xff]  ;;  %v5987_v44 = vpop.permute.xlu1 %5986  ;;  %v15178_v10 = vld [vmem:[#allocation131_spill] sm:$0xff] }
 0x52c   : > { %5249 = vmatmul.mubr.bf16.gmra.mrb[112].mxu0 %v15174_v58  ;;  %6577 = vmatmul.mubr.bf16.gmra.mrb[24].mxu1 %v13106_v41 }
 0x52d   : > { %5256 = vmatprep.mubr.bf16.mxu0 %v15175_v6  ;;  %6584 = vmatprep.mubr.bf16.mxu1 %v6143_v54  ;;  %v15179_v6 = vld [vmem:[#allocation40_spill] sm:$0xff]  ;;  %v6146_v54 = vsel %vm1265_vm8, %v15180_v16, %v5987_v44  ;;  %v15185_v16 = vld [vmem:[#allocation5_spill] sm:$0xff] }
 0x534   : > { %5257 = vmatmul.mubr.bf16.gmra.mrb[116].mxu0 %v15176_v52  ;;  %6585 = vmatmul.mubr.bf16.gmra.mrb[28].mxu1 %v13116_v7 }
 0x535   : > { %5264 = vmatprep.mubr.bf16.mxu0 %v15177_v55  ;;  %6625 = vmatprep.mubr.bf16.mxu1 %v15167_v13  ;;  %v5989_v55 = vpop.permute.xlu0 %5988  ;;  %v5991_v13 = vpop.permute.xlu1 %5990 }
 0x536   : > { %v6149_v17 = vsel %vm1265_vm8, %v15183_v30, %v5989_v55  ;;  %v6152_v44 = vsel %vm1265_vm8, %v15185_v16, %v5991_v13  ;;  %v15187_v55 = vld [vmem:[#allocation6_spill] sm:$0xff]  ;;  %v15189_v30 = vld [vmem:[#allocation12_spill] sm:$0xff] }
 0x537   : > { %v15191_v16 = vld [vmem:[#allocation10_spill] sm:$0xff] }
 0x53c   : > { %5265 = vmatmul.mubr.bf16.gmra.mrb[120].mxu0 %v15178_v10  ;;  %6626 = vmatmul.mubr.bf16.vlgmr.msra.gmra.mrb[160].mxu1 %v6146_v54  ;;  %v15186_v54 = vld [vmem:[#allocation64_spill] sm:$0xff] }
 0x53d   : > { %5272 = vmatprep.mubr.bf16.mxu0 %v15179_v6  ;;  %6633 = vmatprep.mubr.bf16.mxu1 %v15170_v5  ;;  %v15184_v6 = vld [vmem:[#allocation96_spill] sm:$0xff]  ;;  %v5993_v5 = vpop.permute.xlu0 %5992 }
 0x544   : > { %5273 = vmatmul.mubr.bf16.gmra.mrb[124].mxu0 %v15181_v26  ;;  %6634 = vmatmul.mubr.bf16.gmra.mrb[164].mxu1 %v6149_v17  ;;  %v6155_v17 = vsel %vm1265_vm8, %v15187_v55, %v5993_v5  ;;  %v15192_v5 = vld [vmem:[#allocation69_spill] sm:$0xff] }
 0x545   : > { %5280 = vmatprep.mubr.bf16.mxu0 %v15182_v0  ;;  %6641 = vmatprep.mubr.bf16.mxu1 %v15172_v29  ;;  %v5995_v29 = vpop.permute.xlu1 %5994  ;;  %v15188_v0 = vld [vmem:[#allocation102_spill] sm:$0xff] }
 0x546   : > { %v6158_v13 = vsel %vm1265_vm8, %v15189_v30, %v5995_v29  ;;  %v15195_v29 = vld [vmem:[#allocation62_spill] sm:$0xff] }
 0x54c   : > { %5281 = vmatmul.mubr.bf16.gmra.mrb[128].mxu0 %v12616_v57  ;;  %6642 = vmatmul.mubr.bf16.gmra.mrb[168].mxu1 %v6152_v44 }
 0x54d   : > { %5288 = vmatprep.mubr.bf16.mxu0 %v15184_v6  ;;  %6649 = vmatprep.mubr.bf16.mxu1 %v15174_v58  ;;  %v5997_v58 = vpop.permute.xlu0 %5996  ;;  %v15190_v6 = vld [vmem:[#allocation28_spill] sm:$0xff] }
 0x54e   : > { %v6161_v44 = vsel %vm1265_vm8, %v15191_v16, %v5997_v58  ;;  %v15198_v58 = vld [vmem:[#allocation97_spill] sm:$0xff]  ;;  %v15199_v16 = vld [vmem:[#allocation59_spill] sm:$0xff] }
 0x554   : > { %5289 = vmatmul.mubr.bf16.gmra.mrb[132].mxu0 %v12667_v46  ;;  %6650 = vmatmul.mubr.bf16.gmra.mrb[172].mxu1 %v6155_v17  ;;  %v15194_v17 = vld [vmem:[#allocation14_spill] sm:$0xff] }
 0x555   : > { %5296 = vmatprep.mubr.bf16.mxu0 %v15186_v54  ;;  %6657 = vmatprep.mubr.bf16.mxu1 %v15176_v52  ;;  %v5999_v52 = vpop.permute.xlu1 %5998  ;;  %v15193_v54 = vld [vmem:[#allocation38_spill] sm:$0xff] }
 0x556   : > { %v6164_v55 = vsel %vm1265_vm8, %v15193_v54, %v5999_v52  ;;  %v15202_v54 = vld [vmem:[#allocation101_spill] sm:$0xff] }
 0x55c   : > { %5297 = vmatmul.mubr.bf16.gmra.mrb[136].mxu0 %v12708_v40  ;;  %6658 = vmatmul.mubr.bf16.gmra.mrb[176].mxu1 %v6158_v13  ;;  %v15197_v13 = vld [vmem:[#allocation60_spill] sm:$0xff] }
 0x55d   : > { %5304 = vmatprep.mubr.bf16.mxu0 %v15188_v0  ;;  %6665 = vmatprep.mubr.bf16.mxu1 %v15178_v10  ;;  %v6001_v10 = vpop.permute.xlu0 %6000  ;;  %v15196_v0 = vld [vmem:[#allocation27_spill] sm:$0xff] }
 0x55e   : > { %v6167_v30 = vsel %vm1265_vm8, %v15196_v0, %v6001_v10  ;;  %v15203_v10 = vld [vmem:[#allocation16_spill] sm:$0xff] }
 0x564   : > { %5305 = vmatmul.mubr.bf16.gmra.mrb[140].mxu0 %v12739_v50  ;;  %6666 = vmatmul.mubr.bf16.gmra.mrb[180].mxu1 %v6161_v44  ;;  %v15200_v44 = vld [vmem:[#allocation98_spill] sm:$0xff] }
 0x565   : > { %5312 = vmatprep.mubr.bf16.mxu0 %v15190_v6  ;;  %6673 = vmatprep.mubr.bf16.mxu1 %v15181_v26  ;;  %v6003_v26 = vpop.permute.xlu1 %6002 }
 0x566   : > { %v6170_v6 = vsel %vm1265_vm8, %v15198_v58, %v6003_v26  ;;  %v15206_v26 = vld [vmem:[#allocation61_spill] sm:$0xff]  ;;  %v15207_v58 = vld [vmem:[#allocation119_spill] sm:$0xff] }
 0x56c   : > { %5313 = vmatmul.mubr.bf16.gmra.mrb[144].mxu0 %v12762_v47  ;;  %6674 = vmatmul.mubr.bf16.gmra.mrb[184].mxu1 %v6164_v55 }
 0x56d   : > { %5320 = vmatprep.mubr.bf16.mxu0 %v15192_v5  ;;  %6681 = vmatprep.mubr.bf16.mxu1 %v12616_v57  ;;  %v6005_v57 = vpop.permute.xlu0 %6004  ;;  %v15201_v5 = vld [vmem:[#allocation37_spill] sm:$0xff] }
 0x56e   : > { %v6173_v52 = vsel %vm1265_vm8, %v15200_v44, %v6005_v57 }
 0x574   : > { %5321 = vmatmul.mubr.bf16.gmra.mrb[148].mxu0 %v15194_v17  ;;  %6682 = vmatmul.mubr.bf16.gmra.mrb[188].mxu1 %v6167_v30  ;;  %v15205_v30 = vld [vmem:[#allocation118_spill] sm:$0xff] }
 0x575   : > { %5328 = vmatprep.mubr.bf16.mxu0 %v15195_v29  ;;  %6689 = vmatprep.mubr.bf16.mxu1 %v12667_v46  ;;  %v6007_v46 = vpop.permute.xlu1 %6006  ;;  %v15204_v29 = vld [vmem:[#allocation46_spill] sm:$0xff] }
 0x576   : > { %v6176_v55 = vsel %vm1265_vm8, %v15202_v54, %v6007_v46  ;;  %v15212_v54 = vld [vmem:[#allocation78_spill] sm:$0xff] }
 0x57c   : > { %5329 = vmatmul.mubr.bf16.gmra.mrb[152].mxu0 %v12816_v31  ;;  %6690 = vmatmul.mubr.bf16.gmra.mrb[192].mxu1 %v6170_v6  ;;  %v15208_v6 = vld [vmem:[#allocation65_spill] sm:$0xff] }
 0x57d   : > { %5336 = vmatprep.mubr.bf16.mxu0 %v15197_v13  ;;  %6697 = vmatprep.mubr.bf16.mxu1 %v12708_v40  ;;  %v6009_v40 = vpop.permute.xlu0 %6008 }
 0x57e   : > { %v6179_v0 = vsel %vm1265_vm8, %v15204_v29, %v6009_v40 }
 0x584   : > { %5337 = vmatmul.mubr.bf16.gmra.mrb[156].mxu0 %v12845_v48  ;;  %6698 = vmatmul.mubr.bf16.gmra.mrb[196].mxu1 %v6173_v52  ;;  %v15210_v52 = vld [vmem:[#allocation68_spill] sm:$0xff] }
 0x585   : > { %5344 = vmatprep.mubr.bf16.mxu0 %v15199_v16  ;;  %6705 = vmatprep.mubr.bf16.mxu1 %v12739_v50  ;;  %v6011_v50 = vpop.permute.xlu1 %6010  ;;  %v15209_v16 = vld [vmem:[#allocation23_spill] sm:$0xff] }
 0x586   : > { %v6182_v13 = vsel %vm1265_vm8, %v15206_v26, %v6011_v50 }
 0x58c   : > { %5345 = vmatmul.mubr.bf16.gmra.mrb[160].mxu0 %v12866_v49  ;;  %6706 = vmatmul.mubr.bf16.gmra.mrb[200].mxu1 %v6176_v55 }
 0x58d   : > { %5352 = vmatprep.mubr.bf16.mxu0 %v15201_v5  ;;  %6713 = vmatprep.mubr.bf16.mxu1 %v12762_v47  ;;  %v6013_v47 = vpop.permute.xlu0 %6012  ;;  %v15211_v5 = vld [vmem:[#allocation75_spill] sm:$0xff] }
 0x58e   : > { %v6185_v57 = vsel %vm1265_vm8, %v15208_v6, %v6013_v47  ;;  %v15218_v6 = vld [vmem:[#allocation20_spill] sm:$0xff] }
 0x594   : > { %5353 = vmatmul.mubr.bf16.gmra.mrb[164].mxu0 %v12887_v35  ;;  %6714 = vmatmul.mubr.bf16.gmra.mrb[204].mxu1 %v6179_v0 }
 0x595   : > { %5360 = vmatprep.mubr.bf16.mxu0 %v15203_v10  ;;  %6721 = vmatprep.mubr.bf16.mxu1 %v15194_v17  ;;  %v6015_v17 = vpop.permute.xlu1 %6014 }
 0x596   : > { %v6188_v44 = vsel %vm1265_vm8, %v15209_v16, %v6015_v17 }
 0x59c   : > { %5361 = vmatmul.mubr.bf16.gmra.mrb[168].mxu0 %v12912_v37  ;;  %6722 = vmatmul.mubr.bf16.gmra.mrb[208].mxu1 %v6182_v13 }
 0x59d   : > { %5368 = vmatprep.mubr.bf16.mxu0 %v15205_v30  ;;  %6729 = vmatprep.mubr.bf16.mxu1 %v12816_v31  ;;  %v6017_v31 = vpop.permute.xlu0 %6016 }
 0x59e   : > { %v6191_v46 = vsel %vm1265_vm8, %v15210_v52, %v6017_v31  ;;  %v15219_v52 = vld [vmem:[#allocation89_spill] sm:$0xff] }
 0x5a4   : > { %5369 = vmatmul.mubr.bf16.gmra.mrb[172].mxu0 %v12937_v27  ;;  %6730 = vmatmul.mubr.bf16.gmra.mrb[212].mxu1 %v6185_v57 }
 0x5a5   : > { %5376 = vmatprep.mubr.bf16.mxu0 %v15207_v58  ;;  %6737 = vmatprep.mubr.bf16.mxu1 %v12845_v48  ;;  %v6019_v48 = vpop.permute.xlu0 %6018  ;;  %v15217_v58 = vld [vmem:[#allocation106_spill] sm:$0xff] }
 0x5a9   : > { %v6023_v55 = vpop.permute.xlu0 %6022 }
 0x5ac   : > { %5377 = vmatmul.mubr.bf16.gmra.mrb[176].mxu0 %v12958_v59  ;;  %6738 = vmatmul.mubr.bf16.gmra.mrb[216].mxu1 %v6188_v44 }
 0x5ad   : > { %5384 = vmatprep.mubr.bf16.mxu0 %v12854_v28  ;;  %6745 = vmatprep.mubr.bf16.mxu1 %v12866_v49  ;;  %v13201_v28 = vpop.permute.xlu1 %4175  ;;  %v6194_v49 = vsel %vm1265_vm8, %v15211_v5, %v6019_v48  ;;  %v6027_v10 = vpop.permute.xlu0 %6026 }
 0x5b4   : > { %5385 = vmatmul.mubr.bf16.gmra.mrb[180].mxu0 %v12979_v23  ;;  %6746 = vmatmul.mubr.bf16.gmra.mrb[220].mxu1 %v6191_v46 }
 0x5b5   : > { %5392 = vmatprep.mubr.bf16.mxu0 %v12879_v15  ;;  %6753 = vmatprep.mubr.bf16.mxu1 %v12887_v35  ;;  %v6021_v15 = vpop.permute.xlu1 %6020 }
 0x5b6   : > { %v6197_v35 = vsel %vm1265_vm8, %v15212_v54, %v6021_v15  ;;  %v15221_v54 = vld [vmem:[#allocation11_spill] sm:$0xff] }
 0x5b9   : > { %v6025_v40 = vpop.permute.xlu1 %6024 }
 0x5bc   : > { %5393 = vmatmul.mubr.bf16.gmra.mrb[184].mxu0 %v13004_v45  ;;  %6754 = vmatmul.mubr.bf16.gmra.mrb[224].mxu1 %v6194_v49  ;;  %v15220_v49 = vld [vmem:[#allocation103_spill] sm:$0xff] }
 0x5bd   : > { %5400 = vmatprep.mubr.bf16.mxu0 %v12904_v62  ;;  %6761 = vmatprep.mubr.bf16.mxu1 %v12912_v37  ;;  %v15213_v62 = vld [vmem:[#allocation63_spill] sm:$0xff]  ;;  %v6029_v47 = vpop.permute.xlu1 %6028 }
 0x5be   : > { %v6200_v37 = vsel %vm1265_vm8, %v15213_v62, %v6023_v55  ;;  %v6209_v57 = vsel %vm1265_vm8, %v15218_v6, %v6029_v47 }
 0x5c4   : > { %5401 = vmatmul.mubr.bf16.gmra.mrb[188].mxu0 %v13029_v51  ;;  %6762 = vmatmul.mubr.bf16.gmra.mrb[228].mxu1 %v6197_v35 }
 0x5c5   : > { %5408 = vmatprep.mubr.bf16.mxu0 %v12923_v8  ;;  %6769 = vmatprep.mubr.bf16.mxu1 %v12937_v27  ;;  %v15214_v8 = vld [vmem:[#allocation32_spill] sm:$0xff] }
 0x5c6   : > { %v6203_v27 = vsel %vm1265_vm8, %v15214_v8, %v6025_v40  ;;  %v15222_v40 = vld [vmem:[#allocation109_spill] sm:$0xff] }
 0x5cc   : > { %5409 = vmatmul.mubr.bf16.gmra.mrb[192].mxu0 %v13044_v24  ;;  %6770 = vmatmul.mubr.bf16.gmra.mrb[232].mxu1 %v6200_v37 }
 0x5cd   : > { %5416 = vmatprep.mubr.bf16.mxu0 %v12946_v53  ;;  %6777 = vmatprep.mubr.bf16.mxu1 %v12958_v59  ;;  %v13227_v53 = vld [vmem:[%s14008_s6] ss:$0 sm:$0xff]  ;;  %v15215_v59 = vld [vmem:[#allocation29_spill] sm:$0xff] }
 0x5d4   : > { %5417 = vmatmul.mubr.bf16.gmra.mrb[196].mxu0 %v13055_v38  ;;  %6778 = vmatmul.mubr.bf16.gmra.mrb[236].mxu1 %v6203_v27 }
 0x5d5   : > { %5424 = vmatprep.mubr.bf16.mxu0 %v12971_v22  ;;  %6785 = vmatprep.mubr.bf16.mxu1 %v12979_v23  ;;  %v6206_v22 = vsel %vm1265_vm8, %v15215_v59, %v6027_v10  ;;  %v15223_v59 = vld [vmem:[#allocation111_spill] sm:$0xff] }
 0x5dc   : > { %5425 = vmatmul.mubr.bf16.gmra.mrb[200].mxu0 %v13071_v12  ;;  %6786 = vmatmul.mubr.bf16.gmra.mrb[240].mxu1 %v6206_v22 }
 0x5dd   : > { %5432 = vmatprep.mubr.bf16.mxu0 %v12996_v56  ;;  %6793 = vmatprep.mubr.bf16.mxu1 %v13004_v45  ;;  %v15216_v56 = vld [vmem:[#allocation67_spill] sm:$0xff] }
 0x5df   : > { %v5218_v29 = vpop.f32.mrb[96].mxu0 }
 0x5e0   : > { %v8135_v0 = vadd.f32 %v13227_v53, %v5218_v29  ;;  %v5220_v50 = vpop.f32.mrb[97].mxu0  ;;  %v15224_v29 = vld [vmem:[#allocation105_spill] sm:$0xff] }
 0x5e1   : > { %v5221_v23 = vpop.f32.mrb[98].mxu0 }
 0x5e2   : > { %v5508_v30 = vadd.f32 %v8135_v0, %v15216_v56  ;;  %v8136_v26 = vadd.f32 %v13227_v53, %v5221_v23  ;;  %v5223_v13 = vpop.f32.mrb[99].mxu0  ;;  %v4533_v0 = vsel %vm1265_vm8, %v15224_v29, %v13100_v14 }
 0x5e4   : > { %7172 = vst.msk [vmem:[%s13237_s28] sm:$0xff] %vm7171_vm10, %v5508_v30  ;;  %v5511_v45 = vadd.f32 %v8136_v26, %v15217_v58  ;;  %5433 = vmatmul.mubr.bf16.gmra.mrb[204].mxu0 %v13084_v63  ;;  %6794 = vmatmul.mubr.bf16.gmra.mrb[244].mxu1 %v6209_v57  ;;  %v15225_v26 = vld [vmem:[#allocation108_spill] sm:$0xff] }
 0x5e5   : > { %5440 = vmatprep.mubr.bf16.mxu0 %v13021_v33  ;;  %6801 = vmatprep.mubr.bf16.mxu1 %v13029_v51  ;;  %v6031_v33 = vpop.permute.xlu0 %6030 }
 0x5e6   : > { %7173 = vst.msk [vmem:[%s13237_s28 + $0x8] sm:$0xff] %vm7171_vm10, %v5511_v45  ;;  %v6212_v51 = vsel %vm1265_vm8, %v15221_v54, %v6031_v33  ;;  %v15226_v45 = vld [vmem:[#allocation110_spill] sm:$0xff] }
 0x5e7   : > { %v5226_v17 = vpop.f32.mrb[100].mxu0 }
 0x5e8   : > { %v8137_v16 = vadd.f32 %v13227_v53, %v5226_v17  ;;  %v5228_v44 = vpop.f32.mrb[101].mxu0 }
 0x5e9   : > { %v5229_v31 = vpop.f32.mrb[102].mxu0  ;;  %v6035_v58 = vpop.permute.xlu0 %6034 }
 0x5ea   : > { %v5516_v46 = vadd.f32 %v8137_v16, %v15219_v52  ;;  %v8138_v48 = vadd.f32 %v13227_v53, %v5229_v31  ;;  %v5231_v5 = vpop.f32.mrb[103].mxu0  ;;  %v15229_v52 = vld [vmem:[#allocation95_spill] sm:$0xff] }
 0x5ec   : > { %7174 = vst.msk [vmem:[%s13237_s28 + $0x10] sm:$0xff] %vm7171_vm10, %v5516_v46  ;;  %v5519_v15 = vadd.f32 %v8138_v48, %v15220_v49  ;;  %5441 = vmatmul.mubr.bf16.gmra.mrb[208].mxu0 %v13094_v4  ;;  %6802 = vmatmul.mubr.bf16.gmra.mrb[248].mxu1 %v6212_v51  ;;  %v15230_v49 = vld [vmem:[#allocation30_spill] sm:$0xff] }
 0x5ed   : > { %5448 = vmatprep.mubr.bf16.mxu0 %v13038_v42  ;;  %6809 = vmatprep.mubr.bf16.mxu1 %v13044_v24  ;;  %v6033_v42 = vpop.permute.xlu1 %6032 }
 0x5ee   : > { %7175 = vst.msk [vmem:[%s13237_s28 + $0x18] sm:$0xff] %vm7171_vm10, %v5519_v15  ;;  %v6215_v24 = vsel %vm1265_vm8, %v15120_v1, %v6033_v42  ;;  %v15227_v1 = vld [vmem:[#allocation71_spill] sm:$0xff]  ;;  %v15231_v15 = vld [vmem:[#allocation114_spill] sm:$0xff] }
 0x5ef   : > { %v5234_v35 = vpop.f32.mrb[104].mxu0 }
 0x5f0   : > { %v8139_v55 = vadd.f32 %v13227_v53, %v5234_v35  ;;  %v5236_v62 = vpop.f32.mrb[105].mxu0 }
 0x5f1   : > { %v5237_v37 = vpop.f32.mrb[106].mxu0  ;;  %v6037_v33 = vpop.permute.xlu1 %6036 }
 0x5f2   : > { %v5524_v8 = vadd.f32 %v8139_v55, %v15222_v40  ;;  %v8140_v27 = vadd.f32 %v13227_v53, %v5237_v37  ;;  %v5239_v10 = vpop.f32.mrb[107].mxu0  ;;  %v6221_v51 = vsel %vm1265_vm8, %v15133_v9, %v6037_v33  ;;  %v15233_v37 = vld [vmem:[#allocation44_spill] sm:$0xff]  ;;  %v15234_v9 = vld [vmem:[#allocation113_spill] sm:$0xff] }
 0x5f3   : > { %v6039_v10 = vpop.permute.xlu0 %6038 }
 0x5f4   : > { %7176 = vst.msk [vmem:[%s13237_s28 + $0x20] sm:$0xff] %vm7171_vm10, %v5524_v8  ;;  %v5527_v22 = vadd.f32 %v8140_v27, %v15223_v59  ;;  %5449 = vmatmul.mubr.bf16.gmra.mrb[212].mxu0 %v13106_v41  ;;  %6810 = vmatmul.mubr.bf16.gmra.mrb[252].mxu1 %v6215_v24  ;;  %v15235_v59 = vld [vmem:[#allocation66_spill] sm:$0xff] }
 0x5f5   : > { %5456 = vmatprep.mubr.bf16.mxu0 %v4533_v0  ;;  %6817 = vmatprep.mubr.bf16.mxu1 %v13055_v38  ;;  %v6218_v38 = vsel %vm1265_vm8, %v15127_v36, %v6035_v58  ;;  %v13300_v36 = vsel %vm1265_vm8, %v15230_v49, %v13201_v28 }
 0x5f6   : > { %7177 = vst.msk [vmem:[%s13237_s28 + $0x28] sm:$0xff] %vm7171_vm10, %v5527_v22  ;;  %v15236_v22 = vld [vmem:[#allocation36_spill] sm:$0xff] }
 0x5f7   : > { %v5242_v50 = vpop.f32.mrb[108].mxu0  ;;  %v6043_v49 = vpop.permute.xlu0 %6042 }
 0x5f8   : > { %v8141_v23 = vadd.f32 %v13227_v53, %v5242_v50  ;;  %v5244_v56 = vpop.f32.mrb[109].mxu0 }
 0x5f9   : > { %v5245_v30 = vpop.f32.mrb[110].mxu0 }
 0x5fa   : > { %v5532_v13 = vadd.f32 %v8141_v23, %v15225_v26  ;;  %v8142_v47 = vadd.f32 %v13227_v53, %v5245_v30  ;;  %v5247_v14 = vpop.f32.mrb[111].mxu0  ;;  %v15237_v23 = vld [vmem:[#allocation127_spill] sm:$0xff] }
 0x5fb   : > { %v15238_v14 = vld [vmem:[#allocation72_spill] sm:$0xff] }
 0x5fc   : > { %7178 = vst.msk [vmem:[%s13237_s28 + $0x30] sm:$0xff] %vm7171_vm10, %v5532_v13  ;;  %v5535_v6 = vadd.f32 %v8142_v47, %v15226_v45  ;;  %5457 = vmatmul.mubr.bf16.gmra.mrb[216].mxu0 %v13116_v7  ;;  %6818 = vmatmul.mubr.bf16.gmra.mrb[0].mxu1 %v6218_v38  ;;  %v6041_v47 = vpop.permute.xlu1 %6040  ;;  %v15239_v45 = vld [vmem:[#allocation51_spill] sm:$0xff] }
 0x5fd   : > { %7499 = vmatprep.mubr.msk.bf16.mxu0 %vm9336_vm9, %v15227_v1  ;;  %6825 = vmatprep.mubr.bf16.mxu1 %v13071_v12  ;;  %v15232_v12 = vld [vmem:[#allocation84_spill] sm:$0xff]  ;;  %v6227_v38 = vsel %vm1265_vm8, %v15142_v39, %v6041_v47  ;;  %v15249_v47 = vld [vmem:[#allocation54_spill] sm:$0xff] }
 0x5fe   : > { %7179 = vst.msk [vmem:[%s13237_s28 + $0x38] sm:$0xff] %vm7171_vm10, %v5535_v6 }
 0x5ff   : > { %v5250_v17 = vpop.f32.mrb[112].mxu0 }
 0x600   : > { %v8143_v16 = vadd.f32 %v13227_v53, %v5250_v17  ;;  %v5252_v44 = vpop.f32.mrb[113].mxu0 }
 0x601   : > { %v5253_v31 = vpop.f32.mrb[114].mxu0 }
 0x602   : > { %v5540_v46 = vadd.f32 %v8143_v16, %v15229_v52  ;;  %v8144_v48 = vadd.f32 %v13227_v53, %v5253_v31  ;;  %v5255_v5 = vpop.f32.mrb[115].mxu0  ;;  %v15241_v52 = vld [vmem:[#allocation41_spill] sm:$0xff] }
 0x604   : > { %7180 = vst.msk [vmem:[%s13237_s28 + $0x40] sm:$0xff] %vm7171_vm10, %v5540_v46  ;;  %v5543_v54 = vadd.f32 %v8144_v48, %v15231_v15  ;;  %5465 = vmatmul.mubr.bf16.gmra.mrb[220].mxu0 %v13300_v36  ;;  %6826 = vmatmul.mubr.bf16.gmra.mrb[4].mxu1 %v6221_v51  ;;  %v15242_v15 = vld [vmem:[#allocation129_spill] sm:$0xff] }
 0x605   : > { %8071 = vmatprep.mubr.msk.bf16.mxu0 %vm1265_vm8, %v15232_v12  ;;  %6833 = vmatprep.mubr.bf16.mxu1 %v13084_v63  ;;  %v6224_v63 = vsel %vm1265_vm8, %v15138_v43, %v6039_v10  ;;  %v15243_v12 = vld [vmem:[#allocation120_spill] sm:$0xff] }
 0x606   : > { %7181 = vst.msk [vmem:[%s13237_s28 + $0x48] sm:$0xff] %vm7171_vm10, %v5543_v54 }
 0x607   : > { %v5258_v35 = vpop.f32.mrb[116].mxu0 }
 0x608   : > { %v8145_v28 = vadd.f32 %v13227_v53, %v5258_v35  ;;  %v5260_v55 = vpop.f32.mrb[117].mxu0 }
 0x609   : > { %v5261_v62 = vpop.f32.mrb[118].mxu0 }
 0x60a   : > { %v5548_v40 = vadd.f32 %v8145_v28, %v15233_v37  ;;  %v8146_v8 = vadd.f32 %v13227_v53, %v5261_v62  ;;  %v5263_v27 = vpop.f32.mrb[119].mxu0  ;;  %v6230_v28 = vsel %vm1265_vm8, %v15149_v21, %v6043_v49 }
 0x60c   : > { %7182 = vst.msk [vmem:[%s13237_s28 + $0x50] sm:$0xff] %vm7171_vm10, %v5548_v40  ;;  %v5551_v42 = vadd.f32 %v8146_v8, %v15234_v9  ;;  %8072 = vmatmul.mubr.msk.bf16.vlgmr.msra.gmra.mrb[224].mxu0 %vm1265_vm8, %v15235_v59  ;;  %6834 = vmatmul.mubr.bf16.gmra.mrb[8].mxu1 %v6224_v63  ;;  %v15245_v8 = vld [vmem:[#allocation25_spill] sm:$0xff]  ;;  %v6045_v59 = vpop.permute.xlu1 %6044 }
 0x60d   : > { %8075 = vmatprep.mubr.msk.bf16.mxu0 %vm1265_vm8, %v15236_v22  ;;  %6841 = vmatprep.mubr.bf16.mxu1 %v13094_v4  ;;  %v15240_v4 = vld [vmem:[#allocation45_spill] sm:$0xff]  ;;  %v15246_v22 = vld [vmem:[#allocation134_spill] sm:$0xff] }
 0x60e   : > { %7183 = vst.msk [vmem:[%s13237_s28 + $0x58] sm:$0xff] %vm7171_vm10, %v5551_v42 }
 0x60f   : > { %v5266_v29 = vpop.f32.mrb[120].mxu0  ;;  %v13331_v13 = vpop.f32.mrb[160].mxu1 }
 0x610   : > { %v8147_v0 = vadd.f32 %v13227_v53, %v5266_v29  ;;  %v5268_v24 = vpop.f32.mrb[121].mxu0  ;;  %v6629_v43 = vpop.f32.mrb[161].mxu1  ;;  %v15247_v29 = vld [vmem:[#allocation122_spill] sm:$0xff] }
 0x611   : > { %v5269_v50 = vpop.f32.mrb[122].mxu0  ;;  %v13338_v6 = vpop.f32.mrb[162].mxu1 }
 0x612   : > { %v5556_v56 = vadd.f32 %v8147_v0, %v15237_v23  ;;  %v8148_v30 = vadd.f32 %v13227_v53, %v5269_v50  ;;  %v5271_v26 = vpop.f32.mrb[123].mxu0  ;;  %v6632_v1 = vpop.f32.mrb[163].mxu1  ;;  %v6233_v50 = vsel %vm1265_vm8, %v15155_v20, %v6045_v59 }
 0x613   : > { %v15250_v1 = vld [vmem:[#allocation133_spill] sm:$0xff] }
 0x614   : > { %7184 = vst.msk [vmem:[%s13237_s28 + $0x60] sm:$0xff] %vm7171_vm10, %v5556_v56  ;;  %v5559_v58 = vadd.f32 %v8148_v30, %v15238_v14  ;;  %8076 = vmatmul.mubr.msk.bf16.gmra.mrb[228].mxu0 %vm1265_vm8, %v15239_v45  ;;  %6842 = vmatmul.mubr.bf16.gmra.mrb[12].mxu1 %v6227_v38 }
 0x615   : > { %8079 = vmatprep.mubr.msk.bf16.mxu0 %vm1265_vm8, %v15240_v4  ;;  %6849 = vmatprep.mubr.bf16.mxu1 %v13106_v41  ;;  %v15244_v41 = vld [vmem:[#allocation91_spill] sm:$0xff]  ;;  %v6047_v4 = vpop.permute.xlu0 %6046 }
 0x616   : > { %7185 = vst.msk [vmem:[%s13237_s28 + $0x68] sm:$0xff] %vm7171_vm10, %v5559_v58 }
 0x617   : > { %v5274_v17 = vpop.f32.mrb[124].mxu0  ;;  %v13350_v33 = vpop.f32.mrb[164].mxu1 }
 0x618   : > { %v8149_v16 = vadd.f32 %v13227_v53, %v5274_v17  ;;  %v5276_v44 = vpop.f32.mrb[125].mxu0  ;;  %v6637_v39 = vpop.f32.mrb[165].mxu1  ;;  %v15251_v17 = vld [vmem:[#allocation100_spill] sm:$0xff] }
 0x619   : > { %v5277_v31 = vpop.f32.mrb[126].mxu0  ;;  %v13357_v51 = vpop.f32.mrb[166].mxu1  ;;  %v15254_v39 = vld [vmem:[#allocation138_spill] sm:$0xff] }
 0x61a   : > { %v5564_v46 = vadd.f32 %v8149_v16, %v15241_v52  ;;  %v8150_v48 = vadd.f32 %v13227_v53, %v5277_v31  ;;  %v5279_v5 = vpop.f32.mrb[127].mxu0  ;;  %v6640_v35 = vpop.f32.mrb[167].mxu1  ;;  %v6236_v31 = vsel %vm1265_vm8, %v15161_v61, %v6047_v4 }
 0x61b   : > { %v15253_v5 = vld [vmem:[#allocation8_spill] sm:$0xff]  ;;  %v6049_v61 = vpop.permute.xlu1 %6048 }
 0x61c   : > { %7186 = vst.msk [vmem:[%s13237_s28 + $0x70] sm:$0xff] %vm7171_vm10, %v5564_v46  ;;  %v5567_v54 = vadd.f32 %v8150_v48, %v15242_v15  ;;  %8080 = vmatmul.mubr.msk.bf16.gmra.mrb[232].mxu0 %vm1265_vm8, %v15243_v12  ;;  %6850 = vmatmul.mubr.bf16.gmra.mrb[16].mxu1 %v6230_v28  ;;  %v15255_v28 = vld [vmem:[#allocation140_spill] sm:$0xff] }
 0x61d   : > { %8083 = vmatprep.mubr.msk.bf16.mxu0 %vm1265_vm8, %v15244_v41  ;;  %6857 = vmatprep.mubr.bf16.mxu1 %v13116_v7  ;;  %v15248_v7 = vld [vmem:[#allocation117_spill] sm:$0xff] }
 0x61e   : > { %7187 = vst.msk [vmem:[%s13237_s28 + $0x78] sm:$0xff] %vm7171_vm10, %v5567_v54 }
 0x61f   : > { %v5282_v55 = vpop.f32.mrb[128].mxu0  ;;  %v13369_v42 = vpop.f32.mrb[168].mxu1 }
 0x620   : > { %v8151_v62 = vadd.f32 %v13227_v53, %v5282_v55  ;;  %v5284_v37 = vpop.f32.mrb[129].mxu0  ;;  %v6645_v21 = vpop.f32.mrb[169].mxu1 }
 0x621   : > { %v5285_v40 = vpop.f32.mrb[130].mxu0  ;;  %v13376_v0 = vpop.f32.mrb[170].mxu1  ;;  %v15257_v37 = vld [vmem:[#allocation121_spill] sm:$0xff] }
 0x622   : > { %v5572_v27 = vadd.f32 %v8151_v62, %v15245_v8  ;;  %v8152_v10 = vadd.f32 %v13227_v53, %v5285_v40  ;;  %v5287_v9 = vpop.f32.mrb[131].mxu0  ;;  %v6648_v24 = vpop.f32.mrb[171].mxu1  ;;  %v15256_v62 = vld [vmem:[#allocation125_spill] sm:$0xff]  ;;  %v15258_v8 = vld [vmem:[#allocation39_spill] sm:$0xff] }
 0x624   : > { %7188 = vst.msk [vmem:[%s13237_s28 + $0x80] sm:$0xff] %vm7171_vm10, %v5572_v27  ;;  %v5575_v63 = vadd.f32 %v8152_v10, %v15246_v22  ;;  %8084 = vmatmul.mubr.msk.bf16.gmra.mrb[236].mxu0 %vm1265_vm8, %v15247_v29  ;;  %6858 = vmatmul.mubr.bf16.gmra.mrb[20].mxu1 %v6233_v50  ;;  %v6239_v27 = vsel %vm1265_vm8, %v15258_v8, %v6049_v61  ;;  %v15259_v22 = vld [vmem:[#allocation137_spill] sm:$0xff]  ;;  %v15268_v8 = vld [vmem:[#allocation128_spill] sm:$0xff] }
 0x625   : > { %8087 = vmatprep.mubr.msk.bf16.mxu0 %vm1265_vm8, %v15248_v7  ;;  %6865 = vmatprep.mubr.bf16.mxu1 %v13300_v36  ;;  %v15252_v36 = vld [vmem:[#allocation47_spill] sm:$0xff]  ;;  %v15266_v61 = vld [vmem:[#allocation77_spill] sm:$0xff] }
 0x626   : > { %7189 = vst.msk [vmem:[%s13237_s28 + $0x88] sm:$0xff] %vm7171_vm10, %v5575_v63 }
 0x627   : > { %v5290_v23 = vpop.f32.mrb[132].mxu0  ;;  %v13388_v45 = vpop.f32.mrb[172].mxu1 }
 0x628   : > { %v8153_v56 = vadd.f32 %v13227_v53, %v5290_v23  ;;  %v5292_v30 = vpop.f32.mrb[133].mxu0  ;;  %v6653_v20 = vpop.f32.mrb[173].mxu1  ;;  %v15260_v23 = vld [vmem:[#allocation139_spill] sm:$0xff] }
 0x629   : > { %v5293_v26 = vpop.f32.mrb[134].mxu0  ;;  %v13395_v16 = vpop.f32.mrb[174].mxu1  ;;  %v15261_v30 = vld [vmem:[#allocation130_spill] sm:$0xff] }
 0x62a   : > { %v5580_v43 = vadd.f32 %v8153_v56, %v15249_v47  ;;  %v8154_v14 = vadd.f32 %v13227_v53, %v5293_v26  ;;  %v5295_v58 = vpop.f32.mrb[135].mxu0  ;;  %v6656_v44 = vpop.f32.mrb[175].mxu1  ;;  %v15262_v47 = vld [vmem:[#allocation88_spill] sm:$0xff] }
 0x62c   : > { %7190 = vst.msk [vmem:[%s13237_s28 + $0x90] sm:$0xff] %vm7171_vm10, %v5580_v43  ;;  %v5583_v38 = vadd.f32 %v8154_v14, %v15250_v1  ;;  %8088 = vmatmul.mubr.msk.bf16.gmra.mrb[240].mxu0 %vm1265_vm8, %v15251_v17  ;;  %6866 = vmatmul.mubr.bf16.gmra.mrb[24].mxu1 %v6236_v31  ;;  %v15263_v1 = vld [vmem:[#allocation52_spill] sm:$0xff] }
 0x62d   : > { %8091 = vmatprep.mubr.msk.bf16.mxu0 %vm1265_vm8, %v15252_v36  ;;  %7535 = vmatprep.mubr.msk.bf16.mxu1 %vm9336_vm9, %v15253_v5 }
 0x62e   : > { %7191 = vst.msk [vmem:[%s13237_s28 + $0x98] sm:$0xff] %vm7171_vm10, %v5583_v38 }
 0x62f   : > { %v5298_v52 = vpop.f32.mrb[136].mxu0  ;;  %v13409_v41 = vpop.f32.mrb[176].mxu1 }
 0x630   : > { %v8155_v46 = vadd.f32 %v13227_v53, %v5298_v52  ;;  %v5300_v48 = vpop.f32.mrb[137].mxu0  ;;  %v6661_v35 = vpop.f32.mrb[177].mxu1  ;;  %v15264_v52 = vld [vmem:[#allocation143_spill] sm:$0xff] }
 0x631   : > { %v5301_v49 = vpop.f32.mrb[138].mxu0  ;;  %v13416_v57 = vpop.f32.mrb[178].mxu1  ;;  %v15265_v48 = vld [vmem:[#allocation124_spill] sm:$0xff] }
 0x632   : > { %v5588_v15 = vadd.f32 %v8155_v46, %v15254_v39  ;;  %v8156_v54 = vadd.f32 %v13227_v53, %v5301_v49  ;;  %v5303_v12 = vpop.f32.mrb[139].mxu0  ;;  %v6664_v40 = vpop.f32.mrb[179].mxu1 }
 0x634   : > { %7192 = vst.msk [vmem:[%s13237_s28 + $0xa0] sm:$0xff] %vm7171_vm10, %v5588_v15  ;;  %v5591_v55 = vadd.f32 %v8156_v54, %v15255_v28  ;;  %8092 = vmatmul.mubr.msk.bf16.gmra.mrb[244].mxu0 %vm1265_vm8, %v15256_v62  ;;  %6874 = vmatmul.mubr.bf16.gmra.mrb[28].mxu1 %v6239_v27 }
 0x635   : > { %8095 = vmatprep.mubr.msk.bf16.mxu0 %vm1265_vm8, %v15257_v37 }
 0x636   : > { %7193 = vst.msk [vmem:[%s13237_s28 + $0xa8] sm:$0xff] %vm7171_vm10, %v5591_v55 }
 0x637   : > { %v5306_v10 = vpop.f32.mrb[140].mxu0  ;;  %v13427_v24 = vpop.f32.mrb[180].mxu1 }
 0x638   : > { %v8157_v9 = vadd.f32 %v13227_v53, %v5306_v10  ;;  %v5308_v59 = vpop.f32.mrb[141].mxu0  ;;  %v6669_v50 = vpop.f32.mrb[181].mxu1 }
 0x639   : > { %v5309_v21 = vpop.f32.mrb[142].mxu0  ;;  %v13434_v26 = vpop.f32.mrb[182].mxu1 }
 0x63a   : > { %v5596_v63 = vadd.f32 %v8157_v9, %v15259_v22  ;;  %v8158_v29 = vadd.f32 %v13227_v53, %v5309_v21  ;;  %v5311_v7 = vpop.f32.mrb[143].mxu0  ;;  %v6672_v43 = vpop.f32.mrb[183].mxu1 }
 0x63c   : > { %7194 = vst.msk [vmem:[%s13237_s28 + $0xb0] sm:$0xff] %vm7171_vm10, %v5596_v63  ;;  %v5599_v56 = vadd.f32 %v8158_v29, %v15260_v23  ;;  %8096 = vmatmul.mubr.msk.bf16.gmra.mrb[248].mxu0 %vm1265_vm8, %v15261_v30  ;;  %v15269_v63 = vld [vmem:[#allocation83_spill] sm:$0xff] }
 0x63d   : > { %8099 = vmatprep.mubr.msk.bf16.mxu0 %vm1265_vm8, %v15262_v47  ;;  %v15271_v47 = vld [vmem:[#allocation132_spill] sm:$0xff] }
 0x63e   : > { %7195 = vst.msk [vmem:[%s13237_s28 + $0xb8] sm:$0xff] %vm7171_vm10, %v5599_v56 }
 0x63f   : > { %v5314_v14 = vpop.f32.mrb[144].mxu0  ;;  %v13443_v44 = vpop.f32.mrb[184].mxu1 }
 0x640   : > { %v8159_v58 = vadd.f32 %v13227_v53, %v5314_v14  ;;  %v5316_v4 = vpop.f32.mrb[145].mxu0  ;;  %v6677_v31 = vpop.f32.mrb[185].mxu1 }
 0x641   : > { %v5317_v20 = vpop.f32.mrb[146].mxu0  ;;  %v13450_v5 = vpop.f32.mrb[186].mxu1 }
 0x642   : > { %v5604_v38 = vadd.f32 %v8159_v58, %v15263_v1  ;;  %v8160_v17 = vadd.f32 %v13227_v53, %v5317_v20  ;;  %v5319_v36 = vpop.f32.mrb[147].mxu0  ;;  %v6680_v49 = vpop.f32.mrb[187].mxu1 }
 0x644   : > { %7196 = vst.msk [vmem:[%s13237_s28 + $0xc0] sm:$0xff] %vm7171_vm10, %v5604_v38  ;;  %v5607_v46 = vadd.f32 %v8160_v17, %v15264_v52  ;;  %8100 = vmatmul.mubr.msk.bf16.gmra.mrb[252].mxu0 %vm1265_vm8, %v15265_v48  ;;  %v15272_v38 = vld [vmem:[#allocation33_spill] sm:$0xff] }
 0x645   : > { %8103 = vmatprep.mubr.msk.bf16.mxu0 %vm1265_vm8, %v12535_v25  ;;  %v15267_v25 = vld [vmem:[#allocation142_spill] sm:$0xff] }
 0x646   : > { %7197 = vst.msk [vmem:[%s13237_s28 + $0xc8] sm:$0xff] %vm7171_vm10, %v5607_v46 }
 0x647   : > { %v5322_v39 = vpop.f32.mrb[148].mxu0  ;;  %v13459_v62 = vpop.f32.mrb[188].mxu1 }
 0x648   : > { %v8161_v15 = vadd.f32 %v13227_v53, %v5322_v39  ;;  %v5324_v54 = vpop.f32.mrb[149].mxu0  ;;  %v6685_v37 = vpop.f32.mrb[189].mxu1 }
 0x649   : > { %v5325_v12 = vpop.f32.mrb[150].mxu0  ;;  %v13466_v27 = vpop.f32.mrb[190].mxu1 }
 0x64a   : > { %v5612_v35 = vadd.f32 %v8161_v15, %v15266_v61  ;;  %v8162_v28 = vadd.f32 %v13227_v53, %v5325_v12  ;;  %v5327_v55 = vpop.f32.mrb[151].mxu0  ;;  %v6688_v10 = vpop.f32.mrb[191].mxu1 }
 0x64c   : > { %7198 = vst.msk [vmem:[%s13237_s28 + $0xd0] sm:$0xff] %vm7171_vm10, %v5612_v35  ;;  %v5615_v40 = vadd.f32 %v8162_v28, %v15267_v25  ;;  %8104 = vmatmul.mubr.msk.bf16.gmra.mrb[0].mxu0 %vm1265_vm8, %v15268_v8  ;;  %v15274_v35 = vld [vmem:[#allocation145_spill] sm:$0xff] }
 0x64d   : > { %8107 = vmatprep.mubr.msk.bf16.mxu0 %vm1265_vm8, %v12561_v2  ;;  %v15270_v2 = vld [vmem:[#allocation74_spill] sm:$0xff] }
 0x64e   : > { %7199 = vst.msk [vmem:[%s13237_s28 + $0xd8] sm:$0xff] %vm7171_vm10, %v5615_v40 }
 0x64f   : > { %v5330_v9 = vpop.f32.mrb[152].mxu0  ;;  %v13475_v23 = vpop.f32.mrb[192].mxu1 }
 0x650   : > { %v8163_v59 = vadd.f32 %v13227_v53, %v5330_v9  ;;  %v5332_v21 = vpop.f32.mrb[153].mxu0  ;;  %v6693_v56 = vpop.f32.mrb[193].mxu1 }
 0x651   : > { %v5333_v22 = vpop.f32.mrb[154].mxu0  ;;  %v13482_v43 = vpop.f32.mrb[194].mxu1 }
 0x652   : > { %v5620_v29 = vadd.f32 %v8163_v59, %v15269_v63  ;;  %v8164_v7 = vadd.f32 %v13227_v53, %v5333_v22  ;;  %v5335_v50 = vpop.f32.mrb[155].mxu0  ;;  %v6696_v14 = vpop.f32.mrb[195].mxu1  ;;  %v15276_v63 = vld [vmem:[#allocation57_spill] sm:$0xff] }
 0x654   : > { %7200 = vst.msk [vmem:[%s13237_s28 + $0xe0] sm:$0xff] %vm7171_vm10, %v5620_v29  ;;  %v5623_v30 = vadd.f32 %v8164_v7, %v15270_v2  ;;  %8108 = vmatmul.mubr.msk.bf16.gmra.mrb[4].mxu0 %vm1265_vm8, %v15271_v47 }
 0x655   : > { %8111 = vmatprep.mubr.msk.bf16.mxu0 %vm1265_vm8, %v12606_v60  ;;  %v15273_v60 = vld [vmem:[#allocation144_spill] sm:$0xff] }
 0x656   : > { %7201 = vst.msk [vmem:[%s13237_s28 + $0xe8] sm:$0xff] %vm7171_vm10, %v5623_v30 }
 0x657   : > { %v5338_v58 = vpop.f32.mrb[156].mxu0  ;;  %v13491_v52 = vpop.f32.mrb[196].mxu1 }
 0x658   : > { %v8165_v4 = vadd.f32 %v13227_v53, %v5338_v58  ;;  %v5340_v20 = vpop.f32.mrb[157].mxu0  ;;  %v6701_v46 = vpop.f32.mrb[197].mxu1 }
 0x659   : > { %v5341_v1 = vpop.f32.mrb[158].mxu0  ;;  %v13498_v49 = vpop.f32.mrb[198].mxu1 }
 0x65a   : > { %v5628_v17 = vadd.f32 %v8165_v4, %v15272_v38  ;;  %v8166_v36 = vadd.f32 %v13227_v53, %v5341_v1  ;;  %v5343_v31 = vpop.f32.mrb[159].mxu0  ;;  %v6704_v39 = vpop.f32.mrb[199].mxu1  ;;  %v15278_v1 = vld [vmem:[#allocation147_spill] sm:$0xff] }
 0x65b   : > { %v15281_v39 = vld [vmem:[#allocation79_spill] sm:$0xff] }
 0x65c   : > { %7202 = vst.msk [vmem:[%s13237_s28 + $0xf0] sm:$0xff] %vm7171_vm10, %v5628_v17  ;;  %v5631_v48 = vadd.f32 %v8166_v36, %v15273_v60  ;;  %8112 = vmatmul.mubr.msk.bf16.gmra.mrb[8].mxu0 %vm1265_vm8, %v12529_v32  ;;  %v15280_v60 = vld [vmem:[#allocation135_spill] sm:$0xff] }
 0x65d   : > { %8115 = vmatprep.mubr.msk.bf16.mxu0 %vm1265_vm8, %v12631_v34  ;;  %v15275_v34 = vld [vmem:[#allocation4_spill] sm:$0xff] }
 0x65e   : > { %7203 = vst.msk [vmem:[%s13237_s28 + $0xf8] sm:$0xff] %vm7171_vm10, %v5631_v48 }
 0x65f   : > { %v5346_v15 = vpop.f32.mrb[160].mxu0  ;;  %v13507_v32 = vpop.f32.mrb[200].mxu1 }
 0x660   : > { %v8167_v54 = vadd.f32 %v13227_v53, %v5346_v15  ;;  %v5348_v12 = vpop.f32.mrb[161].mxu0  ;;  %v6709_v25 = vpop.f32.mrb[201].mxu1 }
 0x661   : > { %v5349_v61 = vpop.f32.mrb[162].mxu0  ;;  %v13514_v8 = vpop.f32.mrb[202].mxu1 }
 0x662   : > { %v5636_v28 = vadd.f32 %v8167_v54, %v15274_v35  ;;  %v8168_v55 = vadd.f32 %v13227_v53, %v5349_v61  ;;  %v5351_v37 = vpop.f32.mrb[163].mxu0  ;;  %v6712_v10 = vpop.f32.mrb[203].mxu1 }
 0x663   : > { %v15283_v10 = vld [vmem:[#allocation18_spill] sm:$0xff] }
 0x664   : > { %7204 = vst.msk [vmem:[%s13237_s28 + $0x100] sm:$0xff] %vm7171_vm10, %v5636_v28  ;;  %v5639_v40 = vadd.f32 %v8168_v55, %v15275_v34  ;;  %8116 = vmatmul.mubr.msk.bf16.gmra.mrb[12].mxu0 %vm1265_vm8, %v12556_v11  ;;  %v15282_v28 = vld [vmem:[#allocation116_spill] sm:$0xff] }
 0x665   : > { %8119 = vmatprep.mubr.msk.bf16.mxu0 %vm1265_vm8, %v12656_v19  ;;  %v15277_v19 = vld [vmem:[#allocation146_spill] sm:$0xff] }
 0x666   : > { %7205 = vst.msk [vmem:[%s13237_s28 + $0x108] sm:$0xff] %vm7171_vm10, %v5639_v40 }
 0x667   : > { %v5354_v9 = vpop.f32.mrb[164].mxu0  ;;  %v13523_v11 = vpop.f32.mrb[204].mxu1 }
 0x668   : > { %v8169_v59 = vadd.f32 %v13227_v53, %v5354_v9  ;;  %v5356_v21 = vpop.f32.mrb[165].mxu0  ;;  %v6717_v56 = vpop.f32.mrb[205].mxu1 }
 0x669   : > { %v5357_v22 = vpop.f32.mrb[166].mxu0  ;;  %v13530_v30 = vpop.f32.mrb[206].mxu1 }
 0x66a   : > { %v5644_v29 = vadd.f32 %v8169_v59, %v15276_v63  ;;  %v8170_v7 = vadd.f32 %v13227_v53, %v5357_v22  ;;  %v5359_v50 = vpop.f32.mrb[167].mxu0  ;;  %v6720_v47 = vpop.f32.mrb[207].mxu1  ;;  %v15284_v59 = vld [vmem:[#allocation136_spill] sm:$0xff]  ;;  %v15285_v22 = vld [vmem:[#allocation141_spill] sm:$0xff] }
 0x66c   : > { %7206 = vst.msk [vmem:[%s13237_s28 + $0x110] sm:$0xff] %vm7171_vm10, %v5644_v29  ;;  %v5647_v2 = vadd.f32 %v8170_v7, %v15277_v19  ;;  %8120 = vmatmul.mubr.msk.bf16.gmra.mrb[16].mxu0 %vm1265_vm8, %v12588_v18  ;;  %v15286_v19 = vld [vmem:[#allocation126_spill] sm:$0xff] }
 0x66d   : > { %8123 = vmatprep.mubr.msk.bf16.mxu0 %vm1265_vm8, %v12680_v3  ;;  %v15279_v3 = vld [vmem:[#allocation148_spill] sm:$0xff] }
 0x66e   : > { %7207 = vst.msk [vmem:[%s13237_s28 + $0x118] sm:$0xff] %vm7171_vm10, %v5647_v2 }
 0x66f   : > { %v5362_v14 = vpop.f32.mrb[168].mxu0  ;;  %v13539_v18 = vpop.f32.mrb[208].mxu1 }
 0x670   : > { %v8171_v58 = vadd.f32 %v13227_v53, %v5362_v14  ;;  %v5364_v4 = vpop.f32.mrb[169].mxu0  ;;  %v6725_v31 = vpop.f32.mrb[209].mxu1 }
 0x671   : > { %v5365_v20 = vpop.f32.mrb[170].mxu0  ;;  %v13546_v48 = vpop.f32.mrb[210].mxu1 }
 0x672   : > { %v5652_v38 = vadd.f32 %v8171_v58, %v15278_v1  ;;  %v8172_v17 = vadd.f32 %v13227_v53, %v5365_v20  ;;  %v5367_v36 = vpop.f32.mrb[171].mxu0  ;;  %v6728_v15 = vpop.f32.mrb[211].mxu1  ;;  %v15287_v20 = vld [vmem:[#allocation55_spill] sm:$0xff] }
 0x674   : > { %7208 = vst.msk [vmem:[%s13237_s28 + $0x120] sm:$0xff] %vm7171_vm10, %v5652_v38  ;;  %v5655_v46 = vadd.f32 %v8172_v17, %v15279_v3  ;;  %8124 = vmatmul.mubr.msk.bf16.gmra.mrb[20].mxu0 %vm1265_vm8, %v15280_v60  ;;  %v15288_v38 = vld [vmem:[#allocation3_spill] sm:$0xff] }
 0x675   : > { %8127 = vmatprep.mubr.msk.bf16.mxu0 %vm1265_vm8, %v15281_v39  ;;  %v15289_v39 = vld [vmem:[#allocation19_spill] sm:$0xff] }
 0x676   : > { %7209 = vst.msk [vmem:[%s13237_s28 + $0x128] sm:$0xff] %vm7171_vm10, %v5655_v46 }
 0x677   : > { %v5370_v54 = vpop.f32.mrb[172].mxu0  ;;  %v13555_v34 = vpop.f32.mrb[212].mxu1 }
 0x678   : > { %v8173_v12 = vadd.f32 %v13227_v53, %v5370_v54  ;;  %v5372_v61 = vpop.f32.mrb[173].mxu0  ;;  %v6733_v40 = vpop.f32.mrb[213].mxu1 }
 0x679   : > { %v5373_v35 = vpop.f32.mrb[174].mxu0  ;;  %v13562_v21 = vpop.f32.mrb[214].mxu1 }
 0x67a   : > { %v5660_v55 = vadd.f32 %v8173_v12, %v15282_v28  ;;  %v8174_v37 = vadd.f32 %v13227_v53, %v5373_v35  ;;  %v5375_v25 = vpop.f32.mrb[175].mxu0  ;;  %v6736_v63 = vpop.f32.mrb[215].mxu1  ;;  %v15290_v28 = vld [vmem:[#allocation43_spill] sm:$0xff] }
 0x67c   : > { %7210 = vst.msk [vmem:[%s13237_s28 + $0x130] sm:$0xff] %vm7171_vm10, %v5660_v55  ;;  %v5663_v9 = vadd.f32 %v8174_v37, %v15283_v10  ;;  %8128 = vmatmul.mubr.msk.bf16.gmra.mrb[24].mxu0 %vm1265_vm8, %v15284_v59 }
 0x67d   : > { %8131 = vmatprep.mubr.msk.bf16.mxu0 %vm1265_vm8, %v15285_v22  ;;  %v15291_v22 = vld [vmem:[#allocation9_spill] sm:$0xff] }
 0x67e   : > { %7211 = vst.msk [vmem:[%s13237_s28 + $0x138] sm:$0xff] %vm7171_vm10, %v5663_v9 }
 0x67f   : > { %v5378_v29 = vpop.f32.mrb[176].mxu0  ;;  %v13571_v58 = vpop.f32.mrb[216].mxu1 }
 0x680   : > { %v8175_v7 = vadd.f32 %v13227_v53, %v5378_v29  ;;  %v5380_v50 = vpop.f32.mrb[177].mxu0  ;;  %v6741_v4 = vpop.f32.mrb[217].mxu1 }
 0x681   : > { %v5381_v56 = vpop.f32.mrb[178].mxu0  ;;  %v13578_v17 = vpop.f32.mrb[218].mxu1 }
 0x682   : > { %v5668_v2 = vadd.f32 %v8175_v7, %v15286_v19  ;;  %v8176_v47 = vadd.f32 %v13227_v53, %v5381_v56  ;;  %v5383_v14 = vpop.f32.mrb[179].mxu0  ;;  %v6744_v36 = vpop.f32.mrb[219].mxu1  ;;  %v15292_v19 = vld [vmem:[#allocation81_spill] sm:$0xff] }
 0x683   : > { %v15293_v36 = vld [vmem:[#allocation13_spill] sm:$0xff] }
 0x684   : > { %7212 = vst.msk [vmem:[%s13237_s28 + $0x140] sm:$0xff] %vm7171_vm10, %v5668_v2  ;;  %v5671_v1 = vadd.f32 %v8176_v47, %v15287_v20  ;;  %8132 = vmatmul.mubr.msk.bf16.gmra.mrb[28].mxu0 %vm1265_vm8, %v15288_v38 }
 0x686   : > { %7213 = vst.msk [vmem:[%s13237_s28 + $0x148] sm:$0xff] %vm7171_vm10, %v5671_v1 }
 0x687   : > { %v5386_v31 = vpop.f32.mrb[180].mxu0  ;;  %v13585_v61 = vpop.f32.mrb[220].mxu1 }
 0x688   : > { %v8177_v3 = vadd.f32 %v13227_v53, %v5386_v31  ;;  %v5388_v46 = vpop.f32.mrb[181].mxu0  ;;  %v6749_v35 = vpop.f32.mrb[221].mxu1 }
 0x689   : > { %v5389_v60 = vpop.f32.mrb[182].mxu0  ;;  %v13590_v37 = vpop.f32.mrb[222].mxu1 }
 0x68a   : > { %v5676_v15 = vadd.f32 %v8177_v3, %v15289_v39  ;;  %v8178_v54 = vadd.f32 %v13227_v53, %v5389_v60  ;;  %v5391_v12 = vpop.f32.mrb[183].mxu0  ;;  %v6752_v25 = vpop.f32.mrb[223].mxu1 }
 0x68c   : > { %7214 = vst.msk [vmem:[%s13237_s28 + $0x150] sm:$0xff] %vm7171_vm10, %v5676_v15  ;;  %v5679_v55 = vadd.f32 %v8178_v54, %v15290_v28  ;;  %v15294_v15 = vld [vmem:[#allocation22_spill] sm:$0xff] }
 0x68e   : > { %7215 = vst.msk [vmem:[%s13237_s28 + $0x158] sm:$0xff] %vm7171_vm10, %v5679_v55 }
 0x68f   : > { %v5394_v40 = vpop.f32.mrb[184].mxu0  ;;  %v13597_v50 = vpop.f32.mrb[224].mxu1 }
 0x690   : > { %v8179_v10 = vadd.f32 %v13227_v53, %v5394_v40  ;;  %v5396_v9 = vpop.f32.mrb[185].mxu0  ;;  %v6757_v56 = vpop.f32.mrb[225].mxu1 }
 0x691   : > { %v5397_v59 = vpop.f32.mrb[186].mxu0  ;;  %v13602_v47 = vpop.f32.mrb[226].mxu1 }
 0x692   : > { %v5684_v63 = vadd.f32 %v8179_v10, %v15291_v22  ;;  %v8180_v29 = vadd.f32 %v13227_v53, %v5397_v59  ;;  %v5399_v7 = vpop.f32.mrb[187].mxu0  ;;  %v6760_v14 = vpop.f32.mrb[227].mxu1  ;;  %v15295_v10 = vld [vmem:[#allocation87_spill] sm:$0xff] }
 0x693   : > { %v15296_v7 = vld [vmem:[#allocation53_spill] sm:$0xff] }
 0x694   : > { %7216 = vst.msk [vmem:[%s13237_s28 + $0x160] sm:$0xff] %vm7171_vm10, %v5684_v63  ;;  %v5687_v2 = vadd.f32 %v8180_v29, %v15292_v19 }
 0x696   : > { %7217 = vst.msk [vmem:[%s13237_s28 + $0x168] sm:$0xff] %vm7171_vm10, %v5687_v2 }
 0x697   : > { %v5402_v4 = vpop.f32.mrb[188].mxu0  ;;  %v13609_v60 = vpop.f32.mrb[228].mxu1 }
 0x698   : > { %v8181_v20 = vadd.f32 %v13227_v53, %v5402_v4  ;;  %v5404_v1 = vpop.f32.mrb[189].mxu0  ;;  %v6765_v39 = vpop.f32.mrb[229].mxu1 }
 0x699   : > { %v5405_v38 = vpop.f32.mrb[190].mxu0  ;;  %v13614_v12 = vpop.f32.mrb[230].mxu1 }
 0x69a   : > { %v5692_v31 = vadd.f32 %v8181_v20, %v15293_v36  ;;  %v8182_v3 = vadd.f32 %v13227_v53, %v5405_v38  ;;  %v5407_v46 = vpop.f32.mrb[191].mxu0  ;;  %v6768_v35 = vpop.f32.mrb[231].mxu1  ;;  %v15297_v38 = vld [vmem:[#allocation80_spill] sm:$0xff] }
 0x69c   : > { %7218 = vst.msk [vmem:[%s13237_s28 + $0x170] sm:$0xff] %vm7171_vm10, %v5692_v31  ;;  %v5695_v54 = vadd.f32 %v8182_v3, %v15294_v15  ;;  %v15298_v15 = vld [vmem:[#allocation21_spill] sm:$0xff] }
 0x69e   : > { %7219 = vst.msk [vmem:[%s13237_s28 + $0x178] sm:$0xff] %vm7171_vm10, %v5695_v54 }
 0x69f   : > { %v5410_v28 = vpop.f32.mrb[192].mxu0  ;;  %v13621_v63 = vpop.f32.mrb[232].mxu1 }
 0x6a0   : > { %v8183_v55 = vadd.f32 %v13227_v53, %v5410_v28  ;;  %v5412_v25 = vpop.f32.mrb[193].mxu0  ;;  %v6773_v29 = vpop.f32.mrb[233].mxu1 }
 0x6a1   : > { %v5413_v40 = vpop.f32.mrb[194].mxu0  ;;  %v13626_v19 = vpop.f32.mrb[234].mxu1 }
 0x6a2   : > { %v5700_v9 = vadd.f32 %v8183_v55, %v15295_v10  ;;  %v8184_v59 = vadd.f32 %v13227_v53, %v5413_v40  ;;  %v5415_v22 = vpop.f32.mrb[195].mxu0  ;;  %v6776_v2 = vpop.f32.mrb[235].mxu1 }
 0x6a3   : > { %v15300_v2 = vld [vmem:[#allocation24_spill] sm:$0xff] }
 0x6a4   : > { %7220 = vst.msk [vmem:[%s13237_s28 + $0x180] sm:$0xff] %vm7171_vm10, %v5700_v9  ;;  %v5703_v56 = vadd.f32 %v8184_v59, %v15296_v7  ;;  %v15299_v9 = vld [vmem:[#allocation35_spill] sm:$0xff] }
 0x6a6   : > { %7221 = vst.msk [vmem:[%s13237_s28 + $0x188] sm:$0xff] %vm7171_vm10, %v5703_v56 }
 0x6a7   : > { %v5418_v14 = vpop.f32.mrb[196].mxu0  ;;  %v13633_v46 = vpop.f32.mrb[236].mxu1 }
 0x6a8   : > { %v8185_v4 = vadd.f32 %v13227_v53, %v5418_v14  ;;  %v5420_v20 = vpop.f32.mrb[197].mxu0  ;;  %v6781_v39 = vpop.f32.mrb[237].mxu1 }
 0x6a9   : > { %v5421_v1 = vpop.f32.mrb[198].mxu0  ;;  %v13638_v35 = vpop.f32.mrb[238].mxu1 }
 0x6aa   : > { %v5708_v36 = vadd.f32 %v8185_v4, %v15297_v38  ;;  %v8186_v31 = vadd.f32 %v13227_v53, %v5421_v1  ;;  %v5423_v3 = vpop.f32.mrb[199].mxu0  ;;  %v6784_v28 = vpop.f32.mrb[239].mxu1 }
 0x6ab   : > { %v15301_v3 = vld [vmem:[#allocation90_spill] sm:$0xff] }
 0x6ac   : > { %7222 = vst.msk [vmem:[%s13237_s28 + $0x190] sm:$0xff] %vm7171_vm10, %v5708_v36  ;;  %v5711_v54 = vadd.f32 %v8186_v31, %v15298_v15 }
 0x6ae   : > { %7223 = vst.msk [vmem:[%s13237_s28 + $0x198] sm:$0xff] %vm7171_vm10, %v5711_v54 }
 0x6af   : > { %v5426_v55 = vpop.f32.mrb[200].mxu0  ;;  %v13645_v7 = vpop.f32.mrb[240].mxu1 }
 0x6b0   : > { %v8187_v25 = vadd.f32 %v13227_v53, %v5426_v55  ;;  %v5428_v40 = vpop.f32.mrb[201].mxu0  ;;  %v6789_v56 = vpop.f32.mrb[241].mxu1 }
 0x6b1   : > { %v5429_v10 = vpop.f32.mrb[202].mxu0  ;;  %v13650_v4 = vpop.f32.mrb[242].mxu1 }
 0x6b2   : > { %v5716_v59 = vadd.f32 %v8187_v25, %v15299_v9  ;;  %v8188_v22 = vadd.f32 %v13227_v53, %v5429_v10  ;;  %v5431_v29 = vpop.f32.mrb[203].mxu0  ;;  %v6792_v20 = vpop.f32.mrb[243].mxu1  ;;  %v15302_v25 = vld [vmem:[#allocation93_spill] sm:$0xff] }
 0x6b4   : > { %7224 = vst.msk [vmem:[%s13237_s28 + $0x1a0] sm:$0xff] %vm7171_vm10, %v5716_v59  ;;  %v5719_v14 = vadd.f32 %v8188_v22, %v15300_v2  ;;  %v15303_v2 = vld [vmem:[#allocation50_spill] sm:$0xff] }
 0x6b6   : > { %7225 = vst.msk [vmem:[%s13237_s28 + $0x1a8] sm:$0xff] %vm7171_vm10, %v5719_v14 }
 0x6b7   : > { %v5434_v1 = vpop.f32.mrb[204].mxu0  ;;  %v13657_v28 = vpop.f32.mrb[244].mxu1 }
 0x6b8   : > { %v8189_v38 = vadd.f32 %v13227_v53, %v5434_v1  ;;  %v5436_v36 = vpop.f32.mrb[205].mxu0  ;;  %v6797_v55 = vpop.f32.mrb[245].mxu1 }
 0x6b9   : > { %v5437_v31 = vpop.f32.mrb[206].mxu0  ;;  %v13662_v10 = vpop.f32.mrb[246].mxu1 }
 0x6ba   : > { %v5724_v39 = vadd.f32 %v8189_v38, %v15301_v3  ;;  %v8190_v15 = vadd.f32 %v13227_v53, %v5437_v31  ;;  %v5439_v54 = vpop.f32.mrb[207].mxu0  ;;  %v6800_v9 = vpop.f32.mrb[247].mxu1  ;;  %v15304_v31 = vld [vmem:[#allocation150_spill] sm:$0xff] }
 0x6bb   : > { %v15305_v9 = vld [vmem:[#allocation92_spill] sm:$0xff] }
 0x6bc   : > { %7226 = vst.msk [vmem:[%s13237_s28 + $0x1b0] sm:$0xff] %vm7171_vm10, %v5724_v39  ;;  %v5727_v40 = vadd.f32 %v8190_v15, %v15302_v25 }
 0x6be   : > { %7227 = vst.msk [vmem:[%s13237_s28 + $0x1b8] sm:$0xff] %vm7171_vm10, %v5727_v40 }
 0x6bf   : > { %v5442_v59 = vpop.f32.mrb[208].mxu0  ;;  %v13669_v38 = vpop.f32.mrb[248].mxu1 }
 0x6c0   : > { %v8191_v22 = vadd.f32 %v13227_v53, %v5442_v59  ;;  %v5444_v29 = vpop.f32.mrb[209].mxu0  ;;  %v6805_v36 = vpop.f32.mrb[249].mxu1 }
 0x6c1   : > { %v5445_v56 = vpop.f32.mrb[210].mxu0  ;;  %v13674_v39 = vpop.f32.mrb[250].mxu1 }
 0x6c2   : > { %v5732_v14 = vadd.f32 %v8191_v22, %v15303_v2  ;;  %v8192_v20 = vadd.f32 %v13227_v53, %v5445_v56  ;;  %v5447_v1 = vpop.f32.mrb[211].mxu0  ;;  %v6808_v15 = vpop.f32.mrb[251].mxu1 }
 0x6c4   : > { %7228 = vst.msk [vmem:[%s13237_s28 + $0x1c0] sm:$0xff] %vm7171_vm10, %v5732_v14  ;;  %v5735_v3 = vadd.f32 %v8192_v20, %v15304_v31  ;;  %v15306_v14 = vld [vmem:[#allocation149_spill] sm:$0xff] }
 0x6c6   : > { %7229 = vst.msk [vmem:[%s13237_s28 + $0x1c8] sm:$0xff] %vm7171_vm10, %v5735_v3 }
 0x6c7   : > { %v5450_v54 = vpop.f32.mrb[212].mxu0  ;;  %v13681_v56 = vpop.f32.mrb[252].mxu1 }
 0x6c8   : > { %v8193_v55 = vadd.f32 %v13227_v53, %v5450_v54  ;;  %v5452_v25 = vpop.f32.mrb[213].mxu0  ;;  %v6813_v2 = vpop.f32.mrb[253].mxu1 }
 0x6c9   : > { %v5453_v40 = vpop.f32.mrb[214].mxu0  ;;  %v13686_v1 = vpop.f32.mrb[254].mxu1 }
 0x6ca   : > { %v5740_v59 = vadd.f32 %v8193_v55, %v15305_v9  ;;  %v8194_v22 = vadd.f32 %v13227_v53, %v5453_v40  ;;  %v5455_v29 = vpop.f32.mrb[215].mxu0  ;;  %v6816_v36 = vpop.f32.mrb[255].mxu1  ;;  %v15307_v55 = vld [vmem:[#allocation49_spill] sm:$0xff] }
 0x6cc   : > { %7230 = vst.msk [vmem:[%s13237_s28 + $0x1d0] sm:$0xff] %vm7171_vm10, %v5740_v59  ;;  %v5743_v20 = vadd.f32 %v8194_v22, %v15306_v14  ;;  %v15309_v22 = vld [vmem:[#allocation152_spill] sm:$0xff] }
 0x6ce   : > { %7231 = vst.msk [vmem:[%s13237_s28 + $0x1d8] sm:$0xff] %vm7171_vm10, %v5743_v20 }
 0x6cf   : > { %v5458_v31 = vpop.f32.mrb[216].mxu0  ;;  %v13693_v29 = vpop.f32.mrb[0].mxu1 }
 0x6d0   : > { %v8195_v3 = vadd.f32 %v13227_v53, %v5458_v31  ;;  %v5460_v15 = vpop.f32.mrb[217].mxu0  ;;  %15308 = vst [vmem:[#allocation94_spill] sm:$0xff] %v13693_v29  ;;  %v6821_v59 = vpop.f32.mrb[1].mxu1 }
 0x6d1   : > { %v5461_v54 = vpop.f32.mrb[218].mxu0  ;;  %v13698_v14 = vpop.f32.mrb[2].mxu1 }
 0x6d2   : > { %v5748_v25 = vadd.f32 %v8195_v3, %v15307_v55  ;;  %v8196_v40 = vadd.f32 %v13227_v53, %v5461_v54  ;;  %v5463_v9 = vpop.f32.mrb[219].mxu0  ;;  %v6824_v20 = vpop.f32.mrb[3].mxu1  ;;  %v15310_v54 = vld [vmem:[#allocation15_spill] sm:$0xff] }
 0x6d4   : > { %7232 = vst.msk [vmem:[%s13237_s28 + $0x1e0] sm:$0xff] %vm7171_vm10, %v5748_v25  ;;  %v5751_v2 = vadd.f32 %v8196_v40, %v15309_v22  ;;  %v15311_v40 = vld [vmem:[#allocation151_spill] sm:$0xff] }
 0x6d6   : > { %7233 = vst.msk [vmem:[%s13237_s28 + $0x1e8] sm:$0xff] %vm7171_vm10, %v5751_v2 }
 0x6d7   : > { %v5466_v36 = vpop.f32.mrb[220].mxu0  ;;  %v13705_v29 = vpop.f32.mrb[4].mxu1 }
 0x6d8   : > { %v8197_v31 = vadd.f32 %v13227_v53, %v5466_v36  ;;  %v5468_v3 = vpop.f32.mrb[221].mxu0  ;;  %v6829_v25 = vpop.f32.mrb[5].mxu1  ;;  %v13715_v36 = vld [vmem:[%s14008_s6] ss:$0 sm:$0xff] }
 0x6d9   : > { %v5469_v15 = vpop.f32.mrb[222].mxu0  ;;  %v13710_v2 = vpop.f32.mrb[6].mxu1 }
 0x6da   : > { %v5756_v55 = vadd.f32 %v8197_v31, %v15310_v54  ;;  %v8198_v9 = vadd.f32 %v13227_v53, %v5469_v15  ;;  %v5471_v59 = vpop.f32.mrb[223].mxu0  ;;  %v6832_v20 = vpop.f32.mrb[7].mxu1  ;;  %v8201_v53 = vadd.f32 %v13715_v36, %v13350_v33  ;;  %v8199_v31 = vadd.f32 %v13715_v36, %v13331_v13 }
 0x6db   : > { %v8202_v15 = vadd.f32 %v13715_v36, %v13357_v51 }
 0x6dc   : > { %7234 = vst.msk [vmem:[%s13237_s28 + $0x1f0] sm:$0xff] %vm7171_vm10, %v5756_v55  ;;  %v5759_v22 = vadd.f32 %v8198_v9, %v15311_v40  ;;  %v8200_v9 = vadd.f32 %v13715_v36, %v13338_v6 }
 0x6de   : > { %7235 = vst.msk [vmem:[%s13237_s28 + $0x1f8] sm:$0xff] %vm7171_vm10, %v5759_v22 }
 0x6df   : > { %v8073_v3 = vpop.f32.mrb[224].mxu0  ;;  %v13729_v22 = vpop.f32.mrb[8].mxu1 }
 0x6e0   : > { %v6925_v54 = vadd.f32 %v8201_v53, %v8073_v3  ;;  %v6916_v55 = vpop.f32.mrb[225].mxu0  ;;  %v6837_v20 = vpop.f32.mrb[9].mxu1  ;;  %v8205_v53 = vadd.f32 %v13715_v36, %v13388_v45 }
 0x6e1   : > { %v6917_v59 = vadd.f32 %v8199_v31, %v6916_v55  ;;  %v8074_v25 = vpop.f32.mrb[226].mxu0  ;;  %v13735_v51 = vpop.f32.mrb[10].mxu1  ;;  %v8203_v31 = vadd.f32 %v13715_v36, %v13369_v42  ;;  %v8209_v20 = vadd.f32 %v13715_v36, %v13427_v24 }
 0x6e2   : > { %7238 = vst.msk [vmem:[%s13237_s28 + $0x210] sm:$0xff] %vm7171_vm10, %v6925_v54  ;;  %v6928_v33 = vadd.f32 %v8202_v15, %v8074_v25  ;;  %v6919_v40 = vpop.f32.mrb[227].mxu0  ;;  %v6840_v6 = vpop.f32.mrb[11].mxu1  ;;  %v8206_v15 = vadd.f32 %v13715_v36, %v13395_v16 }
 0x6e3   : > { %7236 = vst.msk [vmem:[%s13237_s28 + $0x200] sm:$0xff] %vm7171_vm10, %v6917_v59  ;;  %v6920_v13 = vadd.f32 %v8200_v9, %v6919_v40  ;;  %v8204_v9 = vadd.f32 %v13715_v36, %v13376_v0  ;;  %v8207_v6 = vadd.f32 %v13715_v36, %v13409_v41 }
 0x6e4   : > { %7239 = vst.msk [vmem:[%s13237_s28 + $0x218] sm:$0xff] %vm7171_vm10, %v6928_v33 }
 0x6e5   : > { %7237 = vst.msk [vmem:[%s13237_s28 + $0x208] sm:$0xff] %vm7171_vm10, %v6920_v13 }
 0x6e7   : > { %v8077_v3 = vpop.f32.mrb[228].mxu0  ;;  %v13749_v40 = vpop.f32.mrb[12].mxu1 }
 0x6e8   : > { %v6941_v54 = vadd.f32 %v8205_v53, %v8077_v3  ;;  %v6932_v55 = vpop.f32.mrb[229].mxu0  ;;  %v6845_v13 = vpop.f32.mrb[13].mxu1 }
 0x6e9   : > { %v6933_v59 = vadd.f32 %v8203_v31, %v6932_v55  ;;  %v8078_v25 = vpop.f32.mrb[230].mxu0  ;;  %v13755_v16 = vpop.f32.mrb[14].mxu1  ;;  %v8210_v31 = vadd.f32 %v13715_v36, %v13434_v26 }
 0x6ea   : > { %7242 = vst.msk [vmem:[%s13237_s28 + $0x230] sm:$0xff] %vm7171_vm10, %v6941_v54  ;;  %v6944_v33 = vadd.f32 %v8206_v15, %v8078_v25  ;;  %v6935_v45 = vpop.f32.mrb[231].mxu0  ;;  %v6848_v0 = vpop.f32.mrb[15].mxu1  ;;  %v8208_v54 = vadd.f32 %v13715_v36, %v13416_v57 }
 0x6eb   : > { %7240 = vst.msk [vmem:[%s13237_s28 + $0x220] sm:$0xff] %vm7171_vm10, %v6933_v59  ;;  %v6936_v42 = vadd.f32 %v8204_v9, %v6935_v45  ;;  %v8213_v45 = vadd.f32 %v13715_v36, %v13459_v62  ;;  %v8214_v0 = vadd.f32 %v13715_v36, %v13466_v27 }
 0x6ec   : > { %7243 = vst.msk [vmem:[%s13237_s28 + $0x238] sm:$0xff] %vm7171_vm10, %v6944_v33 }
 0x6ed   : > { %7241 = vst.msk [vmem:[%s13237_s28 + $0x228] sm:$0xff] %vm7171_vm10, %v6936_v42  ;;  %v8211_v42 = vadd.f32 %v13715_v36, %v13443_v44 }
 0x6ef   : > { %v8081_v53 = vpop.f32.mrb[232].mxu0  ;;  %v13769_v25 = vpop.f32.mrb[16].mxu1 }
 0x6f0   : > { %v6957_v3 = vadd.f32 %v8209_v20, %v8081_v53  ;;  %v6948_v15 = vpop.f32.mrb[233].mxu0  ;;  %v6853_v33 = vpop.f32.mrb[17].mxu1  ;;  %v8212_v53 = vadd.f32 %v13715_v36, %v13450_v5 }
 0x6f1   : > { %v6949_v55 = vadd.f32 %v8207_v6, %v6948_v15  ;;  %v8082_v9 = vpop.f32.mrb[234].mxu0  ;;  %v13775_v26 = vpop.f32.mrb[18].mxu1 }
 0x6f2   : > { %7246 = vst.msk [vmem:[%s13237_s28 + $0x250] sm:$0xff] %vm7171_vm10, %v6957_v3  ;;  %v6960_v59 = vadd.f32 %v8210_v31, %v8082_v9  ;;  %v6951_v24 = vpop.f32.mrb[235].mxu0  ;;  %v6856_v57 = vpop.f32.mrb[19].mxu1  ;;  %v8217_v9 = vadd.f32 %v13715_v36, %v13491_v52 }
 0x6f3   : > { %7244 = vst.msk [vmem:[%s13237_s28 + $0x240] sm:$0xff] %vm7171_vm10, %v6949_v55  ;;  %v6952_v41 = vadd.f32 %v8208_v54, %v6951_v24 }
 0x6f4   : > { %7247 = vst.msk [vmem:[%s13237_s28 + $0x258] sm:$0xff] %vm7171_vm10, %v6960_v59  ;;  %v8215_v59 = vadd.f32 %v13715_v36, %v13475_v23 }
 0x6f5   : > { %7245 = vst.msk [vmem:[%s13237_s28 + $0x248] sm:$0xff] %vm7171_vm10, %v6952_v41  ;;  %v8218_v41 = vadd.f32 %v13715_v36, %v13498_v49 }
 0x6f7   : > { %v8085_v13 = vpop.f32.mrb[236].mxu0  ;;  %v13789_v54 = vpop.f32.mrb[20].mxu1 }
 0x6f8   : > { %v6973_v20 = vadd.f32 %v8213_v45, %v8085_v13  ;;  %v6964_v6 = vpop.f32.mrb[237].mxu0  ;;  %v6861_v55 = vpop.f32.mrb[21].mxu1  ;;  %v8216_v45 = vadd.f32 %v13715_v36, %v13482_v43 }
 0x6f9   : > { %v6965_v31 = vadd.f32 %v8211_v42, %v6964_v6  ;;  %v8086_v3 = vpop.f32.mrb[238].mxu0  ;;  %v13795_v27 = vpop.f32.mrb[22].mxu1  ;;  %v8220_v55 = vadd.f32 %v13715_v36, %v13514_v8 }
 0x6fa   : > { %7250 = vst.msk [vmem:[%s13237_s28 + $0x270] sm:$0xff] %vm7171_vm10, %v6973_v20  ;;  %v6976_v15 = vadd.f32 %v8214_v0, %v8086_v3  ;;  %v6967_v62 = vpop.f32.mrb[239].mxu0  ;;  %v6864_v5 = vpop.f32.mrb[23].mxu1 }
 0x6fb   : > { %7248 = vst.msk [vmem:[%s13237_s28 + $0x260] sm:$0xff] %vm7171_vm10, %v6965_v31  ;;  %v6968_v44 = vadd.f32 %v8212_v53, %v6967_v62  ;;  %v8221_v53 = vadd.f32 %v13715_v36, %v13523_v11  ;;  %v8219_v31 = vadd.f32 %v13715_v36, %v13507_v32 }
 0x6fc   : > { %7251 = vst.msk [vmem:[%s13237_s28 + $0x278] sm:$0xff] %vm7171_vm10, %v6976_v15  ;;  %v8222_v15 = vadd.f32 %v13715_v36, %v13530_v30 }
 0x6fd   : > { %7249 = vst.msk [vmem:[%s13237_s28 + $0x268] sm:$0xff] %vm7171_vm10, %v6968_v44 }
 0x6ff   : > { %v8089_v24 = vpop.f32.mrb[240].mxu0  ;;  %v13809_v20 = vpop.f32.mrb[24].mxu1 }
 0x700   : > { %v6989_v33 = vadd.f32 %v8217_v9, %v8089_v24  ;;  %v6980_v57 = vpop.f32.mrb[241].mxu0  ;;  %v6869_v6 = vpop.f32.mrb[25].mxu1 }
 0x701   : > { %v6981_v42 = vadd.f32 %v8215_v59, %v6980_v57  ;;  %v8090_v13 = vpop.f32.mrb[242].mxu0  ;;  %v13815_v49 = vpop.f32.mrb[26].mxu1  ;;  %v8223_v57 = vadd.f32 %v13715_v36, %v13539_v18 }
 0x702   : > { %7254 = vst.msk [vmem:[%s13237_s28 + $0x290] sm:$0xff] %vm7171_vm10, %v6989_v33  ;;  %v6992_v0 = vadd.f32 %v8218_v41, %v8090_v13  ;;  %v6983_v52 = vpop.f32.mrb[243].mxu0  ;;  %v6872_v43 = vpop.f32.mrb[27].mxu1  ;;  %v8225_v33 = vadd.f32 %v13715_v36, %v13555_v34  ;;  %v8227_v34 = vadd.f32 %v13715_v36, %v13571_v58 }
 0x703   : > { %7252 = vst.msk [vmem:[%s13237_s28 + $0x280] sm:$0xff] %vm7171_vm10, %v6981_v42  ;;  %v6984_v23 = vadd.f32 %v8216_v45, %v6983_v52  ;;  %v8226_v42 = vadd.f32 %v13715_v36, %v13562_v21  ;;  %v8224_v52 = vadd.f32 %v13715_v36, %v13546_v48  ;;  %v8229_v48 = vadd.f32 %v13715_v36, %v13585_v61 }
 0x704   : > { %7255 = vst.msk [vmem:[%s13237_s28 + $0x298] sm:$0xff] %vm7171_vm10, %v6992_v0  ;;  %v8231_v61 = vadd.f32 %v13715_v36, %v13597_v50 }
 0x705   : > { %7253 = vst.msk [vmem:[%s13237_s28 + $0x288] sm:$0xff] %vm7171_vm10, %v6984_v23 }
 0x707   : > { %v8093_v3 = vpop.f32.mrb[244].mxu0  ;;  %v13829_v24 = vpop.f32.mrb[28].mxu1 }
 0x708   : > { %v7005_v62 = vadd.f32 %v8221_v53, %v8093_v3  ;;  %v6996_v44 = vpop.f32.mrb[245].mxu0  ;;  %v6877_v41 = vpop.f32.mrb[29].mxu1 }
 0x709   : > { %v6997_v5 = vadd.f32 %v8219_v31, %v6996_v44  ;;  %v8094_v9 = vpop.f32.mrb[246].mxu0  ;;  %v13835_v30 = vpop.f32.mrb[30].mxu1  ;;  %v8230_v31 = vadd.f32 %v13715_v36, %v13590_v37  ;;  %v8232_v41 = vadd.f32 %v13715_v36, %v13602_v47  ;;  %v8237_v47 = vadd.f32 %v13715_v36, %v13633_v46 }
 0x70a   : > { %7258 = vst.msk [vmem:[%s13237_s28 + $0x2b0] sm:$0xff] %vm7171_vm10, %v7005_v62  ;;  %v7008_v59 = vadd.f32 %v8222_v15, %v8094_v9  ;;  %v6999_v11 = vpop.f32.mrb[247].mxu0  ;;  %v6880_v8 = vpop.f32.mrb[31].mxu1  ;;  %v8228_v62 = vadd.f32 %v13715_v36, %v13578_v17  ;;  %v8233_v17 = vadd.f32 %v13715_v36, %v13609_v60  ;;  %v8235_v60 = vadd.f32 %v13715_v36, %v13621_v63 }
 0x70b   : > { %7256 = vst.msk [vmem:[%s13237_s28 + $0x2a0] sm:$0xff] %vm7171_vm10, %v6997_v5  ;;  %v7000_v32 = vadd.f32 %v8220_v55, %v6999_v11  ;;  %v8239_v46 = vadd.f32 %v13715_v36, %v13645_v7 }
 0x70c   : > { %7259 = vst.msk [vmem:[%s13237_s28 + $0x2b8] sm:$0xff] %vm7171_vm10, %v7008_v59  ;;  %v8234_v59 = vadd.f32 %v13715_v36, %v13614_v12 }
 0x70d   : > { %7257 = vst.msk [vmem:[%s13237_s28 + $0x2a8] sm:$0xff] %vm7171_vm10, %v7000_v32 }
 0x70f   : > { %v8097_v45 = vpop.f32.mrb[248].mxu0 }
 0x710   : > { %v7021_v13 = vadd.f32 %v8225_v33, %v8097_v45  ;;  %v7012_v0 = vpop.f32.mrb[249].mxu0 }
 0x711   : > { %v7013_v23 = vadd.f32 %v8223_v57, %v7012_v0  ;;  %v8098_v6 = vpop.f32.mrb[250].mxu0 }
 0x712   : > { %7262 = vst.msk [vmem:[%s13237_s28 + $0x2d0] sm:$0xff] %vm7171_vm10, %v7021_v13  ;;  %v7024_v43 = vadd.f32 %v8226_v42, %v8098_v6  ;;  %v7015_v53 = vpop.f32.mrb[251].mxu0  ;;  %v8238_v42 = vadd.f32 %v13715_v36, %v13638_v35 }
 0x713   : > { %7260 = vst.msk [vmem:[%s13237_s28 + $0x2c0] sm:$0xff] %vm7171_vm10, %v7013_v23  ;;  %v7016_v18 = vadd.f32 %v8224_v52, %v7015_v53  ;;  %v8236_v52 = vadd.f32 %v13715_v36, %v13626_v19  ;;  %v8241_v19 = vadd.f32 %v13715_v36, %v13657_v28  ;;  %v8243_v28 = vadd.f32 %v13715_v36, %v13669_v38 }
 0x714   : > { %7263 = vst.msk [vmem:[%s13237_s28 + $0x2d8] sm:$0xff] %vm7171_vm10, %v7024_v43 }
 0x715   : > { %7261 = vst.msk [vmem:[%s13237_s28 + $0x2c8] sm:$0xff] %vm7171_vm10, %v7016_v18  ;;  %v8242_v18 = vadd.f32 %v13715_v36, %v13662_v10 }
 0x717   : > { %v8101_v21 = vpop.f32.mrb[252].mxu0 }
 0x718   : > { %v7037_v3 = vadd.f32 %v8229_v48, %v8101_v21  ;;  %v7028_v15 = vpop.f32.mrb[253].mxu0  ;;  %v8240_v21 = vadd.f32 %v13715_v36, %v13650_v4  ;;  %v8245_v4 = vadd.f32 %v13715_v36, %v13681_v56  ;;  %v15312_v56 = vld [vmem:[#allocation94_spill] sm:$0xff] }
 0x719   : > { %v7029_v44 = vadd.f32 %v8227_v34, %v7028_v15  ;;  %v8102_v55 = vpop.f32.mrb[254].mxu0 }
 0x71a   : > { %7266 = vst.msk [vmem:[%s13237_s28 + $0x2f0] sm:$0xff] %vm7171_vm10, %v7037_v3  ;;  %v7040_v5 = vadd.f32 %v8230_v31, %v8102_v55  ;;  %v7031_v9 = vpop.f32.mrb[255].mxu0 }
 0x71b   : > { %7264 = vst.msk [vmem:[%s13237_s28 + $0x2e0] sm:$0xff] %vm7171_vm10, %v7029_v44  ;;  %v7032_v58 = vadd.f32 %v8228_v62, %v7031_v9  ;;  %v8246_v44 = vadd.f32 %v13715_v36, %v13686_v1  ;;  %v8244_v9 = vadd.f32 %v13715_v36, %v13674_v39  ;;  %v8249_v39 = vadd.f32 %v13715_v36, %v13705_v29 }
 0x71c   : > { %7267 = vst.msk [vmem:[%s13237_s28 + $0x2f8] sm:$0xff] %vm7171_vm10, %v7040_v5  ;;  %v8247_v1 = vadd.f32 %v13715_v36, %v15312_v56 }
 0x71d   : > { %7265 = vst.msk [vmem:[%s13237_s28 + $0x2e8] sm:$0xff] %vm7171_vm10, %v7032_v58 }
 0x71f   : > { %v8105_v37 = vpop.f32.mrb[0].mxu0 }
 0x720   : > { %v7053_v11 = vadd.f32 %v8233_v17, %v8105_v37  ;;  %v7044_v32 = vpop.f32.mrb[1].mxu0 }
 0x721   : > { %v7045_v8 = vadd.f32 %v8231_v61, %v7044_v32  ;;  %v8106_v33 = vpop.f32.mrb[2].mxu0 }
 0x722   : > { %7270 = vst.msk [vmem:[%s13237_s28 + $0x310] sm:$0xff] %vm7171_vm10, %v7053_v11  ;;  %v7056_v57 = vadd.f32 %v8234_v59, %v8106_v33  ;;  %v7047_v45 = vpop.f32.mrb[3].mxu0  ;;  %v8250_v11 = vadd.f32 %v13715_v36, %v13710_v2  ;;  %v8251_v2 = vadd.f32 %v13715_v36, %v13729_v22 }
 0x723   : > { %7268 = vst.msk [vmem:[%s13237_s28 + $0x300] sm:$0xff] %vm7171_vm10, %v7045_v8  ;;  %v7048_v50 = vadd.f32 %v8232_v41, %v7047_v45  ;;  %v8248_v8 = vadd.f32 %v13715_v36, %v13698_v14  ;;  %v8253_v14 = vadd.f32 %v13715_v36, %v13749_v40  ;;  %v8255_v40 = vadd.f32 %v13715_v36, %v13769_v25 }
 0x724   : > { %7271 = vst.msk [vmem:[%s13237_s28 + $0x318] sm:$0xff] %vm7171_vm10, %v7056_v57 }
 0x725   : > { %7269 = vst.msk [vmem:[%s13237_s28 + $0x308] sm:$0xff] %vm7171_vm10, %v7048_v50 }
 0x727   : > { %v8109_v12 = vpop.f32.mrb[4].mxu0 }
 0x728   : > { %v7069_v13 = vadd.f32 %v8237_v47, %v8109_v12  ;;  %v7060_v0 = vpop.f32.mrb[5].mxu0 }
 0x729   : > { %v7061_v23 = vadd.f32 %v8235_v60, %v7060_v0  ;;  %v8110_v6 = vpop.f32.mrb[6].mxu0  ;;  %v8254_v60 = vadd.f32 %v13715_v36, %v13755_v16 }
 0x72a   : > { %7274 = vst.msk [vmem:[%s13237_s28 + $0x330] sm:$0xff] %vm7171_vm10, %v7069_v13  ;;  %v7072_v43 = vadd.f32 %v8238_v42, %v8110_v6  ;;  %v7063_v53 = vpop.f32.mrb[7].mxu0  ;;  %v8252_v13 = vadd.f32 %v13715_v36, %v13735_v51  ;;  %v8257_v51 = vadd.f32 %v13715_v36, %v13789_v54  ;;  %v8259_v54 = vadd.f32 %v13715_v36, %v13809_v20 }
 0x72b   : > { %7272 = vst.msk [vmem:[%s13237_s28 + $0x320] sm:$0xff] %vm7171_vm10, %v7061_v23  ;;  %v7064_v63 = vadd.f32 %v8236_v52, %v7063_v53 }
 0x72c   : > { %7275 = vst.msk [vmem:[%s13237_s28 + $0x338] sm:$0xff] %vm7171_vm10, %v7072_v43  ;;  %v8258_v43 = vadd.f32 %v13715_v36, %v13795_v27 }
 0x72d   : > { %7273 = vst.msk [vmem:[%s13237_s28 + $0x328] sm:$0xff] %vm7171_vm10, %v7064_v63 }
 0x72f   : > { %v8113_v35 = vpop.f32.mrb[8].mxu0 }
 0x730   : > { %v7085_v48 = vadd.f32 %v8241_v19, %v8113_v35  ;;  %v7076_v34 = vpop.f32.mrb[9].mxu0  ;;  %v8256_v19 = vadd.f32 %v13715_v36, %v13775_v26  ;;  %v8261_v26 = vadd.f32 %v13715_v36, %v13829_v24 }
 0x731   : > { %v7077_v31 = vadd.f32 %v8239_v46, %v7076_v34  ;;  %v8114_v3 = vpop.f32.mrb[10].mxu0  ;;  %v8262_v34 = vadd.f32 %v13715_v36, %v13835_v30 }
 0x732   : > { %7278 = vst.msk [vmem:[%s13237_s28 + $0x350] sm:$0xff] %vm7171_vm10, %v7085_v48  ;;  %v7088_v15 = vadd.f32 %v8242_v18, %v8114_v3  ;;  %v7079_v62 = vpop.f32.mrb[11].mxu0  ;;  %v8260_v3 = vadd.f32 %v13715_v36, %v13815_v49 }
 0x733   : > { %7276 = vst.msk [vmem:[%s13237_s28 + $0x340] sm:$0xff] %vm7171_vm10, %v7077_v31  ;;  %v7080_v7 = vadd.f32 %v8240_v21, %v7079_v62 }
 0x734   : > { %7279 = vst.msk [vmem:[%s13237_s28 + $0x358] sm:$0xff] %vm7171_vm10, %v7088_v15 }
 0x735   : > { %7277 = vst.msk [vmem:[%s13237_s28 + $0x348] sm:$0xff] %vm7171_vm10, %v7080_v7 }
 0x737   : > { %v8117_v10 = vpop.f32.mrb[12].mxu0 }
 0x738   : > { %v7101_v55 = vadd.f32 %v8245_v4, %v8117_v10  ;;  %v7092_v5 = vpop.f32.mrb[13].mxu0 }
 0x739   : > { %v7093_v58 = vadd.f32 %v8243_v28, %v7092_v5  ;;  %v8118_v17 = vpop.f32.mrb[14].mxu0 }
 0x73a   : > { %7282 = vst.msk [vmem:[%s13237_s28 + $0x370] sm:$0xff] %vm7171_vm10, %v7101_v55  ;;  %v7104_v61 = vadd.f32 %v8246_v44, %v8118_v17  ;;  %v7095_v37 = vpop.f32.mrb[15].mxu0 }
 0x73b   : > { %7280 = vst.msk [vmem:[%s13237_s28 + $0x360] sm:$0xff] %vm7171_vm10, %v7093_v58  ;;  %v7096_v38 = vadd.f32 %v8244_v9, %v7095_v37 }
 0x73c   : > { %7283 = vst.msk [vmem:[%s13237_s28 + $0x378] sm:$0xff] %vm7171_vm10, %v7104_v61 }
 0x73d   : > { %7281 = vst.msk [vmem:[%s13237_s28 + $0x368] sm:$0xff] %vm7171_vm10, %v7096_v38 }
 0x73f   : > { %v8121_v59 = vpop.f32.mrb[16].mxu0 }
 0x740   : > { %v7117_v32 = vadd.f32 %v8249_v39, %v8121_v59  ;;  %v7108_v41 = vpop.f32.mrb[17].mxu0 }
 0x741   : > { %v7109_v33 = vadd.f32 %v8247_v1, %v7108_v41  ;;  %v8122_v57 = vpop.f32.mrb[18].mxu0 }
 0x742   : > { %7286 = vst.msk [vmem:[%s13237_s28 + $0x390] sm:$0xff] %vm7171_vm10, %v7117_v32  ;;  %v7120_v45 = vadd.f32 %v8250_v11, %v8122_v57  ;;  %v7111_v50 = vpop.f32.mrb[19].mxu0 }
 0x743   : > { %7284 = vst.msk [vmem:[%s13237_s28 + $0x380] sm:$0xff] %vm7171_vm10, %v7109_v33  ;;  %v7112_v29 = vadd.f32 %v8248_v8, %v7111_v50 }
 0x744   : > { %7287 = vst.msk [vmem:[%s13237_s28 + $0x398] sm:$0xff] %vm7171_vm10, %v7120_v45 }
 0x745   : > { %7285 = vst.msk [vmem:[%s13237_s28 + $0x388] sm:$0xff] %vm7171_vm10, %v7112_v29 }
 0x747   : > { %v8125_v47 = vpop.f32.mrb[20].mxu0 }
 0x748   : > { %v7133_v12 = vadd.f32 %v8253_v14, %v8125_v47  ;;  %v7124_v42 = vpop.f32.mrb[21].mxu0 }
 0x749   : > { %v7125_v0 = vadd.f32 %v8251_v2, %v7124_v42  ;;  %v8126_v52 = vpop.f32.mrb[22].mxu0 }
 0x74a   : > { %7290 = vst.msk [vmem:[%s13237_s28 + $0x3b0] sm:$0xff] %vm7171_vm10, %v7133_v12  ;;  %v7136_v23 = vadd.f32 %v8254_v60, %v8126_v52  ;;  %v7127_v6 = vpop.f32.mrb[23].mxu0 }
 0x74b   : > { %7288 = vst.msk [vmem:[%s13237_s28 + $0x3a0] sm:$0xff] %vm7171_vm10, %v7125_v0  ;;  %v7128_v22 = vadd.f32 %v8252_v13, %v7127_v6 }
 0x74c   : > { %7291 = vst.msk [vmem:[%s13237_s28 + $0x3b8] sm:$0xff] %vm7171_vm10, %v7136_v23 }
 0x74d   : > { %7289 = vst.msk [vmem:[%s13237_s28 + $0x3a8] sm:$0xff] %vm7171_vm10, %v7128_v22 }
 0x74f   : > { %v8129_v16 = vpop.f32.mrb[24].mxu0 }
 0x750   : > { %v7149_v53 = vadd.f32 %v8257_v51, %v8129_v16  ;;  %v7140_v63 = vpop.f32.mrb[25].mxu0 }
 0x751   : > { %v7141_v46 = vadd.f32 %v8255_v40, %v7140_v63  ;;  %v8130_v35 = vpop.f32.mrb[26].mxu0 }
 0x752   : > { %7294 = vst.msk [vmem:[%s13237_s28 + $0x3d0] sm:$0xff] %vm7171_vm10, %v7149_v53  ;;  %v7152_v18 = vadd.f32 %v8258_v43, %v8130_v35  ;;  %v7143_v48 = vpop.f32.mrb[27].mxu0 }
 0x753   : > { %7292 = vst.msk [vmem:[%s13237_s28 + $0x3c0] sm:$0xff] %vm7171_vm10, %v7141_v46  ;;  %v7144_v25 = vadd.f32 %v8256_v19, %v7143_v48 }
 0x754   : > { %7295 = vst.msk [vmem:[%s13237_s28 + $0x3d8] sm:$0xff] %vm7171_vm10, %v7152_v18 }
 0x755   : > { %7293 = vst.msk [vmem:[%s13237_s28 + $0x3c8] sm:$0xff] %vm7171_vm10, %v7144_v25 }
 0x757   : > { %v8133_v27 = vpop.f32.mrb[28].mxu0 }
 0x758   : > { %v7165_v21 = vadd.f32 %v8261_v26, %v8133_v27  ;;  %v7156_v31 = vpop.f32.mrb[29].mxu0 }
 0x759   : > { %v7157_v15 = vadd.f32 %v8259_v54, %v7156_v31  ;;  %v8134_v62 = vpop.f32.mrb[30].mxu0 }
 0x75a   : > { %7298 = vst.msk [vmem:[%s13237_s28 + $0x3f0] sm:$0xff] %vm7171_vm10, %v7165_v21  ;;  %v7168_v7 = vadd.f32 %v8262_v34, %v8134_v62  ;;  %v7159_v4 = vpop.f32.mrb[31].mxu0 }
 0x75b   : > { %7296 = vst.msk [vmem:[%s13237_s28 + $0x3e0] sm:$0xff] %vm7171_vm10, %v7157_v15  ;;  %v7160_v24 = vadd.f32 %v8260_v3, %v7159_v4 }
 0x75c   : > { %7299 = vst.msk [vmem:[%s13237_s28 + $0x3f8] sm:$0xff] %vm7171_vm10, %v7168_v7 }
 0x75d   : > { %7297 = vst.msk [vmem:[%s13237_s28 + $0x3e8] sm:$0xff] %vm7171_vm10, %v7160_v24 }
 0x75e PF: > { %s17_s24 = sadd.s32 1, %s8639_s24  }
 0x75f   : > { %p14_p4 = scmp.ge.s32.totalorder %s17_s24, 4  }
 0x761   :  { %16 = sbr.rel (!%p14_p4) target bundleno = 1 (0x1), region = 78 }

</bundles_post_ra>
